<compile_context>
chip_gen: v7x
topology: tpu7x:2x2x1
jax: 0.10.0
libtpu: 0.0.40
codegen_flags: <defaults>
</compile_context>

<pallas_src>
import numpy as np
import jax
import jax.numpy as jnp
from jax.experimental import pallas as pl
from jax.experimental.pallas import tpu as pltpu

LRELU_SLOPE = 0.2
BN_EPS = 1e-5
HID = 512  # dec_hidden_dim

_ALL9 = [(kh, kw) for kh in range(3) for kw in range(3)]

# Per ConvTranspose2d layer geometry (per image).  `taps` lists the (kh, kw) kernel taps
# that can ever contribute to the output (layer 1 only keeps 4 of 9).
_GEO = [
    dict(cin=512, cout=256, hin=1, hout=2, s=2, taps=[(1, 1), (1, 2), (2, 1), (2, 2)]),
    dict(cin=256, cout=128, hin=2, hout=4, s=2, taps=_ALL9),
    dict(cin=128, cout=64,  hin=4, hout=8, s=2, taps=_ALL9),
    dict(cin=64,  cout=128, hin=8, hout=8, s=1, taps=_ALL9),
]


# ---------------------------------------------------------------------------
# Kernel
# ---------------------------------------------------------------------------
def decoder_kernel(z_ref, fcw_ref, fcb_ref, w1_ref,
                   g1_ref, b1_ref, g2_ref, b2_ref, g3_ref, b3_ref,
                   w2_hbm, s2_hbm, w3_hbm, s3_hbm, w4_hbm, s4_hbm,
                   out_ref,
                   l1_ref, ts2_ref, ts3_ref, ts4_ref,
                   w2_ref, s2_ref, w3_ref, s3_ref, w4_ref, s4_ref,
                   dma_sems):
    bf16 = jnp.bfloat16
    B = z_ref.shape[0]

    def mm(a, b):
        # bf16 x bf16 MXU matmul, f32 accumulation, DEFAULT precision.
        return jnp.dot(a, b, preferred_element_type=jnp.float32)

    # Kick off DMAs for all later-layer weights / scatter matrices now so they overlap
    # with the fc / layer-1 / layer-2 compute; wait right before each consumer.
    copies = []
    for idx, (src, dst) in enumerate([(w2_hbm, w2_ref), (s2_hbm, s2_ref),
                                      (w3_hbm, w3_ref), (s3_hbm, s3_ref),
                                      (w4_hbm, w4_ref), (s4_hbm, s4_ref)]):
        cp = pltpu.make_async_copy(src, dst, dma_sems.at[idx])
        cp.start()
        copies.append(cp)

    def leaky(x):
        return jnp.where(x > 0, x, LRELU_SLOPE * x)

    def bn_leaky(x, g_ref, b_ref):
        # Training-mode BatchNorm2d (batch stats, biased variance): single f32 pass,
        # gamma folded into one per-channel scale.
        n_inv = 1.0 / x.shape[0]
        sm1 = jnp.sum(x, axis=0, keepdims=True)
        sm2 = jnp.sum(x * x, axis=0, keepdims=True)
        mu = sm1 * n_inv
        var = sm2 * n_inv - mu * mu
        scale = g_ref[...] * jax.lax.rsqrt(var + BN_EPS)
        shift = b_ref[...] - mu * scale
        return leaky(x * scale + shift)

    def conv_t(x, w, s_img, ts_ref, n_taps, n_in_img, c_out):
        """Bias-free ConvTranspose2d: one fused tap matmul + per-image col2im scatter."""
        t = mm(x.astype(bf16), w).astype(bf16)        # (B*n_in_img, n_taps*c_out) bf16
        for b in range(B):                            # static unroll over batch & taps
            for k in range(n_taps):
                ts_ref[b, k * n_in_img:(k + 1) * n_in_img, :] = (
                    t[b * n_in_img:(b + 1) * n_in_img, k * c_out:(k + 1) * c_out])
        # per-image 0/1 col2im scatter: (n_out_img, n_taps*n_in_img) @ (..., c_out)
        return jnp.concatenate([mm(s_img, ts_ref[b]) for b in range(B)], axis=0)

    # fc: Linear(latent -> 512) + LeakyReLU(0.2)
    h = leaky(mm(z_ref[...].astype(bf16), fcw_ref[...]) + fcb_ref[...])    # (B, 512)

    # Layer 1: 1x1 -> 2x2.  Each surviving tap hits exactly one output pixel, so the
    # col2im is a pure row permutation: write the 256-lane tap slices straight into
    # their output rows (no scatter matrix, no extra matmul).
    t1 = mm(h.astype(bf16), w1_ref[...])                                   # (B, 4*256)
    for b in range(B):
        for k in range(4):
            l1_ref[b * 4 + k:b * 4 + k + 1, :] = t1[b:b + 1, k * 256:(k + 1) * 256]
    x = bn_leaky(l1_ref[...], g1_ref, b1_ref)                              # (B*4, 256)

    # Layer 2: 2x2 -> 4x4
    copies[0].wait(); copies[1].wait()
    x = bn_leaky(conv_t(x, w2_ref[...], s2_ref[...], ts2_ref, 9, 4, 128),
                 g2_ref, b2_ref)                                           # (B*16, 128)

    # Layer 3: 4x4 -> 8x8 (true 64 output channels, no zero padding)
    copies[2].wait(); copies[3].wait()
    x = bn_leaky(conv_t(x, w3_ref[...], s3_ref[...], ts3_ref, 9, 16, 64),
                 g3_ref, b3_ref)                                           # (B*64, 64)

    # Layer 4: 8x8 -> 8x8 (stride 1) + Tanh
    copies[4].wait(); copies[5].wait()
    x = conv_t(x, w4_ref[...], s4_ref[...], ts4_ref, 9, 64, 128)           # (B*64, 128)
    out_ref[...] = jnp.tanh(x)


# ---------------------------------------------------------------------------
# One-time (init-time) weight preprocessing -- hoisted out of the call path.
# ---------------------------------------------------------------------------
def _build_scatter_img(taps, hin, win, hout, wout, stride, pad):
    """Per-image 0/1 col2im scatter matrix (hout*wout, n_taps*hin*win) (batch independent)."""
    n_in = hin * win
    s = np.zeros((hout * wout, len(taps) * n_in), np.float32)
    for t_idx, (kh, kw) in enumerate(taps):
        for ii in range(hin):
            for ij in range(win):
                oi = ii * stride + kh - pad
                oj = ij * stride + kw - pad
                if 0 <= oi < hout and 0 <= oj < wout:
                    s[oi * wout + oj, t_idx * n_in + ii * win + ij] = 1.0
    return s


def prepare_params(prm):
    """Build all kernel-side operands once (bf16 tap-fused weights, per-image scatter
    matrices, transposed fc weight, BN params).  Call once at init; reuse every call."""
    p = {k: np.asarray(v, np.float32) for k, v in prm.items()}
    out = {
        'fcw': jnp.asarray(p['fc_w'].T, jnp.bfloat16),                 # (latent, 512)
        'fcb': jnp.asarray(p['fc_b'].reshape(1, -1), jnp.float32),
    }
    for i, geo in enumerate(_GEO, start=1):
        w = p[f'w{i}']                                                 # (Cin, Cout, 3, 3)
        blocks = [w[:, :, kh, kw] for (kh, kw) in geo['taps']]
        out[f'w{i}'] = jnp.asarray(np.concatenate(blocks, axis=1), jnp.bfloat16)
        if i > 1:   # layer 1's col2im is a row permutation -> no scatter matrix
            out[f's{i}'] = jnp.asarray(
                _build_scatter_img(geo['taps'], geo['hin'], geo['hin'],
                                   geo['hout'], geo['hout'], geo['s'], 1), jnp.bfloat16)
        if i < 4:
            out[f'g{i}'] = jnp.asarray(p[f'g{i}'].reshape(1, -1), jnp.float32)
            out[f'b{i}'] = jnp.asarray(p[f'b{i}'].reshape(1, -1), jnp.float32)
    return out


# ---------------------------------------------------------------------------
# Call path: only the pallas_call + layout glue.
# ---------------------------------------------------------------------------
def decoder_forward(z, pp):
    B = z.shape[0]
    args = [z, pp['fcw'], pp['fcb'], pp['w1'],
            pp['g1'], pp['b1'], pp['g2'], pp['b2'], pp['g3'], pp['b3'],
            pp['w2'], pp['s2'], pp['w3'], pp['s3'], pp['w4'], pp['s4']]
    in_specs = ([pl.BlockSpec(memory_space=pltpu.MemorySpace.VMEM)] * 10 +
                [pl.BlockSpec(memory_space=pl.ANY)] * 6)
    scratch = [
        pltpu.VMEM((B * 4, 256), jnp.float32),        # layer-1 row-permuted output
        pltpu.VMEM((B, 9 * 4, 128), jnp.bfloat16),    # ts2 (tap-stacked, per image)
        pltpu.VMEM((B, 9 * 16, 64), jnp.bfloat16),    # ts3
        pltpu.VMEM((B, 9 * 64, 128), jnp.bfloat16),   # ts4
        pltpu.VMEM(pp['w2'].shape, jnp.bfloat16),     # manual-DMA landing buffers
        pltpu.VMEM(pp['s2'].shape, jnp.bfloat16),
        pltpu.VMEM(pp['w3'].shape, jnp.bfloat16),
        pltpu.VMEM(pp['s3'].shape, jnp.bfloat16),
        pltpu.VMEM(pp['w4'].shape, jnp.bfloat16),
        pltpu.VMEM(pp['s4'].shape, jnp.bfloat16),
        pltpu.SemaphoreType.DMA((6,)),
    ]
    out_flat = pl.pallas_call(
        decoder_kernel,
        out_shape=jax.ShapeDtypeStruct((B * 64, 128), jnp.float32),
        in_specs=in_specs,
        out_specs=pl.BlockSpec(memory_space=pltpu.MemorySpace.VMEM),
        scratch_shapes=scratch,
    )(*args)

    # glue: (B*H*W, C) slab -> NCHW -> final torch view(-1, 1, 256, 32)
    out = out_flat.reshape(B, 8, 8, 128).transpose(0, 3, 1, 2)
    return out.reshape(B, 1, 256, 32)


# ---------------------------------------------------------------------------
# Pure-JAX reference (independent of the kernel math) for validation.
# ---------------------------------------------------------------------------
def _conv_transpose_ref(x, w, stride, pad, out_pad):
    k = w.shape[2]
    w_flip = jnp.flip(w, (2, 3)).transpose(1, 0, 2, 3)  # -> OIHW (Cout, Cin, k, k)
    lo, hi = k - 1 - pad, k - 1 - pad + out_pad
    return jax.lax.conv_general_dilated(
        x, w_flip, window_strides=(1, 1), padding=[(lo, hi), (lo, hi)],
        lhs_dilation=(stride, stride),
        dimension_numbers=('NCHW', 'OIHW', 'NCHW'),
        precision=jax.lax.Precision.HIGHEST)


def reference_forward(z, prm):
    lrelu = lambda x: jnp.where(x > 0, x, LRELU_SLOPE * x)
    h = lrelu(z @ prm['fc_w'].T + prm['fc_b'])
    x = h.reshape(h.shape[0], HID, 1, 1)
    cfg = [(2, 1), (2, 1), (2, 1), (1, 0)]
    for i, (s, op) in enumerate(cfg, start=1):
        x = _conv_transpose_ref(x, prm[f'w{i}'], s, 1, op)
        if i < 4:
            mu = x.mean(axis=(0, 2, 3), keepdims=True)
            var = ((x - mu) ** 2).mean(axis=(0, 2, 3), keepdims=True)
            g = prm[f'g{i}'].reshape(1, -1, 1, 1)
            b = prm[f'b{i}'].reshape(1, -1, 1, 1)
            x = lrelu((x - mu) / jnp.sqrt(var + BN_EPS) * g + b)
        else:
            x = jnp.tanh(x)
    return x.reshape(-1, 1, 256, 32)


if __name__ == "__main__":
    B, LATENT = 2, 32
    key = jax.random.PRNGKey(0)
    ks = jax.random.split(key, 13)
    prm = {
        'fc_w': 0.1 * jax.random.normal(ks[0], (HID, LATENT), jnp.float32),
        'fc_b': 0.1 * jax.random.normal(ks[1], (HID,), jnp.float32),
        'w1': 0.05 * jax.random.normal(ks[2], (512, 256, 3, 3), jnp.float32),
        'g1': 1.0 + 0.1 * jax.random.normal(ks[3], (256,), jnp.float32),
        'b1': 0.1 * jax.random.normal(ks[4], (256,), jnp.float32),
        'w2': 0.05 * jax.random.normal(ks[5], (256, 128, 3, 3), jnp.float32),
        'g2': 1.0 + 0.1 * jax.random.normal(ks[6], (128,), jnp.float32),
        'b2': 0.1 * jax.random.normal(ks[7], (128,), jnp.float32),
        'w3': 0.05 * jax.random.normal(ks[8], (128, 64, 3, 3), jnp.float32),
        'g3': 1.0 + 0.1 * jax.random.normal(ks[9], (64,), jnp.float32),
        'b3': 0.1 * jax.random.normal(ks[10], (64,), jnp.float32),
        'w4': 0.05 * jax.random.normal(ks[11], (64, 128, 3, 3), jnp.float32),
    }
    # Round kernel-side bf16 operands so kernel and f32 reference share the exact same
    # effective weights; remaining mismatch is only bf16 activation truncation.
    rb = lambda a: a.astype(jnp.bfloat16).astype(jnp.float32)
    for k in ('fc_w', 'w1', 'w2', 'w3', 'w4'):
        prm[k] = rb(prm[k])
    z = rb(jax.random.normal(ks[12], (B, LATENT), jnp.float32))

    pp = prepare_params(prm)               # one-time weight prep (hoisted out of the call)
    fwd = jax.jit(decoder_forward)

    out = fwd(z, pp)
    out = jax.block_until_ready(out)
    assert out.shape == (B, 1, 256, 32), out.shape

    ref = reference_forward(z, prm)
    # Kernel computes with bf16 matmul inputs (f32 accumulation); reference is full f32.
    np.testing.assert_allclose(np.asarray(out, np.float32), np.asarray(ref),
                               atol=5e-2, rtol=5e-2)
    print("KERNEL_OK")
</pallas_src>

<mosaic_0001>
module attributes {stable_mosaic.version = 11 : i64} {
  func.func @decoder_kernel(%arg0: memref<2x32xf32, #tpu.memory_space<vmem>>, %arg1: memref<32x512xbf16, #tpu.memory_space<vmem>>, %arg2: memref<1x512xf32, #tpu.memory_space<vmem>>, %arg3: memref<512x1024xbf16, #tpu.memory_space<vmem>>, %arg4: memref<1x256xf32, #tpu.memory_space<vmem>>, %arg5: memref<1x256xf32, #tpu.memory_space<vmem>>, %arg6: memref<1x128xf32, #tpu.memory_space<vmem>>, %arg7: memref<1x128xf32, #tpu.memory_space<vmem>>, %arg8: memref<1x64xf32, #tpu.memory_space<vmem>>, %arg9: memref<1x64xf32, #tpu.memory_space<vmem>>, %arg10: memref<256x1152xbf16, #tpu.memory_space<any>>, %arg11: memref<16x36xbf16, #tpu.memory_space<any>>, %arg12: memref<128x576xbf16, #tpu.memory_space<any>>, %arg13: memref<64x144xbf16, #tpu.memory_space<any>>, %arg14: memref<64x1152xbf16, #tpu.memory_space<any>>, %arg15: memref<64x576xbf16, #tpu.memory_space<any>>, %arg16: memref<128x128xf32, #tpu.memory_space<vmem>>, %arg17: memref<8x256xf32, #tpu.memory_space<vmem>>, %arg18: memref<2x36x128xbf16, #tpu.memory_space<vmem>>, %arg19: memref<2x144x64xbf16, #tpu.memory_space<vmem>>, %arg20: memref<2x576x128xbf16, #tpu.memory_space<vmem>>, %arg21: memref<256x1152xbf16, #tpu.memory_space<vmem>>, %arg22: memref<16x36xbf16, #tpu.memory_space<vmem>>, %arg23: memref<128x576xbf16, #tpu.memory_space<vmem>>, %arg24: memref<64x144xbf16, #tpu.memory_space<vmem>>, %arg25: memref<64x1152xbf16, #tpu.memory_space<vmem>>, %arg26: memref<64x576xbf16, #tpu.memory_space<vmem>>, %arg27: memref<6x!tpu.dma_semaphore, #tpu.memory_space<semaphore_mem>>) attributes {dimension_semantics = [], scalar_prefetch = 0 : i64, scratch_operands = 11 : i64, tpu.core_type = #tpu.core_type<tc>} {
    %c0_i32 = arith.constant 0 : i32
    %0 = tpu.memref_slice %arg27[%c0_i32] : memref<6x!tpu.dma_semaphore, #tpu.memory_space<semaphore_mem>> -> memref<1x!tpu.dma_semaphore, #tpu.memory_space<semaphore_mem>>
    %1 = tpu.memref_squeeze %0 : memref<1x!tpu.dma_semaphore, #tpu.memory_space<semaphore_mem>> -> memref<!tpu.dma_semaphore, #tpu.memory_space<semaphore_mem>>
    tpu.enqueue_dma source(%arg10 : memref<256x1152xbf16, #tpu.memory_space<any>>) target(%arg21 : memref<256x1152xbf16, #tpu.memory_space<vmem>>) target_semaphore(%1 : memref<!tpu.dma_semaphore, #tpu.memory_space<semaphore_mem>>)
    %c1_i32 = arith.constant 1 : i32
    %2 = tpu.memref_slice %arg27[%c1_i32] : memref<6x!tpu.dma_semaphore, #tpu.memory_space<semaphore_mem>> -> memref<1x!tpu.dma_semaphore, #tpu.memory_space<semaphore_mem>>
    %3 = tpu.memref_squeeze %2 : memref<1x!tpu.dma_semaphore, #tpu.memory_space<semaphore_mem>> -> memref<!tpu.dma_semaphore, #tpu.memory_space<semaphore_mem>>
    tpu.enqueue_dma source(%arg11 : memref<16x36xbf16, #tpu.memory_space<any>>) target(%arg22 : memref<16x36xbf16, #tpu.memory_space<vmem>>) target_semaphore(%3 : memref<!tpu.dma_semaphore, #tpu.memory_space<semaphore_mem>>)
    %c2_i32 = arith.constant 2 : i32
    %4 = tpu.memref_slice %arg27[%c2_i32] : memref<6x!tpu.dma_semaphore, #tpu.memory_space<semaphore_mem>> -> memref<1x!tpu.dma_semaphore, #tpu.memory_space<semaphore_mem>>
    %5 = tpu.memref_squeeze %4 : memref<1x!tpu.dma_semaphore, #tpu.memory_space<semaphore_mem>> -> memref<!tpu.dma_semaphore, #tpu.memory_space<semaphore_mem>>
    tpu.enqueue_dma source(%arg12 : memref<128x576xbf16, #tpu.memory_space<any>>) target(%arg23 : memref<128x576xbf16, #tpu.memory_space<vmem>>) target_semaphore(%5 : memref<!tpu.dma_semaphore, #tpu.memory_space<semaphore_mem>>)
    %c3_i32 = arith.constant 3 : i32
    %6 = tpu.memref_slice %arg27[%c3_i32] : memref<6x!tpu.dma_semaphore, #tpu.memory_space<semaphore_mem>> -> memref<1x!tpu.dma_semaphore, #tpu.memory_space<semaphore_mem>>
    %7 = tpu.memref_squeeze %6 : memref<1x!tpu.dma_semaphore, #tpu.memory_space<semaphore_mem>> -> memref<!tpu.dma_semaphore, #tpu.memory_space<semaphore_mem>>
    tpu.enqueue_dma source(%arg13 : memref<64x144xbf16, #tpu.memory_space<any>>) target(%arg24 : memref<64x144xbf16, #tpu.memory_space<vmem>>) target_semaphore(%7 : memref<!tpu.dma_semaphore, #tpu.memory_space<semaphore_mem>>)
    %c4_i32 = arith.constant 4 : i32
    %8 = tpu.memref_slice %arg27[%c4_i32] : memref<6x!tpu.dma_semaphore, #tpu.memory_space<semaphore_mem>> -> memref<1x!tpu.dma_semaphore, #tpu.memory_space<semaphore_mem>>
    %9 = tpu.memref_squeeze %8 : memref<1x!tpu.dma_semaphore, #tpu.memory_space<semaphore_mem>> -> memref<!tpu.dma_semaphore, #tpu.memory_space<semaphore_mem>>
    tpu.enqueue_dma source(%arg14 : memref<64x1152xbf16, #tpu.memory_space<any>>) target(%arg25 : memref<64x1152xbf16, #tpu.memory_space<vmem>>) target_semaphore(%9 : memref<!tpu.dma_semaphore, #tpu.memory_space<semaphore_mem>>)
    %c5_i32 = arith.constant 5 : i32
    %10 = tpu.memref_slice %arg27[%c5_i32] : memref<6x!tpu.dma_semaphore, #tpu.memory_space<semaphore_mem>> -> memref<1x!tpu.dma_semaphore, #tpu.memory_space<semaphore_mem>>
    %11 = tpu.memref_squeeze %10 : memref<1x!tpu.dma_semaphore, #tpu.memory_space<semaphore_mem>> -> memref<!tpu.dma_semaphore, #tpu.memory_space<semaphore_mem>>
    tpu.enqueue_dma source(%arg15 : memref<64x576xbf16, #tpu.memory_space<any>>) target(%arg26 : memref<64x576xbf16, #tpu.memory_space<vmem>>) target_semaphore(%11 : memref<!tpu.dma_semaphore, #tpu.memory_space<semaphore_mem>>)
    %c0 = arith.constant 0 : index
    %c0_0 = arith.constant 0 : index
    %12 = vector.load %arg0[%c0, %c0_0] : memref<2x32xf32, #tpu.memory_space<vmem>>, vector<2x32xf32>
    %13 = arith.truncf %12 : vector<2x32xf32> to vector<2x32xbf16>
    %c0_1 = arith.constant 0 : index
    %c0_2 = arith.constant 0 : index
    %14 = vector.load %arg1[%c0_1, %c0_2] : memref<32x512xbf16, #tpu.memory_space<vmem>>, vector<32x512xbf16>
    %cst = arith.constant dense<0.000000e+00> : vector<2x512xf32>
    %15 = tpu.matmul %13, %14, %cst {dimension_numbers = #tpu.dot_dimension_numbers<[1], [0], [0], [1], [0, 0, 1, 1], [], []>} : vector<2x32xbf16>, vector<32x512xbf16>, vector<2x512xf32> -> vector<2x512xf32>
    %c0_3 = arith.constant 0 : index
    %c0_4 = arith.constant 0 : index
    %16 = vector.load %arg2[%c0_3, %c0_4] : memref<1x512xf32, #tpu.memory_space<vmem>>, vector<1x512xf32>
    %17 = vector.broadcast %16 : vector<1x512xf32> to vector<2x512xf32>
    %18 = arith.addf %15, %17 : vector<2x512xf32>
    %cst_5 = arith.constant 0.000000e+00 : f32
    %19 = vector.broadcast %cst_5 : f32 to vector<2x512xf32>
    %20 = arith.cmpf ogt, %18, %19 : vector<2x512xf32>
    %cst_6 = arith.constant 2.000000e-01 : f32
    %21 = vector.broadcast %cst_6 : f32 to vector<2x512xf32>
    %22 = arith.mulf %21, %18 : vector<2x512xf32>
    %23 = arith.select %20, %18, %22 : vector<2x512xi1>, vector<2x512xf32>
    %24 = arith.truncf %23 : vector<2x512xf32> to vector<2x512xbf16>
    %c0_7 = arith.constant 0 : index
    %c0_8 = arith.constant 0 : index
    %25 = vector.load %arg3[%c0_7, %c0_8] : memref<512x1024xbf16, #tpu.memory_space<vmem>>, vector<512x1024xbf16>
    %cst_9 = arith.constant dense<0.000000e+00> : vector<2x1024xf32>
    %26 = tpu.matmul %24, %25, %cst_9 {dimension_numbers = #tpu.dot_dimension_numbers<[1], [0], [0], [1], [0, 0, 1, 1], [], []>} : vector<2x512xbf16>, vector<512x1024xbf16>, vector<2x1024xf32> -> vector<2x1024xf32>
    %27 = vector.extract_strided_slice %26 {offsets = [0, 0], sizes = [1, 256], strides = [1, 1]} : vector<2x1024xf32> to vector<1x256xf32>
    %c0_10 = arith.constant 0 : index
    %c0_11 = arith.constant 0 : index
    %28 = vector.load %arg17[%c0_10, %c0_11] : memref<8x256xf32, #tpu.memory_space<vmem>>, vector<1x256xf32>
    tpu.vector_store %arg17[%c0_10, %c0_11], %27 {strides = array<i32>} : memref<8x256xf32, #tpu.memory_space<vmem>>, vector<1x256xf32>,
    %29 = vector.extract_strided_slice %26 {offsets = [0, 256], sizes = [1, 256], strides = [1, 1]} : vector<2x1024xf32> to vector<1x256xf32>
    %c1 = arith.constant 1 : index
    %c0_12 = arith.constant 0 : index
    %30 = vector.load %arg17[%c1, %c0_12] : memref<8x256xf32, #tpu.memory_space<vmem>>, vector<1x256xf32>
    tpu.vector_store %arg17[%c1, %c0_12], %29 {strides = array<i32>} : memref<8x256xf32, #tpu.memory_space<vmem>>, vector<1x256xf32>,
    %31 = vector.extract_strided_slice %26 {offsets = [0, 512], sizes = [1, 256], strides = [1, 1]} : vector<2x1024xf32> to vector<1x256xf32>
    %c2 = arith.constant 2 : index
    %c0_13 = arith.constant 0 : index
    %32 = vector.load %arg17[%c2, %c0_13] : memref<8x256xf32, #tpu.memory_space<vmem>>, vector<1x256xf32>
    tpu.vector_store %arg17[%c2, %c0_13], %31 {strides = array<i32>} : memref<8x256xf32, #tpu.memory_space<vmem>>, vector<1x256xf32>,
    %33 = vector.extract_strided_slice %26 {offsets = [0, 768], sizes = [1, 256], strides = [1, 1]} : vector<2x1024xf32> to vector<1x256xf32>
    %c3 = arith.constant 3 : index
    %c0_14 = arith.constant 0 : index
    %34 = vector.load %arg17[%c3, %c0_14] : memref<8x256xf32, #tpu.memory_space<vmem>>, vector<1x256xf32>
    tpu.vector_store %arg17[%c3, %c0_14], %33 {strides = array<i32>} : memref<8x256xf32, #tpu.memory_space<vmem>>, vector<1x256xf32>,
    %35 = vector.extract_strided_slice %26 {offsets = [1, 0], sizes = [1, 256], strides = [1, 1]} : vector<2x1024xf32> to vector<1x256xf32>
    %c4 = arith.constant 4 : index
    %c0_15 = arith.constant 0 : index
    %36 = vector.load %arg17[%c4, %c0_15] : memref<8x256xf32, #tpu.memory_space<vmem>>, vector<1x256xf32>
    tpu.vector_store %arg17[%c4, %c0_15], %35 {strides = array<i32>} : memref<8x256xf32, #tpu.memory_space<vmem>>, vector<1x256xf32>,
    %37 = vector.extract_strided_slice %26 {offsets = [1, 256], sizes = [1, 256], strides = [1, 1]} : vector<2x1024xf32> to vector<1x256xf32>
    %c5 = arith.constant 5 : index
    %c0_16 = arith.constant 0 : index
    %38 = vector.load %arg17[%c5, %c0_16] : memref<8x256xf32, #tpu.memory_space<vmem>>, vector<1x256xf32>
    tpu.vector_store %arg17[%c5, %c0_16], %37 {strides = array<i32>} : memref<8x256xf32, #tpu.memory_space<vmem>>, vector<1x256xf32>,
    %39 = vector.extract_strided_slice %26 {offsets = [1, 512], sizes = [1, 256], strides = [1, 1]} : vector<2x1024xf32> to vector<1x256xf32>
    %c6 = arith.constant 6 : index
    %c0_17 = arith.constant 0 : index
    %40 = vector.load %arg17[%c6, %c0_17] : memref<8x256xf32, #tpu.memory_space<vmem>>, vector<1x256xf32>
    tpu.vector_store %arg17[%c6, %c0_17], %39 {strides = array<i32>} : memref<8x256xf32, #tpu.memory_space<vmem>>, vector<1x256xf32>,
    %41 = vector.extract_strided_slice %26 {offsets = [1, 768], sizes = [1, 256], strides = [1, 1]} : vector<2x1024xf32> to vector<1x256xf32>
    %c7 = arith.constant 7 : index
    %c0_18 = arith.constant 0 : index
    %42 = vector.load %arg17[%c7, %c0_18] : memref<8x256xf32, #tpu.memory_space<vmem>>, vector<1x256xf32>
    tpu.vector_store %arg17[%c7, %c0_18], %41 {strides = array<i32>} : memref<8x256xf32, #tpu.memory_space<vmem>>, vector<1x256xf32>,
    %c0_19 = arith.constant 0 : index
    %c0_20 = arith.constant 0 : index
    %43 = vector.load %arg17[%c0_19, %c0_20] : memref<8x256xf32, #tpu.memory_space<vmem>>, vector<8x256xf32>
    %cst_21 = arith.constant dense<0.000000e+00> : vector<256xf32>
    %44 = vector.multi_reduction <add>, %43, %cst_21 [0] : vector<8x256xf32> to vector<256xf32>
    %45 = vector.shape_cast %44 : vector<256xf32> to vector<1x256xf32>
    %46 = arith.mulf %43, %43 : vector<8x256xf32>
    %cst_22 = arith.constant dense<0.000000e+00> : vector<256xf32>
    %47 = vector.multi_reduction <add>, %46, %cst_22 [0] : vector<8x256xf32> to vector<256xf32>
    %48 = vector.shape_cast %47 : vector<256xf32> to vector<1x256xf32>
    %cst_23 = arith.constant 1.250000e-01 : f32
    %49 = vector.broadcast %cst_23 : f32 to vector<1x256xf32>
    %50 = arith.mulf %45, %49 : vector<1x256xf32>
    %cst_24 = arith.constant 1.250000e-01 : f32
    %51 = vector.broadcast %cst_24 : f32 to vector<1x256xf32>
    %52 = arith.mulf %48, %51 : vector<1x256xf32>
    %53 = arith.mulf %50, %50 : vector<1x256xf32>
    %54 = arith.subf %52, %53 : vector<1x256xf32>
    %c0_25 = arith.constant 0 : index
    %c0_26 = arith.constant 0 : index
    %55 = vector.load %arg4[%c0_25, %c0_26] : memref<1x256xf32, #tpu.memory_space<vmem>>, vector<1x256xf32>
    %cst_27 = arith.constant 9.99999974E-6 : f32
    %56 = vector.broadcast %cst_27 : f32 to vector<1x256xf32>
    %57 = arith.addf %54, %56 : vector<1x256xf32>
    %58 = math.rsqrt %57 : vector<1x256xf32>
    %59 = arith.mulf %55, %58 : vector<1x256xf32>
    %c0_28 = arith.constant 0 : index
    %c0_29 = arith.constant 0 : index
    %60 = vector.load %arg5[%c0_28, %c0_29] : memref<1x256xf32, #tpu.memory_space<vmem>>, vector<1x256xf32>
    %61 = arith.mulf %50, %59 : vector<1x256xf32>
    %62 = arith.subf %60, %61 : vector<1x256xf32>
    %63 = vector.broadcast %59 : vector<1x256xf32> to vector<8x256xf32>
    %64 = arith.mulf %43, %63 : vector<8x256xf32>
    %65 = vector.broadcast %62 : vector<1x256xf32> to vector<8x256xf32>
    %66 = arith.addf %64, %65 : vector<8x256xf32>
    %cst_30 = arith.constant 0.000000e+00 : f32
    %67 = vector.broadcast %cst_30 : f32 to vector<8x256xf32>
    %68 = arith.cmpf ogt, %66, %67 : vector<8x256xf32>
    %cst_31 = arith.constant 2.000000e-01 : f32
    %69 = vector.broadcast %cst_31 : f32 to vector<8x256xf32>
    %70 = arith.mulf %69, %66 : vector<8x256xf32>
    %71 = arith.select %68, %66, %70 : vector<8x256xi1>, vector<8x256xf32>
    %c0_i32_32 = arith.constant 0 : i32
    %72 = tpu.memref_slice %arg27[%c0_i32_32] : memref<6x!tpu.dma_semaphore, #tpu.memory_space<semaphore_mem>> -> memref<1x!tpu.dma_semaphore, #tpu.memory_space<semaphore_mem>>
    %73 = tpu.memref_squeeze %72 : memref<1x!tpu.dma_semaphore, #tpu.memory_space<semaphore_mem>> -> memref<!tpu.dma_semaphore, #tpu.memory_space<semaphore_mem>>
    tpu.wait_dma2 semaphore(%73 : memref<!tpu.dma_semaphore, #tpu.memory_space<semaphore_mem>>) src(%arg10 : memref<256x1152xbf16, #tpu.memory_space<any>>) dst(%arg21 : memref<256x1152xbf16, #tpu.memory_space<vmem>>)
    %c1_i32_33 = arith.constant 1 : i32
    %74 = tpu.memref_slice %arg27[%c1_i32_33] : memref<6x!tpu.dma_semaphore, #tpu.memory_space<semaphore_mem>> -> memref<1x!tpu.dma_semaphore, #tpu.memory_space<semaphore_mem>>
    %75 = tpu.memref_squeeze %74 : memref<1x!tpu.dma_semaphore, #tpu.memory_space<semaphore_mem>> -> memref<!tpu.dma_semaphore, #tpu.memory_space<semaphore_mem>>
    tpu.wait_dma2 semaphore(%75 : memref<!tpu.dma_semaphore, #tpu.memory_space<semaphore_mem>>) src(%arg11 : memref<16x36xbf16, #tpu.memory_space<any>>) dst(%arg22 : memref<16x36xbf16, #tpu.memory_space<vmem>>)
    %c0_34 = arith.constant 0 : index
    %c0_35 = arith.constant 0 : index
    %76 = vector.load %arg21[%c0_34, %c0_35] : memref<256x1152xbf16, #tpu.memory_space<vmem>>, vector<256x1152xbf16>
    %c0_36 = arith.constant 0 : index
    %c0_37 = arith.constant 0 : index
    %77 = vector.load %arg22[%c0_36, %c0_37] : memref<16x36xbf16, #tpu.memory_space<vmem>>, vector<16x36xbf16>
    %78 = arith.truncf %71 : vector<8x256xf32> to vector<8x256xbf16>
    %cst_38 = arith.constant dense<0.000000e+00> : vector<8x1152xf32>
    %79 = tpu.matmul %78, %76, %cst_38 {dimension_numbers = #tpu.dot_dimension_numbers<[1], [0], [0], [1], [0, 0, 1, 1], [], []>} : vector<8x256xbf16>, vector<256x1152xbf16>, vector<8x1152xf32> -> vector<8x1152xf32>
    %80 = arith.truncf %79 : vector<8x1152xf32> to vector<8x1152xbf16>
    %81 = vector.extract_strided_slice %80 {offsets = [0, 0], sizes = [4, 128], strides = [1, 1]} : vector<8x1152xbf16> to vector<4x128xbf16>
    %c0_39 = arith.constant 0 : index
    %c0_40 = arith.constant 0 : index
    %c0_41 = arith.constant 0 : index
    %82 = vector.load %arg18[%c0_39, %c0_40, %c0_41] : memref<2x36x128xbf16, #tpu.memory_space<vmem>>, vector<1x4x128xbf16>
    %83 = vector.shape_cast %82 : vector<1x4x128xbf16> to vector<4x128xbf16>
    %84 = vector.shape_cast %81 : vector<4x128xbf16> to vector<1x4x128xbf16>
    tpu.vector_store %arg18[%c0_39, %c0_40, %c0_41], %84 {strides = array<i32>} : memref<2x36x128xbf16, #tpu.memory_space<vmem>>, vector<1x4x128xbf16>,
    %85 = vector.extract_strided_slice %80 {offsets = [0, 128], sizes = [4, 128], strides = [1, 1]} : vector<8x1152xbf16> to vector<4x128xbf16>
    %c0_42 = arith.constant 0 : index
    %c4_43 = arith.constant 4 : index
    %c0_44 = arith.constant 0 : index
    %86 = vector.load %arg18[%c0_42, %c4_43, %c0_44] : memref<2x36x128xbf16, #tpu.memory_space<vmem>>, vector<1x4x128xbf16>
    %87 = vector.shape_cast %86 : vector<1x4x128xbf16> to vector<4x128xbf16>
    %88 = vector.shape_cast %85 : vector<4x128xbf16> to vector<1x4x128xbf16>
    tpu.vector_store %arg18[%c0_42, %c4_43, %c0_44], %88 {strides = array<i32>} : memref<2x36x128xbf16, #tpu.memory_space<vmem>>, vector<1x4x128xbf16>,
    %89 = vector.extract_strided_slice %80 {offsets = [0, 256], sizes = [4, 128], strides = [1, 1]} : vector<8x1152xbf16> to vector<4x128xbf16>
    %c0_45 = arith.constant 0 : index
    %c8 = arith.constant 8 : index
    %c0_46 = arith.constant 0 : index
    %90 = vector.load %arg18[%c0_45, %c8, %c0_46] : memref<2x36x128xbf16, #tpu.memory_space<vmem>>, vector<1x4x128xbf16>
    %91 = vector.shape_cast %90 : vector<1x4x128xbf16> to vector<4x128xbf16>
    %92 = vector.shape_cast %89 : vector<4x128xbf16> to vector<1x4x128xbf16>
    tpu.vector_store %arg18[%c0_45, %c8, %c0_46], %92 {strides = array<i32>} : memref<2x36x128xbf16, #tpu.memory_space<vmem>>, vector<1x4x128xbf16>,
    %93 = vector.extract_strided_slice %80 {offsets = [0, 384], sizes = [4, 128], strides = [1, 1]} : vector<8x1152xbf16> to vector<4x128xbf16>
    %c0_47 = arith.constant 0 : index
    %c12 = arith.constant 12 : index
    %c0_48 = arith.constant 0 : index
    %94 = vector.load %arg18[%c0_47, %c12, %c0_48] : memref<2x36x128xbf16, #tpu.memory_space<vmem>>, vector<1x4x128xbf16>
    %95 = vector.shape_cast %94 : vector<1x4x128xbf16> to vector<4x128xbf16>
    %96 = vector.shape_cast %93 : vector<4x128xbf16> to vector<1x4x128xbf16>
    tpu.vector_store %arg18[%c0_47, %c12, %c0_48], %96 {strides = array<i32>} : memref<2x36x128xbf16, #tpu.memory_space<vmem>>, vector<1x4x128xbf16>,
    %97 = vector.extract_strided_slice %80 {offsets = [0, 512], sizes = [4, 128], strides = [1, 1]} : vector<8x1152xbf16> to vector<4x128xbf16>
    %c0_49 = arith.constant 0 : index
    %c16 = arith.constant 16 : index
    %c0_50 = arith.constant 0 : index
    %98 = vector.load %arg18[%c0_49, %c16, %c0_50] : memref<2x36x128xbf16, #tpu.memory_space<vmem>>, vector<1x4x128xbf16>
    %99 = vector.shape_cast %98 : vector<1x4x128xbf16> to vector<4x128xbf16>
    %100 = vector.shape_cast %97 : vector<4x128xbf16> to vector<1x4x128xbf16>
    tpu.vector_store %arg18[%c0_49, %c16, %c0_50], %100 {strides = array<i32>} : memref<2x36x128xbf16, #tpu.memory_space<vmem>>, vector<1x4x128xbf16>,
    %101 = vector.extract_strided_slice %80 {offsets = [0, 640], sizes = [4, 128], strides = [1, 1]} : vector<8x1152xbf16> to vector<4x128xbf16>
    %c0_51 = arith.constant 0 : index
    %c20 = arith.constant 20 : index
    %c0_52 = arith.constant 0 : index
    %102 = vector.load %arg18[%c0_51, %c20, %c0_52] : memref<2x36x128xbf16, #tpu.memory_space<vmem>>, vector<1x4x128xbf16>
    %103 = vector.shape_cast %102 : vector<1x4x128xbf16> to vector<4x128xbf16>
    %104 = vector.shape_cast %101 : vector<4x128xbf16> to vector<1x4x128xbf16>
    tpu.vector_store %arg18[%c0_51, %c20, %c0_52], %104 {strides = array<i32>} : memref<2x36x128xbf16, #tpu.memory_space<vmem>>, vector<1x4x128xbf16>,
    %105 = vector.extract_strided_slice %80 {offsets = [0, 768], sizes = [4, 128], strides = [1, 1]} : vector<8x1152xbf16> to vector<4x128xbf16>
    %c0_53 = arith.constant 0 : index
    %c24 = arith.constant 24 : index
    %c0_54 = arith.constant 0 : index
    %106 = vector.load %arg18[%c0_53, %c24, %c0_54] : memref<2x36x128xbf16, #tpu.memory_space<vmem>>, vector<1x4x128xbf16>
    %107 = vector.shape_cast %106 : vector<1x4x128xbf16> to vector<4x128xbf16>
    %108 = vector.shape_cast %105 : vector<4x128xbf16> to vector<1x4x128xbf16>
    tpu.vector_store %arg18[%c0_53, %c24, %c0_54], %108 {strides = array<i32>} : memref<2x36x128xbf16, #tpu.memory_space<vmem>>, vector<1x4x128xbf16>,
    %109 = vector.extract_strided_slice %80 {offsets = [0, 896], sizes = [4, 128], strides = [1, 1]} : vector<8x1152xbf16> to vector<4x128xbf16>
    %c0_55 = arith.constant 0 : index
    %c28 = arith.constant 28 : index
    %c0_56 = arith.constant 0 : index
    %110 = vector.load %arg18[%c0_55, %c28, %c0_56] : memref<2x36x128xbf16, #tpu.memory_space<vmem>>, vector<1x4x128xbf16>
    %111 = vector.shape_cast %110 : vector<1x4x128xbf16> to vector<4x128xbf16>
    %112 = vector.shape_cast %109 : vector<4x128xbf16> to vector<1x4x128xbf16>
    tpu.vector_store %arg18[%c0_55, %c28, %c0_56], %112 {strides = array<i32>} : memref<2x36x128xbf16, #tpu.memory_space<vmem>>, vector<1x4x128xbf16>,
    %113 = vector.extract_strided_slice %80 {offsets = [0, 1024], sizes = [4, 128], strides = [1, 1]} : vector<8x1152xbf16> to vector<4x128xbf16>
    %c0_57 = arith.constant 0 : index
    %c32 = arith.constant 32 : index
    %c0_58 = arith.constant 0 : index
    %114 = vector.load %arg18[%c0_57, %c32, %c0_58] : memref<2x36x128xbf16, #tpu.memory_space<vmem>>, vector<1x4x128xbf16>
    %115 = vector.shape_cast %114 : vector<1x4x128xbf16> to vector<4x128xbf16>
    %116 = vector.shape_cast %113 : vector<4x128xbf16> to vector<1x4x128xbf16>
    tpu.vector_store %arg18[%c0_57, %c32, %c0_58], %116 {strides = array<i32>} : memref<2x36x128xbf16, #tpu.memory_space<vmem>>, vector<1x4x128xbf16>,
    %117 = vector.extract_strided_slice %80 {offsets = [4, 0], sizes = [4, 128], strides = [1, 1]} : vector<8x1152xbf16> to vector<4x128xbf16>
    %c1_59 = arith.constant 1 : index
    %c0_60 = arith.constant 0 : index
    %c0_61 = arith.constant 0 : index
    %118 = vector.load %arg18[%c1_59, %c0_60, %c0_61] : memref<2x36x128xbf16, #tpu.memory_space<vmem>>, vector<1x4x128xbf16>
    %119 = vector.shape_cast %118 : vector<1x4x128xbf16> to vector<4x128xbf16>
    %120 = vector.shape_cast %117 : vector<4x128xbf16> to vector<1x4x128xbf16>
    tpu.vector_store %arg18[%c1_59, %c0_60, %c0_61], %120 {strides = array<i32>} : memref<2x36x128xbf16, #tpu.memory_space<vmem>>, vector<1x4x128xbf16>,
    %121 = vector.extract_strided_slice %80 {offsets = [4, 128], sizes = [4, 128], strides = [1, 1]} : vector<8x1152xbf16> to vector<4x128xbf16>
    %c1_62 = arith.constant 1 : index
    %c4_63 = arith.constant 4 : index
    %c0_64 = arith.constant 0 : index
    %122 = vector.load %arg18[%c1_62, %c4_63, %c0_64] : memref<2x36x128xbf16, #tpu.memory_space<vmem>>, vector<1x4x128xbf16>
    %123 = vector.shape_cast %122 : vector<1x4x128xbf16> to vector<4x128xbf16>
    %124 = vector.shape_cast %121 : vector<4x128xbf16> to vector<1x4x128xbf16>
    tpu.vector_store %arg18[%c1_62, %c4_63, %c0_64], %124 {strides = array<i32>} : memref<2x36x128xbf16, #tpu.memory_space<vmem>>, vector<1x4x128xbf16>,
    %125 = vector.extract_strided_slice %80 {offsets = [4, 256], sizes = [4, 128], strides = [1, 1]} : vector<8x1152xbf16> to vector<4x128xbf16>
    %c1_65 = arith.constant 1 : index
    %c8_66 = arith.constant 8 : index
    %c0_67 = arith.constant 0 : index
    %126 = vector.load %arg18[%c1_65, %c8_66, %c0_67] : memref<2x36x128xbf16, #tpu.memory_space<vmem>>, vector<1x4x128xbf16>
    %127 = vector.shape_cast %126 : vector<1x4x128xbf16> to vector<4x128xbf16>
    %128 = vector.shape_cast %125 : vector<4x128xbf16> to vector<1x4x128xbf16>
    tpu.vector_store %arg18[%c1_65, %c8_66, %c0_67], %128 {strides = array<i32>} : memref<2x36x128xbf16, #tpu.memory_space<vmem>>, vector<1x4x128xbf16>,
    %129 = vector.extract_strided_slice %80 {offsets = [4, 384], sizes = [4, 128], strides = [1, 1]} : vector<8x1152xbf16> to vector<4x128xbf16>
    %c1_68 = arith.constant 1 : index
    %c12_69 = arith.constant 12 : index
    %c0_70 = arith.constant 0 : index
    %130 = vector.load %arg18[%c1_68, %c12_69, %c0_70] : memref<2x36x128xbf16, #tpu.memory_space<vmem>>, vector<1x4x128xbf16>
    %131 = vector.shape_cast %130 : vector<1x4x128xbf16> to vector<4x128xbf16>
    %132 = vector.shape_cast %129 : vector<4x128xbf16> to vector<1x4x128xbf16>
    tpu.vector_store %arg18[%c1_68, %c12_69, %c0_70], %132 {strides = array<i32>} : memref<2x36x128xbf16, #tpu.memory_space<vmem>>, vector<1x4x128xbf16>,
    %133 = vector.extract_strided_slice %80 {offsets = [4, 512], sizes = [4, 128], strides = [1, 1]} : vector<8x1152xbf16> to vector<4x128xbf16>
    %c1_71 = arith.constant 1 : index
    %c16_72 = arith.constant 16 : index
    %c0_73 = arith.constant 0 : index
    %134 = vector.load %arg18[%c1_71, %c16_72, %c0_73] : memref<2x36x128xbf16, #tpu.memory_space<vmem>>, vector<1x4x128xbf16>
    %135 = vector.shape_cast %134 : vector<1x4x128xbf16> to vector<4x128xbf16>
    %136 = vector.shape_cast %133 : vector<4x128xbf16> to vector<1x4x128xbf16>
    tpu.vector_store %arg18[%c1_71, %c16_72, %c0_73], %136 {strides = array<i32>} : memref<2x36x128xbf16, #tpu.memory_space<vmem>>, vector<1x4x128xbf16>,
    %137 = vector.extract_strided_slice %80 {offsets = [4, 640], sizes = [4, 128], strides = [1, 1]} : vector<8x1152xbf16> to vector<4x128xbf16>
    %c1_74 = arith.constant 1 : index
    %c20_75 = arith.constant 20 : index
    %c0_76 = arith.constant 0 : index
    %138 = vector.load %arg18[%c1_74, %c20_75, %c0_76] : memref<2x36x128xbf16, #tpu.memory_space<vmem>>, vector<1x4x128xbf16>
    %139 = vector.shape_cast %138 : vector<1x4x128xbf16> to vector<4x128xbf16>
    %140 = vector.shape_cast %137 : vector<4x128xbf16> to vector<1x4x128xbf16>
    tpu.vector_store %arg18[%c1_74, %c20_75, %c0_76], %140 {strides = array<i32>} : memref<2x36x128xbf16, #tpu.memory_space<vmem>>, vector<1x4x128xbf16>,
    %141 = vector.extract_strided_slice %80 {offsets = [4, 768], sizes = [4, 128], strides = [1, 1]} : vector<8x1152xbf16> to vector<4x128xbf16>
    %c1_77 = arith.constant 1 : index
    %c24_78 = arith.constant 24 : index
    %c0_79 = arith.constant 0 : index
    %142 = vector.load %arg18[%c1_77, %c24_78, %c0_79] : memref<2x36x128xbf16, #tpu.memory_space<vmem>>, vector<1x4x128xbf16>
    %143 = vector.shape_cast %142 : vector<1x4x128xbf16> to vector<4x128xbf16>
    %144 = vector.shape_cast %141 : vector<4x128xbf16> to vector<1x4x128xbf16>
    tpu.vector_store %arg18[%c1_77, %c24_78, %c0_79], %144 {strides = array<i32>} : memref<2x36x128xbf16, #tpu.memory_space<vmem>>, vector<1x4x128xbf16>,
    %145 = vector.extract_strided_slice %80 {offsets = [4, 896], sizes = [4, 128], strides = [1, 1]} : vector<8x1152xbf16> to vector<4x128xbf16>
    %c1_80 = arith.constant 1 : index
    %c28_81 = arith.constant 28 : index
    %c0_82 = arith.constant 0 : index
    %146 = vector.load %arg18[%c1_80, %c28_81, %c0_82] : memref<2x36x128xbf16, #tpu.memory_space<vmem>>, vector<1x4x128xbf16>
    %147 = vector.shape_cast %146 : vector<1x4x128xbf16> to vector<4x128xbf16>
    %148 = vector.shape_cast %145 : vector<4x128xbf16> to vector<1x4x128xbf16>
    tpu.vector_store %arg18[%c1_80, %c28_81, %c0_82], %148 {strides = array<i32>} : memref<2x36x128xbf16, #tpu.memory_space<vmem>>, vector<1x4x128xbf16>,
    %149 = vector.extract_strided_slice %80 {offsets = [4, 1024], sizes = [4, 128], strides = [1, 1]} : vector<8x1152xbf16> to vector<4x128xbf16>
    %c1_83 = arith.constant 1 : index
    %c32_84 = arith.constant 32 : index
    %c0_85 = arith.constant 0 : index
    %150 = vector.load %arg18[%c1_83, %c32_84, %c0_85] : memref<2x36x128xbf16, #tpu.memory_space<vmem>>, vector<1x4x128xbf16>
    %151 = vector.shape_cast %150 : vector<1x4x128xbf16> to vector<4x128xbf16>
    %152 = vector.shape_cast %149 : vector<4x128xbf16> to vector<1x4x128xbf16>
    tpu.vector_store %arg18[%c1_83, %c32_84, %c0_85], %152 {strides = array<i32>} : memref<2x36x128xbf16, #tpu.memory_space<vmem>>, vector<1x4x128xbf16>,
    %c0_86 = arith.constant 0 : index
    %c0_87 = arith.constant 0 : index
    %c0_88 = arith.constant 0 : index
    %153 = vector.load %arg18[%c0_86, %c0_87, %c0_88] : memref<2x36x128xbf16, #tpu.memory_space<vmem>>, vector<1x36x128xbf16>
    %154 = vector.shape_cast %153 : vector<1x36x128xbf16> to vector<36x128xbf16>
    %cst_89 = arith.constant dense<0.000000e+00> : vector<16x128xf32>
    %155 = tpu.matmul %77, %154, %cst_89 {dimension_numbers = #tpu.dot_dimension_numbers<[1], [0], [0], [1], [0, 0, 1, 1], [], []>} : vector<16x36xbf16>, vector<36x128xbf16>, vector<16x128xf32> -> vector<16x128xf32>
    %c1_90 = arith.constant 1 : index
    %c0_91 = arith.constant 0 : index
    %c0_92 = arith.constant 0 : index
    %156 = vector.load %arg18[%c1_90, %c0_91, %c0_92] : memref<2x36x128xbf16, #tpu.memory_space<vmem>>, vector<1x36x128xbf16>
    %157 = vector.shape_cast %156 : vector<1x36x128xbf16> to vector<36x128xbf16>
    %cst_93 = arith.constant dense<0.000000e+00> : vector<16x128xf32>
    %158 = tpu.matmul %77, %157, %cst_93 {dimension_numbers = #tpu.dot_dimension_numbers<[1], [0], [0], [1], [0, 0, 1, 1], [], []>} : vector<16x36xbf16>, vector<36x128xbf16>, vector<16x128xf32> -> vector<16x128xf32>
    %159 = tpu.concatenate %155, %158 in 0 : vector<16x128xf32>, vector<16x128xf32> -> vector<32x128xf32>
    %cst_94 = arith.constant dense<0.000000e+00> : vector<128xf32>
    %160 = vector.multi_reduction <add>, %159, %cst_94 [0] : vector<32x128xf32> to vector<128xf32>
    %161 = vector.shape_cast %160 : vector<128xf32> to vector<1x128xf32>
    %162 = arith.mulf %159, %159 : vector<32x128xf32>
    %cst_95 = arith.constant dense<0.000000e+00> : vector<128xf32>
    %163 = vector.multi_reduction <add>, %162, %cst_95 [0] : vector<32x128xf32> to vector<128xf32>
    %164 = vector.shape_cast %163 : vector<128xf32> to vector<1x128xf32>
    %cst_96 = arith.constant 3.125000e-02 : f32
    %165 = vector.broadcast %cst_96 : f32 to vector<1x128xf32>
    %166 = arith.mulf %161, %165 : vector<1x128xf32>
    %cst_97 = arith.constant 3.125000e-02 : f32
    %167 = vector.broadcast %cst_97 : f32 to vector<1x128xf32>
    %168 = arith.mulf %164, %167 : vector<1x128xf32>
    %169 = arith.mulf %166, %166 : vector<1x128xf32>
    %170 = arith.subf %168, %169 : vector<1x128xf32>
    %c0_98 = arith.constant 0 : index
    %c0_99 = arith.constant 0 : index
    %171 = vector.load %arg6[%c0_98, %c0_99] : memref<1x128xf32, #tpu.memory_space<vmem>>, vector<1x128xf32>
    %cst_100 = arith.constant 9.99999974E-6 : f32
    %172 = vector.broadcast %cst_100 : f32 to vector<1x128xf32>
    %173 = arith.addf %170, %172 : vector<1x128xf32>
    %174 = math.rsqrt %173 : vector<1x128xf32>
    %175 = arith.mulf %171, %174 : vector<1x128xf32>
    %c0_101 = arith.constant 0 : index
    %c0_102 = arith.constant 0 : index
    %176 = vector.load %arg7[%c0_101, %c0_102] : memref<1x128xf32, #tpu.memory_space<vmem>>, vector<1x128xf32>
    %177 = arith.mulf %166, %175 : vector<1x128xf32>
    %178 = arith.subf %176, %177 : vector<1x128xf32>
    %179 = vector.broadcast %175 : vector<1x128xf32> to vector<32x128xf32>
    %180 = arith.mulf %159, %179 : vector<32x128xf32>
    %181 = vector.broadcast %178 : vector<1x128xf32> to vector<32x128xf32>
    %182 = arith.addf %180, %181 : vector<32x128xf32>
    %cst_103 = arith.constant 0.000000e+00 : f32
    %183 = vector.broadcast %cst_103 : f32 to vector<32x128xf32>
    %184 = arith.cmpf ogt, %182, %183 : vector<32x128xf32>
    %cst_104 = arith.constant 2.000000e-01 : f32
    %185 = vector.broadcast %cst_104 : f32 to vector<32x128xf32>
    %186 = arith.mulf %185, %182 : vector<32x128xf32>
    %187 = arith.select %184, %182, %186 : vector<32x128xi1>, vector<32x128xf32>
    %c2_i32_105 = arith.constant 2 : i32
    %188 = tpu.memref_slice %arg27[%c2_i32_105] : memref<6x!tpu.dma_semaphore, #tpu.memory_space<semaphore_mem>> -> memref<1x!tpu.dma_semaphore, #tpu.memory_space<semaphore_mem>>
    %189 = tpu.memref_squeeze %188 : memref<1x!tpu.dma_semaphore, #tpu.memory_space<semaphore_mem>> -> memref<!tpu.dma_semaphore, #tpu.memory_space<semaphore_mem>>
    tpu.wait_dma2 semaphore(%189 : memref<!tpu.dma_semaphore, #tpu.memory_space<semaphore_mem>>) src(%arg12 : memref<128x576xbf16, #tpu.memory_space<any>>) dst(%arg23 : memref<128x576xbf16, #tpu.memory_space<vmem>>)
    %c3_i32_106 = arith.constant 3 : i32
    %190 = tpu.memref_slice %arg27[%c3_i32_106] : memref<6x!tpu.dma_semaphore, #tpu.memory_space<semaphore_mem>> -> memref<1x!tpu.dma_semaphore, #tpu.memory_space<semaphore_mem>>
    %191 = tpu.memref_squeeze %190 : memref<1x!tpu.dma_semaphore, #tpu.memory_space<semaphore_mem>> -> memref<!tpu.dma_semaphore, #tpu.memory_space<semaphore_mem>>
    tpu.wait_dma2 semaphore(%191 : memref<!tpu.dma_semaphore, #tpu.memory_space<semaphore_mem>>) src(%arg13 : memref<64x144xbf16, #tpu.memory_space<any>>) dst(%arg24 : memref<64x144xbf16, #tpu.memory_space<vmem>>)
    %c0_107 = arith.constant 0 : index
    %c0_108 = arith.constant 0 : index
    %192 = vector.load %arg23[%c0_107, %c0_108] : memref<128x576xbf16, #tpu.memory_space<vmem>>, vector<128x576xbf16>
    %c0_109 = arith.constant 0 : index
    %c0_110 = arith.constant 0 : index
    %193 = vector.load %arg24[%c0_109, %c0_110] : memref<64x144xbf16, #tpu.memory_space<vmem>>, vector<64x144xbf16>
    %194 = arith.truncf %187 : vector<32x128xf32> to vector<32x128xbf16>
    %cst_111 = arith.constant dense<0.000000e+00> : vector<32x576xf32>
    %195 = tpu.matmul %194, %192, %cst_111 {dimension_numbers = #tpu.dot_dimension_numbers<[1], [0], [0], [1], [0, 0, 1, 1], [], []>} : vector<32x128xbf16>, vector<128x576xbf16>, vector<32x576xf32> -> vector<32x576xf32>
    %196 = arith.truncf %195 : vector<32x576xf32> to vector<32x576xbf16>
    %197 = vector.extract_strided_slice %196 {offsets = [0, 0], sizes = [16, 64], strides = [1, 1]} : vector<32x576xbf16> to vector<16x64xbf16>
    %c0_112 = arith.constant 0 : index
    %c0_113 = arith.constant 0 : index
    %c0_114 = arith.constant 0 : index
    %198 = vector.load %arg19[%c0_112, %c0_113, %c0_114] : memref<2x144x64xbf16, #tpu.memory_space<vmem>>, vector<1x16x64xbf16>
    %199 = vector.shape_cast %198 : vector<1x16x64xbf16> to vector<16x64xbf16>
    %200 = vector.shape_cast %197 : vector<16x64xbf16> to vector<1x16x64xbf16>
    tpu.vector_store %arg19[%c0_112, %c0_113, %c0_114], %200 {strides = array<i32>} : memref<2x144x64xbf16, #tpu.memory_space<vmem>>, vector<1x16x64xbf16>,
    %201 = vector.extract_strided_slice %196 {offsets = [0, 64], sizes = [16, 64], strides = [1, 1]} : vector<32x576xbf16> to vector<16x64xbf16>
    %c0_115 = arith.constant 0 : index
    %c16_116 = arith.constant 16 : index
    %c0_117 = arith.constant 0 : index
    %202 = vector.load %arg19[%c0_115, %c16_116, %c0_117] : memref<2x144x64xbf16, #tpu.memory_space<vmem>>, vector<1x16x64xbf16>
    %203 = vector.shape_cast %202 : vector<1x16x64xbf16> to vector<16x64xbf16>
    %204 = vector.shape_cast %201 : vector<16x64xbf16> to vector<1x16x64xbf16>
    tpu.vector_store %arg19[%c0_115, %c16_116, %c0_117], %204 {strides = array<i32>} : memref<2x144x64xbf16, #tpu.memory_space<vmem>>, vector<1x16x64xbf16>,
    %205 = vector.extract_strided_slice %196 {offsets = [0, 128], sizes = [16, 64], strides = [1, 1]} : vector<32x576xbf16> to vector<16x64xbf16>
    %c0_118 = arith.constant 0 : index
    %c32_119 = arith.constant 32 : index
    %c0_120 = arith.constant 0 : index
    %206 = vector.load %arg19[%c0_118, %c32_119, %c0_120] : memref<2x144x64xbf16, #tpu.memory_space<vmem>>, vector<1x16x64xbf16>
    %207 = vector.shape_cast %206 : vector<1x16x64xbf16> to vector<16x64xbf16>
    %208 = vector.shape_cast %205 : vector<16x64xbf16> to vector<1x16x64xbf16>
    tpu.vector_store %arg19[%c0_118, %c32_119, %c0_120], %208 {strides = array<i32>} : memref<2x144x64xbf16, #tpu.memory_space<vmem>>, vector<1x16x64xbf16>,
    %209 = vector.extract_strided_slice %196 {offsets = [0, 192], sizes = [16, 64], strides = [1, 1]} : vector<32x576xbf16> to vector<16x64xbf16>
    %c0_121 = arith.constant 0 : index
    %c48 = arith.constant 48 : index
    %c0_122 = arith.constant 0 : index
    %210 = vector.load %arg19[%c0_121, %c48, %c0_122] : memref<2x144x64xbf16, #tpu.memory_space<vmem>>, vector<1x16x64xbf16>
    %211 = vector.shape_cast %210 : vector<1x16x64xbf16> to vector<16x64xbf16>
    %212 = vector.shape_cast %209 : vector<16x64xbf16> to vector<1x16x64xbf16>
    tpu.vector_store %arg19[%c0_121, %c48, %c0_122], %212 {strides = array<i32>} : memref<2x144x64xbf16, #tpu.memory_space<vmem>>, vector<1x16x64xbf16>,
    %213 = vector.extract_strided_slice %196 {offsets = [0, 256], sizes = [16, 64], strides = [1, 1]} : vector<32x576xbf16> to vector<16x64xbf16>
    %c0_123 = arith.constant 0 : index
    %c64 = arith.constant 64 : index
    %c0_124 = arith.constant 0 : index
    %214 = vector.load %arg19[%c0_123, %c64, %c0_124] : memref<2x144x64xbf16, #tpu.memory_space<vmem>>, vector<1x16x64xbf16>
    %215 = vector.shape_cast %214 : vector<1x16x64xbf16> to vector<16x64xbf16>
    %216 = vector.shape_cast %213 : vector<16x64xbf16> to vector<1x16x64xbf16>
    tpu.vector_store %arg19[%c0_123, %c64, %c0_124], %216 {strides = array<i32>} : memref<2x144x64xbf16, #tpu.memory_space<vmem>>, vector<1x16x64xbf16>,
    %217 = vector.extract_strided_slice %196 {offsets = [0, 320], sizes = [16, 64], strides = [1, 1]} : vector<32x576xbf16> to vector<16x64xbf16>
    %c0_125 = arith.constant 0 : index
    %c80 = arith.constant 80 : index
    %c0_126 = arith.constant 0 : index
    %218 = vector.load %arg19[%c0_125, %c80, %c0_126] : memref<2x144x64xbf16, #tpu.memory_space<vmem>>, vector<1x16x64xbf16>
    %219 = vector.shape_cast %218 : vector<1x16x64xbf16> to vector<16x64xbf16>
    %220 = vector.shape_cast %217 : vector<16x64xbf16> to vector<1x16x64xbf16>
    tpu.vector_store %arg19[%c0_125, %c80, %c0_126], %220 {strides = array<i32>} : memref<2x144x64xbf16, #tpu.memory_space<vmem>>, vector<1x16x64xbf16>,
    %221 = vector.extract_strided_slice %196 {offsets = [0, 384], sizes = [16, 64], strides = [1, 1]} : vector<32x576xbf16> to vector<16x64xbf16>
    %c0_127 = arith.constant 0 : index
    %c96 = arith.constant 96 : index
    %c0_128 = arith.constant 0 : index
    %222 = vector.load %arg19[%c0_127, %c96, %c0_128] : memref<2x144x64xbf16, #tpu.memory_space<vmem>>, vector<1x16x64xbf16>
    %223 = vector.shape_cast %222 : vector<1x16x64xbf16> to vector<16x64xbf16>
    %224 = vector.shape_cast %221 : vector<16x64xbf16> to vector<1x16x64xbf16>
    tpu.vector_store %arg19[%c0_127, %c96, %c0_128], %224 {strides = array<i32>} : memref<2x144x64xbf16, #tpu.memory_space<vmem>>, vector<1x16x64xbf16>,
    %225 = vector.extract_strided_slice %196 {offsets = [0, 448], sizes = [16, 64], strides = [1, 1]} : vector<32x576xbf16> to vector<16x64xbf16>
    %c0_129 = arith.constant 0 : index
    %c112 = arith.constant 112 : index
    %c0_130 = arith.constant 0 : index
    %226 = vector.load %arg19[%c0_129, %c112, %c0_130] : memref<2x144x64xbf16, #tpu.memory_space<vmem>>, vector<1x16x64xbf16>
    %227 = vector.shape_cast %226 : vector<1x16x64xbf16> to vector<16x64xbf16>
    %228 = vector.shape_cast %225 : vector<16x64xbf16> to vector<1x16x64xbf16>
    tpu.vector_store %arg19[%c0_129, %c112, %c0_130], %228 {strides = array<i32>} : memref<2x144x64xbf16, #tpu.memory_space<vmem>>, vector<1x16x64xbf16>,
    %229 = vector.extract_strided_slice %196 {offsets = [0, 512], sizes = [16, 64], strides = [1, 1]} : vector<32x576xbf16> to vector<16x64xbf16>
    %c0_131 = arith.constant 0 : index
    %c128 = arith.constant 128 : index
    %c0_132 = arith.constant 0 : index
    %230 = vector.load %arg19[%c0_131, %c128, %c0_132] : memref<2x144x64xbf16, #tpu.memory_space<vmem>>, vector<1x16x64xbf16>
    %231 = vector.shape_cast %230 : vector<1x16x64xbf16> to vector<16x64xbf16>
    %232 = vector.shape_cast %229 : vector<16x64xbf16> to vector<1x16x64xbf16>
    tpu.vector_store %arg19[%c0_131, %c128, %c0_132], %232 {strides = array<i32>} : memref<2x144x64xbf16, #tpu.memory_space<vmem>>, vector<1x16x64xbf16>,
    %233 = vector.extract_strided_slice %196 {offsets = [16, 0], sizes = [16, 64], strides = [1, 1]} : vector<32x576xbf16> to vector<16x64xbf16>
    %c1_133 = arith.constant 1 : index
    %c0_134 = arith.constant 0 : index
    %c0_135 = arith.constant 0 : index
    %234 = vector.load %arg19[%c1_133, %c0_134, %c0_135] : memref<2x144x64xbf16, #tpu.memory_space<vmem>>, vector<1x16x64xbf16>
    %235 = vector.shape_cast %234 : vector<1x16x64xbf16> to vector<16x64xbf16>
    %236 = vector.shape_cast %233 : vector<16x64xbf16> to vector<1x16x64xbf16>
    tpu.vector_store %arg19[%c1_133, %c0_134, %c0_135], %236 {strides = array<i32>} : memref<2x144x64xbf16, #tpu.memory_space<vmem>>, vector<1x16x64xbf16>,
    %237 = vector.extract_strided_slice %196 {offsets = [16, 64], sizes = [16, 64], strides = [1, 1]} : vector<32x576xbf16> to vector<16x64xbf16>
    %c1_136 = arith.constant 1 : index
    %c16_137 = arith.constant 16 : index
    %c0_138 = arith.constant 0 : index
    %238 = vector.load %arg19[%c1_136, %c16_137, %c0_138] : memref<2x144x64xbf16, #tpu.memory_space<vmem>>, vector<1x16x64xbf16>
    %239 = vector.shape_cast %238 : vector<1x16x64xbf16> to vector<16x64xbf16>
    %240 = vector.shape_cast %237 : vector<16x64xbf16> to vector<1x16x64xbf16>
    tpu.vector_store %arg19[%c1_136, %c16_137, %c0_138], %240 {strides = array<i32>} : memref<2x144x64xbf16, #tpu.memory_space<vmem>>, vector<1x16x64xbf16>,
    %241 = vector.extract_strided_slice %196 {offsets = [16, 128], sizes = [16, 64], strides = [1, 1]} : vector<32x576xbf16> to vector<16x64xbf16>
    %c1_139 = arith.constant 1 : index
    %c32_140 = arith.constant 32 : index
    %c0_141 = arith.constant 0 : index
    %242 = vector.load %arg19[%c1_139, %c32_140, %c0_141] : memref<2x144x64xbf16, #tpu.memory_space<vmem>>, vector<1x16x64xbf16>
    %243 = vector.shape_cast %242 : vector<1x16x64xbf16> to vector<16x64xbf16>
    %244 = vector.shape_cast %241 : vector<16x64xbf16> to vector<1x16x64xbf16>
    tpu.vector_store %arg19[%c1_139, %c32_140, %c0_141], %244 {strides = array<i32>} : memref<2x144x64xbf16, #tpu.memory_space<vmem>>, vector<1x16x64xbf16>,
    %245 = vector.extract_strided_slice %196 {offsets = [16, 192], sizes = [16, 64], strides = [1, 1]} : vector<32x576xbf16> to vector<16x64xbf16>
    %c1_142 = arith.constant 1 : index
    %c48_143 = arith.constant 48 : index
    %c0_144 = arith.constant 0 : index
    %246 = vector.load %arg19[%c1_142, %c48_143, %c0_144] : memref<2x144x64xbf16, #tpu.memory_space<vmem>>, vector<1x16x64xbf16>
    %247 = vector.shape_cast %246 : vector<1x16x64xbf16> to vector<16x64xbf16>
    %248 = vector.shape_cast %245 : vector<16x64xbf16> to vector<1x16x64xbf16>
    tpu.vector_store %arg19[%c1_142, %c48_143, %c0_144], %248 {strides = array<i32>} : memref<2x144x64xbf16, #tpu.memory_space<vmem>>, vector<1x16x64xbf16>,
    %249 = vector.extract_strided_slice %196 {offsets = [16, 256], sizes = [16, 64], strides = [1, 1]} : vector<32x576xbf16> to vector<16x64xbf16>
    %c1_145 = arith.constant 1 : index
    %c64_146 = arith.constant 64 : index
    %c0_147 = arith.constant 0 : index
    %250 = vector.load %arg19[%c1_145, %c64_146, %c0_147] : memref<2x144x64xbf16, #tpu.memory_space<vmem>>, vector<1x16x64xbf16>
    %251 = vector.shape_cast %250 : vector<1x16x64xbf16> to vector<16x64xbf16>
    %252 = vector.shape_cast %249 : vector<16x64xbf16> to vector<1x16x64xbf16>
    tpu.vector_store %arg19[%c1_145, %c64_146, %c0_147], %252 {strides = array<i32>} : memref<2x144x64xbf16, #tpu.memory_space<vmem>>, vector<1x16x64xbf16>,
    %253 = vector.extract_strided_slice %196 {offsets = [16, 320], sizes = [16, 64], strides = [1, 1]} : vector<32x576xbf16> to vector<16x64xbf16>
    %c1_148 = arith.constant 1 : index
    %c80_149 = arith.constant 80 : index
    %c0_150 = arith.constant 0 : index
    %254 = vector.load %arg19[%c1_148, %c80_149, %c0_150] : memref<2x144x64xbf16, #tpu.memory_space<vmem>>, vector<1x16x64xbf16>
    %255 = vector.shape_cast %254 : vector<1x16x64xbf16> to vector<16x64xbf16>
    %256 = vector.shape_cast %253 : vector<16x64xbf16> to vector<1x16x64xbf16>
    tpu.vector_store %arg19[%c1_148, %c80_149, %c0_150], %256 {strides = array<i32>} : memref<2x144x64xbf16, #tpu.memory_space<vmem>>, vector<1x16x64xbf16>,
    %257 = vector.extract_strided_slice %196 {offsets = [16, 384], sizes = [16, 64], strides = [1, 1]} : vector<32x576xbf16> to vector<16x64xbf16>
    %c1_151 = arith.constant 1 : index
    %c96_152 = arith.constant 96 : index
    %c0_153 = arith.constant 0 : index
    %258 = vector.load %arg19[%c1_151, %c96_152, %c0_153] : memref<2x144x64xbf16, #tpu.memory_space<vmem>>, vector<1x16x64xbf16>
    %259 = vector.shape_cast %258 : vector<1x16x64xbf16> to vector<16x64xbf16>
    %260 = vector.shape_cast %257 : vector<16x64xbf16> to vector<1x16x64xbf16>
    tpu.vector_store %arg19[%c1_151, %c96_152, %c0_153], %260 {strides = array<i32>} : memref<2x144x64xbf16, #tpu.memory_space<vmem>>, vector<1x16x64xbf16>,
    %261 = vector.extract_strided_slice %196 {offsets = [16, 448], sizes = [16, 64], strides = [1, 1]} : vector<32x576xbf16> to vector<16x64xbf16>
    %c1_154 = arith.constant 1 : index
    %c112_155 = arith.constant 112 : index
    %c0_156 = arith.constant 0 : index
    %262 = vector.load %arg19[%c1_154, %c112_155, %c0_156] : memref<2x144x64xbf16, #tpu.memory_space<vmem>>, vector<1x16x64xbf16>
    %263 = vector.shape_cast %262 : vector<1x16x64xbf16> to vector<16x64xbf16>
    %264 = vector.shape_cast %261 : vector<16x64xbf16> to vector<1x16x64xbf16>
    tpu.vector_store %arg19[%c1_154, %c112_155, %c0_156], %264 {strides = array<i32>} : memref<2x144x64xbf16, #tpu.memory_space<vmem>>, vector<1x16x64xbf16>,
    %265 = vector.extract_strided_slice %196 {offsets = [16, 512], sizes = [16, 64], strides = [1, 1]} : vector<32x576xbf16> to vector<16x64xbf16>
    %c1_157 = arith.constant 1 : index
    %c128_158 = arith.constant 128 : index
    %c0_159 = arith.constant 0 : index
    %266 = vector.load %arg19[%c1_157, %c128_158, %c0_159] : memref<2x144x64xbf16, #tpu.memory_space<vmem>>, vector<1x16x64xbf16>
    %267 = vector.shape_cast %266 : vector<1x16x64xbf16> to vector<16x64xbf16>
    %268 = vector.shape_cast %265 : vector<16x64xbf16> to vector<1x16x64xbf16>
    tpu.vector_store %arg19[%c1_157, %c128_158, %c0_159], %268 {strides = array<i32>} : memref<2x144x64xbf16, #tpu.memory_space<vmem>>, vector<1x16x64xbf16>,
    %c0_160 = arith.constant 0 : index
    %c0_161 = arith.constant 0 : index
    %c0_162 = arith.constant 0 : index
    %269 = vector.load %arg19[%c0_160, %c0_161, %c0_162] : memref<2x144x64xbf16, #tpu.memory_space<vmem>>, vector<1x144x64xbf16>
    %270 = vector.shape_cast %269 : vector<1x144x64xbf16> to vector<144x64xbf16>
    %cst_163 = arith.constant dense<0.000000e+00> : vector<64x64xf32>
    %271 = tpu.matmul %193, %270, %cst_163 {dimension_numbers = #tpu.dot_dimension_numbers<[1], [0], [0], [1], [0, 0, 1, 1], [], []>} : vector<64x144xbf16>, vector<144x64xbf16>, vector<64x64xf32> -> vector<64x64xf32>
    %c1_164 = arith.constant 1 : index
    %c0_165 = arith.constant 0 : index
    %c0_166 = arith.constant 0 : index
    %272 = vector.load %arg19[%c1_164, %c0_165, %c0_166] : memref<2x144x64xbf16, #tpu.memory_space<vmem>>, vector<1x144x64xbf16>
    %273 = vector.shape_cast %272 : vector<1x144x64xbf16> to vector<144x64xbf16>
    %cst_167 = arith.constant dense<0.000000e+00> : vector<64x64xf32>
    %274 = tpu.matmul %193, %273, %cst_167 {dimension_numbers = #tpu.dot_dimension_numbers<[1], [0], [0], [1], [0, 0, 1, 1], [], []>} : vector<64x144xbf16>, vector<144x64xbf16>, vector<64x64xf32> -> vector<64x64xf32>
    %275 = tpu.concatenate %271, %274 in 0 : vector<64x64xf32>, vector<64x64xf32> -> vector<128x64xf32>
    %cst_168 = arith.constant dense<0.000000e+00> : vector<64xf32>
    %276 = vector.multi_reduction <add>, %275, %cst_168 [0] : vector<128x64xf32> to vector<64xf32>
    %277 = vector.shape_cast %276 : vector<64xf32> to vector<1x64xf32>
    %278 = arith.mulf %275, %275 : vector<128x64xf32>
    %cst_169 = arith.constant dense<0.000000e+00> : vector<64xf32>
    %279 = vector.multi_reduction <add>, %278, %cst_169 [0] : vector<128x64xf32> to vector<64xf32>
    %280 = vector.shape_cast %279 : vector<64xf32> to vector<1x64xf32>
    %cst_170 = arith.constant 7.812500e-03 : f32
    %281 = vector.broadcast %cst_170 : f32 to vector<1x64xf32>
    %282 = arith.mulf %277, %281 : vector<1x64xf32>
    %cst_171 = arith.constant 7.812500e-03 : f32
    %283 = vector.broadcast %cst_171 : f32 to vector<1x64xf32>
    %284 = arith.mulf %280, %283 : vector<1x64xf32>
    %285 = arith.mulf %282, %282 : vector<1x64xf32>
    %286 = arith.subf %284, %285 : vector<1x64xf32>
    %c0_172 = arith.constant 0 : index
    %c0_173 = arith.constant 0 : index
    %287 = vector.load %arg8[%c0_172, %c0_173] : memref<1x64xf32, #tpu.memory_space<vmem>>, vector<1x64xf32>
    %cst_174 = arith.constant 9.99999974E-6 : f32
    %288 = vector.broadcast %cst_174 : f32 to vector<1x64xf32>
    %289 = arith.addf %286, %288 : vector<1x64xf32>
    %290 = math.rsqrt %289 : vector<1x64xf32>
    %291 = arith.mulf %287, %290 : vector<1x64xf32>
    %c0_175 = arith.constant 0 : index
    %c0_176 = arith.constant 0 : index
    %292 = vector.load %arg9[%c0_175, %c0_176] : memref<1x64xf32, #tpu.memory_space<vmem>>, vector<1x64xf32>
    %293 = arith.mulf %282, %291 : vector<1x64xf32>
    %294 = arith.subf %292, %293 : vector<1x64xf32>
    %295 = vector.broadcast %291 : vector<1x64xf32> to vector<128x64xf32>
    %296 = arith.mulf %275, %295 : vector<128x64xf32>
    %297 = vector.broadcast %294 : vector<1x64xf32> to vector<128x64xf32>
    %298 = arith.addf %296, %297 : vector<128x64xf32>
    %cst_177 = arith.constant 0.000000e+00 : f32
    %299 = vector.broadcast %cst_177 : f32 to vector<128x64xf32>
    %300 = arith.cmpf ogt, %298, %299 : vector<128x64xf32>
    %cst_178 = arith.constant 2.000000e-01 : f32
    %301 = vector.broadcast %cst_178 : f32 to vector<128x64xf32>
    %302 = arith.mulf %301, %298 : vector<128x64xf32>
    %303 = arith.select %300, %298, %302 : vector<128x64xi1>, vector<128x64xf32>
    %c4_i32_179 = arith.constant 4 : i32
    %304 = tpu.memref_slice %arg27[%c4_i32_179] : memref<6x!tpu.dma_semaphore, #tpu.memory_space<semaphore_mem>> -> memref<1x!tpu.dma_semaphore, #tpu.memory_space<semaphore_mem>>
    %305 = tpu.memref_squeeze %304 : memref<1x!tpu.dma_semaphore, #tpu.memory_space<semaphore_mem>> -> memref<!tpu.dma_semaphore, #tpu.memory_space<semaphore_mem>>
    tpu.wait_dma2 semaphore(%305 : memref<!tpu.dma_semaphore, #tpu.memory_space<semaphore_mem>>) src(%arg14 : memref<64x1152xbf16, #tpu.memory_space<any>>) dst(%arg25 : memref<64x1152xbf16, #tpu.memory_space<vmem>>)
    %c5_i32_180 = arith.constant 5 : i32
    %306 = tpu.memref_slice %arg27[%c5_i32_180] : memref<6x!tpu.dma_semaphore, #tpu.memory_space<semaphore_mem>> -> memref<1x!tpu.dma_semaphore, #tpu.memory_space<semaphore_mem>>
    %307 = tpu.memref_squeeze %306 : memref<1x!tpu.dma_semaphore, #tpu.memory_space<semaphore_mem>> -> memref<!tpu.dma_semaphore, #tpu.memory_space<semaphore_mem>>
    tpu.wait_dma2 semaphore(%307 : memref<!tpu.dma_semaphore, #tpu.memory_space<semaphore_mem>>) src(%arg15 : memref<64x576xbf16, #tpu.memory_space<any>>) dst(%arg26 : memref<64x576xbf16, #tpu.memory_space<vmem>>)
    %c0_181 = arith.constant 0 : index
    %c0_182 = arith.constant 0 : index
    %308 = vector.load %arg25[%c0_181, %c0_182] : memref<64x1152xbf16, #tpu.memory_space<vmem>>, vector<64x1152xbf16>
    %c0_183 = arith.constant 0 : index
    %c0_184 = arith.constant 0 : index
    %309 = vector.load %arg26[%c0_183, %c0_184] : memref<64x576xbf16, #tpu.memory_space<vmem>>, vector<64x576xbf16>
    %310 = arith.truncf %303 : vector<128x64xf32> to vector<128x64xbf16>
    %cst_185 = arith.constant dense<0.000000e+00> : vector<128x1152xf32>
    %311 = tpu.matmul %310, %308, %cst_185 {dimension_numbers = #tpu.dot_dimension_numbers<[1], [0], [0], [1], [0, 0, 1, 1], [], []>} : vector<128x64xbf16>, vector<64x1152xbf16>, vector<128x1152xf32> -> vector<128x1152xf32>
    %312 = arith.truncf %311 : vector<128x1152xf32> to vector<128x1152xbf16>
    %313 = vector.extract_strided_slice %312 {offsets = [0, 0], sizes = [64, 128], strides = [1, 1]} : vector<128x1152xbf16> to vector<64x128xbf16>
    %c0_186 = arith.constant 0 : index
    %c0_187 = arith.constant 0 : index
    %c0_188 = arith.constant 0 : index
    %314 = vector.load %arg20[%c0_186, %c0_187, %c0_188] : memref<2x576x128xbf16, #tpu.memory_space<vmem>>, vector<1x64x128xbf16>
    %315 = vector.shape_cast %314 : vector<1x64x128xbf16> to vector<64x128xbf16>
    %316 = vector.shape_cast %313 : vector<64x128xbf16> to vector<1x64x128xbf16>
    tpu.vector_store %arg20[%c0_186, %c0_187, %c0_188], %316 {strides = array<i32>} : memref<2x576x128xbf16, #tpu.memory_space<vmem>>, vector<1x64x128xbf16>,
    %317 = vector.extract_strided_slice %312 {offsets = [0, 128], sizes = [64, 128], strides = [1, 1]} : vector<128x1152xbf16> to vector<64x128xbf16>
    %c0_189 = arith.constant 0 : index
    %c64_190 = arith.constant 64 : index
    %c0_191 = arith.constant 0 : index
    %318 = vector.load %arg20[%c0_189, %c64_190, %c0_191] : memref<2x576x128xbf16, #tpu.memory_space<vmem>>, vector<1x64x128xbf16>
    %319 = vector.shape_cast %318 : vector<1x64x128xbf16> to vector<64x128xbf16>
    %320 = vector.shape_cast %317 : vector<64x128xbf16> to vector<1x64x128xbf16>
    tpu.vector_store %arg20[%c0_189, %c64_190, %c0_191], %320 {strides = array<i32>} : memref<2x576x128xbf16, #tpu.memory_space<vmem>>, vector<1x64x128xbf16>,
    %321 = vector.extract_strided_slice %312 {offsets = [0, 256], sizes = [64, 128], strides = [1, 1]} : vector<128x1152xbf16> to vector<64x128xbf16>
    %c0_192 = arith.constant 0 : index
    %c128_193 = arith.constant 128 : index
    %c0_194 = arith.constant 0 : index
    %322 = vector.load %arg20[%c0_192, %c128_193, %c0_194] : memref<2x576x128xbf16, #tpu.memory_space<vmem>>, vector<1x64x128xbf16>
    %323 = vector.shape_cast %322 : vector<1x64x128xbf16> to vector<64x128xbf16>
    %324 = vector.shape_cast %321 : vector<64x128xbf16> to vector<1x64x128xbf16>
    tpu.vector_store %arg20[%c0_192, %c128_193, %c0_194], %324 {strides = array<i32>} : memref<2x576x128xbf16, #tpu.memory_space<vmem>>, vector<1x64x128xbf16>,
    %325 = vector.extract_strided_slice %312 {offsets = [0, 384], sizes = [64, 128], strides = [1, 1]} : vector<128x1152xbf16> to vector<64x128xbf16>
    %c0_195 = arith.constant 0 : index
    %c192 = arith.constant 192 : index
    %c0_196 = arith.constant 0 : index
    %326 = vector.load %arg20[%c0_195, %c192, %c0_196] : memref<2x576x128xbf16, #tpu.memory_space<vmem>>, vector<1x64x128xbf16>
    %327 = vector.shape_cast %326 : vector<1x64x128xbf16> to vector<64x128xbf16>
    %328 = vector.shape_cast %325 : vector<64x128xbf16> to vector<1x64x128xbf16>
    tpu.vector_store %arg20[%c0_195, %c192, %c0_196], %328 {strides = array<i32>} : memref<2x576x128xbf16, #tpu.memory_space<vmem>>, vector<1x64x128xbf16>,
    %329 = vector.extract_strided_slice %312 {offsets = [0, 512], sizes = [64, 128], strides = [1, 1]} : vector<128x1152xbf16> to vector<64x128xbf16>
    %c0_197 = arith.constant 0 : index
    %c256 = arith.constant 256 : index
    %c0_198 = arith.constant 0 : index
    %330 = vector.load %arg20[%c0_197, %c256, %c0_198] : memref<2x576x128xbf16, #tpu.memory_space<vmem>>, vector<1x64x128xbf16>
    %331 = vector.shape_cast %330 : vector<1x64x128xbf16> to vector<64x128xbf16>
    %332 = vector.shape_cast %329 : vector<64x128xbf16> to vector<1x64x128xbf16>
    tpu.vector_store %arg20[%c0_197, %c256, %c0_198], %332 {strides = array<i32>} : memref<2x576x128xbf16, #tpu.memory_space<vmem>>, vector<1x64x128xbf16>,
    %333 = vector.extract_strided_slice %312 {offsets = [0, 640], sizes = [64, 128], strides = [1, 1]} : vector<128x1152xbf16> to vector<64x128xbf16>
    %c0_199 = arith.constant 0 : index
    %c320 = arith.constant 320 : index
    %c0_200 = arith.constant 0 : index
    %334 = vector.load %arg20[%c0_199, %c320, %c0_200] : memref<2x576x128xbf16, #tpu.memory_space<vmem>>, vector<1x64x128xbf16>
    %335 = vector.shape_cast %334 : vector<1x64x128xbf16> to vector<64x128xbf16>
    %336 = vector.shape_cast %333 : vector<64x128xbf16> to vector<1x64x128xbf16>
    tpu.vector_store %arg20[%c0_199, %c320, %c0_200], %336 {strides = array<i32>} : memref<2x576x128xbf16, #tpu.memory_space<vmem>>, vector<1x64x128xbf16>,
    %337 = vector.extract_strided_slice %312 {offsets = [0, 768], sizes = [64, 128], strides = [1, 1]} : vector<128x1152xbf16> to vector<64x128xbf16>
    %c0_201 = arith.constant 0 : index
    %c384 = arith.constant 384 : index
    %c0_202 = arith.constant 0 : index
    %338 = vector.load %arg20[%c0_201, %c384, %c0_202] : memref<2x576x128xbf16, #tpu.memory_space<vmem>>, vector<1x64x128xbf16>
    %339 = vector.shape_cast %338 : vector<1x64x128xbf16> to vector<64x128xbf16>
    %340 = vector.shape_cast %337 : vector<64x128xbf16> to vector<1x64x128xbf16>
    tpu.vector_store %arg20[%c0_201, %c384, %c0_202], %340 {strides = array<i32>} : memref<2x576x128xbf16, #tpu.memory_space<vmem>>, vector<1x64x128xbf16>,
    %341 = vector.extract_strided_slice %312 {offsets = [0, 896], sizes = [64, 128], strides = [1, 1]} : vector<128x1152xbf16> to vector<64x128xbf16>
    %c0_203 = arith.constant 0 : index
    %c448 = arith.constant 448 : index
    %c0_204 = arith.constant 0 : index
    %342 = vector.load %arg20[%c0_203, %c448, %c0_204] : memref<2x576x128xbf16, #tpu.memory_space<vmem>>, vector<1x64x128xbf16>
    %343 = vector.shape_cast %342 : vector<1x64x128xbf16> to vector<64x128xbf16>
    %344 = vector.shape_cast %341 : vector<64x128xbf16> to vector<1x64x128xbf16>
    tpu.vector_store %arg20[%c0_203, %c448, %c0_204], %344 {strides = array<i32>} : memref<2x576x128xbf16, #tpu.memory_space<vmem>>, vector<1x64x128xbf16>,
    %345 = vector.extract_strided_slice %312 {offsets = [0, 1024], sizes = [64, 128], strides = [1, 1]} : vector<128x1152xbf16> to vector<64x128xbf16>
    %c0_205 = arith.constant 0 : index
    %c512 = arith.constant 512 : index
    %c0_206 = arith.constant 0 : index
    %346 = vector.load %arg20[%c0_205, %c512, %c0_206] : memref<2x576x128xbf16, #tpu.memory_space<vmem>>, vector<1x64x128xbf16>
    %347 = vector.shape_cast %346 : vector<1x64x128xbf16> to vector<64x128xbf16>
    %348 = vector.shape_cast %345 : vector<64x128xbf16> to vector<1x64x128xbf16>
    tpu.vector_store %arg20[%c0_205, %c512, %c0_206], %348 {strides = array<i32>} : memref<2x576x128xbf16, #tpu.memory_space<vmem>>, vector<1x64x128xbf16>,
    %349 = vector.extract_strided_slice %312 {offsets = [64, 0], sizes = [64, 128], strides = [1, 1]} : vector<128x1152xbf16> to vector<64x128xbf16>
    %c1_207 = arith.constant 1 : index
    %c0_208 = arith.constant 0 : index
    %c0_209 = arith.constant 0 : index
    %350 = vector.load %arg20[%c1_207, %c0_208, %c0_209] : memref<2x576x128xbf16, #tpu.memory_space<vmem>>, vector<1x64x128xbf16>
    %351 = vector.shape_cast %350 : vector<1x64x128xbf16> to vector<64x128xbf16>
    %352 = vector.shape_cast %349 : vector<64x128xbf16> to vector<1x64x128xbf16>
    tpu.vector_store %arg20[%c1_207, %c0_208, %c0_209], %352 {strides = array<i32>} : memref<2x576x128xbf16, #tpu.memory_space<vmem>>, vector<1x64x128xbf16>,
    %353 = vector.extract_strided_slice %312 {offsets = [64, 128], sizes = [64, 128], strides = [1, 1]} : vector<128x1152xbf16> to vector<64x128xbf16>
    %c1_210 = arith.constant 1 : index
    %c64_211 = arith.constant 64 : index
    %c0_212 = arith.constant 0 : index
    %354 = vector.load %arg20[%c1_210, %c64_211, %c0_212] : memref<2x576x128xbf16, #tpu.memory_space<vmem>>, vector<1x64x128xbf16>
    %355 = vector.shape_cast %354 : vector<1x64x128xbf16> to vector<64x128xbf16>
    %356 = vector.shape_cast %353 : vector<64x128xbf16> to vector<1x64x128xbf16>
    tpu.vector_store %arg20[%c1_210, %c64_211, %c0_212], %356 {strides = array<i32>} : memref<2x576x128xbf16, #tpu.memory_space<vmem>>, vector<1x64x128xbf16>,
    %357 = vector.extract_strided_slice %312 {offsets = [64, 256], sizes = [64, 128], strides = [1, 1]} : vector<128x1152xbf16> to vector<64x128xbf16>
    %c1_213 = arith.constant 1 : index
    %c128_214 = arith.constant 128 : index
    %c0_215 = arith.constant 0 : index
    %358 = vector.load %arg20[%c1_213, %c128_214, %c0_215] : memref<2x576x128xbf16, #tpu.memory_space<vmem>>, vector<1x64x128xbf16>
    %359 = vector.shape_cast %358 : vector<1x64x128xbf16> to vector<64x128xbf16>
    %360 = vector.shape_cast %357 : vector<64x128xbf16> to vector<1x64x128xbf16>
    tpu.vector_store %arg20[%c1_213, %c128_214, %c0_215], %360 {strides = array<i32>} : memref<2x576x128xbf16, #tpu.memory_space<vmem>>, vector<1x64x128xbf16>,
    %361 = vector.extract_strided_slice %312 {offsets = [64, 384], sizes = [64, 128], strides = [1, 1]} : vector<128x1152xbf16> to vector<64x128xbf16>
    %c1_216 = arith.constant 1 : index
    %c192_217 = arith.constant 192 : index
    %c0_218 = arith.constant 0 : index
    %362 = vector.load %arg20[%c1_216, %c192_217, %c0_218] : memref<2x576x128xbf16, #tpu.memory_space<vmem>>, vector<1x64x128xbf16>
    %363 = vector.shape_cast %362 : vector<1x64x128xbf16> to vector<64x128xbf16>
    %364 = vector.shape_cast %361 : vector<64x128xbf16> to vector<1x64x128xbf16>
    tpu.vector_store %arg20[%c1_216, %c192_217, %c0_218], %364 {strides = array<i32>} : memref<2x576x128xbf16, #tpu.memory_space<vmem>>, vector<1x64x128xbf16>,
    %365 = vector.extract_strided_slice %312 {offsets = [64, 512], sizes = [64, 128], strides = [1, 1]} : vector<128x1152xbf16> to vector<64x128xbf16>
    %c1_219 = arith.constant 1 : index
    %c256_220 = arith.constant 256 : index
    %c0_221 = arith.constant 0 : index
    %366 = vector.load %arg20[%c1_219, %c256_220, %c0_221] : memref<2x576x128xbf16, #tpu.memory_space<vmem>>, vector<1x64x128xbf16>
    %367 = vector.shape_cast %366 : vector<1x64x128xbf16> to vector<64x128xbf16>
    %368 = vector.shape_cast %365 : vector<64x128xbf16> to vector<1x64x128xbf16>
    tpu.vector_store %arg20[%c1_219, %c256_220, %c0_221], %368 {strides = array<i32>} : memref<2x576x128xbf16, #tpu.memory_space<vmem>>, vector<1x64x128xbf16>,
    %369 = vector.extract_strided_slice %312 {offsets = [64, 640], sizes = [64, 128], strides = [1, 1]} : vector<128x1152xbf16> to vector<64x128xbf16>
    %c1_222 = arith.constant 1 : index
    %c320_223 = arith.constant 320 : index
    %c0_224 = arith.constant 0 : index
    %370 = vector.load %arg20[%c1_222, %c320_223, %c0_224] : memref<2x576x128xbf16, #tpu.memory_space<vmem>>, vector<1x64x128xbf16>
    %371 = vector.shape_cast %370 : vector<1x64x128xbf16> to vector<64x128xbf16>
    %372 = vector.shape_cast %369 : vector<64x128xbf16> to vector<1x64x128xbf16>
    tpu.vector_store %arg20[%c1_222, %c320_223, %c0_224], %372 {strides = array<i32>} : memref<2x576x128xbf16, #tpu.memory_space<vmem>>, vector<1x64x128xbf16>,
    %373 = vector.extract_strided_slice %312 {offsets = [64, 768], sizes = [64, 128], strides = [1, 1]} : vector<128x1152xbf16> to vector<64x128xbf16>
    %c1_225 = arith.constant 1 : index
    %c384_226 = arith.constant 384 : index
    %c0_227 = arith.constant 0 : index
    %374 = vector.load %arg20[%c1_225, %c384_226, %c0_227] : memref<2x576x128xbf16, #tpu.memory_space<vmem>>, vector<1x64x128xbf16>
    %375 = vector.shape_cast %374 : vector<1x64x128xbf16> to vector<64x128xbf16>
    %376 = vector.shape_cast %373 : vector<64x128xbf16> to vector<1x64x128xbf16>
    tpu.vector_store %arg20[%c1_225, %c384_226, %c0_227], %376 {strides = array<i32>} : memref<2x576x128xbf16, #tpu.memory_space<vmem>>, vector<1x64x128xbf16>,
    %377 = vector.extract_strided_slice %312 {offsets = [64, 896], sizes = [64, 128], strides = [1, 1]} : vector<128x1152xbf16> to vector<64x128xbf16>
    %c1_228 = arith.constant 1 : index
    %c448_229 = arith.constant 448 : index
    %c0_230 = arith.constant 0 : index
    %378 = vector.load %arg20[%c1_228, %c448_229, %c0_230] : memref<2x576x128xbf16, #tpu.memory_space<vmem>>, vector<1x64x128xbf16>
    %379 = vector.shape_cast %378 : vector<1x64x128xbf16> to vector<64x128xbf16>
    %380 = vector.shape_cast %377 : vector<64x128xbf16> to vector<1x64x128xbf16>
    tpu.vector_store %arg20[%c1_228, %c448_229, %c0_230], %380 {strides = array<i32>} : memref<2x576x128xbf16, #tpu.memory_space<vmem>>, vector<1x64x128xbf16>,
    %381 = vector.extract_strided_slice %312 {offsets = [64, 1024], sizes = [64, 128], strides = [1, 1]} : vector<128x1152xbf16> to vector<64x128xbf16>
    %c1_231 = arith.constant 1 : index
    %c512_232 = arith.constant 512 : index
    %c0_233 = arith.constant 0 : index
    %382 = vector.load %arg20[%c1_231, %c512_232, %c0_233] : memref<2x576x128xbf16, #tpu.memory_space<vmem>>, vector<1x64x128xbf16>
    %383 = vector.shape_cast %382 : vector<1x64x128xbf16> to vector<64x128xbf16>
    %384 = vector.shape_cast %381 : vector<64x128xbf16> to vector<1x64x128xbf16>
    tpu.vector_store %arg20[%c1_231, %c512_232, %c0_233], %384 {strides = array<i32>} : memref<2x576x128xbf16, #tpu.memory_space<vmem>>, vector<1x64x128xbf16>,
    %c0_234 = arith.constant 0 : index
    %c0_235 = arith.constant 0 : index
    %c0_236 = arith.constant 0 : index
    %385 = vector.load %arg20[%c0_234, %c0_235, %c0_236] : memref<2x576x128xbf16, #tpu.memory_space<vmem>>, vector<1x576x128xbf16>
    %386 = vector.shape_cast %385 : vector<1x576x128xbf16> to vector<576x128xbf16>
    %cst_237 = arith.constant dense<0.000000e+00> : vector<64x128xf32>
    %387 = tpu.matmul %309, %386, %cst_237 {dimension_numbers = #tpu.dot_dimension_numbers<[1], [0], [0], [1], [0, 0, 1, 1], [], []>} : vector<64x576xbf16>, vector<576x128xbf16>, vector<64x128xf32> -> vector<64x128xf32>
    %c1_238 = arith.constant 1 : index
    %c0_239 = arith.constant 0 : index
    %c0_240 = arith.constant 0 : index
    %388 = vector.load %arg20[%c1_238, %c0_239, %c0_240] : memref<2x576x128xbf16, #tpu.memory_space<vmem>>, vector<1x576x128xbf16>
    %389 = vector.shape_cast %388 : vector<1x576x128xbf16> to vector<576x128xbf16>
    %cst_241 = arith.constant dense<0.000000e+00> : vector<64x128xf32>
    %390 = tpu.matmul %309, %389, %cst_241 {dimension_numbers = #tpu.dot_dimension_numbers<[1], [0], [0], [1], [0, 0, 1, 1], [], []>} : vector<64x576xbf16>, vector<576x128xbf16>, vector<64x128xf32> -> vector<64x128xf32>
    %391 = tpu.concatenate %387, %390 in 0 : vector<64x128xf32>, vector<64x128xf32> -> vector<128x128xf32>
    %392 = math.tanh %391 : vector<128x128xf32>
    %c0_242 = arith.constant 0 : index
    %c0_243 = arith.constant 0 : index
    %393 = vector.load %arg16[%c0_242, %c0_243] : memref<128x128xf32, #tpu.memory_space<vmem>>, vector<128x128xf32>
    tpu.vector_store %arg16[%c0_242, %c0_243], %392 {strides = array<i32>} : memref<128x128xf32, #tpu.memory_space<vmem>>, vector<128x128xf32>,
    return
  }
}

</mosaic_0001>

<bundles_post_ra>
// kernel: decoder_forward.1
= control target key start
LH: loop header
LB: loop body
LE: loop exit
PB: predicated region body
PF: predicated region fallthrough
CT: control target
= control target key end

     0   :  { %s8602_s0 = inlined_call_operand.vmem [shape: f32[2,32], index: 0, kind: input, shape index: {}]   ;;  %s8603_s1 = inlined_call_operand.vmem [shape: bf16[32,512], index: 1, kind: input, shape index: {}]   ;;  %s8604_s2 = inlined_call_operand.vmem [shape: f32[1,512], index: 2, kind: input, shape index: {}]   ;;  %s8605_s3 = inlined_call_operand.hbm [shape: bf16[512,1024], index: 3, kind: input, shape index: {}]   ;;  %s8606_s4 = inlined_call_operand.vmem [shape: f32[1,256], index: 4, kind: input, shape index: {}]   ;;  %s8607_s5 = inlined_call_operand.vmem [shape: f32[1,256], index: 5, kind: input, shape index: {}]   ;;  %s8608_s6 = inlined_call_operand.vmem [shape: f32[1,128], index: 6, kind: input, shape index: {}]   ;;  %s8609_s7 = inlined_call_operand.vmem [shape: f32[1,128], index: 7, kind: input, shape index: {}]   ;;  %s8610_s8 = inlined_call_operand.vmem [shape: f32[1,64], index: 8, kind: input, shape index: {}]   ;;  %s8611_s9 = inlined_call_operand.vmem [shape: f32[1,64], index: 9, kind: input, shape index: {}]   ;;  %s8612_s10 = inlined_call_operand.hbm [shape: bf16[256,1152], index: 10, kind: input, shape index: {}]   ;;  %s8613_s11 = inlined_call_operand.vmem [shape: bf16[16,36], index: 11, kind: input, shape index: {}]   ;;  %s8614_s12 = inlined_call_operand.vmem [shape: bf16[128,576], index: 12, kind: input, shape index: {}]   ;;  %s8615_s13 = inlined_call_operand.vmem [shape: bf16[64,144], index: 13, kind: input, shape index: {}]   ;;  %s8616_s14 = inlined_call_operand.vmem [shape: bf16[64,1152], index: 14, kind: input, shape index: {}]   ;;  %s8617_s15 = inlined_call_operand.vmem [shape: bf16[64,576], index: 15, kind: input, shape index: {}]   ;;  %s8618_s16 = inlined_call_operand.vmem [shape: f32[128,128], index: 16, kind: output, shape index: {}]  }
   0x1   :  { %8628 = sst [smem:[#allocation37_spill]] %s8602_s0 }
   0x2   :  { %21 = vsyncpa [#allocation14], 0  ;;  %s6929_s21 = smov [#allocation13]   ;;  %s6893_s25 = scalar_lea.hbm %s8605_s3, 32768 }
   0x3   :  { %s33_s22 = sshll.u32 %s6929_s21, 4  ;;  %p6894_p0 = scmp.ne.s32.totalorder %s8605_s3, %s6893_s25  ;;  %s34_s22 = int_to_ptr.vmem [resolvable:$true] %s33_s22 }
   0x4   :  { %p6897_p1 = scmp.lt.u32.totalorder %s6893_s25, %s8605_s3 }
   0x6   :  { %p6899_p2 = pnand %p6897_p1, %p6894_p0 }
   0x8   :  { %6902 = shalt.err (!%p6899_p2)
}
   0x9   :  { %s6903_s30 = scalar_lea.vmem %s34_s22, 32768  ;;  %p6908_p4 = scmp.lt.s32.totalorder %s34_s22, %s34_s22 }
   0xa   :  { %p6904_p3 = scmp.ne.s32.totalorder %s34_s22, %s6903_s30  ;;  %p6909_p5 = scmp.lt.s32.totalorder %s6903_s30, %s6903_s30 }
   0xc   :  { %p6910_p6 = por %p6909_p5, %p6908_p4 }
   0xe   :  { %p6911_p7 = pnand %p6910_p6, %p6904_p3 }
  0x10   :  { %6914 = shalt.err (!%p6911_p7)
}
  0x11   :  { %s6930_s0 = smov 512   ;;  %s6931_s17 = smov 32  }
  0x12   :  { %39 = dma.hbm_to_vmem [thread:$0]  %s8605_s3, 32768, %s34_s22, [#allocation14], %s6930_s0, %s6930_s0, %s6931_s17  }
  0x13   :  { %6915 = dma.done.wait [#allocation14], 32768  }
  0x14   :  { %6916 = vsyncadd [#allocation14], 4294934528  ;;  %s60_s20 = sld [smem:[#allocation0]]   ;;  %s6932_s21 = smov 1152  }
  0x15   :  { %72 = sst [smem:[#allocation16]] %s6932_s21  ;;  %s6933_s23 = smov 9  }
  0x16   :  { %74 = sst [smem:[#allocation16 + $0x1]] %s6932_s21  ;;  %s6934_s24 = smov 64  }
  0x17   :  { %76 = sst [smem:[#allocation16 + $0x2]] %s6933_s23  ;;  %s6935_s25 = smov 128  }
  0x18   :  { %78 = sst [smem:[#allocation16 + $0x3]] %s6934_s24  ;;  %s6936_s26 = smov 2  }
  0x19   :  { %80 = sst [smem:[#allocation16 + $0x4]] %s6935_s25  ;;  %s6937_s28 = smov 576  }
  0x1a   :  { %82 = sst [smem:[#allocation16 + $0x5]] %s6936_s26  ;;  %s6117_s27 = sshll.u32 %s60_s20, 26 }
  0x1b   :  { %84 = sst [smem:[#allocation16 + $0x6]] %s6937_s28  ;;  %s6118_s29 = sadd.s32 134217728, %s6117_s27 }
  0x1c   :  { %86 = sst [smem:[#allocation16 + $0x7]] %s6934_s24  ;;  %s6938_s3 = smov 4  }
  0x1d   :  { %88 = sst [smem:[#allocation16 + $0x8]] %s6938_s3  ;;  %s6939_s22 = smov [#allocation6]  }
  0x1e   :  { %s68_s30 = sshll.u32 %s6939_s22, 4  ;;  %s6940_s0 = smov [#allocation12]   ;;  %s69_s30 = int_to_ptr.vmem [resolvable:$true] %s68_s30 }
  0x1f   :  { %s6941_s17 = smov [#allocation15]  }
  0x20   :  { %90 = dma.general %s8612_s10, 18432, %s69_s30, %s6940_s0, %s6941_s17, [#allocation16], %s6118_s29, 0  }
  0x21   :  { %v7051_v0 = vld [vmem:[%s8613_s11] sm:$0xff] }
  0x22   :  { %133 = vsyncadd [#allocation12 + $0x1], 128  ;;  %v152_v1 = vld [vmem:[%s8614_s12] sm:$0xf]  ;;  %v154_v2 = vld [vmem:[%s8614_s12 + $0x14] sm:$0xf] }
  0x23   :  { %153 = vst [vmem:[#allocation8] sm:$0xf] %v152_v1  ;;  %155 = vst [vmem:[#allocation8 + $0x4] sm:$0xf] %v154_v2  ;;  %v156_v3 = vld [vmem:[%s8614_s12 + $0x4] sm:$0xf] }
  0x24   :  { %v158_v4 = vld [vmem:[%s8614_s12 + $0x18] sm:$0xf]  ;;  %v160_v5 = vld [vmem:[%s8614_s12 + $0x8] sm:$0xf]  ;;  %157 = vst [vmem:[#allocation8 + $0x8] sm:$0xf] %v156_v3 }
  0x25   :  { %159 = vst [vmem:[#allocation8 + $0xc] sm:$0xf] %v158_v4  ;;  %161 = vst [vmem:[#allocation8 + $0x10] sm:$0xf] %v160_v5  ;;  %v162_v6 = vld [vmem:[%s8614_s12 + $0x1c] sm:$0xf] }
  0x26   :  { %v164_v7 = vld [vmem:[%s8614_s12 + $0xc] sm:$0xf]  ;;  %v166_v8 = vld [vmem:[%s8614_s12 + $0x20] sm:$0xf]  ;;  %163 = vst [vmem:[#allocation8 + $0x14] sm:$0xf] %v162_v6 }
  0x27   :  { %165 = vst [vmem:[#allocation8 + $0x18] sm:$0xf] %v164_v7  ;;  %167 = vst [vmem:[#allocation8 + $0x1c] sm:$0xf] %v166_v8  ;;  %v168_v9 = vld [vmem:[%s8614_s12 + $0x10] sm:$0xf] }
  0x28   :  { %v170_v10 = vld [vmem:[%s8614_s12 + $0x24] sm:$0xff]   ;;  %v174_v11 = vld [vmem:[%s8614_s12 + $0x3c] sm:$0xf]  ;;  %169 = vst [vmem:[#allocation8 + $0x20] sm:$0xf] %v168_v9  ;;  %v190_v19 = vld [vmem:[%s8614_s12 + $0x4c] sm:$0xff]  }
  0x29   :  { %171 = vst [vmem:[#allocation8 + $0x24] sm:$0xff] %v170_v10   ;;  %175 = vst [vmem:[#allocation8 + $0x2c] sm:$0xf] %v174_v11  ;;  %v176_v12 = vld [vmem:[%s8614_s12 + $0x2c] sm:$0xf]  ;;  %v210_v28 = vld [vmem:[%s8614_s12 + $0x74] sm:$0xff]  }
  0x2a   :  { %v178_v13 = vld [vmem:[%s8614_s12 + $0x40] sm:$0xf]  ;;  %v180_v14 = vld [vmem:[%s8614_s12 + $0x30] sm:$0xf]  ;;  %177 = vst [vmem:[#allocation8 + $0x30] sm:$0xf] %v176_v12 }
  0x2b   :  { %179 = vst [vmem:[#allocation8 + $0x34] sm:$0xf] %v178_v13  ;;  %181 = vst [vmem:[#allocation8 + $0x38] sm:$0xf] %v180_v14  ;;  %v182_v15 = vld [vmem:[%s8614_s12 + $0x44] sm:$0xf] }
  0x2c   :  { %v184_v16 = vld [vmem:[%s8614_s12 + $0x34] sm:$0xf]  ;;  %v186_v17 = vld [vmem:[%s8614_s12 + $0x48] sm:$0xf]  ;;  %183 = vst [vmem:[#allocation8 + $0x3c] sm:$0xf] %v182_v15 }
  0x2d   :  { %185 = vst [vmem:[#allocation8 + $0x40] sm:$0xf] %v184_v16  ;;  %187 = vst [vmem:[#allocation8 + $0x44] sm:$0xf] %v186_v17  ;;  %v188_v18 = vld [vmem:[%s8614_s12 + $0x38] sm:$0xf] }
  0x2e   :  { %v194_v20 = vld [vmem:[%s8614_s12 + $0x64] sm:$0xf]  ;;  %189 = vst [vmem:[#allocation8 + $0x48] sm:$0xf] %v188_v18  ;;  %191 = vst [vmem:[#allocation8 + $0x4c] sm:$0xff] %v190_v19   ;;  %v230_v37 = vld [vmem:[%s8614_s12 + $0x9c] sm:$0xff]  }
  0x2f   :  { %195 = vst [vmem:[#allocation8 + $0x54] sm:$0xf] %v194_v20  ;;  %v196_v21 = vld [vmem:[%s8614_s12 + $0x54] sm:$0xf]  ;;  %v198_v22 = vld [vmem:[%s8614_s12 + $0x68] sm:$0xf] }
  0x30   :  { %v200_v23 = vld [vmem:[%s8614_s12 + $0x58] sm:$0xf]  ;;  %197 = vst [vmem:[#allocation8 + $0x58] sm:$0xf] %v196_v21  ;;  %199 = vst [vmem:[#allocation8 + $0x5c] sm:$0xf] %v198_v22 }
  0x31   :  { %201 = vst [vmem:[#allocation8 + $0x60] sm:$0xf] %v200_v23  ;;  %v202_v24 = vld [vmem:[%s8614_s12 + $0x6c] sm:$0xf]  ;;  %v204_v25 = vld [vmem:[%s8614_s12 + $0x5c] sm:$0xf] }
  0x32   :  { %v206_v26 = vld [vmem:[%s8614_s12 + $0x70] sm:$0xf]  ;;  %203 = vst [vmem:[#allocation8 + $0x64] sm:$0xf] %v202_v24  ;;  %205 = vst [vmem:[#allocation8 + $0x68] sm:$0xf] %v204_v25 }
  0x33   :  { %207 = vst [vmem:[#allocation8 + $0x6c] sm:$0xf] %v206_v26  ;;  %v208_v27 = vld [vmem:[%s8614_s12 + $0x60] sm:$0xf]  ;;  %v214_v29 = vld [vmem:[%s8614_s12 + $0x8c] sm:$0xf] }
  0x34   :  { %209 = vst [vmem:[#allocation8 + $0x70] sm:$0xf] %v208_v27  ;;  %211 = vst [vmem:[#allocation8 + $0x74] sm:$0xff] %v210_v28   ;;  %v216_v30 = vld [vmem:[%s8614_s12 + $0x7c] sm:$0xf]  ;;  %v250_v46 = vld [vmem:[%s8614_s12 + $0xc4] sm:$0xff]  }
  0x35   :  { %215 = vst [vmem:[#allocation8 + $0x7c] sm:$0xf] %v214_v29  ;;  %v218_v31 = vld [vmem:[%s8614_s12 + $0x90] sm:$0xf]  ;;  %v220_v32 = vld [vmem:[%s8614_s12 + $0x80] sm:$0xf] }
  0x36   :  { %217 = vst [vmem:[#allocation8 + $0x80] sm:$0xf] %v216_v30  ;;  %219 = vst [vmem:[#allocation8 + $0x84] sm:$0xf] %v218_v31  ;;  %v222_v33 = vld [vmem:[%s8614_s12 + $0x94] sm:$0xf] }
  0x37   :  { %221 = vst [vmem:[#allocation8 + $0x88] sm:$0xf] %v220_v32  ;;  %v224_v34 = vld [vmem:[%s8614_s12 + $0x84] sm:$0xf]  ;;  %v226_v35 = vld [vmem:[%s8614_s12 + $0x98] sm:$0xf] }
  0x38   :  { %223 = vst [vmem:[#allocation8 + $0x8c] sm:$0xf] %v222_v33  ;;  %225 = vst [vmem:[#allocation8 + $0x90] sm:$0xf] %v224_v34  ;;  %v228_v36 = vld [vmem:[%s8614_s12 + $0x88] sm:$0xf] }
  0x39   :  { %227 = vst [vmem:[#allocation8 + $0x94] sm:$0xf] %v226_v35  ;;  %v234_v38 = vld [vmem:[%s8614_s12 + $0xb4] sm:$0xf]  ;;  %229 = vst [vmem:[#allocation8 + $0x98] sm:$0xf] %v228_v36 }
  0x3a   :  { %231 = vst [vmem:[#allocation8 + $0x9c] sm:$0xff] %v230_v37   ;;  %235 = vst [vmem:[#allocation8 + $0xa4] sm:$0xf] %v234_v38  ;;  %v236_v39 = vld [vmem:[%s8614_s12 + $0xa4] sm:$0xf]  ;;  %v270_v55 = vld [vmem:[%s8614_s12 + $0xec] sm:$0xff]  }
  0x3b   :  { %v238_v40 = vld [vmem:[%s8614_s12 + $0xb8] sm:$0xf]  ;;  %v240_v41 = vld [vmem:[%s8614_s12 + $0xa8] sm:$0xf]  ;;  %237 = vst [vmem:[#allocation8 + $0xa8] sm:$0xf] %v236_v39 }
  0x3c   :  { %239 = vst [vmem:[#allocation8 + $0xac] sm:$0xf] %v238_v40  ;;  %241 = vst [vmem:[#allocation8 + $0xb0] sm:$0xf] %v240_v41  ;;  %v242_v42 = vld [vmem:[%s8614_s12 + $0xbc] sm:$0xf] }
  0x3d   :  { %v244_v43 = vld [vmem:[%s8614_s12 + $0xac] sm:$0xf]  ;;  %v246_v44 = vld [vmem:[%s8614_s12 + $0xc0] sm:$0xf]  ;;  %243 = vst [vmem:[#allocation8 + $0xb4] sm:$0xf] %v242_v42 }
  0x3e   :  { %245 = vst [vmem:[#allocation8 + $0xb8] sm:$0xf] %v244_v43  ;;  %247 = vst [vmem:[#allocation8 + $0xbc] sm:$0xf] %v246_v44  ;;  %v248_v45 = vld [vmem:[%s8614_s12 + $0xb0] sm:$0xf] }
  0x3f   :  { %v254_v47 = vld [vmem:[%s8614_s12 + $0xdc] sm:$0xf]  ;;  %249 = vst [vmem:[#allocation8 + $0xc0] sm:$0xf] %v248_v45  ;;  %251 = vst [vmem:[#allocation8 + $0xc4] sm:$0xff] %v250_v46   ;;  %v290_v1 = vld [vmem:[%s8614_s12 + $0x114] sm:$0xff]  }
  0x40   :  { %255 = vst [vmem:[#allocation8 + $0xcc] sm:$0xf] %v254_v47  ;;  %v256_v48 = vld [vmem:[%s8614_s12 + $0xcc] sm:$0xf]  ;;  %v258_v49 = vld [vmem:[%s8614_s12 + $0xe0] sm:$0xf] }
  0x41   :  { %v260_v50 = vld [vmem:[%s8614_s12 + $0xd0] sm:$0xf]  ;;  %257 = vst [vmem:[#allocation8 + $0xd0] sm:$0xf] %v256_v48  ;;  %259 = vst [vmem:[#allocation8 + $0xd4] sm:$0xf] %v258_v49 }
  0x42   :  { %261 = vst [vmem:[#allocation8 + $0xd8] sm:$0xf] %v260_v50  ;;  %v262_v51 = vld [vmem:[%s8614_s12 + $0xe4] sm:$0xf]  ;;  %v264_v52 = vld [vmem:[%s8614_s12 + $0xd4] sm:$0xf] }
  0x43   :  { %v266_v53 = vld [vmem:[%s8614_s12 + $0xe8] sm:$0xf]  ;;  %263 = vst [vmem:[#allocation8 + $0xdc] sm:$0xf] %v262_v51  ;;  %265 = vst [vmem:[#allocation8 + $0xe0] sm:$0xf] %v264_v52 }
  0x44   :  { %267 = vst [vmem:[#allocation8 + $0xe4] sm:$0xf] %v266_v53  ;;  %v268_v54 = vld [vmem:[%s8614_s12 + $0xd8] sm:$0xf]  ;;  %v274_v56 = vld [vmem:[%s8614_s12 + $0x104] sm:$0xf] }
  0x45   :  { %269 = vst [vmem:[#allocation8 + $0xe8] sm:$0xf] %v268_v54  ;;  %271 = vst [vmem:[#allocation8 + $0xec] sm:$0xff] %v270_v55   ;;  %v276_v57 = vld [vmem:[%s8614_s12 + $0xf4] sm:$0xf] }
  0x46   :  { %275 = vst [vmem:[#allocation8 + $0xf4] sm:$0xf] %v274_v56  ;;  %v278_v58 = vld [vmem:[%s8614_s12 + $0x108] sm:$0xf]  ;;  %v280_v59 = vld [vmem:[%s8614_s12 + $0xf8] sm:$0xf] }
  0x47   :  { %277 = vst [vmem:[#allocation8 + $0xf8] sm:$0xf] %v276_v57  ;;  %279 = vst [vmem:[#allocation8 + $0xfc] sm:$0xf] %v278_v58  ;;  %v282_v60 = vld [vmem:[%s8614_s12 + $0x10c] sm:$0xf] }
  0x48   :  { %281 = vst [vmem:[#allocation8 + $0x100] sm:$0xf] %v280_v59  ;;  %v284_v61 = vld [vmem:[%s8614_s12 + $0xfc] sm:$0xf]  ;;  %v286_v62 = vld [vmem:[%s8614_s12 + $0x110] sm:$0xf] }
  0x49   :  { %283 = vst [vmem:[#allocation8 + $0x104] sm:$0xf] %v282_v60  ;;  %285 = vst [vmem:[#allocation8 + $0x108] sm:$0xf] %v284_v61  ;;  %v288_v63 = vld [vmem:[%s8614_s12 + $0x100] sm:$0xf] }
  0x4a   :  { %287 = vst [vmem:[#allocation8 + $0x10c] sm:$0xf] %v286_v62  ;;  %v294_v2 = vld [vmem:[%s8614_s12 + $0x12c] sm:$0xf]  ;;  %289 = vst [vmem:[#allocation8 + $0x110] sm:$0xf] %v288_v63 }
  0x4b   :  { %291 = vst [vmem:[#allocation8 + $0x114] sm:$0xff] %v290_v1   ;;  %295 = vst [vmem:[#allocation8 + $0x11c] sm:$0xf] %v294_v2  ;;  %v296_v3 = vld [vmem:[%s8614_s12 + $0x11c] sm:$0xf] }
  0x4c   :  { %v298_v4 = vld [vmem:[%s8614_s12 + $0x130] sm:$0xf]  ;;  %v300_v5 = vld [vmem:[%s8614_s12 + $0x120] sm:$0xf]  ;;  %297 = vst [vmem:[#allocation8 + $0x120] sm:$0xf] %v296_v3 }
  0x4d   :  { %299 = vst [vmem:[#allocation8 + $0x124] sm:$0xf] %v298_v4  ;;  %301 = vst [vmem:[#allocation8 + $0x128] sm:$0xf] %v300_v5  ;;  %v302_v6 = vld [vmem:[%s8614_s12 + $0x134] sm:$0xf] }
  0x4e   :  { %v304_v7 = vld [vmem:[%s8614_s12 + $0x124] sm:$0xf]  ;;  %v306_v8 = vld [vmem:[%s8614_s12 + $0x138] sm:$0xf]  ;;  %303 = vst [vmem:[#allocation8 + $0x12c] sm:$0xf] %v302_v6 }
  0x4f   :  { %305 = vst [vmem:[#allocation8 + $0x130] sm:$0xf] %v304_v7  ;;  %307 = vst [vmem:[#allocation8 + $0x134] sm:$0xf] %v306_v8  ;;  %v308_v9 = vld [vmem:[%s8614_s12 + $0x128] sm:$0xf] }
  0x50   :  { %v310_v10 = vld [vmem:[%s8614_s12 + $0x13c] sm:$0xf]  ;;  %309 = vst [vmem:[#allocation8 + $0x138] sm:$0xf] %v308_v9 }
  0x51   :  { %311 = vst [vmem:[#allocation8 + $0x13c] sm:$0xf] %v310_v10 }
  0x52   :  { %502 = vsyncadd [#allocation12 + $0x2], 5120  ;;  %v521_v11 = vld [vmem:[%s8615_s13] sm:$0xf]  ;;  %v523_v12 = vld [vmem:[%s8615_s13 + $0x8] sm:$0xf] }
  0x53   :  { %522 = vst [vmem:[#allocation9] sm:$0xf] %v521_v11  ;;  %524 = vst [vmem:[#allocation9 + $0x4] sm:$0xf] %v523_v12  ;;  %v525_v13 = vld [vmem:[%s8615_s13 + $0x4] sm:$0xf] }
  0x54   :  { %v527_v14 = vld [vmem:[%s8615_s13 + $0xc] sm:$0xff]   ;;  %v531_v15 = vld [vmem:[%s8615_s13 + $0x18] sm:$0xf]  ;;  %526 = vst [vmem:[#allocation9 + $0x8] sm:$0xf] %v525_v13  ;;  %v535_v17 = vld [vmem:[%s8615_s13 + $0x1c] sm:$0xff]  }
  0x55   :  { %528 = vst [vmem:[#allocation9 + $0xc] sm:$0xff] %v527_v14   ;;  %532 = vst [vmem:[#allocation9 + $0x14] sm:$0xf] %v531_v15  ;;  %v533_v16 = vld [vmem:[%s8615_s13 + $0x14] sm:$0xf]  ;;  %v543_v20 = vld [vmem:[%s8615_s13 + $0x2c] sm:$0xff]  }
  0x56   :  { %v539_v18 = vld [vmem:[%s8615_s13 + $0x28] sm:$0xf]  ;;  %534 = vst [vmem:[#allocation9 + $0x18] sm:$0xf] %v533_v16  ;;  %536 = vst [vmem:[#allocation9 + $0x1c] sm:$0xff] %v535_v17  }
  0x57   :  { %540 = vst [vmem:[#allocation9 + $0x24] sm:$0xf] %v539_v18  ;;  %v541_v19 = vld [vmem:[%s8615_s13 + $0x24] sm:$0xf]  ;;  %v547_v21 = vld [vmem:[%s8615_s13 + $0x38] sm:$0xf] }
  0x58   :  { %542 = vst [vmem:[#allocation9 + $0x28] sm:$0xf] %v541_v19  ;;  %544 = vst [vmem:[#allocation9 + $0x2c] sm:$0xff] %v543_v20   ;;  %v549_v22 = vld [vmem:[%s8615_s13 + $0x34] sm:$0xf] }
  0x59   :  { %548 = vst [vmem:[#allocation9 + $0x34] sm:$0xf] %v547_v21  ;;  %v551_v23 = vld [vmem:[%s8615_s13 + $0x3c] sm:$0xf]  ;;  %550 = vst [vmem:[#allocation9 + $0x38] sm:$0xf] %v549_v22 }
  0x5a   :  { %552 = vst [vmem:[#allocation9 + $0x3c] sm:$0xf] %v551_v23 }
  0x5b   :  { %615 = vsyncadd [#allocation12 + $0x3], 1024  ;;  %v634_v24 = vld [vmem:[%s8616_s14] sm:$0xf]  ;;  %v636_v25 = vld [vmem:[%s8616_s14 + $0x24] sm:$0xf] }
  0x5c   :  { %635 = vst [vmem:[#allocation10] sm:$0xf] %v634_v24  ;;  %637 = vst [vmem:[#allocation10 + $0x4] sm:$0xf] %v636_v25  ;;  %v638_v26 = vld [vmem:[%s8616_s14 + $0x4] sm:$0xf] }
  0x5d   :  { %v640_v27 = vld [vmem:[%s8616_s14 + $0x28] sm:$0xf]  ;;  %639 = vst [vmem:[#allocation10 + $0x8] sm:$0xf] %v638_v26  ;;  %v644_v29 = vld [vmem:[%s8616_s14 + $0x2c] sm:$0xf] }
  0x5e   :  { %v642_v28 = vld [vmem:[%s8616_s14 + $0x8] sm:$0xf]  ;;  %641 = vst [vmem:[#allocation10 + $0xc] sm:$0xf] %v640_v27  ;;  %v646_v30 = vld [vmem:[%s8616_s14 + $0xc] sm:$0xf] }
  0x5f   :  { %643 = vst [vmem:[#allocation10 + $0x10] sm:$0xf] %v642_v28  ;;  %v648_v31 = vld [vmem:[%s8616_s14 + $0x30] sm:$0xf]  ;;  %645 = vst [vmem:[#allocation10 + $0x14] sm:$0xf] %v644_v29 }
  0x60   :  { %647 = vst [vmem:[#allocation10 + $0x18] sm:$0xf] %v646_v30  ;;  %649 = vst [vmem:[#allocation10 + $0x1c] sm:$0xf] %v648_v31  ;;  %v650_v32 = vld [vmem:[%s8616_s14 + $0x10] sm:$0xf] }
  0x61   :  { %v652_v33 = vld [vmem:[%s8616_s14 + $0x34] sm:$0xf]  ;;  %651 = vst [vmem:[#allocation10 + $0x20] sm:$0xf] %v650_v32  ;;  %v656_v35 = vld [vmem:[%s8616_s14 + $0x38] sm:$0xf] }
  0x62   :  { %v654_v34 = vld [vmem:[%s8616_s14 + $0x14] sm:$0xf]  ;;  %653 = vst [vmem:[#allocation10 + $0x24] sm:$0xf] %v652_v33  ;;  %v658_v36 = vld [vmem:[%s8616_s14 + $0x18] sm:$0xf] }
  0x63   :  { %655 = vst [vmem:[#allocation10 + $0x28] sm:$0xf] %v654_v34  ;;  %v660_v37 = vld [vmem:[%s8616_s14 + $0x3c] sm:$0xf]  ;;  %657 = vst [vmem:[#allocation10 + $0x2c] sm:$0xf] %v656_v35 }
  0x64   :  { %659 = vst [vmem:[#allocation10 + $0x30] sm:$0xf] %v658_v36  ;;  %661 = vst [vmem:[#allocation10 + $0x34] sm:$0xf] %v660_v37  ;;  %v662_v38 = vld [vmem:[%s8616_s14 + $0x1c] sm:$0xf] }
  0x65   :  { %v664_v39 = vld [vmem:[%s8616_s14 + $0x40] sm:$0xf]  ;;  %663 = vst [vmem:[#allocation10 + $0x38] sm:$0xf] %v662_v38  ;;  %v668_v41 = vld [vmem:[%s8616_s14 + $0x44] sm:$0xff]   ;;  %v704_v58 = vld [vmem:[%s8616_s14 + $0x8c] sm:$0xff]  }
  0x66   :  { %v666_v40 = vld [vmem:[%s8616_s14 + $0x20] sm:$0xf]  ;;  %665 = vst [vmem:[#allocation10 + $0x3c] sm:$0xf] %v664_v39  ;;  %v672_v42 = vld [vmem:[%s8616_s14 + $0x6c] sm:$0xf] }
  0x67   :  { %667 = vst [vmem:[#allocation10 + $0x40] sm:$0xf] %v666_v40  ;;  %v674_v43 = vld [vmem:[%s8616_s14 + $0x4c] sm:$0xf]  ;;  %669 = vst [vmem:[#allocation10 + $0x44] sm:$0xff] %v668_v41   ;;  %v740_v12 = vld [vmem:[%s8616_s14 + $0xd4] sm:$0xff]  }
  0x68   :  { %673 = vst [vmem:[#allocation10 + $0x4c] sm:$0xf] %v672_v42  ;;  %675 = vst [vmem:[#allocation10 + $0x50] sm:$0xf] %v674_v43  ;;  %v676_v44 = vld [vmem:[%s8616_s14 + $0x70] sm:$0xf] }
  0x69   :  { %v678_v45 = vld [vmem:[%s8616_s14 + $0x50] sm:$0xf]  ;;  %v680_v46 = vld [vmem:[%s8616_s14 + $0x74] sm:$0xf]  ;;  %677 = vst [vmem:[#allocation10 + $0x54] sm:$0xf] %v676_v44 }
  0x6a   :  { %679 = vst [vmem:[#allocation10 + $0x58] sm:$0xf] %v678_v45  ;;  %681 = vst [vmem:[#allocation10 + $0x5c] sm:$0xf] %v680_v46  ;;  %v682_v47 = vld [vmem:[%s8616_s14 + $0x54] sm:$0xf] }
  0x6b   :  { %v684_v48 = vld [vmem:[%s8616_s14 + $0x78] sm:$0xf]  ;;  %683 = vst [vmem:[#allocation10 + $0x60] sm:$0xf] %v682_v47  ;;  %v688_v50 = vld [vmem:[%s8616_s14 + $0x7c] sm:$0xf] }
  0x6c   :  { %v686_v49 = vld [vmem:[%s8616_s14 + $0x58] sm:$0xf]  ;;  %685 = vst [vmem:[#allocation10 + $0x64] sm:$0xf] %v684_v48  ;;  %v690_v51 = vld [vmem:[%s8616_s14 + $0x5c] sm:$0xf] }
  0x6d   :  { %687 = vst [vmem:[#allocation10 + $0x68] sm:$0xf] %v686_v49  ;;  %v692_v52 = vld [vmem:[%s8616_s14 + $0x80] sm:$0xf]  ;;  %689 = vst [vmem:[#allocation10 + $0x6c] sm:$0xf] %v688_v50 }
  0x6e   :  { %691 = vst [vmem:[#allocation10 + $0x70] sm:$0xf] %v690_v51  ;;  %693 = vst [vmem:[#allocation10 + $0x74] sm:$0xf] %v692_v52  ;;  %v694_v53 = vld [vmem:[%s8616_s14 + $0x60] sm:$0xf] }
  0x6f   :  { %v696_v54 = vld [vmem:[%s8616_s14 + $0x84] sm:$0xf]  ;;  %695 = vst [vmem:[#allocation10 + $0x78] sm:$0xf] %v694_v53  ;;  %v700_v56 = vld [vmem:[%s8616_s14 + $0x88] sm:$0xf] }
  0x70   :  { %v698_v55 = vld [vmem:[%s8616_s14 + $0x64] sm:$0xf]  ;;  %697 = vst [vmem:[#allocation10 + $0x7c] sm:$0xf] %v696_v54  ;;  %v702_v57 = vld [vmem:[%s8616_s14 + $0x68] sm:$0xf] }
  0x71   :  { %699 = vst [vmem:[#allocation10 + $0x80] sm:$0xf] %v698_v55  ;;  %701 = vst [vmem:[#allocation10 + $0x84] sm:$0xf] %v700_v56  ;;  %v708_v59 = vld [vmem:[%s8616_s14 + $0xb4] sm:$0xf] }
  0x72   :  { %703 = vst [vmem:[#allocation10 + $0x88] sm:$0xf] %v702_v57  ;;  %705 = vst [vmem:[#allocation10 + $0x8c] sm:$0xff] %v704_v58   ;;  %v710_v60 = vld [vmem:[%s8616_s14 + $0x94] sm:$0xf] }
  0x73   :  { %v712_v61 = vld [vmem:[%s8616_s14 + $0xb8] sm:$0xf]  ;;  %709 = vst [vmem:[#allocation10 + $0x94] sm:$0xf] %v708_v59  ;;  %711 = vst [vmem:[#allocation10 + $0x98] sm:$0xf] %v710_v60 }
  0x74   :  { %713 = vst [vmem:[#allocation10 + $0x9c] sm:$0xf] %v712_v61  ;;  %v714_v62 = vld [vmem:[%s8616_s14 + $0x98] sm:$0xf]  ;;  %v716_v63 = vld [vmem:[%s8616_s14 + $0xbc] sm:$0xf] }
  0x75   :  { %v718_v1 = vld [vmem:[%s8616_s14 + $0x9c] sm:$0xf]  ;;  %715 = vst [vmem:[#allocation10 + $0xa0] sm:$0xf] %v714_v62  ;;  %717 = vst [vmem:[#allocation10 + $0xa4] sm:$0xf] %v716_v63 }
  0x76   :  { %719 = vst [vmem:[#allocation10 + $0xa8] sm:$0xf] %v718_v1  ;;  %v720_v2 = vld [vmem:[%s8616_s14 + $0xc0] sm:$0xf]  ;;  %v724_v4 = vld [vmem:[%s8616_s14 + $0xc4] sm:$0xf] }
  0x77   :  { %v722_v3 = vld [vmem:[%s8616_s14 + $0xa0] sm:$0xf]  ;;  %721 = vst [vmem:[#allocation10 + $0xac] sm:$0xf] %v720_v2  ;;  %725 = vst [vmem:[#allocation10 + $0xb4] sm:$0xf] %v724_v4 }
  0x78   :  { %723 = vst [vmem:[#allocation10 + $0xb0] sm:$0xf] %v722_v3  ;;  %v726_v5 = vld [vmem:[%s8616_s14 + $0xa4] sm:$0xf]  ;;  %v728_v6 = vld [vmem:[%s8616_s14 + $0xc8] sm:$0xf] }
  0x79   :  { %v730_v7 = vld [vmem:[%s8616_s14 + $0xa8] sm:$0xf]  ;;  %727 = vst [vmem:[#allocation10 + $0xb8] sm:$0xf] %v726_v5  ;;  %729 = vst [vmem:[#allocation10 + $0xbc] sm:$0xf] %v728_v6 }
  0x7a   :  { %731 = vst [vmem:[#allocation10 + $0xc0] sm:$0xf] %v730_v7  ;;  %v732_v8 = vld [vmem:[%s8616_s14 + $0xcc] sm:$0xf]  ;;  %v736_v10 = vld [vmem:[%s8616_s14 + $0xd0] sm:$0xf] }
  0x7b   :  { %v734_v9 = vld [vmem:[%s8616_s14 + $0xac] sm:$0xf]  ;;  %733 = vst [vmem:[#allocation10 + $0xc4] sm:$0xf] %v732_v8  ;;  %737 = vst [vmem:[#allocation10 + $0xcc] sm:$0xf] %v736_v10 }
  0x7c   :  { %735 = vst [vmem:[#allocation10 + $0xc8] sm:$0xf] %v734_v9  ;;  %v738_v11 = vld [vmem:[%s8616_s14 + $0xb0] sm:$0xf]  ;;  %v744_v13 = vld [vmem:[%s8616_s14 + $0xfc] sm:$0xf] }
  0x7d   :  { %739 = vst [vmem:[#allocation10 + $0xd0] sm:$0xf] %v738_v11  ;;  %741 = vst [vmem:[#allocation10 + $0xd4] sm:$0xff] %v740_v12   ;;  %v746_v14 = vld [vmem:[%s8616_s14 + $0xdc] sm:$0xf] }
  0x7e   :  { %745 = vst [vmem:[#allocation10 + $0xdc] sm:$0xf] %v744_v13  ;;  %v748_v15 = vld [vmem:[%s8616_s14 + $0x100] sm:$0xf]  ;;  %747 = vst [vmem:[#allocation10 + $0xe0] sm:$0xf] %v746_v14 }
  0x7f   :  { %v750_v16 = vld [vmem:[%s8616_s14 + $0xe0] sm:$0xf]  ;;  %749 = vst [vmem:[#allocation10 + $0xe4] sm:$0xf] %v748_v15  ;;  %v752_v17 = vld [vmem:[%s8616_s14 + $0x104] sm:$0xf] }
  0x80   :  { %751 = vst [vmem:[#allocation10 + $0xe8] sm:$0xf] %v750_v16  ;;  %v754_v18 = vld [vmem:[%s8616_s14 + $0xe4] sm:$0xf]  ;;  %v756_v19 = vld [vmem:[%s8616_s14 + $0x108] sm:$0xf] }
  0x81   :  { %753 = vst [vmem:[#allocation10 + $0xec] sm:$0xf] %v752_v17  ;;  %755 = vst [vmem:[#allocation10 + $0xf0] sm:$0xf] %v754_v18  ;;  %v758_v20 = vld [vmem:[%s8616_s14 + $0xe8] sm:$0xf] }
  0x82   :  { %757 = vst [vmem:[#allocation10 + $0xf4] sm:$0xf] %v756_v19  ;;  %v760_v21 = vld [vmem:[%s8616_s14 + $0x10c] sm:$0xf]  ;;  %759 = vst [vmem:[#allocation10 + $0xf8] sm:$0xf] %v758_v20 }
  0x83   :  { %v762_v22 = vld [vmem:[%s8616_s14 + $0xec] sm:$0xf]  ;;  %761 = vst [vmem:[#allocation10 + $0xfc] sm:$0xf] %v760_v21  ;;  %v764_v23 = vld [vmem:[%s8616_s14 + $0x110] sm:$0xf] }
  0x84   :  { %763 = vst [vmem:[#allocation10 + $0x100] sm:$0xf] %v762_v22  ;;  %v766_v24 = vld [vmem:[%s8616_s14 + $0xf0] sm:$0xf]  ;;  %v768_v25 = vld [vmem:[%s8616_s14 + $0x114] sm:$0xf] }
  0x85   :  { %765 = vst [vmem:[#allocation10 + $0x104] sm:$0xf] %v764_v23  ;;  %767 = vst [vmem:[#allocation10 + $0x108] sm:$0xf] %v766_v24  ;;  %v770_v26 = vld [vmem:[%s8616_s14 + $0xf4] sm:$0xf] }
  0x86   :  { %769 = vst [vmem:[#allocation10 + $0x10c] sm:$0xf] %v768_v25  ;;  %v772_v27 = vld [vmem:[%s8616_s14 + $0x118] sm:$0xf]  ;;  %771 = vst [vmem:[#allocation10 + $0x110] sm:$0xf] %v770_v26 }
  0x87   :  { %v774_v28 = vld [vmem:[%s8616_s14 + $0xf8] sm:$0xf]  ;;  %773 = vst [vmem:[#allocation10 + $0x114] sm:$0xf] %v772_v27  ;;  %v776_v29 = vld [vmem:[%s8616_s14 + $0x11c] sm:$0xf] }
  0x88   :  { %775 = vst [vmem:[#allocation10 + $0x118] sm:$0xf] %v774_v28  ;;  %777 = vst [vmem:[#allocation10 + $0x11c] sm:$0xf] %v776_v29 }
  0x89   :  { %952 = vsyncadd [#allocation12 + $0x4], 4608  ;;  %v971_v30 = vld [vmem:[%s8617_s15] sm:$0xf]  ;;  %v973_v31 = vld [vmem:[%s8617_s15 + $0x14] sm:$0xf] }
  0x8a   :  { %972 = vst [vmem:[#allocation11] sm:$0xf] %v971_v30  ;;  %974 = vst [vmem:[#allocation11 + $0x4] sm:$0xf] %v973_v31  ;;  %v975_v32 = vld [vmem:[%s8617_s15 + $0x4] sm:$0xf] }
  0x8b   :  { %v977_v33 = vld [vmem:[%s8617_s15 + $0x18] sm:$0xf]  ;;  %v979_v34 = vld [vmem:[%s8617_s15 + $0x8] sm:$0xf]  ;;  %976 = vst [vmem:[#allocation11 + $0x8] sm:$0xf] %v975_v32 }
  0x8c   :  { %978 = vst [vmem:[#allocation11 + $0xc] sm:$0xf] %v977_v33  ;;  %980 = vst [vmem:[#allocation11 + $0x10] sm:$0xf] %v979_v34  ;;  %v981_v35 = vld [vmem:[%s8617_s15 + $0x1c] sm:$0xf] }
  0x8d   :  { %v983_v36 = vld [vmem:[%s8617_s15 + $0xc] sm:$0xf]  ;;  %v985_v37 = vld [vmem:[%s8617_s15 + $0x20] sm:$0xf]  ;;  %982 = vst [vmem:[#allocation11 + $0x14] sm:$0xf] %v981_v35 }
  0x8e   :  { %984 = vst [vmem:[#allocation11 + $0x18] sm:$0xf] %v983_v36  ;;  %986 = vst [vmem:[#allocation11 + $0x1c] sm:$0xf] %v985_v37  ;;  %v987_v38 = vld [vmem:[%s8617_s15 + $0x10] sm:$0xf] }
  0x8f   :  { %v989_v39 = vld [vmem:[%s8617_s15 + $0x24] sm:$0xff]   ;;  %v993_v40 = vld [vmem:[%s8617_s15 + $0x3c] sm:$0xf]  ;;  %988 = vst [vmem:[#allocation11 + $0x20] sm:$0xf] %v987_v38  ;;  %v1009_v48 = vld [vmem:[%s8617_s15 + $0x4c] sm:$0xff]  }
  0x90   :  { %990 = vst [vmem:[#allocation11 + $0x24] sm:$0xff] %v989_v39   ;;  %994 = vst [vmem:[#allocation11 + $0x2c] sm:$0xf] %v993_v40  ;;  %v995_v41 = vld [vmem:[%s8617_s15 + $0x2c] sm:$0xf]  ;;  %v1029_v57 = vld [vmem:[%s8617_s15 + $0x74] sm:$0xff]  }
  0x91   :  { %v997_v42 = vld [vmem:[%s8617_s15 + $0x40] sm:$0xf]  ;;  %v999_v43 = vld [vmem:[%s8617_s15 + $0x30] sm:$0xf]  ;;  %996 = vst [vmem:[#allocation11 + $0x30] sm:$0xf] %v995_v41 }
  0x92   :  { %998 = vst [vmem:[#allocation11 + $0x34] sm:$0xf] %v997_v42  ;;  %1000 = vst [vmem:[#allocation11 + $0x38] sm:$0xf] %v999_v43  ;;  %v1001_v44 = vld [vmem:[%s8617_s15 + $0x44] sm:$0xf] }
  0x93   :  { %v1003_v45 = vld [vmem:[%s8617_s15 + $0x34] sm:$0xf]  ;;  %v1005_v46 = vld [vmem:[%s8617_s15 + $0x48] sm:$0xf]  ;;  %1002 = vst [vmem:[#allocation11 + $0x3c] sm:$0xf] %v1001_v44 }
  0x94   :  { %1004 = vst [vmem:[#allocation11 + $0x40] sm:$0xf] %v1003_v45  ;;  %1006 = vst [vmem:[#allocation11 + $0x44] sm:$0xf] %v1005_v46  ;;  %v1007_v47 = vld [vmem:[%s8617_s15 + $0x38] sm:$0xf] }
  0x95   :  { %v1013_v49 = vld [vmem:[%s8617_s15 + $0x64] sm:$0xf]  ;;  %1008 = vst [vmem:[#allocation11 + $0x48] sm:$0xf] %v1007_v47  ;;  %1010 = vst [vmem:[#allocation11 + $0x4c] sm:$0xff] %v1009_v48  }
  0x96   :  { %1014 = vst [vmem:[#allocation11 + $0x54] sm:$0xf] %v1013_v49  ;;  %v1015_v50 = vld [vmem:[%s8617_s15 + $0x54] sm:$0xf]  ;;  %v1017_v51 = vld [vmem:[%s8617_s15 + $0x68] sm:$0xf] }
  0x97   :  { %v1019_v52 = vld [vmem:[%s8617_s15 + $0x58] sm:$0xf]  ;;  %1016 = vst [vmem:[#allocation11 + $0x58] sm:$0xf] %v1015_v50  ;;  %1018 = vst [vmem:[#allocation11 + $0x5c] sm:$0xf] %v1017_v51 }
  0x98   :  { %1020 = vst [vmem:[#allocation11 + $0x60] sm:$0xf] %v1019_v52  ;;  %v1021_v53 = vld [vmem:[%s8617_s15 + $0x6c] sm:$0xf]  ;;  %v1023_v54 = vld [vmem:[%s8617_s15 + $0x5c] sm:$0xf] }
  0x99   :  { %v1025_v55 = vld [vmem:[%s8617_s15 + $0x70] sm:$0xf]  ;;  %1022 = vst [vmem:[#allocation11 + $0x64] sm:$0xf] %v1021_v53  ;;  %1024 = vst [vmem:[#allocation11 + $0x68] sm:$0xf] %v1023_v54 }
  0x9a   :  { %1026 = vst [vmem:[#allocation11 + $0x6c] sm:$0xf] %v1025_v55  ;;  %v1027_v56 = vld [vmem:[%s8617_s15 + $0x60] sm:$0xf]  ;;  %v1033_v58 = vld [vmem:[%s8617_s15 + $0x8c] sm:$0xf] }
  0x9b   :  { %1028 = vst [vmem:[#allocation11 + $0x70] sm:$0xf] %v1027_v56  ;;  %1030 = vst [vmem:[#allocation11 + $0x74] sm:$0xff] %v1029_v57   ;;  %v1035_v59 = vld [vmem:[%s8617_s15 + $0x7c] sm:$0xf] }
  0x9c   :  { %1034 = vst [vmem:[#allocation11 + $0x7c] sm:$0xf] %v1033_v58  ;;  %v1037_v60 = vld [vmem:[%s8617_s15 + $0x90] sm:$0xf]  ;;  %v1039_v61 = vld [vmem:[%s8617_s15 + $0x80] sm:$0xf] }
  0x9d   :  { %1036 = vst [vmem:[#allocation11 + $0x80] sm:$0xf] %v1035_v59  ;;  %1038 = vst [vmem:[#allocation11 + $0x84] sm:$0xf] %v1037_v60  ;;  %v1041_v62 = vld [vmem:[%s8617_s15 + $0x94] sm:$0xf] }
  0x9e   :  { %1040 = vst [vmem:[#allocation11 + $0x88] sm:$0xf] %v1039_v61  ;;  %v1043_v63 = vld [vmem:[%s8617_s15 + $0x84] sm:$0xf]  ;;  %v1045_v1 = vld [vmem:[%s8617_s15 + $0x98] sm:$0xf] }
  0x9f   :  { %1042 = vst [vmem:[#allocation11 + $0x8c] sm:$0xf] %v1041_v62  ;;  %1044 = vst [vmem:[#allocation11 + $0x90] sm:$0xf] %v1043_v63  ;;  %v1047_v2 = vld [vmem:[%s8617_s15 + $0x88] sm:$0xf] }
  0xa0   :  { %1046 = vst [vmem:[#allocation11 + $0x94] sm:$0xf] %v1045_v1  ;;  %v1049_v3 = vld [vmem:[%s8617_s15 + $0x9c] sm:$0xf]  ;;  %1048 = vst [vmem:[#allocation11 + $0x98] sm:$0xf] %v1047_v2 }
  0xa1   :  { %1050 = vst [vmem:[#allocation11 + $0x9c] sm:$0xf] %v1049_v3 }
  0xa2   :  { %1161 = vsyncadd [#allocation12 + $0x5], 2560  ;;  %v6835_v4 = vld [vmem:[%s8603_s1 + $0x4] ss:$16 sps:$4 sm:$0xff]   ;;  %v6837_v5 = vld [vmem:[%s8603_s1] ss:$16 sps:$4 sm:$0xff]  }
  0xa3   :  { %v6942_v6 = vmov 0   ;;  %v6838_v7 = vld [vmem:[%s8603_s1 + $0x24] ss:$16 sps:$4 sm:$0xff]   ;;  %v6840_v8 = vld [vmem:[%s8603_s1 + $0x20] ss:$16 sps:$4 sm:$0xff]   ;;  %1238 = vmatprep.subr.bf16.mxu0 %v6835_v4  ;;  %s8629_s13 = sld [smem:[#allocation37_spill]] }
  0xa4   :  { %1270 = vmatprep.mubr.bf16.mxu0 %v6942_v6  ;;  %1311 = vmatprep.mubr.bf16.mxu1 %v6942_v6  ;;  %v6841_v10 = vld [vmem:[%s8603_s1 + $0xc] ss:$16 sps:$4 sm:$0xff]   ;;  %v6843_v11 = vld [vmem:[%s8603_s1 + $0x8] ss:$16 sps:$4 sm:$0xff]   ;;  %v1337_v16 = vld [vmem:[#allocation13 + $0x8] sm:$0xff]  ;;  %vm1234_vm0 = vcmask 261120  }
  0xa5   :  { %1239 = vmatpush1.bf16.msra.mxu0 %v6837_v5  ;;  %v6844_v12 = vld [vmem:[%s8603_s1 + $0x2c] ss:$16 sps:$4 sm:$0xff]   ;;  %v6846_v13 = vld [vmem:[%s8603_s1 + $0x28] ss:$16 sps:$4 sm:$0xff]   ;;  %1279 = vmatprep.subr.bf16.mxu1 %v6841_v10  ;;  %v1341_v19 = vld [vmem:[#allocation13 + $0x28] sm:$0xff] }
  0xa6   :  { %1240 = vmatprep.subr.bf16.mxu0 %v6838_v7  ;;  %v1336_v14 = vld [vmem:[#allocation13] sm:$0xff]  ;;  %1280 = vmatpush1.bf16.msra.mxu1 %v6843_v11  ;;  %v6132_v23 = vcombine.high %v1337_v16, %v1341_v19  ;;  %v1345_v25 = vld [vmem:[#allocation13 + $0x48] sm:$0xff]  ;;  %v6131_v29 = vcombine.low %v1337_v16, %v1341_v19 }
  0xa7   :  { %v1340_v15 = vld [vmem:[#allocation13 + $0x20] sm:$0xff]  ;;  %1281 = vmatprep.subr.bf16.mxu1 %v6844_v12  ;;  %v1349_v26 = vld [vmem:[#allocation13 + $0x68] sm:$0xff] }
  0xa8   :  { %v6130_v18 = vcombine.high %v1336_v14, %v1340_v15  ;;  %v1344_v20 = vld [vmem:[#allocation13 + $0x40] sm:$0xff]  ;;  %v6129_v22 = vcombine.low %v1336_v14, %v1340_v15  ;;  %v6140_v31 = vcombine.high %v1345_v25, %v1349_v26  ;;  %v1353_v33 = vld [vmem:[#allocation13 + $0x88] sm:$0xff]  ;;  %v6139_v37 = vcombine.low %v1345_v25, %v1349_v26 }
  0xa9   :  { %v1162_v9 = vld [vmem:[%s8629_s13] sm:$0x3]  ;;  %v1348_v21 = vld [vmem:[#allocation13 + $0x60] sm:$0xff]  ;;  %1241 = vmatpush1.bf16.msra.mxu0 %v6840_v8  ;;  %v1357_v34 = vld [vmem:[#allocation13 + $0xa8] sm:$0xff] }
  0xaa   :  { %v1163_v17 = vpack.c.bf16 %v1162_v9, %v1162_v9  ;;  %2872 = vmatprep.subr.bf16.mxu0 %v6130_v18  ;;  %v6138_v24 = vcombine.high %v1344_v20, %v1348_v21  ;;  %v1352_v27 = vld [vmem:[#allocation13 + $0x80] sm:$0xff]  ;;  %1282 = vmatpush1.bf16.msra.mxu1 %v6846_v13  ;;  %v6137_v30 = vcombine.low %v1344_v20, %v1348_v21  ;;  %v1361_v41 = vld [vmem:[#allocation13 + $0xc8] sm:$0xff] }
  0xab   :  { %v1356_v28 = vld [vmem:[#allocation13 + $0xa0] sm:$0xff]  ;;  %2954 = vmatprep.subr.bf16.mxu1 %v6132_v23  ;;  %v6148_v39 = vcombine.high %v1353_v33, %v1357_v34  ;;  %v1365_v42 = vld [vmem:[#allocation13 + $0xe8] sm:$0xff]  ;;  %v6147_v45 = vcombine.low %v1353_v33, %v1357_v34 }
  0xac   :  { %6127 = vmatmul.mubr.msk.bf16.vlgmr.msra.gmra.mrb[0].mxu0 %vm1234_vm0, %v1163_v17  ;;  %v6146_v32 = vcombine.high %v1352_v27, %v1356_v28  ;;  %v1360_v35 = vld [vmem:[#allocation13 + $0xc0] sm:$0xff]  ;;  %v6145_v38 = vcombine.low %v1352_v27, %v1356_v28  ;;  %v6156_v47 = vcombine.high %v1361_v41, %v1365_v42  ;;  %v1369_v49 = vld [vmem:[#allocation13 + $0x108] sm:$0xff]  ;;  %v6155_v53 = vcombine.low %v1361_v41, %v1365_v42 }
  0xad   :  { %2873 = vmatpush1.bf16.msra.mxu0 %v6129_v22  ;;  %6128 = vmatmul.mubr.msk.bf16.vlgmr.msra.gmra.mrb[0].mxu1 %vm1234_vm0, %v1163_v17  ;;  %v1364_v36 = vld [vmem:[#allocation13 + $0xe0] sm:$0xff]  ;;  %v1373_v50 = vld [vmem:[#allocation13 + $0x128] sm:$0xff] }
  0xae   :  { %2874 = vmatprep.subr.bf16.mxu0 %v6138_v24  ;;  %2955 = vmatpush1.bf16.msra.mxu1 %v6131_v29  ;;  %v6154_v40 = vcombine.high %v1360_v35, %v1364_v36  ;;  %v1368_v43 = vld [vmem:[#allocation13 + $0x100] sm:$0xff]  ;;  %v6153_v46 = vcombine.low %v1360_v35, %v1364_v36  ;;  %v6164_v55 = vcombine.high %v1369_v49, %v1373_v50  ;;  %v1377_v57 = vld [vmem:[#allocation13 + $0x148] sm:$0xff] }
  0xaf   :  { %2956 = vmatprep.subr.bf16.mxu1 %v6140_v31  ;;  %v1372_v44 = vld [vmem:[#allocation13 + $0x120] sm:$0xff]  ;;  %v1381_v58 = vld [vmem:[#allocation13 + $0x168] sm:$0xff]  ;;  %v6163_v61 = vcombine.low %v1369_v49, %v1373_v50 }
  0xb0   :  { %v6162_v48 = vcombine.high %v1368_v43, %v1372_v44  ;;  %v1376_v51 = vld [vmem:[#allocation13 + $0x140] sm:$0xff]  ;;  %v6161_v54 = vcombine.low %v1368_v43, %v1372_v44  ;;  %v6172_v63 = vcombine.high %v1377_v57, %v1381_v58  ;;  %v1385_v2 = vld [vmem:[#allocation13 + $0x188] sm:$0xff]  ;;  %v6171_v7 = vcombine.low %v1377_v57, %v1381_v58 }
  0xb1   :  { %2875 = vmatpush1.bf16.msra.mxu0 %v6137_v30  ;;  %v1380_v52 = vld [vmem:[#allocation13 + $0x160] sm:$0xff]  ;;  %v1389_v3 = vld [vmem:[#allocation13 + $0x1a8] sm:$0xff] }
  0xb2   :  { %2876 = vmatprep.subr.bf16.mxu0 %v6146_v32  ;;  %2957 = vmatpush1.bf16.msra.mxu1 %v6139_v37  ;;  %v6170_v56 = vcombine.high %v1376_v51, %v1380_v52  ;;  %v1384_v59 = vld [vmem:[#allocation13 + $0x180] sm:$0xff]  ;;  %v6169_v62 = vcombine.low %v1376_v51, %v1380_v52  ;;  %v6180_v9 = vcombine.high %v1385_v2, %v1389_v3  ;;  %v1393_v11 = vld [vmem:[#allocation13 + $0x1c8] sm:$0xff] }
  0xb3   :  { %2958 = vmatprep.subr.bf16.mxu1 %v6148_v39  ;;  %v1388_v60 = vld [vmem:[#allocation13 + $0x1a0] sm:$0xff]  ;;  %v1397_v12 = vld [vmem:[#allocation13 + $0x1e8] sm:$0xff]  ;;  %v6179_v15 = vcombine.low %v1385_v2, %v1389_v3 }
  0xb4   :  { %v6178_v1 = vcombine.high %v1384_v59, %v1388_v60  ;;  %v1392_v4 = vld [vmem:[#allocation13 + $0x1c0] sm:$0xff]  ;;  %v6177_v8 = vcombine.low %v1384_v59, %v1388_v60  ;;  %v6188_v17 = vcombine.high %v1393_v11, %v1397_v12  ;;  %v1401_v19 = vld [vmem:[#allocation13 + $0x208] sm:$0xff]  ;;  %v6187_v23 = vcombine.low %v1393_v11, %v1397_v12 }
  0xb5   :  { %2877 = vmatpush1.bf16.msra.mxu0 %v6145_v38  ;;  %v1396_v5 = vld [vmem:[#allocation13 + $0x1e0] sm:$0xff]  ;;  %v1405_v20 = vld [vmem:[#allocation13 + $0x228] sm:$0xff] }
  0xb6   :  { %2878 = vmatprep.subr.bf16.mxu0 %v6154_v40  ;;  %2959 = vmatpush1.bf16.msra.mxu1 %v6147_v45  ;;  %v6186_v10 = vcombine.high %v1392_v4, %v1396_v5  ;;  %v1400_v13 = vld [vmem:[#allocation13 + $0x200] sm:$0xff]  ;;  %v6185_v16 = vcombine.low %v1392_v4, %v1396_v5  ;;  %v6196_v25 = vcombine.high %v1401_v19, %v1405_v20  ;;  %v1409_v27 = vld [vmem:[#allocation13 + $0x248] sm:$0xff] }
  0xb7   :  { %2960 = vmatprep.subr.bf16.mxu1 %v6156_v47  ;;  %v1404_v14 = vld [vmem:[#allocation13 + $0x220] sm:$0xff]  ;;  %v1413_v28 = vld [vmem:[#allocation13 + $0x268] sm:$0xff]  ;;  %v6195_v31 = vcombine.low %v1401_v19, %v1405_v20 }
  0xb8   :  { %v6194_v18 = vcombine.high %v1400_v13, %v1404_v14  ;;  %v1408_v21 = vld [vmem:[#allocation13 + $0x240] sm:$0xff]  ;;  %v6193_v24 = vcombine.low %v1400_v13, %v1404_v14  ;;  %v6204_v33 = vcombine.high %v1409_v27, %v1413_v28  ;;  %v1417_v35 = vld [vmem:[#allocation13 + $0x288] sm:$0xff]  ;;  %v6203_v39 = vcombine.low %v1409_v27, %v1413_v28 }
  0xb9   :  { %2879 = vmatpush1.bf16.msra.mxu0 %v6153_v46  ;;  %v1412_v22 = vld [vmem:[#allocation13 + $0x260] sm:$0xff]  ;;  %v1421_v36 = vld [vmem:[#allocation13 + $0x2a8] sm:$0xff]  ;;  %v1174_v27 = vlaneseq }
  0xba   :  { %2880 = vmatprep.subr.bf16.mxu0 %v6162_v48  ;;  %2961 = vmatpush1.bf16.msra.mxu1 %v6155_v53  ;;  %v6202_v26 = vcombine.high %v1408_v21, %v1412_v22  ;;  %v1416_v29 = vld [vmem:[#allocation13 + $0x280] sm:$0xff]  ;;  %v6201_v32 = vcombine.low %v1408_v21, %v1412_v22  ;;  %v6212_v41 = vcombine.high %v1417_v35, %v1421_v36  ;;  %v1425_v43 = vld [vmem:[#allocation13 + $0x2c8] sm:$0xff] }
  0xbb   :  { %2962 = vmatprep.subr.bf16.mxu1 %v6164_v55  ;;  %v1420_v30 = vld [vmem:[#allocation13 + $0x2a0] sm:$0xff]  ;;  %v1429_v44 = vld [vmem:[#allocation13 + $0x2e8] sm:$0xff]  ;;  %v6211_v47 = vcombine.low %v1417_v35, %v1421_v36  ;;  %v7661_v28 = vshrl.u32 %v1174_v27, 7  ;;  %vm7715_vm5 = vcmp.lt.s32.totalorder %v1174_v27, 256 }
  0xbc   :  { %v6210_v34 = vcombine.high %v1416_v29, %v1420_v30  ;;  %v1424_v37 = vld [vmem:[#allocation13 + $0x2c0] sm:$0xff]  ;;  %v6209_v40 = vcombine.low %v1416_v29, %v1420_v30  ;;  %v6220_v49 = vcombine.high %v1425_v43, %v1429_v44  ;;  %v1433_v51 = vld [vmem:[#allocation13 + $0x308] sm:$0xff]  ;;  %v6219_v55 = vcombine.low %v1425_v43, %v1429_v44  ;;  %v7669_v30 = vld [vmem:[%s8604_s2] sm:$0xf] }
  0xbd   :  { %2881 = vmatpush1.bf16.msra.mxu0 %v6161_v54  ;;  %v1428_v38 = vld [vmem:[#allocation13 + $0x2e0] sm:$0xff]  ;;  %v1437_v52 = vld [vmem:[#allocation13 + $0x328] sm:$0xff]  ;;  %v7664_v29 = vsub.s32 0, %v7661_v28 }
  0xbe   :  { %2882 = vmatprep.subr.bf16.mxu0 %v6170_v56  ;;  %2963 = vmatpush1.bf16.msra.mxu1 %v6163_v61  ;;  %v6218_v42 = vcombine.high %v1424_v37, %v1428_v38  ;;  %v1432_v45 = vld [vmem:[#allocation13 + $0x300] sm:$0xff]  ;;  %v6217_v48 = vcombine.low %v1424_v37, %v1428_v38  ;;  %v6228_v57 = vcombine.high %v1433_v51, %v1437_v52  ;;  %v1441_v59 = vld [vmem:[#allocation13 + $0x348] sm:$0xff] }
  0xbf   :  { %2964 = vmatprep.subr.bf16.mxu1 %v6172_v63  ;;  %v1436_v46 = vld [vmem:[#allocation13 + $0x320] sm:$0xff]  ;;  %v1445_v60 = vld [vmem:[#allocation13 + $0x368] sm:$0xff]  ;;  %v6227_v61 = vcombine.low %v1433_v51, %v1437_v52 }
  0xc0   :  { %v6226_v50 = vcombine.high %v1432_v45, %v1436_v46  ;;  %v1440_v53 = vld [vmem:[#allocation13 + $0x340] sm:$0xff]  ;;  %v6225_v56 = vcombine.low %v1432_v45, %v1436_v46  ;;  %v6236_v63 = vcombine.high %v1441_v59, %v1445_v60  ;;  %v1449_v4 = vld [vmem:[#allocation13 + $0x388] sm:$0xff] }
  0xc1   :  { %2883 = vmatpush1.bf16.msra.mxu0 %v6169_v62  ;;  %v1444_v54 = vld [vmem:[#allocation13 + $0x360] sm:$0xff]  ;;  %v1457_v13 = vld [vmem:[#allocation13 + $0x3c8] sm:$0xff] }
  0xc2   :  { %2884 = vmatprep.subr.bf16.mxu0 %v6178_v1  ;;  %2965 = vmatpush1.bf16.msra.mxu1 %v6171_v7  ;;  %v6234_v58 = vcombine.high %v1440_v53, %v1444_v54  ;;  %v6233_v62 = vcombine.low %v1440_v53, %v1444_v54  ;;  %v6235_v1 = vcombine.low %v1441_v59, %v1445_v60  ;;  %v1448_v2 = vld [vmem:[#allocation13 + $0x380] sm:$0xff]  ;;  %v1453_v7 = vld [vmem:[#allocation13 + $0x3a8] sm:$0xff] }
  0xc3   :  { %2966 = vmatprep.subr.bf16.mxu1 %v6180_v9  ;;  %v1452_v3 = vld [vmem:[#allocation13 + $0x3a0] sm:$0xff]  ;;  %v6243_v9 = vcombine.low %v1449_v4, %v1453_v7  ;;  %v1465_v21 = vld [vmem:[#allocation13 + $0x408] sm:$0xff] }
  0xc4   :  { %v6242_v5 = vcombine.high %v1448_v2, %v1452_v3  ;;  %v1456_v11 = vld [vmem:[#allocation13 + $0x3c0] sm:$0xff] }
  0xc5   :  { %2885 = vmatpush1.bf16.msra.mxu0 %v6177_v8  ;;  %v6241_v8 = vcombine.low %v1448_v2, %v1452_v3  ;;  %v1460_v12 = vld [vmem:[#allocation13 + $0x3e0] sm:$0xff] }
  0xc6   :  { %2886 = vmatprep.subr.bf16.mxu0 %v6186_v10  ;;  %2967 = vmatpush1.bf16.msra.mxu1 %v6179_v15  ;;  %v6244_v10 = vcombine.high %v1449_v4, %v1453_v7  ;;  %v6250_v14 = vcombine.high %v1456_v11, %v1460_v12  ;;  %v1461_v15 = vld [vmem:[#allocation13 + $0x3e8] sm:$0xff]  ;;  %v1464_v19 = vld [vmem:[#allocation13 + $0x400] sm:$0xff] }
  0xc7   :  { %2968 = vmatprep.subr.bf16.mxu1 %v6188_v17  ;;  %v6251_v17 = vcombine.low %v1457_v13, %v1461_v15  ;;  %v1468_v20 = vld [vmem:[#allocation13 + $0x420] sm:$0xff] }
  0xc8   :  { %v6258_v22 = vcombine.high %v1464_v19, %v1468_v20  ;;  %v1472_v45 = vld [vmem:[#allocation13 + $0x440] sm:$0xff] }
  0xc9   :  { %2887 = vmatpush1.bf16.msra.mxu0 %v6185_v16  ;;  %v6249_v16 = vcombine.low %v1456_v11, %v1460_v12  ;;  %v1480_v60 = vld [vmem:[#allocation13 + $0x480] sm:$0xff]  ;;  %v1493_v11 = vld [vmem:[#allocation13 + $0x4e8] sm:$0xff] }
  0xca   :  { %2888 = vmatprep.subr.bf16.mxu0 %v6194_v18  ;;  %2969 = vmatpush1.bf16.msra.mxu1 %v6187_v23  ;;  %v6252_v18 = vcombine.high %v1457_v13, %v1461_v15  ;;  %v1469_v23 = vld [vmem:[#allocation13 + $0x428] sm:$0xff] }
  0xcb   :  { %2970 = vmatprep.subr.bf16.mxu1 %v6196_v25  ;;  %v6259_v25 = vcombine.low %v1465_v21, %v1469_v23 }
  0xcd   :  { %2889 = vmatpush1.bf16.msra.mxu0 %v6193_v24  ;;  %v6257_v24 = vcombine.low %v1464_v19, %v1468_v20  ;;  %v1501_v19 = vld [vmem:[#allocation13 + $0x528] sm:$0xff] }
  0xce   :  { %2890 = vmatprep.subr.bf16.mxu0 %v6202_v26  ;;  %2971 = vmatpush1.bf16.msra.mxu1 %v6195_v31  ;;  %v6260_v26 = vcombine.high %v1465_v21, %v1469_v23  ;;  %v7672_v31 = vsub.s32 1, %v7661_v28 }
  0xcf   :  { %2972 = vmatprep.subr.bf16.mxu1 %v6204_v33  ;;  %v1188_v33 = vsub.s32 3, %v7661_v28 }
  0xd1   :  { %2891 = vmatpush1.bf16.msra.mxu0 %v6201_v32  ;;  %v1177_v32 = vrot.slane %v7669_v30, %v7664_v29  ;;  %v1189_v38 = vrot.slane %v7669_v30, %v1188_v33 }
  0xd2   :  { %2892 = vmatprep.subr.bf16.mxu0 %v6210_v34  ;;  %2973 = vmatpush1.bf16.msra.mxu1 %v6203_v39  ;;  %v1181_v34 = vrot.slane %v7669_v30, %v7672_v31 }
  0xd3   :  { %2974 = vmatprep.subr.bf16.mxu1 %v6212_v41 }
  0xd5   :  { %2893 = vmatpush1.bf16.msra.mxu0 %v6209_v40 }
  0xd6   :  { %2894 = vmatprep.subr.bf16.mxu0 %v6218_v42  ;;  %2975 = vmatpush1.bf16.msra.mxu1 %v6211_v47 }
  0xd7   :  { %2976 = vmatprep.subr.bf16.mxu1 %v6220_v49  ;;  %v1473_v49 = vld [vmem:[#allocation13 + $0x448] sm:$0xff] }
  0xd9   :  { %2895 = vmatpush1.bf16.msra.mxu0 %v6217_v48  ;;  %v1476_v48 = vld [vmem:[#allocation13 + $0x460] sm:$0xff] }
  0xda   :  { %2896 = vmatprep.subr.bf16.mxu0 %v6226_v50  ;;  %2977 = vmatpush1.bf16.msra.mxu1 %v6219_v55  ;;  %v1477_v50 = vld [vmem:[#allocation13 + $0x468] sm:$0xff]  ;;  %v6265_v3 = vcombine.low %v1472_v45, %v1476_v48 }
  0xdb   :  { %2978 = vmatprep.subr.bf16.mxu1 %v6228_v57  ;;  %v6268_v59 = vcombine.high %v1473_v49, %v1477_v50  ;;  %v6267_v4 = vcombine.low %v1473_v49, %v1477_v50  ;;  %v1525_v49 = vld [vmem:[#allocation13 + $0x5e8] sm:$0xff] }
  0xdd   :  { %2897 = vmatpush1.bf16.msra.mxu0 %v6225_v56 }
  0xde   :  { %2898 = vmatprep.subr.bf16.mxu0 %v6234_v58  ;;  %2979 = vmatpush1.bf16.msra.mxu1 %v6227_v61  ;;  %v6266_v58 = vcombine.high %v1472_v45, %v1476_v48  ;;  %v1484_v61 = vld [vmem:[#allocation13 + $0x4a0] sm:$0xff]  ;;  %v1521_v48 = vld [vmem:[#allocation13 + $0x5c8] sm:$0xff] }
  0xdf   :  { %2980 = vmatprep.subr.bf16.mxu1 %v6236_v63  ;;  %v1485_v63 = vld [vmem:[#allocation13 + $0x4a8] sm:$0xff]  ;;  %v6273_v12 = vcombine.low %v1480_v60, %v1484_v61 }
  0xe1   :  { %2899 = vmatpush1.bf16.msra.mxu0 %v6233_v62  ;;  %v1481_v62 = vld [vmem:[#allocation13 + $0x488] sm:$0xff] }
  0xe2   :  { %2981 = vmatpush1.bf16.msra.mxu1 %v6235_v1  ;;  %2900 = vmatprep.subr.bf16.mxu0 %v6242_v5  ;;  %v6274_v5 = vcombine.high %v1480_v60, %v1484_v61  ;;  %v6276_v7 = vcombine.high %v1481_v62, %v1485_v63  ;;  %v6275_v13 = vcombine.low %v1481_v62, %v1485_v63 }
  0xe3   :  { %2982 = vmatprep.subr.bf16.mxu1 %v6244_v10  ;;  %v1489_v10 = vld [vmem:[#allocation13 + $0x4c8] sm:$0xff]  ;;  %v6315_v61 = vcombine.low %v1521_v48, %v1525_v49 }
  0xe4   :  { %v6284_v15 = vcombine.high %v1489_v10, %v1493_v11  ;;  %v6283_v21 = vcombine.low %v1489_v10, %v1493_v11  ;;  %v1544_v11 = vld [vmem:[#allocation13 + $0x680] sm:$0xff] }
  0xe5   :  { %2901 = vmatpush1.bf16.msra.mxu0 %v6241_v8  ;;  %v1488_v8 = vld [vmem:[#allocation13 + $0x4c0] sm:$0xff] }
  0xe6   :  { %2983 = vmatpush1.bf16.msra.mxu1 %v6243_v9  ;;  %2902 = vmatprep.subr.bf16.mxu0 %v6250_v14  ;;  %v1492_v9 = vld [vmem:[#allocation13 + $0x4e0] sm:$0xff] }
  0xe7   :  { %2984 = vmatprep.subr.bf16.mxu1 %v6252_v18  ;;  %v6282_v14 = vcombine.high %v1488_v8, %v1492_v9  ;;  %v1497_v18 = vld [vmem:[#allocation13 + $0x508] sm:$0xff]  ;;  %v6281_v20 = vcombine.low %v1488_v8, %v1492_v9 }
  0xe8   :  { %v6292_v23 = vcombine.high %v1497_v18, %v1501_v19 }
  0xe9   :  { %2903 = vmatpush1.bf16.msra.mxu0 %v6249_v16  ;;  %v1496_v16 = vld [vmem:[#allocation13 + $0x500] sm:$0xff] }
  0xea   :  { %2985 = vmatpush1.bf16.msra.mxu1 %v6251_v17  ;;  %2913 = vmatprep.subr.bf16.mxu0 %v6258_v22  ;;  %v1500_v17 = vld [vmem:[#allocation13 + $0x520] sm:$0xff] }
  0xeb   :  { %2995 = vmatprep.subr.bf16.mxu1 %v6260_v26  ;;  %v6290_v22 = vcombine.high %v1496_v16, %v1500_v17  ;;  %v1505_v26 = vld [vmem:[#allocation13 + $0x548] sm:$0xff]  ;;  %v6289_v33 = vcombine.low %v1496_v16, %v1500_v17 }
 0x17f   :  { %v1272_v35 = vpop.f32.mrb[0].mxu0 }
 0x180   :  { %v1273_v36 = vadd.f32 %v1272_v35, %v1177_v32  ;;  %v1274_v37 = vpop.f32.mrb[1].mxu0  ;;  %v7680_v43 = vpop.f32.mrb[0].mxu1  ;;  %v1509_v32 = vld [vmem:[#allocation13 + $0x568] sm:$0xff] }
 0x181   :  { %v1275_v39 = vadd.f32 %v1274_v37, %v1181_v34  ;;  %v1276_v40 = vpop.f32.mrb[2].mxu0  ;;  %v1315_v46 = vpop.f32.mrb[1].mxu1  ;;  %v6291_v34 = vcombine.low %v1497_v18, %v1501_v19  ;;  %v1512_v37 = vld [vmem:[#allocation13 + $0x580] sm:$0xff] }
 0x182   :  { %vm1320_vm1 = vcmp.gt.f32.partialorder %v1273_v36, 0.0  ;;  %v1324_v41 = vmul.f32 0.2, %v1273_v36  ;;  %v1277_v42 = vpop.f32.mrb[3].mxu0  ;;  %v1316_v51 = vadd.f32 %v1315_v46, %v1189_v38  ;;  %v1317_v52 = vpop.f32.mrb[2].mxu1  ;;  %v1516_v38 = vld [vmem:[#allocation13 + $0x5a0] sm:$0xff] }
 0x183   :  { %vm1321_vm2 = vcmp.gt.f32.partialorder %v1275_v39, 0.0  ;;  %v1325_v44 = vmul.f32 0.2, %v1275_v39  ;;  %v1318_v54 = vpop.f32.mrb[3].mxu1  ;;  %v1517_v40 = vld [vmem:[#allocation13 + $0x5a8] sm:$0xff]  ;;  %v6299_v42 = vcombine.low %v1505_v26, %v1509_v32  ;;  %v1520_v46 = vld [vmem:[#allocation13 + $0x5c0] sm:$0xff]  ;;  %v6305_v50 = vcombine.low %v1512_v37, %v1516_v38 }
 0x184   :  { %v1328_v47 = vsel %vm1320_vm1, %v1273_v36, %v1324_v41  ;;  %vm1323_vm3 = vcmp.gt.f32.partialorder %v1316_v51, 0.0  ;;  %v1327_v56 = vmul.f32 0.2, %v1316_v51  ;;  %v6300_v36 = vcombine.high %v1505_v26, %v1509_v32  ;;  %v1528_v54 = vld [vmem:[#allocation13 + $0x600] sm:$0xff] }
 0x185   :  { %v1329_v53 = vsel %vm1321_vm2, %v1275_v39, %v1325_v44  ;;  %v7684_v57 = vpack.c.bf16 %v1328_v47, %v1328_v47  ;;  %v1513_v39 = vld [vmem:[#allocation13 + $0x588] sm:$0xff]  ;;  %v6306_v44 = vcombine.high %v1512_v37, %v1516_v38  ;;  %v1524_v47 = vld [vmem:[#allocation13 + $0x5e0] sm:$0xff] }
 0x186   :  { %v7682_v55 = vpack.c.bf16 %v1329_v53, %v1329_v53  ;;  %v1331_v1 = vsel %vm1323_vm3, %v1316_v51, %v1327_v56  ;;  %v6308_v45 = vcombine.high %v1513_v39, %v1517_v40  ;;  %v6307_v51 = vcombine.low %v1513_v39, %v1517_v40  ;;  %v1532_v56 = vld [vmem:[#allocation13 + $0x620] sm:$0xff] }
 0x187   :  { %v7690_v2 = vpack.c.bf16 %v1331_v1, %v1331_v1  ;;  %v6314_v52 = vcombine.high %v1520_v46, %v1524_v47  ;;  %v6316_v53 = vcombine.high %v1521_v48, %v1525_v49  ;;  %v6313_v60 = vcombine.low %v1520_v46, %v1524_v47  ;;  %v1536_v1 = vld [vmem:[#allocation13 + $0x640] sm:$0xff] }
 0x188   :  { %2904 = vmatprep.mubr.bf16.mxu0 %v7682_v55  ;;  %2986 = vmatprep.mubr.bf16.mxu1 %v7682_v55  ;;  %v6322_v62 = vcombine.high %v1528_v54, %v1532_v56  ;;  %v1552_v19 = vld [vmem:[#allocation13 + $0x6c0] sm:$0xff] }
 0x189   :  { %2905 = vmatmul.mubr.bf16.vlgmr.msra.gmra.mrb[4].mxu0 %v7684_v57  ;;  %2987 = vmatmul.mubr.bf16.vlgmr.msra.gmra.mrb[4].mxu1 %v7684_v57  ;;  %v1560_v32 = vld [vmem:[#allocation13 + $0x700] sm:$0xff] }
 0x18a   :  { %2914 = vmatpush1.bf16.msra.mxu0 %v6257_v24  ;;  %2996 = vmatpush1.bf16.msra.mxu1 %v6259_v25  ;;  %v1504_v24 = vld [vmem:[#allocation13 + $0x540] sm:$0xff] }
 0x18b   :  { %2915 = vmatprep.subr.bf16.mxu0 %v6266_v58  ;;  %2997 = vmatprep.subr.bf16.mxu1 %v6268_v59  ;;  %v1508_v25 = vld [vmem:[#allocation13 + $0x560] sm:$0xff]  ;;  %v1529_v58 = vld [vmem:[#allocation13 + $0x608] sm:$0xff] }
 0x18c   :  { %2945 = vmatprep.mubr.bf16.mxu0 %v7690_v2  ;;  %3027 = vmatprep.mubr.bf16.mxu1 %v7690_v2  ;;  %v6298_v35 = vcombine.high %v1504_v24, %v1508_v25  ;;  %v6297_v41 = vcombine.low %v1504_v24, %v1508_v25  ;;  %v1533_v59 = vld [vmem:[#allocation13 + $0x628] sm:$0xff]  ;;  %v1568_v40 = vld [vmem:[#allocation13 + $0x740] sm:$0xff] }
 0x18d   :  { %v6324_v63 = vcombine.high %v1529_v58, %v1533_v59  ;;  %v6323_v8 = vcombine.low %v1529_v58, %v1533_v59 }
 0x18e   :  { %2916 = vmatpush1.bf16.msra.mxu0 %v6265_v3  ;;  %2998 = vmatpush1.bf16.msra.mxu1 %v6267_v4  ;;  %v1540_v3 = vld [vmem:[#allocation13 + $0x660] sm:$0xff]  ;;  %v1537_v4 = vld [vmem:[#allocation13 + $0x648] sm:$0xff] }
 0x18f   :  { %2917 = vmatprep.subr.bf16.mxu0 %v6274_v5  ;;  %2999 = vmatprep.subr.bf16.mxu1 %v6276_v7  ;;  %v1541_v5 = vld [vmem:[#allocation13 + $0x668] sm:$0xff]  ;;  %v6321_v7 = vcombine.low %v1528_v54, %v1532_v56  ;;  %v6330_v9 = vcombine.high %v1536_v1, %v1540_v3 }
 0x190   :  { %v6332_v10 = vcombine.high %v1537_v4, %v1541_v5  ;;  %v6331_v16 = vcombine.low %v1537_v4, %v1541_v5  ;;  %v1581_v54 = vld [vmem:[#allocation13 + $0x7a8] sm:$0xff] }
 0x192   :  { %2918 = vmatpush1.bf16.msra.mxu0 %v6273_v12  ;;  %3000 = vmatpush1.bf16.msra.mxu1 %v6275_v13  ;;  %v1548_v12 = vld [vmem:[#allocation13 + $0x6a0] sm:$0xff]  ;;  %v1545_v13 = vld [vmem:[#allocation13 + $0x688] sm:$0xff] }
 0x193   :  { %2919 = vmatprep.subr.bf16.mxu0 %v6282_v14  ;;  %3001 = vmatprep.subr.bf16.mxu1 %v6284_v15  ;;  %v1549_v14 = vld [vmem:[#allocation13 + $0x6a8] sm:$0xff]  ;;  %v6329_v15 = vcombine.low %v1536_v1, %v1540_v3  ;;  %v6338_v17 = vcombine.high %v1544_v11, %v1548_v12 }
 0x194   :  { %v6340_v18 = vcombine.high %v1545_v13, %v1549_v14  ;;  %v6339_v24 = vcombine.low %v1545_v13, %v1549_v14  ;;  %v1585_v1 = vld [vmem:[#allocation13 + $0x7c8] sm:$0xff] }
 0x195   :  { %v1589_v3 = vld [vmem:[#allocation13 + $0x7e8] sm:$0xff] }
 0x196   :  { %2920 = vmatpush1.bf16.msra.mxu0 %v6281_v20  ;;  %3002 = vmatpush1.bf16.msra.mxu1 %v6283_v21  ;;  %v1556_v20 = vld [vmem:[#allocation13 + $0x6e0] sm:$0xff]  ;;  %v1553_v21 = vld [vmem:[#allocation13 + $0x6c8] sm:$0xff]  ;;  %v6379_v13 = vcombine.low %v1585_v1, %v1589_v3 }
 0x197   :  { %2921 = vmatprep.subr.bf16.mxu0 %v6290_v22  ;;  %3003 = vmatprep.subr.bf16.mxu1 %v6292_v23  ;;  %v1557_v22 = vld [vmem:[#allocation13 + $0x6e8] sm:$0xff]  ;;  %v6337_v23 = vcombine.low %v1544_v11, %v1548_v12  ;;  %v6346_v25 = vcombine.high %v1552_v19, %v1556_v20  ;;  %v1339_v11 = vld [vmem:[#allocation13 + $0x18] sm:$0xff] }
 0x198   :  { %v6348_v26 = vcombine.high %v1553_v21, %v1557_v22  ;;  %v6347_v37 = vcombine.low %v1553_v21, %v1557_v22  ;;  %v1343_v12 = vld [vmem:[#allocation13 + $0x38] sm:$0xff] }
 0x19a   :  { %2922 = vmatpush1.bf16.msra.mxu0 %v6289_v33  ;;  %3004 = vmatpush1.bf16.msra.mxu1 %v6291_v34  ;;  %v1564_v33 = vld [vmem:[#allocation13 + $0x720] sm:$0xff]  ;;  %v1561_v34 = vld [vmem:[#allocation13 + $0x708] sm:$0xff] }
 0x19b   :  { %2923 = vmatprep.subr.bf16.mxu0 %v6298_v35  ;;  %3005 = vmatprep.subr.bf16.mxu1 %v6300_v36  ;;  %v1565_v35 = vld [vmem:[#allocation13 + $0x728] sm:$0xff]  ;;  %v6345_v36 = vcombine.low %v1552_v19, %v1556_v20  ;;  %v6354_v38 = vcombine.high %v1560_v32, %v1564_v33  ;;  %v6353_v46 = vcombine.low %v1560_v32, %v1564_v33  ;;  %v1347_v19 = vld [vmem:[#allocation13 + $0x58] sm:$0xff]  ;;  %v1358_v32 = vld [vmem:[#allocation13 + $0xb0] sm:$0xff] }
 0x19c   :  { %v6356_v39 = vcombine.high %v1561_v34, %v1565_v35  ;;  %v6355_v47 = vcombine.low %v1561_v34, %v1565_v35  ;;  %v1351_v20 = vld [vmem:[#allocation13 + $0x78] sm:$0xff] }
 0x19d   :  { %v1355_v33 = vld [vmem:[#allocation13 + $0x98] sm:$0xff] }
 0x19e   :  { %2924 = vmatpush1.bf16.msra.mxu0 %v6297_v41  ;;  %3006 = vmatpush1.bf16.msra.mxu1 %v6299_v42  ;;  %v1184_v41 = vsub.s32 2, %v7661_v28  ;;  %v1572_v42 = vld [vmem:[#allocation13 + $0x760] sm:$0xff]  ;;  %v1359_v34 = vld [vmem:[#allocation13 + $0xb8] sm:$0xff] }
 0x19f   :  { %2925 = vmatprep.subr.bf16.mxu0 %v6306_v44  ;;  %3007 = vmatprep.subr.bf16.mxu1 %v6308_v45  ;;  %v1569_v44 = vld [vmem:[#allocation13 + $0x748] sm:$0xff]  ;;  %v6362_v48 = vcombine.high %v1568_v40, %v1572_v42  ;;  %v6361_v56 = vcombine.low %v1568_v40, %v1572_v42  ;;  %v1366_v40 = vld [vmem:[#allocation13 + $0xf0] sm:$0xff]  ;;  %v1367_v42 = vld [vmem:[#allocation13 + $0xf8] sm:$0xff] }
 0x1a0   :  { %v1573_v45 = vld [vmem:[#allocation13 + $0x768] sm:$0xff] }
 0x1a1   :  { %v6364_v49 = vcombine.high %v1569_v44, %v1573_v45  ;;  %v6363_v58 = vcombine.low %v1569_v44, %v1573_v45  ;;  %v6151_v45 = vcombine.low %v1355_v33, %v1359_v34 }
 0x1a2   :  { %2926 = vmatpush1.bf16.msra.mxu0 %v6305_v50  ;;  %3008 = vmatpush1.bf16.msra.mxu1 %v6307_v51  ;;  %v1576_v50 = vld [vmem:[#allocation13 + $0x780] sm:$0xff]  ;;  %v1185_v51 = vrot.slane %v7669_v30, %v1184_v41  ;;  %v1363_v41 = vld [vmem:[#allocation13 + $0xd8] sm:$0xff] }
 0x1a3   :  { %2927 = vmatprep.subr.bf16.mxu0 %v6314_v52  ;;  %3009 = vmatprep.subr.bf16.mxu1 %v6316_v53  ;;  %v1580_v52 = vld [vmem:[#allocation13 + $0x7a0] sm:$0xff]  ;;  %v1577_v53 = vld [vmem:[#allocation13 + $0x788] sm:$0xff] }
 0x1a4   :  { %v6370_v59 = vcombine.high %v1576_v50, %v1580_v52  ;;  %v6369_v30 = vcombine.low %v1576_v50, %v1580_v52  ;;  %v6371_v4 = vcombine.low %v1577_v53, %v1581_v54  ;;  %v1375_v50 = vld [vmem:[#allocation13 + $0x138] sm:$0xff]  ;;  %v6159_v52 = vcombine.low %v1363_v41, %v1367_v42 }
 0x1a6   :  { %2928 = vmatpush1.bf16.msra.mxu0 %v6313_v60  ;;  %3010 = vmatpush1.bf16.msra.mxu1 %v6315_v61  ;;  %v6372_v60 = vcombine.high %v1577_v53, %v1581_v54  ;;  %v1584_v61 = vld [vmem:[#allocation13 + $0x7c0] sm:$0xff] }
 0x1a7   :  { %2929 = vmatprep.subr.bf16.mxu0 %v6322_v62  ;;  %3011 = vmatprep.subr.bf16.mxu1 %v6324_v63  ;;  %v1314_v62 = vadd.f32 %v7680_v43, %v1185_v51  ;;  %v1588_v63 = vld [vmem:[#allocation13 + $0x7e0] sm:$0xff] }
 0x1a8   :  { %v6378_v5 = vcombine.high %v1584_v61, %v1588_v63  ;;  %v6377_v43 = vcombine.low %v1584_v61, %v1588_v63 }
 0x1a9   :  { %vm1322_vm4 = vcmp.gt.f32.partialorder %v1314_v62, 0.0 }
 0x1aa   :  { %2930 = vmatpush1.bf16.msra.mxu0 %v6321_v7  ;;  %3012 = vmatpush1.bf16.msra.mxu1 %v6323_v8  ;;  %v6380_v7 = vcombine.high %v1585_v1, %v1589_v3  ;;  %v1338_v8 = vld [vmem:[#allocation13 + $0x10] sm:$0xff] }
 0x1ab   :  { %2931 = vmatprep.subr.bf16.mxu0 %v6330_v9  ;;  %3013 = vmatprep.subr.bf16.mxu1 %v6332_v10  ;;  %v1326_v9 = vmul.f32 0.2, %v1314_v62  ;;  %v1342_v10 = vld [vmem:[#allocation13 + $0x30] sm:$0xff] }
 0x1ac   :  { %v6134_v14 = vcombine.high %v1338_v8, %v1342_v10  ;;  %v6133_v21 = vcombine.low %v1338_v8, %v1342_v10  ;;  %v1386_v3 = vld [vmem:[#allocation13 + $0x190] sm:$0xff] }
 0x1ae   :  { %2932 = vmatpush1.bf16.msra.mxu0 %v6329_v15  ;;  %3014 = vmatpush1.bf16.msra.mxu1 %v6331_v16  ;;  %v6136_v15 = vcombine.high %v1339_v11, %v1343_v12  ;;  %v1330_v16 = vsel %vm1322_vm4, %v1314_v62, %v1326_v9 }
 0x1af   :  { %2933 = vmatprep.subr.bf16.mxu0 %v6338_v17  ;;  %3015 = vmatprep.subr.bf16.mxu1 %v6340_v18  ;;  %v1346_v17 = vld [vmem:[#allocation13 + $0x50] sm:$0xff]  ;;  %v7697_v22 = vpack.c.bf16 %v1330_v16, %v1330_v16 }
 0x1b0   :  { %v1350_v18 = vld [vmem:[#allocation13 + $0x70] sm:$0xff] }
 0x1b1   :  { %v6141_v35 = vcombine.low %v1346_v17, %v1350_v18 }
 0x1b2   :  { %2934 = vmatpush1.bf16.msra.mxu0 %v6337_v23  ;;  %3016 = vmatpush1.bf16.msra.mxu1 %v6339_v24  ;;  %v6135_v23 = vcombine.low %v1339_v11, %v1343_v12  ;;  %v6142_v24 = vcombine.high %v1346_v17, %v1350_v18  ;;  %v1394_v11 = vld [vmem:[#allocation13 + $0x1d0] sm:$0xff] }
 0x1b3   :  { %2935 = vmatprep.subr.bf16.mxu0 %v6346_v25  ;;  %3017 = vmatprep.subr.bf16.mxu1 %v6348_v26  ;;  %v6144_v25 = vcombine.high %v1347_v19, %v1351_v20  ;;  %v1354_v26 = vld [vmem:[#allocation13 + $0x90] sm:$0xff] }
 0x1b4   :  { %v6149_v44 = vcombine.low %v1354_v26, %v1358_v32  ;;  %v1398_v12 = vld [vmem:[#allocation13 + $0x1f0] sm:$0xff] }
 0x1b5   :  { %v6190_v16 = vcombine.high %v1394_v11, %v1398_v12  ;;  %v1402_v18 = vld [vmem:[#allocation13 + $0x210] sm:$0xff] }
 0x1b6   :  { %2936 = vmatpush1.bf16.msra.mxu0 %v6345_v36  ;;  %3018 = vmatpush1.bf16.msra.mxu1 %v6347_v37  ;;  %v6143_v36 = vcombine.low %v1347_v19, %v1351_v20  ;;  %v6150_v37 = vcombine.high %v1354_v26, %v1358_v32  ;;  %v1406_v19 = vld [vmem:[#allocation13 + $0x230] sm:$0xff]  ;;  %v1403_v20 = vld [vmem:[#allocation13 + $0x218] sm:$0xff] }
 0x1b7   :  { %2937 = vmatprep.subr.bf16.mxu0 %v6354_v38  ;;  %3019 = vmatprep.subr.bf16.mxu1 %v6356_v39  ;;  %v6152_v38 = vcombine.high %v1355_v33, %v1359_v34  ;;  %v1362_v39 = vld [vmem:[#allocation13 + $0xd0] sm:$0xff]  ;;  %v1411_v34 = vld [vmem:[#allocation13 + $0x258] sm:$0xff] }
 0x1b8   :  { %v6157_v51 = vcombine.low %v1362_v39, %v1366_v40  ;;  %v1410_v32 = vld [vmem:[#allocation13 + $0x250] sm:$0xff] }
 0x1b9   :  { %v1414_v33 = vld [vmem:[#allocation13 + $0x270] sm:$0xff] }
 0x1ba   :  { %2938 = vmatpush1.bf16.msra.mxu0 %v6353_v46  ;;  %3020 = vmatpush1.bf16.msra.mxu1 %v6355_v47  ;;  %v6158_v46 = vcombine.high %v1362_v39, %v1366_v40  ;;  %v6160_v47 = vcombine.high %v1363_v41, %v1367_v42  ;;  %v1418_v40 = vld [vmem:[#allocation13 + $0x290] sm:$0xff]  ;;  %v1419_v42 = vld [vmem:[#allocation13 + $0x298] sm:$0xff] }
 0x1bb   :  { %2939 = vmatprep.subr.bf16.mxu0 %v6362_v48  ;;  %3021 = vmatprep.subr.bf16.mxu1 %v6364_v49  ;;  %v1370_v48 = vld [vmem:[#allocation13 + $0x110] sm:$0xff] }
 0x1bc   :  { %v1374_v49 = vld [vmem:[#allocation13 + $0x130] sm:$0xff] }
 0x1bd   :  { %v6166_v53 = vcombine.high %v1370_v48, %v1374_v49  ;;  %v6165_v61 = vcombine.low %v1370_v48, %v1374_v49  ;;  %v1422_v41 = vld [vmem:[#allocation13 + $0x2b0] sm:$0xff] }
 0x1be   :  { %2940 = vmatpush1.bf16.msra.mxu0 %v6361_v56  ;;  %3022 = vmatpush1.bf16.msra.mxu1 %v6363_v58  ;;  %v1378_v56 = vld [vmem:[#allocation13 + $0x150] sm:$0xff] }
 0x1bf   :  { %2941 = vmatprep.subr.bf16.mxu0 %v6370_v59  ;;  %3023 = vmatprep.subr.bf16.mxu1 %v6372_v60  ;;  %v1382_v58 = vld [vmem:[#allocation13 + $0x170] sm:$0xff]  ;;  %v1379_v59 = vld [vmem:[#allocation13 + $0x158] sm:$0xff] }
 0x1c0   :  { %v1383_v60 = vld [vmem:[#allocation13 + $0x178] sm:$0xff]  ;;  %v6174_v63 = vcombine.high %v1378_v56, %v1382_v58  ;;  %v1426_v49 = vld [vmem:[#allocation13 + $0x2d0] sm:$0xff] }
 0x1c1   :  { %v6176_v1 = vcombine.high %v1379_v59, %v1383_v60  ;;  %v6175_v8 = vcombine.low %v1379_v59, %v1383_v60  ;;  %v1438_v59 = vld [vmem:[#allocation13 + $0x330] sm:$0xff]  ;;  %v1435_v60 = vld [vmem:[#allocation13 + $0x318] sm:$0xff] }
 0x1c2   :  { %2942 = vmatpush1.bf16.msra.mxu0 %v6369_v30  ;;  %3024 = vmatpush1.bf16.msra.mxu1 %v6371_v4  ;;  %v1390_v30 = vld [vmem:[#allocation13 + $0x1b0] sm:$0xff]  ;;  %v1387_v4 = vld [vmem:[#allocation13 + $0x198] sm:$0xff] }
 0x1c3   :  { %2943 = vmatprep.subr.bf16.mxu0 %v6378_v5  ;;  %3025 = vmatprep.subr.bf16.mxu1 %v6380_v7  ;;  %v1391_v5 = vld [vmem:[#allocation13 + $0x1b8] sm:$0xff]  ;;  %v6173_v7 = vcombine.low %v1378_v56, %v1382_v58  ;;  %v6182_v9 = vcombine.high %v1386_v3, %v1390_v30  ;;  %v1434_v58 = vld [vmem:[#allocation13 + $0x310] sm:$0xff] }
 0x1c4   :  { %v6184_v10 = vcombine.high %v1387_v4, %v1391_v5 }
 0x1c6   :  { %2944 = vmatpush1.bf16.msra.mxu0 %v6377_v43  ;;  %3026 = vmatpush1.bf16.msra.mxu1 %v6379_v13  ;;  %v1395_v43 = vld [vmem:[#allocation13 + $0x1d8] sm:$0xff] }
 0x1c7   :  { %3036 = vmatprep.subr.bf16.mxu0 %v6134_v14  ;;  %3118 = vmatprep.subr.bf16.mxu1 %v6136_v15  ;;  %v1399_v13 = vld [vmem:[#allocation13 + $0x1f8] sm:$0xff]  ;;  %v6181_v14 = vcombine.low %v1386_v3, %v1390_v30  ;;  %v6183_v15 = vcombine.low %v1387_v4, %v1391_v5  ;;  %v1442_v30 = vld [vmem:[#allocation13 + $0x350] sm:$0xff] }
 0x1c8   :  { %v6192_v17 = vcombine.high %v1395_v43, %v1399_v13  ;;  %v1446_v4 = vld [vmem:[#allocation13 + $0x370] sm:$0xff]  ;;  %v1443_v5 = vld [vmem:[#allocation13 + $0x358] sm:$0xff] }
 0x1c9   :  { %2946 = vmatmul.mubr.bf16.vlgmr.msra.gmra.mrb[4].mxu0 %v7697_v22  ;;  %3028 = vmatmul.mubr.bf16.vlgmr.msra.gmra.mrb[4].mxu1 %v7697_v22 }
 0x1ca   :  { %3037 = vmatpush1.bf16.msra.mxu0 %v6133_v21  ;;  %3068 = vmatprep.mubr.bf16.mxu0 %v7682_v55  ;;  %v1407_v21 = vld [vmem:[#allocation13 + $0x238] sm:$0xff] }
 0x1cb   :  { %3119 = vmatpush1.bf16.msra.mxu1 %v6135_v23  ;;  %3150 = vmatprep.mubr.bf16.mxu1 %v7682_v55  ;;  %v1371_v55 = vld [vmem:[#allocation13 + $0x118] sm:$0xff]  ;;  %v6189_v23 = vcombine.low %v1394_v11, %v1398_v12  ;;  %v6200_v26 = vcombine.high %v1403_v20, %v1407_v21  ;;  %v1450_v12 = vld [vmem:[#allocation13 + $0x390] sm:$0xff] }
 0x1cc   :  { %3038 = vmatprep.subr.bf16.mxu0 %v6142_v24  ;;  %3120 = vmatprep.subr.bf16.mxu1 %v6144_v25  ;;  %v6168_v54 = vcombine.high %v1371_v55, %v1375_v50  ;;  %v6167_v62 = vcombine.low %v1371_v55, %v1375_v50  ;;  %v6191_v24 = vcombine.low %v1395_v43, %v1399_v13  ;;  %v1430_v55 = vld [vmem:[#allocation13 + $0x2f0] sm:$0xff]  ;;  %v1427_v50 = vld [vmem:[#allocation13 + $0x2d8] sm:$0xff] }
 0x1cd   :  { %v6198_v25 = vcombine.high %v1402_v18, %v1406_v19  ;;  %v1454_v43 = vld [vmem:[#allocation13 + $0x3b0] sm:$0xff]  ;;  %v1451_v13 = vld [vmem:[#allocation13 + $0x398] sm:$0xff] }
 0x1ce   :  { %3039 = vmatpush1.bf16.msra.mxu0 %v6141_v35  ;;  %v1415_v35 = vld [vmem:[#allocation13 + $0x278] sm:$0xff] }
 0x1cf   :  { %3121 = vmatpush1.bf16.msra.mxu1 %v6143_v36  ;;  %3040 = vmatprep.subr.bf16.mxu0 %v6150_v37  ;;  %v6197_v36 = vcombine.low %v1402_v18, %v1406_v19  ;;  %v6199_v37 = vcombine.low %v1403_v20, %v1407_v21  ;;  %v6208_v39 = vcombine.high %v1411_v34, %v1415_v35  ;;  %v1458_v19 = vld [vmem:[#allocation13 + $0x3d0] sm:$0xff]  ;;  %v1459_v21 = vld [vmem:[#allocation13 + $0x3d8] sm:$0xff] }
 0x1d0   :  { %3122 = vmatprep.subr.bf16.mxu1 %v6152_v38  ;;  %v6206_v38 = vcombine.high %v1410_v32, %v1414_v33  ;;  %v1462_v20 = vld [vmem:[#allocation13 + $0x3f0] sm:$0xff] }
 0x1d2   :  { %3041 = vmatpush1.bf16.msra.mxu0 %v6149_v44  ;;  %v1423_v44 = vld [vmem:[#allocation13 + $0x2b8] sm:$0xff] }
 0x1d3   :  { %3123 = vmatpush1.bf16.msra.mxu1 %v6151_v45  ;;  %3042 = vmatprep.subr.bf16.mxu0 %v6158_v46  ;;  %v6205_v45 = vcombine.low %v1410_v32, %v1414_v33  ;;  %v6207_v46 = vcombine.low %v1411_v34, %v1415_v35  ;;  %v6216_v48 = vcombine.high %v1419_v42, %v1423_v44  ;;  %v1466_v33 = vld [vmem:[#allocation13 + $0x410] sm:$0xff]  ;;  %v1467_v35 = vld [vmem:[#allocation13 + $0x418] sm:$0xff] }
 0x1d4   :  { %3124 = vmatprep.subr.bf16.mxu1 %v6160_v47  ;;  %v6214_v47 = vcombine.high %v1418_v40, %v1422_v41  ;;  %v1470_v34 = vld [vmem:[#allocation13 + $0x430] sm:$0xff] }
 0x1d6   :  { %3043 = vmatpush1.bf16.msra.mxu0 %v6157_v51  ;;  %v1431_v51 = vld [vmem:[#allocation13 + $0x2f8] sm:$0xff] }
 0x1d7   :  { %3125 = vmatpush1.bf16.msra.mxu1 %v6159_v52  ;;  %3044 = vmatprep.subr.bf16.mxu0 %v6166_v53  ;;  %v6213_v52 = vcombine.low %v1418_v40, %v1422_v41  ;;  %v6215_v53 = vcombine.low %v1419_v42, %v1423_v44  ;;  %v6224_v56 = vcombine.high %v1427_v50, %v1431_v51  ;;  %v1474_v41 = vld [vmem:[#allocation13 + $0x450] sm:$0xff] }
 0x1d8   :  { %3126 = vmatprep.subr.bf16.mxu1 %v6168_v54  ;;  %v6222_v54 = vcombine.high %v1426_v49, %v1430_v55  ;;  %v1478_v42 = vld [vmem:[#allocation13 + $0x470] sm:$0xff]  ;;  %v6261_v44 = vcombine.low %v1466_v33, %v1470_v34 }
 0x1da   :  { %3045 = vmatpush1.bf16.msra.mxu0 %v6165_v61  ;;  %v1439_v61 = vld [vmem:[#allocation13 + $0x338] sm:$0xff] }
 0x1db   :  { %3127 = vmatpush1.bf16.msra.mxu1 %v6167_v62  ;;  %3046 = vmatprep.subr.bf16.mxu0 %v6174_v63  ;;  %v6221_v62 = vcombine.low %v1426_v49, %v1430_v55  ;;  %v6223_v63 = vcombine.low %v1427_v50, %v1431_v51  ;;  %v6232_v3 = vcombine.high %v1435_v60, %v1439_v61  ;;  %v1482_v49 = vld [vmem:[#allocation13 + $0x490] sm:$0xff]  ;;  %v1483_v51 = vld [vmem:[#allocation13 + $0x498] sm:$0xff] }
 0x1dc   :  { %3128 = vmatprep.subr.bf16.mxu1 %v6176_v1  ;;  %v6230_v1 = vcombine.high %v1434_v58, %v1438_v59  ;;  %v1486_v55 = vld [vmem:[#allocation13 + $0x4b0] sm:$0xff] }
 0x1de   :  { %3047 = vmatpush1.bf16.msra.mxu0 %v6173_v7  ;;  %v1447_v7 = vld [vmem:[#allocation13 + $0x378] sm:$0xff] }
 0x1df   :  { %3129 = vmatpush1.bf16.msra.mxu1 %v6175_v8  ;;  %3048 = vmatprep.subr.bf16.mxu0 %v6182_v9  ;;  %v6229_v8 = vcombine.low %v1434_v58, %v1438_v59  ;;  %v6231_v9 = vcombine.low %v1435_v60, %v1439_v61  ;;  %v6240_v11 = vcombine.high %v1443_v5, %v1447_v7  ;;  %v1490_v59 = vld [vmem:[#allocation13 + $0x4d0] sm:$0xff]  ;;  %v1491_v61 = vld [vmem:[#allocation13 + $0x4d8] sm:$0xff] }
 0x1e0   :  { %3130 = vmatprep.subr.bf16.mxu1 %v6184_v10  ;;  %v6238_v10 = vcombine.high %v1442_v30, %v1446_v4  ;;  %v1494_v60 = vld [vmem:[#allocation13 + $0x4f0] sm:$0xff] }
 0x1e2   :  { %3049 = vmatpush1.bf16.msra.mxu0 %v6181_v14  ;;  %v1455_v14 = vld [vmem:[#allocation13 + $0x3b8] sm:$0xff] }
 0x1e3   :  { %3131 = vmatpush1.bf16.msra.mxu1 %v6183_v15  ;;  %3050 = vmatprep.subr.bf16.mxu0 %v6190_v16  ;;  %v6237_v15 = vcombine.low %v1442_v30, %v1446_v4  ;;  %v6239_v16 = vcombine.low %v1443_v5, %v1447_v7  ;;  %v6248_v18 = vcombine.high %v1451_v13, %v1455_v14  ;;  %v1498_v30 = vld [vmem:[#allocation13 + $0x510] sm:$0xff]  ;;  %v1499_v5 = vld [vmem:[#allocation13 + $0x518] sm:$0xff] }
 0x1e4   :  { %3132 = vmatprep.subr.bf16.mxu1 %v6192_v17  ;;  %v6246_v17 = vcombine.high %v1450_v12, %v1454_v43  ;;  %v1502_v4 = vld [vmem:[#allocation13 + $0x530] sm:$0xff]  ;;  %v1503_v7 = vld [vmem:[#allocation13 + $0x538] sm:$0xff] }
 0x1e6   :  { %3051 = vmatpush1.bf16.msra.mxu0 %v6189_v23  ;;  %v1463_v23 = vld [vmem:[#allocation13 + $0x3f8] sm:$0xff] }
 0x1e7   :  { %3133 = vmatpush1.bf16.msra.mxu1 %v6191_v24  ;;  %3052 = vmatprep.subr.bf16.mxu0 %v6198_v25  ;;  %v6245_v24 = vcombine.low %v1450_v12, %v1454_v43  ;;  %v6247_v25 = vcombine.low %v1451_v13, %v1455_v14  ;;  %v6256_v32 = vcombine.high %v1459_v21, %v1463_v23  ;;  %v1510_v12 = vld [vmem:[#allocation13 + $0x570] sm:$0xff]  ;;  %v1507_v43 = vld [vmem:[#allocation13 + $0x558] sm:$0xff] }
 0x1e8   :  { %3134 = vmatprep.subr.bf16.mxu1 %v6200_v26  ;;  %v6254_v26 = vcombine.high %v1458_v19, %v1462_v20  ;;  %v1511_v13 = vld [vmem:[#allocation13 + $0x578] sm:$0xff]  ;;  %v6293_v14 = vcombine.low %v1498_v30, %v1502_v4 }
 0x1ea   :  { %3053 = vmatpush1.bf16.msra.mxu0 %v6197_v36  ;;  %v1471_v36 = vld [vmem:[#allocation13 + $0x438] sm:$0xff] }
 0x1eb   :  { %3135 = vmatpush1.bf16.msra.mxu1 %v6199_v37  ;;  %3054 = vmatprep.subr.bf16.mxu0 %v6206_v38  ;;  %v6253_v37 = vcombine.low %v1458_v19, %v1462_v20  ;;  %v6255_v38 = vcombine.low %v1459_v21, %v1463_v23  ;;  %v6264_v40 = vcombine.high %v1467_v35, %v1471_v36  ;;  %v1518_v19 = vld [vmem:[#allocation13 + $0x5b0] sm:$0xff]  ;;  %v1515_v20 = vld [vmem:[#allocation13 + $0x598] sm:$0xff] }
 0x1ec   :  { %3136 = vmatprep.subr.bf16.mxu1 %v6208_v39  ;;  %v6262_v39 = vcombine.high %v1466_v33, %v1470_v34  ;;  %v1519_v21 = vld [vmem:[#allocation13 + $0x5b8] sm:$0xff]  ;;  %v1526_v33 = vld [vmem:[#allocation13 + $0x5f0] sm:$0xff] }
 0x1ed   :  { %v1523_v34 = vld [vmem:[#allocation13 + $0x5d8] sm:$0xff] }
 0x1ee   :  { %3055 = vmatpush1.bf16.msra.mxu0 %v6205_v45  ;;  %v1475_v45 = vld [vmem:[#allocation13 + $0x458] sm:$0xff] }
 0x1ef   :  { %3137 = vmatpush1.bf16.msra.mxu1 %v6207_v46  ;;  %3056 = vmatprep.subr.bf16.mxu0 %v6214_v47  ;;  %v1479_v46 = vld [vmem:[#allocation13 + $0x478] sm:$0xff]  ;;  %v6263_v47 = vcombine.low %v1467_v35, %v1471_v36 }
 0x1f0   :  { %3138 = vmatprep.subr.bf16.mxu1 %v6216_v48  ;;  %v6270_v48 = vcombine.high %v1474_v41, %v1478_v42  ;;  %v6272_v50 = vcombine.high %v1475_v45, %v1479_v46  ;;  %v1527_v35 = vld [vmem:[#allocation13 + $0x5f8] sm:$0xff] }
 0x1f2   :  { %3057 = vmatpush1.bf16.msra.mxu0 %v6213_v52  ;;  %v1487_v52 = vld [vmem:[#allocation13 + $0x4b8] sm:$0xff] }
 0x1f3   :  { %3139 = vmatpush1.bf16.msra.mxu1 %v6215_v53  ;;  %3058 = vmatprep.subr.bf16.mxu0 %v6222_v54  ;;  %v6269_v53 = vcombine.low %v1474_v41, %v1478_v42  ;;  %v6271_v54 = vcombine.low %v1475_v45, %v1479_v46  ;;  %v6280_v58 = vcombine.high %v1483_v51, %v1487_v52  ;;  %v1534_v41 = vld [vmem:[#allocation13 + $0x630] sm:$0xff]  ;;  %v1531_v42 = vld [vmem:[#allocation13 + $0x618] sm:$0xff] }
 0x1f4   :  { %3140 = vmatprep.subr.bf16.mxu1 %v6224_v56  ;;  %v6278_v56 = vcombine.high %v1482_v49, %v1486_v55  ;;  %v6319_v46 = vcombine.low %v1523_v34, %v1527_v35 }
 0x1f6   :  { %3059 = vmatpush1.bf16.msra.mxu0 %v6221_v62  ;;  %v1495_v62 = vld [vmem:[#allocation13 + $0x4f8] sm:$0xff] }
 0x1f7   :  { %3141 = vmatpush1.bf16.msra.mxu1 %v6223_v63  ;;  %3060 = vmatprep.subr.bf16.mxu0 %v6230_v1  ;;  %v6277_v63 = vcombine.low %v1482_v49, %v1486_v55  ;;  %v6286_v1 = vcombine.high %v1490_v59, %v1494_v60  ;;  %v1538_v49 = vld [vmem:[#allocation13 + $0x650] sm:$0xff] }
 0x1f8   :  { %3142 = vmatprep.subr.bf16.mxu1 %v6232_v3  ;;  %v6288_v3 = vcombine.high %v1491_v61, %v1495_v62  ;;  %v1542_v55 = vld [vmem:[#allocation13 + $0x670] sm:$0xff] }
 0x1fa   :  { %3061 = vmatpush1.bf16.msra.mxu0 %v6229_v8  ;;  %v6287_v8 = vcombine.low %v1491_v61, %v1495_v62  ;;  %v1551_v61 = vld [vmem:[#allocation13 + $0x6b8] sm:$0xff]  ;;  %v6333_v62 = vcombine.low %v1538_v49, %v1542_v55 }
 0x1fb   :  { %3143 = vmatpush1.bf16.msra.mxu1 %v6231_v9  ;;  %3062 = vmatprep.subr.bf16.mxu0 %v6238_v10  ;;  %v6294_v9 = vcombine.high %v1498_v30, %v1502_v4  ;;  %v6296_v10 = vcombine.high %v1499_v5, %v1503_v7  ;;  %v1558_v30 = vld [vmem:[#allocation13 + $0x6f0] sm:$0xff]  ;;  %v1555_v4 = vld [vmem:[#allocation13 + $0x6d8] sm:$0xff] }
 0x1fc   :  { %3144 = vmatprep.subr.bf16.mxu1 %v6240_v11  ;;  %v1506_v11 = vld [vmem:[#allocation13 + $0x550] sm:$0xff] }
 0x1fd   :  { %v6301_v23 = vcombine.low %v1506_v11, %v1510_v12 }
 0x1fe   :  { %3063 = vmatpush1.bf16.msra.mxu0 %v6237_v15  ;;  %v6295_v15 = vcombine.low %v1499_v5, %v1503_v7  ;;  %v1559_v5 = vld [vmem:[#allocation13 + $0x6f8] sm:$0xff] }
 0x1ff   :  { %3145 = vmatpush1.bf16.msra.mxu1 %v6239_v16  ;;  %3064 = vmatprep.subr.bf16.mxu0 %v6246_v17  ;;  %v6302_v16 = vcombine.high %v1506_v11, %v1510_v12  ;;  %v6304_v17 = vcombine.high %v1507_v43, %v1511_v13  ;;  %v1566_v11 = vld [vmem:[#allocation13 + $0x730] sm:$0xff]  ;;  %v1563_v12 = vld [vmem:[#allocation13 + $0x718] sm:$0xff] }
 0x200   :  { %3146 = vmatprep.subr.bf16.mxu1 %v6248_v18  ;;  %v1514_v18 = vld [vmem:[#allocation13 + $0x590] sm:$0xff] }
 0x201   :  { %v6309_v36 = vcombine.low %v1514_v18, %v1518_v19 }
 0x202   :  { %3065 = vmatpush1.bf16.msra.mxu0 %v6245_v24  ;;  %v6303_v24 = vcombine.low %v1507_v43, %v1511_v13  ;;  %v1567_v43 = vld [vmem:[#allocation13 + $0x738] sm:$0xff] }
 0x203   :  { %3147 = vmatpush1.bf16.msra.mxu1 %v6247_v25  ;;  %3066 = vmatprep.subr.bf16.mxu0 %v6254_v26  ;;  %v6310_v25 = vcombine.high %v1514_v18, %v1518_v19  ;;  %v6312_v26 = vcombine.high %v1515_v20, %v1519_v21  ;;  %v1574_v18 = vld [vmem:[#allocation13 + $0x770] sm:$0xff]  ;;  %v1571_v19 = vld [vmem:[#allocation13 + $0x758] sm:$0xff] }
 0x204   :  { %3148 = vmatprep.subr.bf16.mxu1 %v6256_v32  ;;  %v1522_v32 = vld [vmem:[#allocation13 + $0x5d0] sm:$0xff] }
 0x205   :  { %v6317_v45 = vcombine.low %v1522_v32, %v1526_v33 }
 0x206   :  { %3067 = vmatpush1.bf16.msra.mxu0 %v6253_v37  ;;  %v6311_v37 = vcombine.low %v1515_v20, %v1519_v21  ;;  %v1575_v20 = vld [vmem:[#allocation13 + $0x778] sm:$0xff] }
 0x207   :  { %3149 = vmatpush1.bf16.msra.mxu1 %v6255_v38  ;;  %3077 = vmatprep.subr.bf16.mxu0 %v6262_v39  ;;  %v6318_v38 = vcombine.high %v1522_v32, %v1526_v33  ;;  %v6320_v39 = vcombine.high %v1523_v34, %v1527_v35  ;;  %v1582_v32 = vld [vmem:[#allocation13 + $0x7b0] sm:$0xff]  ;;  %v1579_v33 = vld [vmem:[#allocation13 + $0x798] sm:$0xff] }
 0x208   :  { %3159 = vmatprep.subr.bf16.mxu1 %v6264_v40  ;;  %v1530_v40 = vld [vmem:[#allocation13 + $0x610] sm:$0xff]  ;;  %v1583_v34 = vld [vmem:[#allocation13 + $0x7b8] sm:$0xff] }
 0x209   :  { %3069 = vmatmul.mubr.bf16.vlgmr.msra.gmra.mrb[8].mxu0 %v7684_v57 }
 0x20a   :  { %3151 = vmatmul.mubr.bf16.vlgmr.msra.gmra.mrb[8].mxu1 %v7684_v57  ;;  %3078 = vmatpush1.bf16.msra.mxu0 %v6261_v44  ;;  %v6279_v57 = vcombine.low %v1483_v51, %v1487_v52  ;;  %v1535_v44 = vld [vmem:[#allocation13 + $0x638] sm:$0xff]  ;;  %v6325_v52 = vcombine.low %v1530_v40, %v1534_v41 }
 0x20b   :  { %3109 = vmatprep.mubr.bf16.mxu0 %v7690_v2  ;;  %3160 = vmatpush1.bf16.msra.mxu1 %v6263_v47  ;;  %v6326_v47 = vcombine.high %v1530_v40, %v1534_v41  ;;  %v1543_v51 = vld [vmem:[#allocation13 + $0x678] sm:$0xff]  ;;  %v1590_v40 = vld [vmem:[#allocation13 + $0x7f0] sm:$0xff] }
 0x20c   :  { %3191 = vmatprep.mubr.bf16.mxu1 %v7690_v2  ;;  %3079 = vmatprep.subr.bf16.mxu0 %v6270_v48  ;;  %v6285_v2 = vcombine.low %v1490_v59, %v1494_v60  ;;  %v6328_v48 = vcombine.high %v1531_v42, %v1535_v44  ;;  %v1550_v59 = vld [vmem:[#allocation13 + $0x6b0] sm:$0xff]  ;;  %v1547_v60 = vld [vmem:[#allocation13 + $0x698] sm:$0xff] }
 0x20d   :  { %3161 = vmatprep.subr.bf16.mxu1 %v6272_v50  ;;  %v1539_v50 = vld [vmem:[#allocation13 + $0x658] sm:$0xff] }
 0x20e   :  { %3080 = vmatpush1.bf16.msra.mxu0 %v6269_v53  ;;  %v6327_v53 = vcombine.low %v1531_v42, %v1535_v44  ;;  %v1587_v41 = vld [vmem:[#allocation13 + $0x7d8] sm:$0xff] }
 0x20f   :  { %3162 = vmatpush1.bf16.msra.mxu1 %v6271_v54  ;;  %3081 = vmatprep.subr.bf16.mxu0 %v6278_v56  ;;  %v6334_v54 = vcombine.high %v1538_v49, %v1542_v55  ;;  %v6336_v56 = vcombine.high %v1539_v50, %v1543_v51  ;;  %v1591_v42 = vld [vmem:[#allocation13 + $0x7f8] sm:$0xff]  ;;  %v6943_v55 = vmov 1966171168  }
 0x210   :  { %3163 = vmatprep.subr.bf16.mxu1 %v6280_v58  ;;  %v1546_v58 = vld [vmem:[#allocation13 + $0x690] sm:$0xff]  ;;  %v6383_v49 = vcombine.low %v1587_v41, %v1591_v42 }
 0x211   :  { %v6341_v7 = vcombine.low %v1546_v58, %v1550_v59 }
 0x212   :  { %3082 = vmatpush1.bf16.msra.mxu0 %v6277_v63  ;;  %v6335_v63 = vcombine.low %v1539_v50, %v1543_v51  ;;  %v3204_v50 = vunpack.c.l.s4 %v6943_v55 }
 0x213   :  { %3164 = vmatpush1.bf16.msra.mxu1 %v6279_v57  ;;  %3083 = vmatprep.subr.bf16.mxu0 %v6286_v1  ;;  %v6342_v57 = vcombine.high %v1546_v58, %v1550_v59  ;;  %v6344_v1 = vcombine.high %v1547_v60, %v1551_v61 }
 0x214   :  { %3165 = vmatprep.subr.bf16.mxu1 %v6288_v3  ;;  %v1554_v3 = vld [vmem:[#allocation13 + $0x6d0] sm:$0xff]  ;;  %v3205_v51 = vunpack.c.0.s8 %v3204_v50 }
 0x215   :  { %v6349_v13 = vcombine.low %v1554_v3, %v1558_v30 }
 0x216   :  { %3084 = vmatpush1.bf16.msra.mxu0 %v6285_v2  ;;  %v6343_v2 = vcombine.low %v1547_v60, %v1551_v61 }
 0x217   :  { %3166 = vmatpush1.bf16.msra.mxu1 %v6287_v8  ;;  %3085 = vmatprep.subr.bf16.mxu0 %v6294_v9  ;;  %v6350_v8 = vcombine.high %v1554_v3, %v1558_v30  ;;  %v6352_v9 = vcombine.high %v1555_v4, %v1559_v5 }
 0x218   :  { %3167 = vmatprep.subr.bf16.mxu1 %v6296_v10  ;;  %v1562_v10 = vld [vmem:[#allocation13 + $0x710] sm:$0xff] }
 0x219   :  { %v6357_v21 = vcombine.low %v1562_v10, %v1566_v11 }
 0x21a   :  { %3086 = vmatpush1.bf16.msra.mxu0 %v6293_v14  ;;  %v6351_v14 = vcombine.low %v1555_v4, %v1559_v5 }
 0x21b   :  { %3168 = vmatpush1.bf16.msra.mxu1 %v6295_v15  ;;  %3087 = vmatprep.subr.bf16.mxu0 %v6302_v16  ;;  %v6358_v15 = vcombine.high %v1562_v10, %v1566_v11  ;;  %v6360_v16 = vcombine.high %v1563_v12, %v1567_v43 }
 0x21c   :  { %3169 = vmatprep.subr.bf16.mxu1 %v6304_v17  ;;  %v1570_v17 = vld [vmem:[#allocation13 + $0x750] sm:$0xff] }
 0x21d   :  { %v6365_v35 = vcombine.low %v1570_v17, %v1574_v18 }
 0x21e   :  { %3088 = vmatpush1.bf16.msra.mxu0 %v6301_v23  ;;  %v6359_v23 = vcombine.low %v1563_v12, %v1567_v43 }
 0x21f   :  { %3170 = vmatpush1.bf16.msra.mxu1 %v6303_v24  ;;  %3089 = vmatprep.subr.bf16.mxu0 %v6310_v25  ;;  %v6366_v24 = vcombine.high %v1570_v17, %v1574_v18  ;;  %v6368_v25 = vcombine.high %v1571_v19, %v1575_v20 }
 0x220   :  { %3171 = vmatprep.subr.bf16.mxu1 %v6312_v26  ;;  %v1578_v26 = vld [vmem:[#allocation13 + $0x790] sm:$0xff] }
 0x221   :  { %v6373_v44 = vcombine.low %v1578_v26, %v1582_v32 }
 0x222   :  { %3090 = vmatpush1.bf16.msra.mxu0 %v6309_v36  ;;  %v6367_v36 = vcombine.low %v1571_v19, %v1575_v20 }
 0x223   :  { %3172 = vmatpush1.bf16.msra.mxu1 %v6311_v37  ;;  %3091 = vmatprep.subr.bf16.mxu0 %v6318_v38  ;;  %v6374_v37 = vcombine.high %v1578_v26, %v1582_v32  ;;  %v6376_v38 = vcombine.high %v1579_v33, %v1583_v34 }
 0x224   :  { %3173 = vmatprep.subr.bf16.mxu1 %v6320_v39  ;;  %v1586_v39 = vld [vmem:[#allocation13 + $0x7d0] sm:$0xff] }
 0x226   :  { %3092 = vmatpush1.bf16.msra.mxu0 %v6317_v45  ;;  %v6375_v45 = vcombine.low %v1579_v33, %v1583_v34 }
 0x227   :  { %3174 = vmatpush1.bf16.msra.mxu1 %v6319_v46  ;;  %3093 = vmatprep.subr.bf16.mxu0 %v6326_v47  ;;  %v6382_v46 = vcombine.high %v1586_v39, %v1590_v40  ;;  %v6384_v47 = vcombine.high %v1587_v41, %v1591_v42 }
 0x228   :  { %3175 = vmatprep.subr.bf16.mxu1 %v6328_v48  ;;  %v6381_v48 = vcombine.low %v1586_v39, %v1590_v40 }
 0x22a   :  { %3094 = vmatpush1.bf16.msra.mxu0 %v6325_v52  ;;  %v7710_v52 = vsub.s32 %v3205_v51, %v7661_v28 }
 0x22b   :  { %3176 = vmatpush1.bf16.msra.mxu1 %v6327_v53  ;;  %3095 = vmatprep.subr.bf16.mxu0 %v6334_v54 }
 0x22c   :  { %3177 = vmatprep.subr.bf16.mxu1 %v6336_v56 }
 0x22e   :  { %3096 = vmatpush1.bf16.msra.mxu0 %v6333_v62 }
 0x22f   :  { %3178 = vmatpush1.bf16.msra.mxu1 %v6335_v63  ;;  %3097 = vmatprep.subr.bf16.mxu0 %v6342_v57 }
 0x230   :  { %3179 = vmatprep.subr.bf16.mxu1 %v6344_v1 }
 0x232   :  { %3098 = vmatpush1.bf16.msra.mxu0 %v6341_v7 }
 0x233   :  { %3180 = vmatpush1.bf16.msra.mxu1 %v6343_v2  ;;  %3099 = vmatprep.subr.bf16.mxu0 %v6350_v8 }
 0x234   :  { %3181 = vmatprep.subr.bf16.mxu1 %v6352_v9 }
 0x236   :  { %3100 = vmatpush1.bf16.msra.mxu0 %v6349_v13 }
 0x237   :  { %3182 = vmatpush1.bf16.msra.mxu1 %v6351_v14  ;;  %3101 = vmatprep.subr.bf16.mxu0 %v6358_v15 }
 0x238   :  { %3183 = vmatprep.subr.bf16.mxu1 %v6360_v16 }
 0x23a   :  { %3102 = vmatpush1.bf16.msra.mxu0 %v6357_v21 }
 0x23b   :  { %3184 = vmatpush1.bf16.msra.mxu1 %v6359_v23  ;;  %3103 = vmatprep.subr.bf16.mxu0 %v6366_v24 }
 0x23c   :  { %3185 = vmatprep.subr.bf16.mxu1 %v6368_v25 }
 0x23e   :  { %3104 = vmatpush1.bf16.msra.mxu0 %v6365_v35 }
 0x23f   :  { %3186 = vmatpush1.bf16.msra.mxu1 %v6367_v36  ;;  %3105 = vmatprep.subr.bf16.mxu0 %v6374_v37 }
 0x240   :  { %3187 = vmatprep.subr.bf16.mxu1 %v6376_v38 }
 0x242   :  { %3106 = vmatpush1.bf16.msra.mxu0 %v6373_v44 }
 0x243   :  { %3188 = vmatpush1.bf16.msra.mxu1 %v6375_v45  ;;  %3107 = vmatprep.subr.bf16.mxu0 %v6382_v46 }
 0x244   :  { %3189 = vmatprep.subr.bf16.mxu1 %v6384_v47 }
 0x246   :  { %3108 = vmatpush1.bf16.msra.mxu0 %v6381_v48 }
 0x247   :  { %3190 = vmatpush1.bf16.msra.mxu1 %v6383_v49 }
 0x249   :  { %3110 = vmatmul.mubr.bf16.vlgmr.msra.gmra.mrb[8].mxu0 %v7697_v22 }
 0x24a   :  { %3192 = vmatmul.mubr.bf16.vlgmr.msra.gmra.mrb[8].mxu1 %v7697_v22 }
 0x29c   :  { %v2947_v53 = vpop.f32.mrb[4].mxu0  ;;  %v3029_v54 = vpop.f32.mrb[4].mxu1 }
 0x29d   :  { %v2949_v56 = vpop.f32.mrb[5].mxu0  ;;  %v3031_v58 = vpop.f32.mrb[5].mxu1 }
 0x29e   :  { %v3202_v59 = vcombine.low %v2947_v53, %v2949_v56  ;;  %v3226_v60 = vcombine.low %v3029_v54, %v3031_v58  ;;  %v2951_v61 = vpop.f32.mrb[6].mxu0  ;;  %v3033_v62 = vpop.f32.mrb[6].mxu1 }
 0x29f   :  { %v2952_v63 = vpop.f32.mrb[7].mxu0  ;;  %v3034_v57 = vpop.f32.mrb[7].mxu1 }
 0x2a0   :  { %v3209_v1 = vrot.slane %v3202_v59, %v7710_v52  ;;  %v3233_v22 = vrot.slane %v3226_v60, %v7710_v52 }
 0x2a2   :  { %v3216_v28 = vrot.slane %v3209_v1, %v7710_v52  ;;  %v3287_v30 = vcombine.high %v3209_v1, %v3209_v1  ;;  %v3240_v4 = vrot.slane %v3233_v22, %v7710_v52  ;;  %v3299_v5 = vcombine.high %v3233_v22, %v3233_v22 }
 0x2a4   :  { %3222 = vst.msk [vmem:[#allocation2] ss:$8 sm:$0x3] %vm7715_vm5, %v3216_v28  ;;  %v3294_v7 = vrot.slane %v3287_v30, %v7710_v52  ;;  %3243 = vst.msk [vmem:[#allocation2 + $0x1] ss:$8 sm:$0x3] %vm7715_vm5, %v3240_v4  ;;  %v3306_v2 = vrot.slane %v3299_v5, %v7710_v52 }
 0x2a6   :  { %3297 = vst.msk [vmem:[#allocation2 + $0x4] ss:$8 sm:$0x3] %vm7715_vm5, %v3294_v7  ;;  %3309 = vst.msk [vmem:[#allocation2 + $0x5] ss:$8 sm:$0x3] %vm7715_vm5, %v3306_v2 }
 0x31c   :  { %v3111_v27 = vpop.f32.mrb[8].mxu0 }
 0x31d   :  { %v3193_v8 = vpop.f32.mrb[8].mxu1  ;;  %v3113_v9 = vpop.f32.mrb[9].mxu0 }
 0x31e   :  { %v3247_v10 = vcombine.low %v3111_v27, %v3113_v9  ;;  %v3195_v11 = vpop.f32.mrb[9].mxu1  ;;  %v3115_v12 = vpop.f32.mrb[10].mxu0 }
 0x31f   :  { %v3268_v43 = vcombine.low %v3193_v8, %v3195_v11  ;;  %v3197_v13 = vpop.f32.mrb[10].mxu1  ;;  %v3116_v14 = vpop.f32.mrb[11].mxu0  ;;  %v3371_v8 = vld [vmem:[%s8606_s4] sm:$0x3] }
 0x320   :  { %v3254_v15 = vrot.slane %v3247_v10, %v7710_v52  ;;  %v3198_v16 = vpop.f32.mrb[11].mxu1 }
 0x321   :  { %v3275_v17 = vrot.slane %v3268_v43, %v7710_v52  ;;  %v3395_v16 = vld [vmem:[%s8607_s5] sm:$0x3] }
 0x322   :  { %v3261_v18 = vrot.slane %v3254_v15, %v7710_v52  ;;  %v3311_v19 = vcombine.high %v3254_v15, %v3254_v15 }
 0x323   :  { %v3282_v20 = vrot.slane %v3275_v17, %v7710_v52  ;;  %v3323_v21 = vcombine.high %v3275_v17, %v3275_v17 }
 0x324   :  { %3264 = vst.msk [vmem:[#allocation2 + $0x2] ss:$8 sm:$0x3] %vm7715_vm5, %v3261_v18  ;;  %v3318_v23 = vrot.slane %v3311_v19, %v7710_v52 }
 0x325   :  { %3285 = vst.msk [vmem:[#allocation2 + $0x3] ss:$8 sm:$0x3] %vm7715_vm5, %v3282_v20  ;;  %v3330_v24 = vrot.slane %v3323_v21, %v7710_v52 }
 0x326   :  { %3321 = vst.msk [vmem:[#allocation2 + $0x6] ss:$8 sm:$0x3] %vm7715_vm5, %v3318_v23 }
 0x327   :  { %3333 = vst.msk [vmem:[#allocation2 + $0x7] ss:$8 sm:$0x3] %vm7715_vm5, %v3330_v24 }
 0x32e   :  { %v3335_v25 = vld [vmem:[#allocation2] sm:$0xff]  ;;  %v3336_v26 = vld [vmem:[#allocation2 + $0x8] sm:$0xff] }
 0x32f   :  { %v3337_v32 = vrot.slane %v3335_v25, 4  ;;  %v3343_v33 = vrot.slane %v3336_v26, 4  ;;  %v3349_v34 = vmul.f32 %v3335_v25, %v3335_v25  ;;  %v3350_v35 = vmul.f32 %v3336_v26, %v3336_v26 }
 0x331   :  { %v3338_v36 = vadd.f32 %v3337_v32, %v3335_v25  ;;  %v3344_v37 = vadd.f32 %v3343_v33, %v3336_v26  ;;  %v3351_v38 = vrot.slane %v3349_v34, 4  ;;  %v3357_v39 = vrot.slane %v3350_v35, 4 }
 0x333   :  { %v3339_v40 = vrot.slane %v3338_v36, 2  ;;  %v3345_v41 = vrot.slane %v3344_v37, 2  ;;  %v3352_v42 = vadd.f32 %v3351_v38, %v3349_v34  ;;  %v3358_v44 = vadd.f32 %v3357_v39, %v3350_v35 }
 0x335   :  { %v3340_v45 = vadd.f32 %v3339_v40, %v3338_v36  ;;  %v3346_v46 = vadd.f32 %v3345_v41, %v3344_v37  ;;  %v3353_v47 = vrot.slane %v3352_v42, 2  ;;  %v3359_v48 = vrot.slane %v3358_v44, 2 }
 0x337   :  { %v3341_v49 = vrot.slane %v3340_v45, 1  ;;  %v3347_v55 = vrot.slane %v3346_v46, 1  ;;  %v3354_v50 = vadd.f32 %v3353_v47, %v3352_v42  ;;  %v3360_v51 = vadd.f32 %v3359_v48, %v3358_v44 }
 0x339   :  { %v3342_v53 = vadd.f32 %v3341_v49, %v3340_v45  ;;  %v3348_v54 = vadd.f32 %v3347_v55, %v3346_v46  ;;  %v3355_v56 = vrot.slane %v3354_v50, 1  ;;  %v3361_v58 = vrot.slane %v3360_v51, 1 }
 0x33b   :  { %v3356_v59 = vadd.f32 %v3355_v56, %v3354_v50  ;;  %v3362_v60 = vadd.f32 %v3361_v58, %v3360_v51  ;;  %v3363_v61 = vmul.f32 0.125, %v3342_v53  ;;  %v3364_v62 = vmul.f32 0.125, %v3348_v54 }
 0x33d   :  { %v3365_v63 = vmul.f32 0.125, %v3356_v59  ;;  %v3366_v57 = vmul.f32 0.125, %v3362_v60  ;;  %v3367_v1 = vmul.f32 %v3363_v61, %v3363_v61  ;;  %v3368_v22 = vmul.f32 %v3364_v62, %v3364_v62 }
 0x33f   :  { %v3369_v3 = vsub.f32 %v3365_v63, %v3367_v1  ;;  %v3370_v28 = vsub.f32 %v3366_v57, %v3368_v22 }
 0x341   :  { %v3372_v30 = vadd.f32 1e-05, %v3369_v3  ;;  %v3373_v4 = vadd.f32 1e-05, %v3370_v28 }
 0x343   :  { %6847 = vrsqrt.f32 %v3372_v30 }
 0x344   :  { %6849 = vrsqrt.f32 %v3373_v4 }
 0x34d   :  { %v6848_v5 = vpop.eup %6847 }
 0x34e   :  { %v6850_v7 = vpop.eup %6849 }
 0x34f   :  { %v3378_v2 = vcombine.low %v6848_v5, %v6850_v7 }
 0x351   :  { %v3385_v27 = vrot.slane %v3378_v2, %v7710_v52 }
 0x353   :  { %v3392_v9 = vrot.slane %v3385_v27, %v7710_v52 }
 0x355   :  { %v3394_v10 = vmul.f32 %v3392_v9, %v3371_v8 }
 0x357   :  { %v3400_v11 = vrot.slane %v3394_v10, %v7664_v29  ;;  %v3404_v12 = vrot.slane %v3394_v10, %v7672_v31 }
 0x359   :  { %v3407_v43 = vmul.f32 %v3400_v11, %v3363_v61  ;;  %v3408_v13 = vmul.f32 %v3404_v12, %v3364_v62  ;;  %v3428_v19 = vmul.f32 %v3400_v11, %v3335_v25  ;;  %v3429_v20 = vmul.f32 %v3404_v12, %v3336_v26 }
 0x35b   :  { %v3411_v14 = vcombine.low %v3407_v43, %v3408_v13 }
 0x35d   :  { %v3418_v15 = vrot.slane %v3411_v14, %v7710_v52 }
 0x35f   :  { %v3425_v17 = vrot.slane %v3418_v15, %v7710_v52 }
 0x361   :  { %v3427_v18 = vsub.f32 %v3395_v16, %v3425_v17 }
 0x363   :  { %v3434_v21 = vrot.slane %v3427_v18, %v7664_v29  ;;  %v3438_v23 = vrot.slane %v3427_v18, %v7672_v31 }
 0x365   :  { %v3441_v24 = vadd.f32 %v3434_v21, %v3428_v19  ;;  %v3442_v32 = vadd.f32 %v3438_v23, %v3429_v20 }
 0x367   :  { %vm3443_vm6 = vcmp.gt.f32.partialorder %v3441_v24, 0.0  ;;  %vm3444_vm7 = vcmp.gt.f32.partialorder %v3442_v32, 0.0  ;;  %v3445_v33 = vmul.f32 0.2, %v3441_v24  ;;  %v3446_v34 = vmul.f32 0.2, %v3442_v32 }
 0x369   :  { %v7759_v35 = vsel %vm3443_vm6, %v3441_v24, %v3445_v33  ;;  %v3448_v36 = vsel %vm3444_vm7, %v3442_v32, %v3446_v34 }
 0x36a   :  { %6917 = dma.done.wait [#allocation12], 18432 }
 0x36b   :  { %6918 = vsyncadd [#allocation12], 4294948864 }
 0x36c   :  { %6919 = dma.done.wait [#allocation12 + $0x1], 128 }
 0x36d   :  { %6920 = vsyncadd [#allocation12 + $0x1], 4294967168  ;;  %v7761_v52 = vpack.c.bf16 %v3448_v36, %v3448_v36  ;;  %v3458_v31 = vld [vmem:[#allocation6 + $0x8] sm:$0xff]  ;;  %v3460_v25 = vld [vmem:[#allocation6 + $0x18] sm:$0xff]  ;;  %vm6945_vm8 = vmmov 0   ;;  %vm3910_vm9 = vcmask 1041408  }
 0x36e   :  { %v3457_v26 = vld [vmem:[#allocation6] sm:$0xff]  ;;  %3604 = vmatprep.subr.bf16.mxu0 %v3458_v31  ;;  %3645 = vmatprep.subr.bf16.mxu1 %v3460_v25  ;;  %v3459_v37 = vld [vmem:[#allocation6 + $0x10] sm:$0xff]  ;;  %v3466_v40 = vld [vmem:[#allocation6 + $0x48] sm:$0xff]  ;;  %vm3906_vm10 = vcmask 293888  }
 0x36f   :  { %3636 = vmatprep.mubr.bf16.mxu0 %v7761_v52  ;;  %3677 = vmatprep.mubr.bf16.mxu1 %v7761_v52  ;;  %v3467_v38 = vld [vmem:[#allocation6 + $0x50] sm:$0xff]  ;;  %v3469_v39 = vld [vmem:[#allocation6 + $0x60] sm:$0xff]  ;;  %v3468_v41 = vld [vmem:[#allocation6 + $0x58] sm:$0xff] }
 0x370   :  { %3605 = vmatpush1.bf16.msra.mxu0 %v3457_v26  ;;  %3646 = vmatpush1.bf16.msra.mxu1 %v3459_v37  ;;  %v3476_v42 = vld [vmem:[#allocation6 + $0x98] sm:$0xff]  ;;  %v3478_v44 = vld [vmem:[#allocation6 + $0xa8] sm:$0xff]  ;;  %v3475_v45 = vld [vmem:[#allocation6 + $0x90] sm:$0xff] }
 0x371   :  { %3606 = vmatprep.subr.bf16.mxu0 %v3467_v38  ;;  %3647 = vmatprep.subr.bf16.mxu1 %v3469_v39  ;;  %v3477_v46 = vld [vmem:[#allocation6 + $0xa0] sm:$0xff]  ;;  %v3487_v48 = vld [vmem:[#allocation6 + $0xf0] sm:$0xff]  ;;  %v3484_v49 = vld [vmem:[#allocation6 + $0xd8] sm:$0xff] }
 0x372   :  { %v3485_v47 = vld [vmem:[#allocation6 + $0xe0] sm:$0xff]  ;;  %v3486_v55 = vld [vmem:[#allocation6 + $0xe8] sm:$0xff]  ;;  %v3496_v51 = vld [vmem:[#allocation6 + $0x138] sm:$0xff] }
 0x373   :  { %v3494_v50 = vld [vmem:[#allocation6 + $0x128] sm:$0xff]  ;;  %v3493_v53 = vld [vmem:[#allocation6 + $0x120] sm:$0xff]  ;;  %v3495_v54 = vld [vmem:[#allocation6 + $0x130] sm:$0xff] }
 0x374   :  { %3607 = vmatpush1.bf16.msra.mxu0 %v3466_v40  ;;  %3648 = vmatpush1.bf16.msra.mxu1 %v3468_v41  ;;  %v3503_v56 = vld [vmem:[#allocation6 + $0x170] sm:$0xff]  ;;  %v3505_v58 = vld [vmem:[#allocation6 + $0x180] sm:$0xff]  ;;  %v3502_v59 = vld [vmem:[#allocation6 + $0x168] sm:$0xff]  ;;  %v7767_v41 = vpack.c.bf16 %v7759_v35, %v7759_v35 }
 0x375   :  { %3608 = vmatprep.subr.bf16.mxu0 %v3476_v42  ;;  %3649 = vmatprep.subr.bf16.mxu1 %v3478_v44  ;;  %v3504_v60 = vld [vmem:[#allocation6 + $0x178] sm:$0xff]  ;;  %v3514_v62 = vld [vmem:[#allocation6 + $0x1c8] sm:$0xff]  ;;  %v3511_v63 = vld [vmem:[#allocation6 + $0x1b0] sm:$0xff] }
 0x376   :  { %v3512_v61 = vld [vmem:[#allocation6 + $0x1b8] sm:$0xff]  ;;  %v3513_v57 = vld [vmem:[#allocation6 + $0x1c0] sm:$0xff]  ;;  %v3523_v22 = vld [vmem:[#allocation6 + $0x210] sm:$0xff] }
 0x377   :  { %v3521_v1 = vld [vmem:[#allocation6 + $0x200] sm:$0xff]  ;;  %v3520_v3 = vld [vmem:[#allocation6 + $0x1f8] sm:$0xff]  ;;  %v3522_v28 = vld [vmem:[#allocation6 + $0x208] sm:$0xff] }
 0x378   :  { %3609 = vmatpush1.bf16.msra.mxu0 %v3475_v45  ;;  %3650 = vmatpush1.bf16.msra.mxu1 %v3477_v46  ;;  %v3530_v30 = vld [vmem:[#allocation6 + $0x248] sm:$0xff]  ;;  %v3532_v4 = vld [vmem:[#allocation6 + $0x258] sm:$0xff]  ;;  %v3529_v5 = vld [vmem:[#allocation6 + $0x240] sm:$0xff] }
 0x379   :  { %3610 = vmatprep.subr.bf16.mxu0 %v3485_v47  ;;  %3651 = vmatprep.subr.bf16.mxu1 %v3487_v48  ;;  %v3531_v7 = vld [vmem:[#allocation6 + $0x250] sm:$0xff]  ;;  %v3541_v27 = vld [vmem:[#allocation6 + $0x2a0] sm:$0xff]  ;;  %v3538_v8 = vld [vmem:[#allocation6 + $0x288] sm:$0xff] }
 0x37a   :  { %v3539_v2 = vld [vmem:[#allocation6 + $0x290] sm:$0xff]  ;;  %v3540_v9 = vld [vmem:[#allocation6 + $0x298] sm:$0xff]  ;;  %v3550_v11 = vld [vmem:[#allocation6 + $0x2e8] sm:$0xff] }
 0x37b   :  { %v3548_v10 = vld [vmem:[#allocation6 + $0x2d8] sm:$0xff]  ;;  %v3547_v12 = vld [vmem:[#allocation6 + $0x2d0] sm:$0xff]  ;;  %v3549_v43 = vld [vmem:[#allocation6 + $0x2e0] sm:$0xff] }
 0x37c   :  { %3611 = vmatpush1.bf16.msra.mxu0 %v3484_v49  ;;  %3652 = vmatpush1.bf16.msra.mxu1 %v3486_v55  ;;  %v3557_v13 = vld [vmem:[#allocation6 + $0x320] sm:$0xff]  ;;  %v3559_v14 = vld [vmem:[#allocation6 + $0x330] sm:$0xff]  ;;  %v3556_v15 = vld [vmem:[#allocation6 + $0x318] sm:$0xff] }
 0x37d   :  { %3612 = vmatprep.subr.bf16.mxu0 %v3494_v50  ;;  %3653 = vmatprep.subr.bf16.mxu1 %v3496_v51  ;;  %v3558_v16 = vld [vmem:[#allocation6 + $0x328] sm:$0xff]  ;;  %v3568_v18 = vld [vmem:[#allocation6 + $0x378] sm:$0xff]  ;;  %v3565_v19 = vld [vmem:[#allocation6 + $0x360] sm:$0xff] }
 0x37e   :  { %v3566_v17 = vld [vmem:[#allocation6 + $0x368] sm:$0xff]  ;;  %v3567_v20 = vld [vmem:[#allocation6 + $0x370] sm:$0xff]  ;;  %v3577_v23 = vld [vmem:[#allocation6 + $0x3c0] sm:$0xff] }
 0x37f   :  { %v3575_v21 = vld [vmem:[#allocation6 + $0x3b0] sm:$0xff]  ;;  %v3574_v24 = vld [vmem:[#allocation6 + $0x3a8] sm:$0xff]  ;;  %v3576_v32 = vld [vmem:[#allocation6 + $0x3b8] sm:$0xff] }
 0x380   :  { %3613 = vmatpush1.bf16.msra.mxu0 %v3493_v53  ;;  %3654 = vmatpush1.bf16.msra.mxu1 %v3495_v54  ;;  %v3584_v33 = vld [vmem:[#allocation6 + $0x3f8] sm:$0xff]  ;;  %v3586_v34 = vld [vmem:[#allocation6 + $0x408] sm:$0xff]  ;;  %v3583_v36 = vld [vmem:[#allocation6 + $0x3f0] sm:$0xff] }
 0x381   :  { %3614 = vmatprep.subr.bf16.mxu0 %v3503_v56  ;;  %3655 = vmatprep.subr.bf16.mxu1 %v3505_v58  ;;  %v3585_v31 = vld [vmem:[#allocation6 + $0x400] sm:$0xff]  ;;  %v3595_v26 = vld [vmem:[#allocation6 + $0x450] sm:$0xff]  ;;  %v3592_v37 = vld [vmem:[#allocation6 + $0x438] sm:$0xff] }
 0x382   :  { %v3593_v25 = vld [vmem:[#allocation6 + $0x440] sm:$0xff]  ;;  %v3594_v38 = vld [vmem:[#allocation6 + $0x448] sm:$0xff]  ;;  %v3464_v40 = vld [vmem:[#allocation6 + $0x38] sm:$0xff] }
 0x383   :  { %v3462_v39 = vld [vmem:[#allocation6 + $0x28] sm:$0xff]  ;;  %v3461_v42 = vld [vmem:[#allocation6 + $0x20] sm:$0xff]  ;;  %v3463_v44 = vld [vmem:[#allocation6 + $0x30] sm:$0xff] }
 0x384   :  { %3615 = vmatpush1.bf16.msra.mxu0 %v3502_v59  ;;  %3656 = vmatpush1.bf16.msra.mxu1 %v3504_v60  ;;  %v3471_v45 = vld [vmem:[#allocation6 + $0x70] sm:$0xff]  ;;  %v3473_v46 = vld [vmem:[#allocation6 + $0x80] sm:$0xff]  ;;  %v3470_v47 = vld [vmem:[#allocation6 + $0x68] sm:$0xff] }
 0x385   :  { %3616 = vmatprep.subr.bf16.mxu0 %v3512_v61  ;;  %3657 = vmatprep.subr.bf16.mxu1 %v3514_v62  ;;  %v3472_v48 = vld [vmem:[#allocation6 + $0x78] sm:$0xff]  ;;  %v3482_v49 = vld [vmem:[#allocation6 + $0xc8] sm:$0xff]  ;;  %v3479_v55 = vld [vmem:[#allocation6 + $0xb0] sm:$0xff] }
 0x386   :  { %v3480_v35 = vld [vmem:[#allocation6 + $0xb8] sm:$0xff]  ;;  %v3481_v50 = vld [vmem:[#allocation6 + $0xc0] sm:$0xff]  ;;  %v3491_v53 = vld [vmem:[#allocation6 + $0x110] sm:$0xff] }
 0x387   :  { %v3489_v51 = vld [vmem:[#allocation6 + $0x100] sm:$0xff]  ;;  %v3488_v54 = vld [vmem:[#allocation6 + $0xf8] sm:$0xff]  ;;  %v3490_v56 = vld [vmem:[#allocation6 + $0x108] sm:$0xff] }
 0x388   :  { %3617 = vmatpush1.bf16.msra.mxu0 %v3511_v63  ;;  %3658 = vmatpush1.bf16.msra.mxu1 %v3513_v57  ;;  %v3498_v58 = vld [vmem:[#allocation6 + $0x148] sm:$0xff]  ;;  %v3500_v59 = vld [vmem:[#allocation6 + $0x158] sm:$0xff]  ;;  %v3497_v60 = vld [vmem:[#allocation6 + $0x140] sm:$0xff] }
 0x389   :  { %3618 = vmatprep.subr.bf16.mxu0 %v3521_v1  ;;  %3659 = vmatprep.subr.bf16.mxu1 %v3523_v22  ;;  %v3499_v61 = vld [vmem:[#allocation6 + $0x150] sm:$0xff]  ;;  %v3509_v63 = vld [vmem:[#allocation6 + $0x1a0] sm:$0xff]  ;;  %v3506_v57 = vld [vmem:[#allocation6 + $0x188] sm:$0xff] }
 0x38a   :  { %v3507_v62 = vld [vmem:[#allocation6 + $0x190] sm:$0xff]  ;;  %v3508_v1 = vld [vmem:[#allocation6 + $0x198] sm:$0xff] }
 0x38b   :  { %v3516_v22 = vld [vmem:[#allocation6 + $0x1d8] sm:$0xff] }
 0x38c   :  { %3619 = vmatpush1.bf16.msra.mxu0 %v3520_v3  ;;  %3660 = vmatpush1.bf16.msra.mxu1 %v3522_v28  ;;  %v3518_v3 = vld [vmem:[#allocation6 + $0x1e8] sm:$0xff]  ;;  %v3515_v28 = vld [vmem:[#allocation6 + $0x1d0] sm:$0xff] }
 0x38d   :  { %3620 = vmatprep.subr.bf16.mxu0 %v3530_v30  ;;  %3661 = vmatprep.subr.bf16.mxu1 %v3532_v4  ;;  %v3517_v30 = vld [vmem:[#allocation6 + $0x1e0] sm:$0xff] }
 0x38e   :  { %v3525_v4 = vld [vmem:[#allocation6 + $0x220] sm:$0xff] }
 0x390   :  { %3621 = vmatpush1.bf16.msra.mxu0 %v3529_v5  ;;  %3662 = vmatpush1.bf16.msra.mxu1 %v3531_v7  ;;  %v3527_v5 = vld [vmem:[#allocation6 + $0x230] sm:$0xff]  ;;  %v3524_v7 = vld [vmem:[#allocation6 + $0x218] sm:$0xff] }
 0x391   :  { %3622 = vmatprep.subr.bf16.mxu0 %v3539_v2  ;;  %3663 = vmatprep.subr.bf16.mxu1 %v3541_v27  ;;  %v3526_v2 = vld [vmem:[#allocation6 + $0x228] sm:$0xff] }
 0x392   :  { %v3534_v27 = vld [vmem:[#allocation6 + $0x268] sm:$0xff] }
 0x394   :  { %3623 = vmatpush1.bf16.msra.mxu0 %v3538_v8  ;;  %3664 = vmatpush1.bf16.msra.mxu1 %v3540_v9  ;;  %v3536_v8 = vld [vmem:[#allocation6 + $0x278] sm:$0xff]  ;;  %v3533_v9 = vld [vmem:[#allocation6 + $0x260] sm:$0xff] }
 0x395   :  { %3624 = vmatprep.subr.bf16.mxu0 %v3548_v10  ;;  %3665 = vmatprep.subr.bf16.mxu1 %v3550_v11  ;;  %v3535_v10 = vld [vmem:[#allocation6 + $0x270] sm:$0xff] }
 0x396   :  { %v3543_v11 = vld [vmem:[#allocation6 + $0x2b0] sm:$0xff] }
 0x398   :  { %3625 = vmatpush1.bf16.msra.mxu0 %v3547_v12  ;;  %3666 = vmatpush1.bf16.msra.mxu1 %v3549_v43  ;;  %v3545_v12 = vld [vmem:[#allocation6 + $0x2c0] sm:$0xff]  ;;  %v3542_v43 = vld [vmem:[#allocation6 + $0x2a8] sm:$0xff] }
 0x399   :  { %3626 = vmatprep.subr.bf16.mxu0 %v3557_v13  ;;  %3667 = vmatprep.subr.bf16.mxu1 %v3559_v14  ;;  %v3544_v13 = vld [vmem:[#allocation6 + $0x2b8] sm:$0xff] }
 0x39a   :  { %v3552_v14 = vld [vmem:[#allocation6 + $0x2f8] sm:$0xff] }
 0x39c   :  { %3627 = vmatpush1.bf16.msra.mxu0 %v3556_v15  ;;  %3668 = vmatpush1.bf16.msra.mxu1 %v3558_v16  ;;  %v3554_v15 = vld [vmem:[#allocation6 + $0x308] sm:$0xff]  ;;  %v3551_v16 = vld [vmem:[#allocation6 + $0x2f0] sm:$0xff] }
 0x39d   :  { %3628 = vmatprep.subr.bf16.mxu0 %v3566_v17  ;;  %3669 = vmatprep.subr.bf16.mxu1 %v3568_v18  ;;  %v3553_v17 = vld [vmem:[#allocation6 + $0x300] sm:$0xff] }
 0x39e   :  { %v3561_v18 = vld [vmem:[#allocation6 + $0x340] sm:$0xff] }
 0x3a0   :  { %3629 = vmatpush1.bf16.msra.mxu0 %v3565_v19  ;;  %3670 = vmatpush1.bf16.msra.mxu1 %v3567_v20  ;;  %v3563_v19 = vld [vmem:[#allocation6 + $0x350] sm:$0xff]  ;;  %v3560_v20 = vld [vmem:[#allocation6 + $0x338] sm:$0xff] }
 0x3a1   :  { %3630 = vmatprep.subr.bf16.mxu0 %v3575_v21  ;;  %3671 = vmatprep.subr.bf16.mxu1 %v3577_v23  ;;  %v3562_v21 = vld [vmem:[#allocation6 + $0x348] sm:$0xff] }
 0x3a2   :  { %v3570_v23 = vld [vmem:[#allocation6 + $0x388] sm:$0xff] }
 0x3a4   :  { %3631 = vmatpush1.bf16.msra.mxu0 %v3574_v24  ;;  %3672 = vmatpush1.bf16.msra.mxu1 %v3576_v32  ;;  %v3572_v24 = vld [vmem:[#allocation6 + $0x398] sm:$0xff]  ;;  %v3569_v32 = vld [vmem:[#allocation6 + $0x380] sm:$0xff] }
 0x3a5   :  { %3632 = vmatprep.subr.bf16.mxu0 %v3584_v33  ;;  %3673 = vmatprep.subr.bf16.mxu1 %v3586_v34  ;;  %v3571_v33 = vld [vmem:[#allocation6 + $0x390] sm:$0xff] }
 0x3a6   :  { %v3579_v34 = vld [vmem:[#allocation6 + $0x3d0] sm:$0xff] }
 0x3a8   :  { %3633 = vmatpush1.bf16.msra.mxu0 %v3583_v36  ;;  %3674 = vmatpush1.bf16.msra.mxu1 %v3585_v31  ;;  %v3581_v36 = vld [vmem:[#allocation6 + $0x3e0] sm:$0xff]  ;;  %v3578_v31 = vld [vmem:[#allocation6 + $0x3c8] sm:$0xff] }
 0x3a9   :  { %3634 = vmatprep.subr.bf16.mxu0 %v3593_v25  ;;  %3675 = vmatprep.subr.bf16.mxu1 %v3595_v26  ;;  %v3580_v25 = vld [vmem:[#allocation6 + $0x3d8] sm:$0xff] }
 0x3aa   :  { %v3588_v26 = vld [vmem:[#allocation6 + $0x418] sm:$0xff] }
 0x3ac   :  { %3635 = vmatpush1.bf16.msra.mxu0 %v3592_v37  ;;  %3676 = vmatpush1.bf16.msra.mxu1 %v3594_v38  ;;  %v3590_v37 = vld [vmem:[#allocation6 + $0x428] sm:$0xff]  ;;  %v3587_v38 = vld [vmem:[#allocation6 + $0x410] sm:$0xff] }
 0x3ad   :  { %3686 = vmatprep.subr.bf16.mxu0 %v3462_v39  ;;  %3727 = vmatprep.subr.bf16.mxu1 %v3464_v40  ;;  %v3589_v39 = vld [vmem:[#allocation6 + $0x420] sm:$0xff] }
 0x3ae   :  { %v3597_v40 = vld [vmem:[#allocation6 + $0x460] sm:$0xff] }
 0x3af   :  { %3637 = vmatmul.mubr.bf16.vlgmr.msra.gmra.mrb[12].mxu0 %v7767_v41  ;;  %3678 = vmatmul.mubr.bf16.vlgmr.msra.gmra.mrb[12].mxu1 %v7767_v41 }
 0x3b0   :  { %3687 = vmatpush1.bf16.msra.mxu0 %v3461_v42  ;;  %3728 = vmatpush1.bf16.msra.mxu1 %v3463_v44  ;;  %v3599_v42 = vld [vmem:[#allocation6 + $0x470] sm:$0xff]  ;;  %v3596_v44 = vld [vmem:[#allocation6 + $0x458] sm:$0xff] }
 0x3b1   :  { %3688 = vmatprep.subr.bf16.mxu0 %v3471_v45  ;;  %3729 = vmatprep.subr.bf16.mxu1 %v3473_v46  ;;  %v3598_v45 = vld [vmem:[#allocation6 + $0x468] sm:$0xff]  ;;  %v3537_v46 = vld [vmem:[#allocation6 + $0x280] sm:$0xff] }
 0x3b2   :  { %3718 = vmatprep.mubr.bf16.mxu0 %v7761_v52  ;;  %3759 = vmatprep.mubr.bf16.mxu1 %v7761_v52 }
 0x3b4   :  { %3689 = vmatpush1.bf16.msra.mxu0 %v3470_v47  ;;  %3730 = vmatpush1.bf16.msra.mxu1 %v3472_v48  ;;  %v3465_v47 = vld [vmem:[#allocation6 + $0x40] sm:$0xff]  ;;  %v3546_v48 = vld [vmem:[#allocation6 + $0x2c8] sm:$0xff] }
 0x3b5   :  { %3690 = vmatprep.subr.bf16.mxu0 %v3480_v35  ;;  %3731 = vmatprep.subr.bf16.mxu1 %v3482_v49  ;;  %v3474_v35 = vld [vmem:[#allocation6 + $0x88] sm:$0xff]  ;;  %v3555_v49 = vld [vmem:[#allocation6 + $0x310] sm:$0xff] }
 0x3b8   :  { %3691 = vmatpush1.bf16.msra.mxu0 %v3479_v55  ;;  %3732 = vmatpush1.bf16.msra.mxu1 %v3481_v50  ;;  %v3483_v55 = vld [vmem:[#allocation6 + $0xd0] sm:$0xff]  ;;  %v3564_v50 = vld [vmem:[#allocation6 + $0x358] sm:$0xff] }
 0x3b9   :  { %3692 = vmatprep.subr.bf16.mxu0 %v3489_v51  ;;  %3733 = vmatprep.subr.bf16.mxu1 %v3491_v53  ;;  %v3492_v51 = vld [vmem:[#allocation6 + $0x118] sm:$0xff]  ;;  %v3573_v53 = vld [vmem:[#allocation6 + $0x3a0] sm:$0xff] }
 0x3bc   :  { %3693 = vmatpush1.bf16.msra.mxu0 %v3488_v54  ;;  %3734 = vmatpush1.bf16.msra.mxu1 %v3490_v56  ;;  %v3501_v54 = vld [vmem:[#allocation6 + $0x160] sm:$0xff]  ;;  %v3582_v56 = vld [vmem:[#allocation6 + $0x3e8] sm:$0xff] }
 0x3bd   :  { %3694 = vmatprep.subr.bf16.mxu0 %v3498_v58  ;;  %3735 = vmatprep.subr.bf16.mxu1 %v3500_v59  ;;  %v3510_v58 = vld [vmem:[#allocation6 + $0x1a8] sm:$0xff]  ;;  %v3591_v59 = vld [vmem:[#allocation6 + $0x430] sm:$0xff] }
 0x3c0   :  { %3695 = vmatpush1.bf16.msra.mxu0 %v3497_v60  ;;  %3736 = vmatpush1.bf16.msra.mxu1 %v3499_v61  ;;  %v3600_v60 = vld [vmem:[#allocation6 + $0x478] sm:$0xff] }
 0x3c1   :  { %3696 = vmatprep.subr.bf16.mxu0 %v3507_v62  ;;  %3737 = vmatprep.subr.bf16.mxu1 %v3509_v63  ;;  %v3528_v61 = vld [vmem:[#allocation6 + $0x238] sm:$0xff]  ;;  %v6944_v62 = vmov 0.0  }
 0x3c4   :  { %3697 = vmatpush1.bf16.msra.mxu0 %v3506_v57  ;;  %3738 = vmatpush1.bf16.msra.mxu1 %v3508_v1 }
 0x3c5   :  { %3698 = vmatprep.subr.bf16.mxu0 %v3516_v22  ;;  %3739 = vmatprep.subr.bf16.mxu1 %v3518_v3 }
 0x3c8   :  { %3699 = vmatpush1.bf16.msra.mxu0 %v3515_v28  ;;  %3740 = vmatpush1.bf16.msra.mxu1 %v3517_v30 }
 0x3c9   :  { %3700 = vmatprep.subr.bf16.mxu0 %v3525_v4  ;;  %3741 = vmatprep.subr.bf16.mxu1 %v3527_v5 }
 0x3cc   :  { %3701 = vmatpush1.bf16.msra.mxu0 %v3524_v7  ;;  %3742 = vmatpush1.bf16.msra.mxu1 %v3526_v2 }
 0x3cd   :  { %3702 = vmatprep.subr.bf16.mxu0 %v3534_v27  ;;  %3743 = vmatprep.subr.bf16.mxu1 %v3536_v8 }
 0x3d0   :  { %3703 = vmatpush1.bf16.msra.mxu0 %v3533_v9  ;;  %3744 = vmatpush1.bf16.msra.mxu1 %v3535_v10 }
 0x3d1   :  { %3704 = vmatprep.subr.bf16.mxu0 %v3543_v11  ;;  %3745 = vmatprep.subr.bf16.mxu1 %v3545_v12 }
 0x3d4   :  { %3705 = vmatpush1.bf16.msra.mxu0 %v3542_v43  ;;  %3746 = vmatpush1.bf16.msra.mxu1 %v3544_v13 }
 0x3d5   :  { %3706 = vmatprep.subr.bf16.mxu0 %v3552_v14  ;;  %3747 = vmatprep.subr.bf16.mxu1 %v3554_v15 }
 0x3d8   :  { %3707 = vmatpush1.bf16.msra.mxu0 %v3551_v16  ;;  %3748 = vmatpush1.bf16.msra.mxu1 %v3553_v17 }
 0x3d9   :  { %3708 = vmatprep.subr.bf16.mxu0 %v3561_v18  ;;  %3749 = vmatprep.subr.bf16.mxu1 %v3563_v19 }
 0x3dc   :  { %3709 = vmatpush1.bf16.msra.mxu0 %v3560_v20  ;;  %3750 = vmatpush1.bf16.msra.mxu1 %v3562_v21 }
 0x3dd   :  { %3710 = vmatprep.subr.bf16.mxu0 %v3570_v23  ;;  %3751 = vmatprep.subr.bf16.mxu1 %v3572_v24 }
 0x3e0   :  { %3711 = vmatpush1.bf16.msra.mxu0 %v3569_v32  ;;  %3752 = vmatpush1.bf16.msra.mxu1 %v3571_v33 }
 0x3e1   :  { %3712 = vmatprep.subr.bf16.mxu0 %v3579_v34  ;;  %3753 = vmatprep.subr.bf16.mxu1 %v3581_v36 }
 0x3e4   :  { %3713 = vmatpush1.bf16.msra.mxu0 %v3578_v31  ;;  %3754 = vmatpush1.bf16.msra.mxu1 %v3580_v25 }
 0x3e5   :  { %3714 = vmatprep.subr.bf16.mxu0 %v3588_v26  ;;  %3755 = vmatprep.subr.bf16.mxu1 %v3590_v37 }
 0x3e8   :  { %3715 = vmatpush1.bf16.msra.mxu0 %v3587_v38  ;;  %3756 = vmatpush1.bf16.msra.mxu1 %v3589_v39 }
 0x3e9   :  { %3716 = vmatprep.subr.bf16.mxu0 %v3597_v40  ;;  %3757 = vmatprep.subr.bf16.mxu1 %v3599_v42 }
 0x3ec   :  { %3717 = vmatpush1.bf16.msra.mxu0 %v3596_v44  ;;  %3758 = vmatpush1.bf16.msra.mxu1 %v3598_v45 }
 0x3ed   :  { %6478 = vmatprep.subr.bf16.mxu0 %v3537_v46  ;;  %6706 = vmatprep.subr.bf16.mxu1 %v6944_v62 }
 0x3ef   :  { %3719 = vmatmul.mubr.bf16.vlgmr.msra.gmra.mrb[16].mxu0 %v7767_v41  ;;  %3760 = vmatmul.mubr.bf16.vlgmr.msra.gmra.mrb[16].mxu1 %v7767_v41 }
 0x3f0   :  { %6479 = vmatpush3.bf16.msra.mxu0 %v3465_v47  ;;  %3800 = vmatprep.mubr.bf16.mxu0 %v7761_v52  ;;  %v3519_v52 = vld [vmem:[#allocation6 + $0x1f0] sm:$0xff] }
 0x3f1   :  { %6480 = vmatprep.subr.bf16.mxu0 %v3546_v48  ;;  %6712 = vmatprep.mubr.msk.bf16.mxu1 %vm6945_vm8, %v6944_v62 }
 0x3f4   :  { %6481 = vmatpush3.bf16.msra.mxu0 %v3474_v35 }
 0x3f5   :  { %6482 = vmatprep.subr.bf16.mxu0 %v3555_v49 }
 0x3f8   :  { %6483 = vmatpush3.bf16.msra.mxu0 %v3483_v55 }
 0x3f9   :  { %6484 = vmatprep.subr.bf16.mxu0 %v3564_v50 }
 0x3fc   :  { %6485 = vmatpush3.bf16.msra.mxu0 %v3492_v51 }
 0x3fd   :  { %6486 = vmatprep.subr.bf16.mxu0 %v3573_v53 }
 0x400   :  { %6487 = vmatpush3.bf16.msra.mxu0 %v3501_v54 }
 0x401   :  { %6488 = vmatprep.subr.bf16.mxu0 %v3582_v56 }
 0x404   :  { %6489 = vmatpush3.bf16.msra.mxu0 %v3510_v58 }
 0x405   :  { %6490 = vmatprep.subr.bf16.mxu0 %v3591_v59 }
 0x408   :  { %6491 = vmatpush3.bf16.msra.mxu0 %v3519_v52 }
 0x409   :  { %6492 = vmatprep.subr.bf16.mxu0 %v3600_v60 }
 0x40c   :  { %6493 = vmatpush3.bf16.msra.mxu0 %v3528_v61 }
 0x40f   :  { %3801 = vmatmul.mubr.bf16.vlgmr.msra.gmra.mrb[20].mxu0 %v7767_v41 }
 0x482   :  { %v3638_v63 = vpop.f32.mrb[12].mxu0  ;;  %v3679_v57 = vpop.f32.mrb[12].mxu1 }
 0x483   :  { %v3808_v1 = vpack.c.bf16 %v3638_v63, %v3638_v63  ;;  %v3810_v22 = vpack.c.bf16 %v3679_v57, %v3679_v57  ;;  %v3640_v3 = vpop.f32.mrb[13].mxu0  ;;  %v3681_v28 = vpop.f32.mrb[13].mxu1 }
 0x484   :  { %v3809_v30 = vpack.c.bf16 %v3640_v3, %v3640_v3  ;;  %v3811_v4 = vpack.c.bf16 %v3681_v28, %v3681_v28  ;;  %v3642_v5 = vpop.f32.mrb[14].mxu0  ;;  %v3683_v7 = vpop.f32.mrb[14].mxu1 }
 0x485   :  { %3817 = vst [vmem:[#allocation3] sm:$0x3] %v3808_v1  ;;  %v6390_v2 = vrot.slane %v3808_v1, 10  ;;  %3824 = vst [vmem:[#allocation3 + $0x4] sm:$0x3] %v3810_v22  ;;  %v6392_v27 = vrot.slane %v3810_v22, 10 }
 0x486   :  { %v3643_v8 = vpop.f32.mrb[15].mxu0  ;;  %v3684_v41 = vpop.f32.mrb[15].mxu1  ;;  %v3821_v9 = vrot.slane %v3809_v30, 6  ;;  %3854 = vst [vmem:[#allocation3 + $0x14] sm:$0xc] %v3809_v30  ;;  %v3828_v10 = vrot.slane %v3811_v4, 6 }
 0x487   :  { %3862 = vst [vmem:[#allocation3 + $0x18] sm:$0xc] %v3811_v4  ;;  %3853 = vst [vmem:[#allocation3 + $0x14] sm:$0x3] %v6390_v2 }
 0x488   :  { %3861 = vst [vmem:[#allocation3 + $0x18] sm:$0x3] %v6392_v27  ;;  %3823 = vst [vmem:[#allocation3] sm:$0xc] %v3821_v9 }
 0x489   :  { %3830 = vst [vmem:[#allocation3 + $0x4] sm:$0xc] %v3828_v10 }
 0x48f   :  { %v6854_v45 = vld [vmem:[#allocation3 + $0x14] sm:$0xff]  }
 0x490   :  { %v6851_v11 = vld [vmem:[#allocation3] sm:$0xff]  }
 0x491   :  { %6707 = vmatpush3.bf16.msra.mxu1 %v6851_v11 }
 0x492   :  { %6708 = vmatprep.subr.bf16.mxu1 %v6944_v62 }
 0x4c2   :  { %v3720_v12 = vpop.f32.mrb[16].mxu0  ;;  %v3761_v43 = vpop.f32.mrb[16].mxu1 }
 0x4c3   :  { %v3812_v13 = vpack.c.bf16 %v3720_v12, %v3720_v12  ;;  %v3814_v14 = vpack.c.bf16 %v3761_v43, %v3761_v43  ;;  %v3722_v15 = vpop.f32.mrb[17].mxu0  ;;  %v3763_v16 = vpop.f32.mrb[17].mxu1 }
 0x4c4   :  { %v3813_v17 = vpack.c.bf16 %v3722_v15, %v3722_v15  ;;  %v3815_v18 = vpack.c.bf16 %v3763_v16, %v3763_v16  ;;  %v3724_v19 = vpop.f32.mrb[18].mxu0  ;;  %v3765_v20 = vpop.f32.mrb[18].mxu1 }
 0x4c5   :  { %3831 = vst [vmem:[#allocation3 + $0x8] sm:$0x3] %v3812_v13  ;;  %v6394_v21 = vrot.slane %v3812_v13, 10  ;;  %3838 = vst [vmem:[#allocation3 + $0xc] sm:$0x3] %v3814_v14  ;;  %v6396_v23 = vrot.slane %v3814_v14, 10 }
 0x4c6   :  { %v3725_v24 = vpop.f32.mrb[19].mxu0  ;;  %v3766_v32 = vpop.f32.mrb[19].mxu1  ;;  %v3835_v33 = vrot.slane %v3813_v17, 6  ;;  %3870 = vst [vmem:[#allocation3 + $0x1c] sm:$0xc] %v3813_v17  ;;  %v3842_v34 = vrot.slane %v3815_v18, 6 }
 0x4c7   :  { %3878 = vst [vmem:[#allocation3 + $0x20] sm:$0xc] %v3815_v18  ;;  %3869 = vst [vmem:[#allocation3 + $0x1c] sm:$0x3] %v6394_v21  ;;  %v4045_v14 = vld [vmem:[%s8608_s6] sm:$0x1] }
 0x4c8   :  { %3877 = vst [vmem:[#allocation3 + $0x20] sm:$0x3] %v6396_v23  ;;  %3837 = vst [vmem:[#allocation3 + $0x8] sm:$0xc] %v3835_v33  ;;  %v4049_v17 = vld [vmem:[%s8609_s7] sm:$0x1] }
 0x4c9   :  { %3844 = vst [vmem:[#allocation3 + $0xc] sm:$0xc] %v3842_v34 }
 0x4cf   :  { %v6855_v46 = vld [vmem:[#allocation3 + $0x1c] sm:$0xff]  }
 0x4d0   :  { %v6852_v36 = vld [vmem:[#allocation3 + $0x8] sm:$0xff]  }
 0x4d1   :  { %6709 = vmatpush3.bf16.msra.mxu1 %v6852_v36 }
 0x4d2   :  { %6710 = vmatprep.subr.bf16.mxu1 %v6944_v62 }
 0x4e2   :  { %v6494_v31 = vpop.f32.mrb[20].mxu0 }
 0x4e3   :  { %v6495_v25 = vpop.f32.mrb[21].mxu0 }
 0x4e4   :  { %v6496_v26 = vadd.f32 %v6495_v25, %v6494_v31  ;;  %v6497_v37 = vpop.f32.mrb[22].mxu0 }
 0x4e5   :  { %v6498_v38 = vpop.f32.mrb[23].mxu0 }
 0x4e6   :  { %v3816_v39 = vpack.c.bf16 %v6496_v26, %v6496_v26 }
 0x4e8   :  { %3845 = vst [vmem:[#allocation3 + $0x10] sm:$0x3] %v3816_v39  ;;  %v6398_v40 = vrot.slane %v3816_v39, 10 }
 0x4ea   :  { %3885 = vst [vmem:[#allocation3 + $0x24] sm:$0x3] %v6398_v40 }
 0x4ef   :  { %v6853_v42 = vld [vmem:[#allocation3 + $0x10] ss:$0 sps:$4 sm:$0x33]  }
 0x4f0   :  { %v3912_v44 = vsel %vm3910_vm9, %v6853_v42, 0 }
 0x4f1   :  { %6711 = vmatpush3.bf16.msra.mxu1 %v3912_v44  ;;  %v6856_v47 = vld [vmem:[#allocation3 + $0x24] ss:$0 sps:$4 sm:$0x33]  }
 0x4f2   :  { %6716 = vmatprep.subr.bf16.mxu1 %v6944_v62  ;;  %v3976_v48 = vsel %vm3910_vm9, %v6856_v47, 0 }
 0x4f4   :  { %6713 = vmatmul.mubr.msk.bf16.vlgmr.msra.gmra.mrb[20].mxu1 %vm3906_vm10, %v7051_v0 }
 0x4f5   :  { %6717 = vmatpush3.bf16.msra.mxu1 %v6854_v45  ;;  %6722 = vmatprep.mubr.msk.bf16.mxu1 %vm6945_vm8, %v6944_v62 }
 0x4f6   :  { %6718 = vmatprep.subr.bf16.mxu1 %v6944_v62 }
 0x4f9   :  { %6719 = vmatpush3.bf16.msra.mxu1 %v6855_v46 }
 0x4fa   :  { %6720 = vmatprep.subr.bf16.mxu1 %v6944_v62 }
 0x4fd   :  { %6721 = vmatpush3.bf16.msra.mxu1 %v3976_v48 }
 0x500   :  { %6723 = vmatmul.mubr.msk.bf16.vlgmr.msra.gmra.mrb[24].mxu1 %vm3906_vm10, %v7051_v0 }
 0x5c7   :  { %v3948_v35 = vpop.f32.mrb[20].mxu1 }
 0x5c8   :  { %v4028_v49 = vmul.f32 %v3948_v35, %v3948_v35  ;;  %v6714_v55 = vpop.f32.mrb[21].mxu1 }
 0x5c9   :  { %v3951_v50 = vpop.f32.mrb[22].mxu1 }
 0x5ca   :  { %v4019_v51 = vadd.f32 %v3951_v50, %v3948_v35  ;;  %v4029_v53 = vmul.f32 %v3951_v50, %v3951_v50  ;;  %v6715_v54 = vpop.f32.mrb[23].mxu1 }
 0x5cc   :  { %v4032_v56 = vadd.f32 %v4029_v53, %v4028_v49 }
 0x5d3   :  { %v4012_v58 = vpop.f32.mrb[24].mxu1 }
 0x5d4   :  { %v4020_v59 = vadd.f32 %v4019_v51, %v4012_v58  ;;  %v4030_v52 = vmul.f32 %v4012_v58, %v4012_v58  ;;  %v6724_v60 = vpop.f32.mrb[25].mxu1 }
 0x5d5   :  { %v4015_v61 = vpop.f32.mrb[26].mxu1 }
 0x5d6   :  { %v4033_v63 = vadd.f32 %v4032_v56, %v4030_v52  ;;  %v4021_v57 = vadd.f32 %v4020_v59, %v4015_v61  ;;  %v4031_v62 = vmul.f32 %v4015_v61, %v4015_v61  ;;  %v6725_v1 = vpop.f32.mrb[27].mxu1 }
 0x5d8   :  { %v4022_v22 = vrot.slane %v4021_v57, 4  ;;  %v4034_v3 = vadd.f32 %v4033_v63, %v4031_v62 }
 0x5da   :  { %v4023_v0 = vadd.f32 %v4022_v22, %v4021_v57  ;;  %v4035_v28 = vrot.slane %v4034_v3, 4 }
 0x5dc   :  { %v4024_v30 = vrot.slane %v4023_v0, 2  ;;  %v4036_v4 = vadd.f32 %v4035_v28, %v4034_v3 }
 0x5de   :  { %v4025_v5 = vadd.f32 %v4024_v30, %v4023_v0  ;;  %v4037_v7 = vrot.slane %v4036_v4, 2 }
 0x5e0   :  { %v4026_v2 = vrot.slane %v4025_v5, 1  ;;  %v4038_v27 = vadd.f32 %v4037_v7, %v4036_v4 }
 0x5e2   :  { %v4027_v8 = vadd.f32 %v4026_v2, %v4025_v5  ;;  %v4039_v41 = vrot.slane %v4038_v27, 1 }
 0x5e4   :  { %v4040_v9 = vadd.f32 %v4039_v41, %v4038_v27  ;;  %v4041_v10 = vmul.f32 0.03125, %v4027_v8 }
 0x5e6   :  { %v4042_v11 = vmul.f32 0.03125, %v4040_v9  ;;  %v4043_v12 = vmul.f32 %v4041_v10, %v4041_v10 }
 0x5e8   :  { %v4044_v43 = vsub.f32 %v4042_v11, %v4043_v12 }
 0x5ea   :  { %v4046_v13 = vadd.f32 1e-05, %v4044_v43 }
 0x5ec   :  { %6857 = vrsqrt.f32 %v4046_v13 }
 0x5f6   :  { %v6858_v15 = vpop.eup %6857 }
 0x5f7   :  { %v4048_v16 = vmul.f32 %v6858_v15, %v4045_v14 }
 0x5f9   :  { %v4050_v18 = vmul.f32 %v4048_v16, %v4041_v10  ;;  %v4056_v19 = vrot.slane %v4048_v16, %v7664_v29 }
 0x5fb   :  { %v4051_v20 = vsub.f32 %v4049_v17, %v4050_v18  ;;  %v4058_v21 = vmul.f32 %v4056_v19, %v3948_v35  ;;  %v4059_v23 = vmul.f32 %v4056_v19, %v3951_v50  ;;  %v4060_v24 = vmul.f32 %v4056_v19, %v4012_v58 }
 0x5fc   :  { %v4061_v32 = vmul.f32 %v4056_v19, %v4015_v61 }
 0x5fd   :  { %v4066_v33 = vrot.slane %v4051_v20, %v7664_v29 }
 0x5ff   :  { %v4068_v34 = vadd.f32 %v4066_v33, %v4058_v21  ;;  %v4069_v36 = vadd.f32 %v4066_v33, %v4059_v23  ;;  %v4070_v31 = vadd.f32 %v4066_v33, %v4060_v24  ;;  %v4071_v25 = vadd.f32 %v4066_v33, %v4061_v32 }
 0x601   :  { %vm4072_vm11 = vcmp.gt.f32.partialorder %v4068_v34, 0.0  ;;  %vm4073_vm12 = vcmp.gt.f32.partialorder %v4069_v36, 0.0  ;;  %vm4074_vm13 = vcmp.gt.f32.partialorder %v4070_v31, 0.0  ;;  %vm4075_vm14 = vcmp.gt.f32.partialorder %v4071_v25, 0.0 }
 0x602   :  { %v4076_v26 = vmul.f32 0.2, %v4068_v34  ;;  %v4077_v37 = vmul.f32 0.2, %v4069_v36  ;;  %v4078_v38 = vmul.f32 0.2, %v4070_v31 }
 0x603   :  { %v4079_v39 = vmul.f32 0.2, %v4071_v25 }
 0x604   :  { %v7797_v40 = vsel %vm4072_vm11, %v4068_v34, %v4076_v26  ;;  %v7799_v42 = vsel %vm4073_vm12, %v4069_v36, %v4077_v37  ;;  %v7801_v44 = vsel %vm4074_vm13, %v4070_v31, %v4078_v38 }
 0x605   :  { %v7803_v45 = vsel %vm4075_vm14, %v4071_v25, %v4079_v39 }
 0x606   :  { %6921 = dma.done.wait [#allocation12 + $0x2], 5120 }
 0x607   :  { %6922 = vsyncadd [#allocation12 + $0x2], 4294962176 }
 0x608   :  { %6923 = dma.done.wait [#allocation12 + $0x3], 1024 }
 0x609   :  { %6924 = vsyncadd [#allocation12 + $0x3], 4294966272  ;;  %4174 = vmatprep.mubr.bf16.mxu1 %v6942_v6  ;;  %4227 = vmatprep.mubr.bf16.mxu0 %v6942_v6  ;;  %v4093_v46 = vld [vmem:[#allocation8 + $0x8] sm:$0xff]  ;;  %v4092_v47 = vld [vmem:[#allocation8] sm:$0xff]  ;;  %v4140_v10 = vpack.c.bf16 %v7799_v42, %v7797_v40  ;;  %v4141_v12 = vpack.c.bf16 %v7803_v45, %v7801_v44  ;;  %vm8619_vm15 = vcmask 523264   ;;  %vm4368_vm0 = vcmask 130048  }
 0x60a   :  { %v4098_v48 = vld [vmem:[#allocation8 + $0x30] sm:$0xff]  ;;  %4142 = vmatprep.subr.bf16.mxu1 %v4093_v46  ;;  %v4095_v35 = vld [vmem:[#allocation8 + $0x18] sm:$0xff]  ;;  %v4100_v55 = vld [vmem:[#allocation8 + $0x40] sm:$0xff] }
 0x60b   :  { %v4094_v49 = vld [vmem:[#allocation8 + $0x10] sm:$0xff]  ;;  %4143 = vmatpush1.bf16.msra.mxu1 %v4092_v47  ;;  %4195 = vmatprep.subr.bf16.mxu0 %v4095_v35  ;;  %v4097_v50 = vld [vmem:[#allocation8 + $0x28] sm:$0xff]  ;;  %v4103_v51 = vld [vmem:[#allocation8 + $0x58] sm:$0xff] }
 0x60c   :  { %4144 = vmatprep.subr.bf16.mxu1 %v4098_v48  ;;  %4196 = vmatpush1.bf16.msra.mxu0 %v4094_v49  ;;  %v4099_v53 = vld [vmem:[#allocation8 + $0x38] sm:$0xff]  ;;  %v4105_v54 = vld [vmem:[#allocation8 + $0x68] sm:$0xff]  ;;  %v4102_v56 = vld [vmem:[#allocation8 + $0x50] sm:$0xff] }
 0x60d   :  { %4197 = vmatprep.subr.bf16.mxu0 %v4100_v55  ;;  %v4108_v58 = vld [vmem:[#allocation8 + $0x80] sm:$0xff]  ;;  %v4110_v52 = vld [vmem:[#allocation8 + $0x90] sm:$0xff]  ;;  %v4107_v60 = vld [vmem:[#allocation8 + $0x78] sm:$0xff] }
 0x60e   :  { %v4104_v59 = vld [vmem:[#allocation8 + $0x60] sm:$0xff]  ;;  %v4113_v61 = vld [vmem:[#allocation8 + $0xa8] sm:$0xff]  ;;  %v4115_v57 = vld [vmem:[#allocation8 + $0xb8] sm:$0xff] }
 0x60f   :  { %4145 = vmatpush1.bf16.msra.mxu1 %v4097_v50  ;;  %v4109_v63 = vld [vmem:[#allocation8 + $0x88] sm:$0xff]  ;;  %v4112_v62 = vld [vmem:[#allocation8 + $0xa0] sm:$0xff]  ;;  %v4118_v1 = vld [vmem:[#allocation8 + $0xd0] sm:$0xff] }
 0x610   :  { %4146 = vmatprep.subr.bf16.mxu1 %v4103_v51  ;;  %4198 = vmatpush1.bf16.msra.mxu0 %v4099_v53  ;;  %v4114_v22 = vld [vmem:[#allocation8 + $0xb0] sm:$0xff]  ;;  %v4120_v3 = vld [vmem:[#allocation8 + $0xe0] sm:$0xff]  ;;  %v4117_v0 = vld [vmem:[#allocation8 + $0xc8] sm:$0xff] }
 0x611   :  { %4199 = vmatprep.subr.bf16.mxu0 %v4105_v54  ;;  %v4123_v28 = vld [vmem:[#allocation8 + $0xf8] sm:$0xff]  ;;  %v4125_v4 = vld [vmem:[#allocation8 + $0x108] sm:$0xff]  ;;  %v4122_v5 = vld [vmem:[#allocation8 + $0xf0] sm:$0xff] }
 0x612   :  { %v4119_v30 = vld [vmem:[#allocation8 + $0xd8] sm:$0xff]  ;;  %v4128_v7 = vld [vmem:[#allocation8 + $0x120] sm:$0xff]  ;;  %v4130_v27 = vld [vmem:[#allocation8 + $0x130] sm:$0xff] }
 0x613   :  { %4147 = vmatpush1.bf16.msra.mxu1 %v4102_v56  ;;  %v4124_v2 = vld [vmem:[#allocation8 + $0x100] sm:$0xff]  ;;  %v4127_v8 = vld [vmem:[#allocation8 + $0x118] sm:$0xff]  ;;  %v4129_v41 = vld [vmem:[#allocation8 + $0x128] sm:$0xff] }
 0x614   :  { %4148 = vmatprep.subr.bf16.mxu1 %v4108_v58  ;;  %4200 = vmatpush1.bf16.msra.mxu0 %v4104_v59  ;;  %v4096_v9 = vld [vmem:[#allocation8 + $0x20] sm:$0xff]  ;;  %v4101_v11 = vld [vmem:[#allocation8 + $0x48] sm:$0xff]  ;;  %v4106_v43 = vld [vmem:[#allocation8 + $0x70] sm:$0xff] }
 0x615   :  { %4201 = vmatprep.subr.bf16.mxu0 %v4110_v52  ;;  %v4111_v13 = vld [vmem:[#allocation8 + $0x98] sm:$0xff]  ;;  %v4116_v14 = vld [vmem:[#allocation8 + $0xc0] sm:$0xff]  ;;  %v4121_v15 = vld [vmem:[#allocation8 + $0xe8] sm:$0xff] }
 0x616   :  { %v4126_v16 = vld [vmem:[#allocation8 + $0x110] sm:$0xff]  ;;  %v4131_v17 = vld [vmem:[#allocation8 + $0x138] sm:$0xff]  ;;  %v4133_v50 = vld [vmem:[#allocation9 + $0x8] sm:$0xff] }
 0x617   :  { %4149 = vmatpush1.bf16.msra.mxu1 %v4107_v60 }
 0x618   :  { %4150 = vmatprep.subr.bf16.mxu1 %v4113_v61  ;;  %4202 = vmatpush1.bf16.msra.mxu0 %v4109_v63 }
 0x619   :  { %4203 = vmatprep.subr.bf16.mxu0 %v4115_v57 }
 0x61b   :  { %4151 = vmatpush1.bf16.msra.mxu1 %v4112_v62 }
 0x61c   :  { %4152 = vmatprep.subr.bf16.mxu1 %v4118_v1  ;;  %4204 = vmatpush1.bf16.msra.mxu0 %v4114_v22 }
 0x61d   :  { %4205 = vmatprep.subr.bf16.mxu0 %v4120_v3 }
 0x61f   :  { %4153 = vmatpush1.bf16.msra.mxu1 %v4117_v0 }
 0x620   :  { %4154 = vmatprep.subr.bf16.mxu1 %v4123_v28  ;;  %4206 = vmatpush1.bf16.msra.mxu0 %v4119_v30 }
 0x621   :  { %4207 = vmatprep.subr.bf16.mxu0 %v4125_v4 }
 0x623   :  { %4155 = vmatpush1.bf16.msra.mxu1 %v4122_v5 }
 0x624   :  { %4156 = vmatprep.subr.bf16.mxu1 %v4128_v7  ;;  %4208 = vmatpush1.bf16.msra.mxu0 %v4124_v2 }
 0x625   :  { %4209 = vmatprep.subr.bf16.mxu0 %v4130_v27 }
 0x627   :  { %4157 = vmatpush1.bf16.msra.mxu1 %v4127_v8 }
 0x628   :  { %4210 = vmatpush1.bf16.msra.mxu0 %v4129_v41  ;;  %6726 = vmatprep.subr.bf16.mxu1 %v4096_v9 }
 0x629   :  { %4381 = vmatprep.subr.bf16.mxu0 %v6942_v6 }
 0x62a   :  { %4175 = vmatmul.mubr.bf16.vlgmr.msra.gmra.mrb[28].mxu1 %v4140_v10 }
 0x62b   :  { %4228 = vmatmul.mubr.bf16.vlgmr.msra.gmra.mrb[24].mxu0 %v4140_v10  ;;  %4184 = vmatprep.mubr.bf16.mxu1 %v6942_v6 }
 0x62c   :  { %4237 = vmatprep.mubr.bf16.mxu0 %v6942_v6  ;;  %6727 = vmatpush3.bf16.msra.mxu1 %v4096_v9 }
 0x62d   :  { %6728 = vmatprep.subr.bf16.mxu1 %v4101_v11 }
 0x630   :  { %6729 = vmatpush3.bf16.msra.mxu1 %v4101_v11 }
 0x631   :  { %6730 = vmatprep.subr.bf16.mxu1 %v4106_v43 }
 0x632   :  { %4185 = vmatmul.mubr.bf16.gmra.mrb[32].mxu1 %v4141_v12 }
 0x633   :  { %4238 = vmatmul.mubr.bf16.gmra.mrb[28].mxu0 %v4141_v12  ;;  %6742 = vmatprep.mubr.bf16.mxu1 %v4140_v10 }
 0x634   :  { %6731 = vmatpush3.bf16.msra.mxu1 %v4106_v43  ;;  %6407 = vmatprep.mubr.msk.bf16.mxu0 %vm4368_vm0, %v4133_v50  ;;  %v4135_v43 = vld [vmem:[#allocation9 + $0x18] sm:$0xff] }
 0x635   :  { %6732 = vmatprep.subr.bf16.mxu1 %v4111_v13 }
 0x638   :  { %6733 = vmatpush3.bf16.msra.mxu1 %v4111_v13 }
 0x639   :  { %6734 = vmatprep.subr.bf16.mxu1 %v4116_v14 }
 0x63c   :  { %6735 = vmatpush3.bf16.msra.mxu1 %v4116_v14 }
 0x63d   :  { %6736 = vmatprep.subr.bf16.mxu1 %v4121_v15 }
 0x640   :  { %6737 = vmatpush3.bf16.msra.mxu1 %v4121_v15  ;;  %v4134_v15 = vld [vmem:[#allocation9 + $0x10] sm:$0xff] }
 0x641   :  { %6738 = vmatprep.subr.bf16.mxu1 %v4126_v16 }
 0x644   :  { %6739 = vmatpush3.bf16.msra.mxu1 %v4126_v16  ;;  %v4137_v16 = vld [vmem:[#allocation9 + $0x28] sm:$0xff] }
 0x645   :  { %6740 = vmatprep.subr.bf16.mxu1 %v4131_v17 }
 0x648   :  { %6741 = vmatpush3.bf16.msra.mxu1 %v4131_v17  ;;  %v4136_v17 = vld [vmem:[#allocation9 + $0x20] sm:$0xff] }
 0x649   :  { %4455 = vmatprep.subr.bf16.mxu1 %v6942_v6 }
 0x64b   :  { %6743 = vmatmul.mubr.bf16.vlgmr.msra.gmra.mrb[36].mxu1 %v4141_v12  ;;  %v4132_v12 = vld [vmem:[#allocation9] sm:$0xff] }
 0x64c   :  { %6411 = vmatprep.mubr.msk.bf16.mxu1 %vm4368_vm0, %v4133_v50 }
 0x6fd   :  { %v4176_v18 = vpop.f32.mrb[28].mxu1 }
 0x6fe   :  { %v4178_v19 = vpop.f32.mrb[29].mxu1  ;;  %v4229_v20 = vpop.f32.mrb[24].mxu0 }
 0x6ff   :  { %v4180_v21 = vpop.f32.mrb[30].mxu1  ;;  %v4231_v23 = vpop.f32.mrb[25].mxu0 }
 0x700   :  { %v4297_v24 = vpack.c.bf16 %v4180_v21, %v4176_v18  ;;  %v4182_v32 = vpop.f32.mrb[31].mxu1  ;;  %v4233_v33 = vpop.f32.mrb[26].mxu0  ;;  %v4139_v18 = vld [vmem:[#allocation9 + $0x38] sm:$0xff] }
 0x701   :  { %v4298_v34 = vpack.c.bf16 %v4182_v32, %v4178_v19  ;;  %v4299_v36 = vpack.c.bf16 %v4233_v33, %v4229_v20  ;;  %v4235_v31 = vpop.f32.mrb[27].mxu0  ;;  %v4138_v19 = vld [vmem:[#allocation9 + $0x30] sm:$0xff] }
 0x702   :  { %4308 = vst.msk [vmem:[#allocation4] sm:$0xff] %vm8619_vm15, %v4297_v24  ;;  %4310 = vrot.lane.b32.xlu0 %v4297_v24, %s6934_s24  ;;  %v4300_v25 = vpack.c.bf16 %v4235_v31, %v4231_v23 }
 0x703   :  { %4314 = vst.msk [vmem:[#allocation4 + $0x10] sm:$0xff] %vm8619_vm15, %v4298_v34  ;;  %4320 = vst.msk [vmem:[#allocation4 + $0x20] sm:$0xff] %vm8619_vm15, %v4299_v36  ;;  %4322 = vrot.lane.b32.xlu1 %v4299_v36, %s6934_s24 }
 0x704   :  { %4326 = vst.msk [vmem:[#allocation4 + $0x30] sm:$0xff] %vm8619_vm15, %v4300_v25 }
 0x705   :  { %v4186_v26 = vpop.f32.mrb[32].mxu1 }
 0x706   :  { %4316 = vrot.lane.b32.xlu0 %v4298_v34, %s6934_s24  ;;  %v4188_v37 = vpop.f32.mrb[33].mxu1  ;;  %v4239_v38 = vpop.f32.mrb[28].mxu0 }
 0x707   :  { %v4190_v39 = vpop.f32.mrb[34].mxu1  ;;  %v4241_v40 = vpop.f32.mrb[29].mxu0 }
 0x708   :  { %v4302_v42 = vpack.c.bf16 %v4190_v39, %v4186_v26  ;;  %v4192_v44 = vpop.f32.mrb[35].mxu1  ;;  %v4243_v45 = vpop.f32.mrb[30].mxu0 }
 0x709   :  { %v4359_v46 = vld [vmem:[#allocation4] sm:$0xff]  ;;  %v4303_v47 = vpack.c.bf16 %v4192_v44, %v4188_v37  ;;  %v4304_v48 = vpack.c.bf16 %v4243_v45, %v4239_v38  ;;  %v4245_v35 = vpop.f32.mrb[31].mxu0 }
 0x70a   :  { %4334 = vst.msk [vmem:[#allocation4 + $0x48] sm:$0xff] %vm8619_vm15, %v4302_v42  ;;  %4382 = vmatpush1.bf16.msra.mxu0 %v4359_v46  ;;  %4336 = vrot.lane.b32.xlu1 %v4302_v42, %s6934_s24  ;;  %v4305_v49 = vpack.c.bf16 %v4245_v35, %v4241_v40  ;;  %v4361_v1 = vld [vmem:[#allocation4 + $0x10] sm:$0xff]  ;;  %v4363_v4 = vld [vmem:[#allocation4 + $0x20] sm:$0xff] }
 0x70b   :  { %4328 = vrot.lane.b32.xlu0 %v4300_v25, %s6934_s24  ;;  %4340 = vst.msk [vmem:[#allocation4 + $0x58] sm:$0xff] %vm8619_vm15, %v4303_v47  ;;  %4346 = vst.msk [vmem:[#allocation4 + $0x68] sm:$0xff] %vm8619_vm15, %v4304_v48  ;;  %4383 = vmatprep.subr.bf16.mxu0 %v6942_v6  ;;  %v4365_v27 = vld [vmem:[#allocation4 + $0x30] sm:$0xff] }
 0x70c   :  { %4352 = vst.msk [vmem:[#allocation4 + $0x78] sm:$0xff] %vm8619_vm15, %v4305_v49 }
 0x70e   :  { %4342 = vrot.lane.b32.xlu1 %v4303_v47, %s6934_s24 }
 0x70f   :  { %4348 = vrot.lane.b32.xlu0 %v4304_v48, %s6934_s24 }
 0x711   :  { %v4446_v55 = vld [vmem:[#allocation4 + $0x48] sm:$0xff] }
 0x712   :  { %4456 = vmatpush1.bf16.msra.mxu1 %v4446_v55  ;;  %4354 = vrot.lane.b32.xlu1 %v4305_v49, %s6934_s24  ;;  %v4448_v5 = vld [vmem:[#allocation4 + $0x58] sm:$0xff]  ;;  %v4450_v8 = vld [vmem:[#allocation4 + $0x68] sm:$0xff] }
 0x713   :  { %4457 = vmatprep.subr.bf16.mxu1 %v6942_v6  ;;  %v4452_v11 = vld [vmem:[#allocation4 + $0x78] sm:$0xff] }
 0x71e   :  { %v6744_v51 = vpop.f32.mrb[36].mxu1 }
 0x71f   :  { %v4282_v53 = vpop.f32.mrb[37].mxu1 }
 0x720   :  { %v6745_v54 = vpop.f32.mrb[38].mxu1 }
 0x721   :  { %v4306_v56 = vpack.c.bf16 %v6745_v54, %v6744_v51  ;;  %v4285_v58 = vpop.f32.mrb[39].mxu1 }
 0x722   :  { %v4301_v59 = vpack.c.bf16 %v4285_v58, %v4282_v53 }
 0x723   :  { %4358 = vst.msk [vmem:[#allocation4 + $0x88] sm:$0xff] %vm8619_vm15, %v4306_v56 }
 0x724   :  { %4332 = vst.msk [vmem:[#allocation4 + $0x40] sm:$0xff] %vm8619_vm15, %v4301_v59 }
 0x72a   :  { %v4454_v14 = vld [vmem:[#allocation4 + $0x88] sm:$0xff] }
 0x72b   :  { %v4367_v10 = vld [vmem:[#allocation4 + $0x40] sm:$0xff] }
 0x774   :  { %v4311_v52 = vpop.permute.xlu0 %4310 }
 0x775   :  { %4313 = vst.msk [vmem:[#allocation4 + $0x8] sm:$0xff] %vm8619_vm15, %v4311_v52  ;;  %v4323_v60 = vpop.permute.xlu1 %4322 }
 0x776   :  { %4325 = vst.msk [vmem:[#allocation4 + $0x28] sm:$0xff] %vm8619_vm15, %v4323_v60 }
 0x778   :  { %v4317_v61 = vpop.permute.xlu0 %4316 }
 0x779   :  { %4319 = vst.msk [vmem:[#allocation4 + $0x18] sm:$0xff] %vm8619_vm15, %v4317_v61 }
 0x77c   :  { %v4337_v63 = vpop.permute.xlu1 %4336  ;;  %v4360_v57 = vld [vmem:[#allocation4 + $0x8] sm:$0xff] }
 0x77d   :  { %4339 = vst.msk [vmem:[#allocation4 + $0x50] sm:$0xff] %vm8619_vm15, %v4337_v63  ;;  %4384 = vmatpush1.bf16.msra.mxu0 %v4360_v57  ;;  %v4329_v62 = vpop.permute.xlu0 %4328  ;;  %v4364_v7 = vld [vmem:[#allocation4 + $0x28] sm:$0xff] }
 0x77e   :  { %4331 = vst.msk [vmem:[#allocation4 + $0x38] sm:$0xff] %vm8619_vm15, %v4329_v62  ;;  %4385 = vmatprep.subr.bf16.mxu0 %v6942_v6 }
 0x780   :  { %v4343_v22 = vpop.permute.xlu1 %4342  ;;  %v4362_v0 = vld [vmem:[#allocation4 + $0x18] sm:$0xff] }
 0x781   :  { %4386 = vmatpush1.bf16.msra.mxu0 %v4361_v1  ;;  %4345 = vst.msk [vmem:[#allocation4 + $0x60] sm:$0xff] %vm8619_vm15, %v4343_v22  ;;  %v4349_v3 = vpop.permute.xlu0 %4348 }
 0x782   :  { %4387 = vmatprep.subr.bf16.mxu0 %v6942_v6  ;;  %4351 = vst.msk [vmem:[#allocation4 + $0x70] sm:$0xff] %vm8619_vm15, %v4349_v3 }
 0x784   :  { %v4447_v28 = vld [vmem:[#allocation4 + $0x50] sm:$0xff]  ;;  %v4355_v30 = vpop.permute.xlu1 %4354 }
 0x785   :  { %4388 = vmatpush1.bf16.msra.mxu0 %v4362_v0  ;;  %4458 = vmatpush1.bf16.msra.mxu1 %v4447_v28  ;;  %4357 = vst.msk [vmem:[#allocation4 + $0x80] sm:$0xff] %vm8619_vm15, %v4355_v30  ;;  %v4366_v9 = vld [vmem:[#allocation4 + $0x38] sm:$0xff] }
 0x786   :  { %4389 = vmatprep.subr.bf16.mxu0 %v6942_v6  ;;  %4459 = vmatprep.subr.bf16.mxu1 %v6942_v6 }
 0x788   :  { %v4449_v2 = vld [vmem:[#allocation4 + $0x60] sm:$0xff] }
 0x789   :  { %4390 = vmatpush1.bf16.msra.mxu0 %v4363_v4  ;;  %4460 = vmatpush1.bf16.msra.mxu1 %v4448_v5  ;;  %v4451_v41 = vld [vmem:[#allocation4 + $0x70] sm:$0xff] }
 0x78a   :  { %4391 = vmatprep.subr.bf16.mxu0 %v6942_v6  ;;  %4461 = vmatprep.subr.bf16.mxu1 %v6942_v6 }
 0x78c   :  { %v4453_v13 = vld [vmem:[#allocation4 + $0x80] sm:$0xff] }
 0x78d   :  { %4392 = vmatpush1.bf16.msra.mxu0 %v4364_v7  ;;  %4462 = vmatpush1.bf16.msra.mxu1 %v4449_v2 }
 0x78e   :  { %4393 = vmatprep.subr.bf16.mxu0 %v6942_v6  ;;  %4463 = vmatprep.subr.bf16.mxu1 %v6942_v6 }
 0x791   :  { %4394 = vmatpush1.bf16.msra.mxu0 %v4365_v27  ;;  %4464 = vmatpush1.bf16.msra.mxu1 %v4450_v8 }
 0x792   :  { %4395 = vmatprep.subr.bf16.mxu0 %v6942_v6  ;;  %4465 = vmatprep.subr.bf16.mxu1 %v6942_v6 }
 0x795   :  { %4396 = vmatpush1.bf16.msra.mxu0 %v4366_v9  ;;  %4466 = vmatpush1.bf16.msra.mxu1 %v4451_v41 }
 0x796   :  { %4397 = vmatprep.subr.bf16.mxu0 %v6942_v6  ;;  %4467 = vmatprep.subr.bf16.mxu1 %v6942_v6 }
 0x799   :  { %4398 = vmatpush1.bf16.msra.mxu0 %v4367_v10  ;;  %4468 = vmatpush1.bf16.msra.mxu1 %v4452_v11 }
 0x79a   :  { %4469 = vmatprep.subr.bf16.mxu1 %v6942_v6 }
 0x79c   :  { %4414 = vmatmul.mubr.bf16.vlgmr.msra.gmra.mrb[32].mxu0 %v4132_v12 }
 0x79d   :  { %4470 = vmatpush1.bf16.msra.mxu1 %v4453_v13  ;;  %6408 = vmatprep.mubr.msk.bf16.mxu0 %vm4368_vm0, %v4135_v43 }
 0x79e   :  { %4471 = vmatprep.subr.bf16.mxu1 %v6942_v6 }
 0x7a1   :  { %4472 = vmatpush1.bf16.msra.mxu1 %v4454_v14 }
 0x7a4   :  { %4422 = vmatmul.mubr.bf16.gmra.mrb[36].mxu0 %v4134_v15  ;;  %4488 = vmatmul.mubr.bf16.vlgmr.msra.gmra.mrb[40].mxu1 %v4132_v12 }
 0x7a5   :  { %6409 = vmatprep.mubr.msk.bf16.mxu0 %vm4368_vm0, %v4137_v16  ;;  %6412 = vmatprep.mubr.msk.bf16.mxu1 %vm4368_vm0, %v4135_v43 }
 0x7ac   :  { %4430 = vmatmul.mubr.bf16.gmra.mrb[40].mxu0 %v4136_v17  ;;  %4496 = vmatmul.mubr.bf16.gmra.mrb[44].mxu1 %v4134_v15 }
 0x7ad   :  { %6410 = vmatprep.mubr.msk.bf16.mxu0 %vm4368_vm0, %v4139_v18  ;;  %6413 = vmatprep.mubr.msk.bf16.mxu1 %vm4368_vm0, %v4137_v16 }
 0x7b4   :  { %4438 = vmatmul.mubr.bf16.gmra.mrb[44].mxu0 %v4138_v19  ;;  %4504 = vmatmul.mubr.bf16.gmra.mrb[48].mxu1 %v4136_v17 }
 0x7b5   :  { %6414 = vmatprep.mubr.msk.bf16.mxu1 %vm4368_vm0, %v4139_v18 }
 0x7bc   :  { %4512 = vmatmul.mubr.bf16.gmra.mrb[52].mxu1 %v4138_v19 }
 0x86f   :  { %v7865_v20 = vpop.f32.mrb[32].mxu0 }
 0x870   :  { %v4557_v21 = vmul.f32 %v7865_v20, %v7865_v20  ;;  %v4417_v23 = vpop.f32.mrb[33].mxu0  ;;  %v4520_v32 = vsel %vm8619_vm15, %v7865_v20, 0.0 }
 0x871   :  { %v7869_v24 = vpop.f32.mrb[34].mxu0 }
 0x872   :  { %v4521_v33 = vsel %vm8619_vm15, %v7869_v24, 0.0  ;;  %v4558_v34 = vmul.f32 %v7869_v24, %v7869_v24  ;;  %v4420_v36 = vpop.f32.mrb[35].mxu0  ;;  %v4573_v25 = vsel %vm8619_vm15, %v4557_v21, 0.0 }
 0x873   :  { %v4522_v31 = vadd.f32 %v4521_v33, %v4520_v32 }
 0x874   :  { %v4574_v26 = vsel %vm8619_vm15, %v4558_v34, 0.0 }
 0x875   :  { %v4575_v37 = vadd.f32 %v4574_v26, %v4573_v25 }
 0x877   :  { %v7879_v38 = vpop.f32.mrb[36].mxu0  ;;  %v7881_v39 = vpop.f32.mrb[40].mxu1 }
 0x878   :  { %v4523_v40 = vsel %vm8619_vm15, %v7879_v38, 0.0  ;;  %v4559_v42 = vmul.f32 %v7879_v38, %v7879_v38  ;;  %v4425_v44 = vpop.f32.mrb[37].mxu0  ;;  %v4491_v45 = vpop.f32.mrb[41].mxu1  ;;  %v4565_v15 = vmul.f32 %v7881_v39, %v7881_v39  ;;  %v4535_v33 = vsel %vm8619_vm15, %v7881_v39, 0.0 }
 0x879   :  { %v4524_v46 = vadd.f32 %v4523_v40, %v4522_v31  ;;  %v7887_v47 = vpop.f32.mrb[38].mxu0  ;;  %v7889_v48 = vpop.f32.mrb[42].mxu1 }
 0x87a   :  { %v4576_v35 = vsel %vm8619_vm15, %v4559_v42, 0.0  ;;  %v4525_v49 = vsel %vm8619_vm15, %v7887_v47, 0.0  ;;  %v4560_v55 = vmul.f32 %v7887_v47, %v7887_v47  ;;  %v4428_v50 = vpop.f32.mrb[39].mxu0  ;;  %v4494_v51 = vpop.f32.mrb[43].mxu1  ;;  %v4566_v34 = vmul.f32 %v7889_v48, %v7889_v48 }
 0x87b   :  { %v4577_v53 = vadd.f32 %v4576_v35, %v4575_v37  ;;  %v4526_v54 = vadd.f32 %v4525_v49, %v4524_v46  ;;  %v4588_v26 = vsel %vm8619_vm15, %v4565_v15, 0.0  ;;  %v4537_v37 = vsel %vm8619_vm15, %v7889_v48, 0.0 }
 0x87c   :  { %v4578_v56 = vsel %vm8619_vm15, %v4560_v55, 0.0  ;;  %v4590_v46 = vsel %vm8619_vm15, %v4566_v34, 0.0 }
 0x87d   :  { %v4579_v58 = vadd.f32 %v4578_v56, %v4577_v53 }
 0x87f   :  { %v7897_v59 = vpop.f32.mrb[40].mxu0  ;;  %v7899_v52 = vpop.f32.mrb[44].mxu1 }
 0x880   :  { %v4527_v60 = vsel %vm8619_vm15, %v7897_v59, 0.0  ;;  %v4561_v61 = vmul.f32 %v7897_v59, %v7897_v59  ;;  %v4433_v63 = vpop.f32.mrb[41].mxu0  ;;  %v4499_v57 = vpop.f32.mrb[45].mxu1  ;;  %v4567_v40 = vmul.f32 %v7899_v52, %v7899_v52  ;;  %v4539_v35 = vsel %vm8619_vm15, %v7899_v52, 0.0 }
 0x881   :  { %v4528_v62 = vadd.f32 %v4527_v60, %v4526_v54  ;;  %v7905_v1 = vpop.f32.mrb[42].mxu0  ;;  %v7907_v22 = vpop.f32.mrb[46].mxu1 }
 0x882   :  { %v4580_v3 = vsel %vm8619_vm15, %v4561_v61, 0.0  ;;  %v4529_v0 = vsel %vm8619_vm15, %v7905_v1, 0.0  ;;  %v4562_v28 = vmul.f32 %v7905_v1, %v7905_v1  ;;  %v4436_v30 = vpop.f32.mrb[43].mxu0  ;;  %v4502_v4 = vpop.f32.mrb[47].mxu1  ;;  %v4568_v49 = vmul.f32 %v7907_v22, %v7907_v22 }
 0x883   :  { %v4581_v5 = vadd.f32 %v4580_v3, %v4579_v58  ;;  %v4530_v7 = vadd.f32 %v4529_v0, %v4528_v62  ;;  %v4592_v54 = vsel %vm8619_vm15, %v4567_v40, 0.0  ;;  %v4541_v56 = vsel %vm8619_vm15, %v7907_v22, 0.0 }
 0x884   :  { %v4582_v2 = vsel %vm8619_vm15, %v4562_v28, 0.0  ;;  %v4594_v57 = vsel %vm8619_vm15, %v4568_v49, 0.0 }
 0x885   :  { %v4583_v27 = vadd.f32 %v4582_v2, %v4581_v5 }
 0x887   :  { %v7915_v8 = vpop.f32.mrb[44].mxu0  ;;  %v7917_v41 = vpop.f32.mrb[48].mxu1 }
 0x888   :  { %v4531_v9 = vsel %vm8619_vm15, %v7915_v8, 0.0  ;;  %v4563_v10 = vmul.f32 %v7915_v8, %v7915_v8  ;;  %v4441_v11 = vpop.f32.mrb[45].mxu0  ;;  %v4507_v12 = vpop.f32.mrb[49].mxu1  ;;  %v4569_v58 = vmul.f32 %v7917_v41, %v7917_v41  ;;  %v4543_v62 = vsel %vm8619_vm15, %v7917_v41, 0.0 }
 0x889   :  { %v4532_v43 = vadd.f32 %v4531_v9, %v4530_v7  ;;  %v7923_v13 = vpop.f32.mrb[46].mxu0  ;;  %v7925_v14 = vpop.f32.mrb[50].mxu1 }
 0x88a   :  { %v4584_v16 = vsel %vm8619_vm15, %v4563_v10, 0.0  ;;  %v4533_v17 = vsel %vm8619_vm15, %v7923_v13, 0.0  ;;  %v4564_v18 = vmul.f32 %v7923_v13, %v7923_v13  ;;  %v4444_v19 = vpop.f32.mrb[47].mxu0  ;;  %v4510_v21 = vpop.f32.mrb[51].mxu1  ;;  %v4570_v3 = vmul.f32 %v7925_v14, %v7925_v14 }
 0x88b   :  { %v4585_v23 = vadd.f32 %v4584_v16, %v4583_v27  ;;  %v4534_v32 = vadd.f32 %v4533_v17, %v4532_v43  ;;  %v4596_v4 = vsel %vm8619_vm15, %v4569_v58, 0.0  ;;  %v4545_v5 = vsel %vm8619_vm15, %v7925_v14, 0.0 }
 0x88c   :  { %v4586_v36 = vsel %vm8619_vm15, %v4564_v18, 0.0  ;;  %v4598_v9 = vsel %vm8619_vm15, %v4570_v3, 0.0 }
 0x88d   :  { %v4536_v31 = vadd.f32 %v4535_v33, %v4534_v32  ;;  %v4587_v25 = vadd.f32 %v4586_v36, %v4585_v23 }
 0x88f   :  { %v4538_v42 = vadd.f32 %v4537_v37, %v4536_v31  ;;  %v4589_v44 = vadd.f32 %v4588_v26, %v4587_v25  ;;  %v7944_v45 = vpop.f32.mrb[52].mxu1 }
 0x890   :  { %v4515_v55 = vpop.f32.mrb[53].mxu1  ;;  %v4571_v0 = vmul.f32 %v7944_v45, %v7944_v45  ;;  %v4547_v7 = vsel %vm8619_vm15, %v7944_v45, 0.0 }
 0x891   :  { %v4591_v50 = vadd.f32 %v4590_v46, %v4589_v44  ;;  %v4540_v51 = vadd.f32 %v4539_v35, %v4538_v42  ;;  %v7951_v53 = vpop.f32.mrb[54].mxu1 }
 0x892   :  { %v4518_v60 = vpop.f32.mrb[55].mxu1  ;;  %v4600_v10 = vsel %vm8619_vm15, %v4571_v0, 0.0  ;;  %v4572_v11 = vmul.f32 %v7951_v53, %v7951_v53  ;;  %v4549_v15 = vsel %vm8619_vm15, %v7951_v53, 0.0 }
 0x893   :  { %v4542_v61 = vadd.f32 %v4541_v56, %v4540_v51  ;;  %v4593_v63 = vadd.f32 %v4592_v54, %v4591_v50  ;;  %v4614_v50 = vld [vmem:[%s8610_s8] sm:$0x1] }
 0x894   :  { %v4602_v18 = vsel %vm8619_vm15, %v4572_v11, 0.0  ;;  %v4618_v56 = vld [vmem:[%s8611_s9] sm:$0x1] }
 0x895   :  { %v4544_v28 = vadd.f32 %v4543_v62, %v4542_v61  ;;  %v4595_v30 = vadd.f32 %v4594_v57, %v4593_v63 }
 0x897   :  { %v4597_v2 = vadd.f32 %v4596_v4, %v4595_v30  ;;  %v4546_v27 = vadd.f32 %v4545_v5, %v4544_v28 }
 0x899   :  { %v4599_v12 = vadd.f32 %v4598_v9, %v4597_v2  ;;  %v4548_v43 = vadd.f32 %v4547_v7, %v4546_v27 }
 0x89b   :  { %v4601_v16 = vadd.f32 %v4600_v10, %v4599_v12  ;;  %v4550_v17 = vadd.f32 %v4549_v15, %v4548_v43 }
 0x89d   :  { %v4551_v19 = vrot.slane %v4550_v17, 4  ;;  %v4603_v21 = vadd.f32 %v4602_v18, %v4601_v16 }
 0x89f   :  { %v4552_v23 = vadd.f32 %v4551_v19, %v4550_v17  ;;  %v4604_v32 = vrot.slane %v4603_v21, 4 }
 0x8a1   :  { %v4553_v33 = vrot.slane %v4552_v23, 2  ;;  %v4605_v34 = vadd.f32 %v4604_v32, %v4603_v21 }
 0x8a3   :  { %v4554_v36 = vadd.f32 %v4553_v33, %v4552_v23  ;;  %v4606_v31 = vrot.slane %v4605_v34, 2 }
 0x8a5   :  { %v4555_v25 = vrot.slane %v4554_v36, 1  ;;  %v4607_v26 = vadd.f32 %v4606_v31, %v4605_v34 }
 0x8a7   :  { %v4556_v37 = vadd.f32 %v4555_v25, %v4554_v36  ;;  %v4608_v40 = vrot.slane %v4607_v26, 1 }
 0x8a9   :  { %v4609_v42 = vadd.f32 %v4608_v40, %v4607_v26  ;;  %v4610_v44 = vmul.f32 0.0078125, %v4556_v37 }
 0x8ab   :  { %v4611_v46 = vmul.f32 0.0078125, %v4609_v42  ;;  %v4612_v35 = vmul.f32 %v4610_v44, %v4610_v44 }
 0x8ad   :  { %v4613_v49 = vsub.f32 %v4611_v46, %v4612_v35 }
 0x8af   :  { %v4615_v55 = vadd.f32 1e-05, %v4613_v49 }
 0x8b1   :  { %6859 = vrsqrt.f32 %v4615_v55 }
 0x8bb   :  { %v6860_v51 = vpop.eup %6859 }
 0x8bc   :  { %v4617_v54 = vmul.f32 %v6860_v51, %v4614_v50 }
 0x8be   :  { %v4619_v58 = vmul.f32 %v4617_v54, %v4610_v44  ;;  %v4625_v60 = vrot.slane %v4617_v54, %v7664_v29 }
 0x8c0   :  { %v4620_v61 = vsub.f32 %v4618_v56, %v4619_v58  ;;  %v4627_v63 = vmul.f32 %v4625_v60, %v7865_v20  ;;  %v4628_v57 = vmul.f32 %v4625_v60, %v7869_v24  ;;  %v4629_v62 = vmul.f32 %v4625_v60, %v7879_v38 }
 0x8c1   :  { %v4630_v3 = vmul.f32 %v4625_v60, %v7887_v47  ;;  %v4631_v0 = vmul.f32 %v4625_v60, %v7897_v59  ;;  %v4632_v28 = vmul.f32 %v4625_v60, %v7905_v1  ;;  %v4633_v30 = vmul.f32 %v4625_v60, %v7915_v8 }
 0x8c2   :  { %v4634_v4 = vmul.f32 %v4625_v60, %v7923_v13  ;;  %v4635_v5 = vmul.f32 %v4625_v60, %v7881_v39  ;;  %v4636_v7 = vmul.f32 %v4625_v60, %v7889_v48  ;;  %v4637_v20 = vmul.f32 %v4625_v60, %v7899_v52 }
 0x8c3   :  { %v4638_v24 = vmul.f32 %v4625_v60, %v7907_v22  ;;  %v4639_v38 = vmul.f32 %v4625_v60, %v7917_v41  ;;  %v4640_v47 = vmul.f32 %v4625_v60, %v7925_v14  ;;  %v4641_v59 = vmul.f32 %v4625_v60, %v7944_v45 }
 0x8c4   :  { %v4642_v1 = vmul.f32 %v4625_v60, %v7951_v53  ;;  %v4647_v8 = vrot.slane %v4620_v61, %v7664_v29 }
 0x8c6   :  { %v4649_v2 = vadd.f32 %v4647_v8, %v4627_v63  ;;  %v4650_v13 = vadd.f32 %v4647_v8, %v4628_v57  ;;  %v4651_v27 = vadd.f32 %v4647_v8, %v4629_v62  ;;  %v4652_v39 = vadd.f32 %v4647_v8, %v4630_v3 }
 0x8c7   :  { %v4653_v9 = vadd.f32 %v4647_v8, %v4631_v0  ;;  %v4654_v48 = vadd.f32 %v4647_v8, %v4632_v28  ;;  %v4655_v10 = vadd.f32 %v4647_v8, %v4633_v30  ;;  %v4656_v52 = vadd.f32 %v4647_v8, %v4634_v4 }
 0x8c8   :  { %v4657_v11 = vadd.f32 %v4647_v8, %v4635_v5  ;;  %v4658_v22 = vadd.f32 %v4647_v8, %v4636_v7  ;;  %v4659_v12 = vadd.f32 %v4647_v8, %v4637_v20  ;;  %v4660_v41 = vadd.f32 %v4647_v8, %v4638_v24 }
 0x8c9   :  { %v4661_v43 = vadd.f32 %v4647_v8, %v4639_v38  ;;  %v4662_v14 = vadd.f32 %v4647_v8, %v4640_v47  ;;  %v4663_v15 = vadd.f32 %v4647_v8, %v4641_v59  ;;  %v4664_v45 = vadd.f32 %v4647_v8, %v4642_v1 }
 0x8ca   :  { %vm4665_vm1 = vcmp.gt.f32.partialorder %v4649_v2, 0.0  ;;  %vm4666_vm2 = vcmp.gt.f32.partialorder %v4650_v13, 0.0  ;;  %vm4667_vm3 = vcmp.gt.f32.partialorder %v4651_v27, 0.0  ;;  %vm4668_vm4 = vcmp.gt.f32.partialorder %v4652_v39, 0.0 }
 0x8cb   :  { %vm4669_vm5 = vcmp.gt.f32.partialorder %v4653_v9, 0.0  ;;  %vm4670_vm6 = vcmp.gt.f32.partialorder %v4654_v48, 0.0  ;;  %vm4671_vm7 = vcmp.gt.f32.partialorder %v4655_v10, 0.0  ;;  %vm4672_vm8 = vcmp.gt.f32.partialorder %v4656_v52, 0.0 }
 0x8cc   :  { %vm4673_vm9 = vcmp.gt.f32.partialorder %v4657_v11, 0.0  ;;  %vm4674_vm10 = vcmp.gt.f32.partialorder %v4658_v22, 0.0  ;;  %vm4675_vm11 = vcmp.gt.f32.partialorder %v4659_v12, 0.0  ;;  %vm4676_vm12 = vcmp.gt.f32.partialorder %v4660_v41, 0.0 }
 0x8cd   :  { %vm4677_vm13 = vcmp.gt.f32.partialorder %v4661_v43, 0.0  ;;  %vm4678_vm14 = vcmp.gt.f32.partialorder %v4662_v14, 0.0  ;;  %vm4679_vm0 = vcmp.gt.f32.partialorder %v4663_v15, 0.0  ;;  %vm4680_vm15 = vcmp.gt.f32.partialorder %v4664_v45, 0.0 }
 0x8ce   :  { %v4681_v29 = vmul.f32 0.2, %v4649_v2  ;;  %v4682_v53 = vmul.f32 0.2, %v4650_v13  ;;  %v4683_v16 = vmul.f32 0.2, %v4651_v27 }
 0x8cf   :  { %v4684_v17 = vmul.f32 0.2, %v4652_v39  ;;  %v4685_v18 = vmul.f32 0.2, %v4653_v9  ;;  %v4686_v19 = vmul.f32 0.2, %v4654_v48 }
 0x8d0   :  { %v4687_v21 = vmul.f32 0.2, %v4655_v10  ;;  %v4688_v23 = vmul.f32 0.2, %v4656_v52  ;;  %v4689_v32 = vmul.f32 0.2, %v4657_v11  ;;  %v4697_v33 = vsel %vm4665_vm1, %v4649_v2, %v4681_v29 }
 0x8d1   :  { %v4690_v34 = vmul.f32 0.2, %v4658_v22  ;;  %v4691_v36 = vmul.f32 0.2, %v4659_v12  ;;  %v4692_v31 = vmul.f32 0.2, %v4660_v41  ;;  %v4698_v25 = vsel %vm4666_vm2, %v4650_v13, %v4682_v53 }
 0x8d2   :  { %v4693_v26 = vmul.f32 0.2, %v4661_v43  ;;  %v4694_v37 = vmul.f32 0.2, %v4662_v14  ;;  %v4695_v40 = vmul.f32 0.2, %v4663_v15  ;;  %v8004_v42 = vsel %vm4667_vm3, %v4651_v27, %v4683_v16 }
 0x8d3   :  { %v4696_v44 = vmul.f32 0.2, %v4664_v45  ;;  %v8007_v46 = vsel %vm4668_vm4, %v4652_v39, %v4684_v17  ;;  %v8010_v35 = vsel %vm4669_vm5, %v4653_v9, %v4685_v18  ;;  %v8013_v49 = vsel %vm4670_vm6, %v4654_v48, %v4686_v19 }
 0x8d4   :  { %v8016_v55 = vsel %vm4671_vm7, %v4655_v10, %v4687_v21  ;;  %v8019_v50 = vsel %vm4672_vm8, %v4656_v52, %v4688_v23  ;;  %v8022_v51 = vsel %vm4673_vm9, %v4657_v11, %v4689_v32  ;;  %v8025_v54 = vsel %vm4674_vm10, %v4658_v22, %v4690_v34 }
 0x8d5   :  { %v8028_v56 = vsel %vm4675_vm11, %v4659_v12, %v4691_v36  ;;  %v8031_v58 = vsel %vm4676_vm12, %v4660_v41, %v4692_v31  ;;  %v8034_v60 = vsel %vm4677_vm13, %v4661_v43, %v4693_v26  ;;  %v8037_v61 = vsel %vm4678_vm14, %v4662_v14, %v4694_v37 }
 0x8d6   :  { %v8040_v63 = vsel %vm4679_vm0, %v4663_v15, %v4695_v40  ;;  %v8043_v57 = vsel %vm4680_vm15, %v4664_v45, %v4696_v44 }
 0x8d7   :  { %6925 = dma.done.wait [#allocation12 + $0x4], 4608 }
 0x8d8   :  { %6926 = vsyncadd [#allocation12 + $0x4], 4294962688 }
 0x8d9   :  { %6927 = dma.done.wait [#allocation12 + $0x5], 2560 }
 0x8da   :  { %6928 = vsyncadd [#allocation12 + $0x5], 4294964736  ;;  %4839 = vmatprep.mubr.bf16.mxu0 %v6942_v6  ;;  %4952 = vmatprep.mubr.bf16.mxu1 %v6942_v6  ;;  %v4720_v62 = vld [vmem:[#allocation10 + $0x8] sm:$0xff]  ;;  %v4722_v3 = vld [vmem:[#allocation10 + $0x18] sm:$0xff]  ;;  %v8047_v39 = vpack.c.bf16 %v4698_v25, %v4697_v33  ;;  %vm8632_vm15 = vcmask 523264   ;;  %v8057_v12 = vpack.c.bf16 %v8007_v46, %v8004_v42  ;;  %v8067_v17 = vpack.c.bf16 %v8013_v49, %v8010_v35 }
 0x8db   :  { %v4719_v0 = vld [vmem:[#allocation10] sm:$0xff]  ;;  %4807 = vmatprep.subr.bf16.mxu0 %v4720_v62  ;;  %4920 = vmatprep.subr.bf16.mxu1 %v4722_v3  ;;  %v4721_v28 = vld [vmem:[#allocation10 + $0x10] sm:$0xff]  ;;  %v4728_v5 = vld [vmem:[#allocation10 + $0x48] sm:$0xff]  ;;  %v8077_v19 = vpack.c.bf16 %v8019_v50, %v8016_v55  ;;  %v8087_v21 = vpack.c.bf16 %v8025_v54, %v8022_v51  ;;  %v4780_v23 = vpack.c.bf16 %v8031_v58, %v8028_v56 }
 0x8dc   :  { %v4729_v30 = vld [vmem:[#allocation10 + $0x50] sm:$0xff]  ;;  %v4731_v4 = vld [vmem:[#allocation10 + $0x60] sm:$0xff]  ;;  %4808 = vmatpush1.bf16.msra.mxu0 %v4719_v0  ;;  %4921 = vmatpush1.bf16.msra.mxu1 %v4721_v28  ;;  %v4730_v7 = vld [vmem:[#allocation10 + $0x58] sm:$0xff]  ;;  %v4781_v32 = vpack.c.bf16 %v8037_v61, %v8034_v60  ;;  %v4782_v33 = vpack.c.bf16 %v8043_v57, %v8040_v63 }
 0x8dd   :  { %4809 = vmatprep.subr.bf16.mxu0 %v4729_v30  ;;  %4922 = vmatprep.subr.bf16.mxu1 %v4731_v4  ;;  %v4738_v20 = vld [vmem:[#allocation10 + $0x98] sm:$0xff]  ;;  %v4740_v24 = vld [vmem:[#allocation10 + $0xa8] sm:$0xff]  ;;  %v4737_v38 = vld [vmem:[#allocation10 + $0x90] sm:$0xff] }
 0x8de   :  { %v4739_v47 = vld [vmem:[#allocation10 + $0xa0] sm:$0xff]  ;;  %v4749_v1 = vld [vmem:[#allocation10 + $0xf0] sm:$0xff]  ;;  %v4746_v8 = vld [vmem:[#allocation10 + $0xd8] sm:$0xff] }
 0x8df   :  { %v4747_v59 = vld [vmem:[#allocation10 + $0xe0] sm:$0xff]  ;;  %v4748_v2 = vld [vmem:[#allocation10 + $0xe8] sm:$0xff]  ;;  %v4726_v27 = vld [vmem:[#allocation10 + $0x38] sm:$0xff] }
 0x8e0   :  { %4810 = vmatpush1.bf16.msra.mxu0 %v4728_v5  ;;  %4923 = vmatpush1.bf16.msra.mxu1 %v4730_v7  ;;  %v4724_v13 = vld [vmem:[#allocation10 + $0x28] sm:$0xff]  ;;  %v4723_v9 = vld [vmem:[#allocation10 + $0x20] sm:$0xff]  ;;  %v4725_v48 = vld [vmem:[#allocation10 + $0x30] sm:$0xff] }
 0x8e1   :  { %4811 = vmatprep.subr.bf16.mxu0 %v4738_v20  ;;  %4924 = vmatprep.subr.bf16.mxu1 %v4740_v24  ;;  %vm8633_vm1 = vmmov %vm8632_vm15  ;;  %v4733_v10 = vld [vmem:[#allocation10 + $0x70] sm:$0xff]  ;;  %v4735_v52 = vld [vmem:[#allocation10 + $0x80] sm:$0xff] }
 0x8e2   :  { %v4732_v11 = vld [vmem:[#allocation10 + $0x68] sm:$0xff]  ;;  %v4734_v22 = vld [vmem:[#allocation10 + $0x78] sm:$0xff]  ;;  %v4741_v14 = vld [vmem:[#allocation10 + $0xb0] sm:$0xff] }
 0x8e3   :  { %v4742_v41 = vld [vmem:[#allocation10 + $0xb8] sm:$0xff]  ;;  %v4744_v43 = vld [vmem:[#allocation10 + $0xc8] sm:$0xff]  ;;  %v4743_v15 = vld [vmem:[#allocation10 + $0xc0] sm:$0xff] }
 0x8e4   :  { %4812 = vmatpush1.bf16.msra.mxu0 %v4737_v38  ;;  %4925 = vmatpush1.bf16.msra.mxu1 %v4739_v47  ;;  %vm8634_vm2 = vmmov %vm8633_vm1  ;;  %v4751_v45 = vld [vmem:[#allocation10 + $0x100] sm:$0xff]  ;;  %v4753_v29 = vld [vmem:[#allocation10 + $0x110] sm:$0xff] }
 0x8e5   :  { %4813 = vmatprep.subr.bf16.mxu0 %v4747_v59  ;;  %4926 = vmatprep.subr.bf16.mxu1 %v4749_v1  ;;  %vm8635_vm3 = vmmov %vm8633_vm1  ;;  %v4750_v53 = vld [vmem:[#allocation10 + $0xf8] sm:$0xff]  ;;  %v4752_v16 = vld [vmem:[#allocation10 + $0x108] sm:$0xff] }
 0x8e6   :  { %v4727_v18 = vld [vmem:[#allocation10 + $0x40] sm:$0xff]  ;;  %vm8636_vm4 = vmmov %vm8633_vm1  ;;  %v4736_v34 = vld [vmem:[#allocation10 + $0x88] sm:$0xff] }
 0x8e7   :  { %vm8637_vm5 = vmmov %vm8633_vm1  ;;  %v4745_v36 = vld [vmem:[#allocation10 + $0xd0] sm:$0xff]  ;;  %v4754_v31 = vld [vmem:[#allocation10 + $0x118] sm:$0xff] }
 0x8e8   :  { %4814 = vmatpush1.bf16.msra.mxu0 %v4746_v8  ;;  %4927 = vmatpush1.bf16.msra.mxu1 %v4748_v2  ;;  %vm8638_vm6 = vmmov %vm8633_vm1  ;;  %v8169_v25 = vld [vmem:[#allocation11 + $0x8] sm:$0xff] }
 0x8e9   :  { %5033 = vmatprep.subr.bf16.mxu0 %v4724_v13  ;;  %5146 = vmatprep.subr.bf16.mxu1 %v4726_v27  ;;  %vm8639_vm7 = vmmov %vm8633_vm1 }
 0x8ea   :  { %vm8640_vm8 = vmmov %vm8633_vm1 }
 0x8eb   :  { %6415 = vmatmul.mubr.msk.bf16.vlgmr.msra.gmra.mrb[48].mxu0 %vm8632_vm15, %v8047_v39  ;;  %6423 = vmatmul.mubr.msk.bf16.vlgmr.msra.gmra.mrb[56].mxu1 %vm8633_vm1, %v8047_v39  ;;  %vm8641_vm9 = vmmov %vm8633_vm1 }
 0x8ec   :  { %4849 = vmatprep.mubr.bf16.mxu0 %v6942_v6  ;;  %4962 = vmatprep.mubr.bf16.mxu1 %v6942_v6  ;;  %vm8642_vm10 = vmmov %vm8633_vm1 }
 0x8ed   :  { %5034 = vmatpush1.bf16.msra.mxu0 %v4723_v9  ;;  %5147 = vmatpush1.bf16.msra.mxu1 %v4725_v48  ;;  %vm8643_vm11 = vmmov %vm8633_vm1 }
 0x8ee   :  { %5035 = vmatprep.subr.bf16.mxu0 %v4733_v10  ;;  %5148 = vmatprep.subr.bf16.mxu1 %v4735_v52  ;;  %vm8644_vm12 = vmmov %vm8633_vm1 }
 0x8ef   :  { %vm8645_vm13 = vmmov %vm8633_vm1 }
 0x8f0   :  { %vm8646_vm14 = vmmov %vm8633_vm1 }
 0x8f1   :  { %5036 = vmatpush1.bf16.msra.mxu0 %v4732_v11  ;;  %5149 = vmatpush1.bf16.msra.mxu1 %v4734_v22  ;;  %vm8647_vm0 = vmmov %vm8633_vm1 }
 0x8f2   :  { %5037 = vmatprep.subr.bf16.mxu0 %v4742_v41  ;;  %5150 = vmatprep.subr.bf16.mxu1 %v4744_v43  ;;  %vm8648_vm15 = vmmov %vm8647_vm0 }
 0x8f3   :  { %6416 = vmatmul.mubr.msk.bf16.gmra.mrb[52].mxu0 %vm8634_vm2, %v8057_v12  ;;  %6424 = vmatmul.mubr.msk.bf16.gmra.mrb[60].mxu1 %vm8635_vm3, %v8057_v12  ;;  %vm8649_vm1 = vmmov %vm8647_vm0 }
 0x8f4   :  { %4859 = vmatprep.mubr.bf16.mxu0 %v6942_v6  ;;  %4972 = vmatprep.mubr.bf16.mxu1 %v6942_v6  ;;  %vm8650_vm2 = vmmov %vm8647_vm0 }
 0x8f5   :  { %5038 = vmatpush1.bf16.msra.mxu0 %v4741_v14  ;;  %5151 = vmatpush1.bf16.msra.mxu1 %v4743_v15  ;;  %vm8651_vm3 = vmmov %vm8647_vm0 }
 0x8f6   :  { %5039 = vmatprep.subr.bf16.mxu0 %v4751_v45  ;;  %5152 = vmatprep.subr.bf16.mxu1 %v4753_v29 }
 0x8f9   :  { %5040 = vmatpush1.bf16.msra.mxu0 %v4750_v53  ;;  %5153 = vmatpush1.bf16.msra.mxu1 %v4752_v16 }
 0x8fa   :  { %6746 = vmatprep.subr.bf16.mxu0 %v4727_v18 }
 0x8fb   :  { %6417 = vmatmul.mubr.msk.bf16.gmra.mrb[56].mxu0 %vm8636_vm4, %v8067_v17  ;;  %6425 = vmatmul.mubr.msk.bf16.gmra.mrb[64].mxu1 %vm8637_vm5, %v8067_v17  ;;  %vm8652_vm4 = vmmov %vm8647_vm0 }
 0x8fc   :  { %4869 = vmatprep.mubr.bf16.mxu0 %v6942_v6  ;;  %4982 = vmatprep.mubr.bf16.mxu1 %v6942_v6  ;;  %vm8653_vm5 = vmmov %vm8647_vm0 }
 0x903   :  { %6418 = vmatmul.mubr.msk.bf16.gmra.mrb[60].mxu0 %vm8638_vm6, %v8077_v19  ;;  %6426 = vmatmul.mubr.msk.bf16.gmra.mrb[68].mxu1 %vm8639_vm7, %v8077_v19  ;;  %vm8654_vm6 = vmmov %vm8647_vm0 }
 0x904   :  { %4879 = vmatprep.mubr.bf16.mxu0 %v6942_v6  ;;  %4992 = vmatprep.mubr.bf16.mxu1 %v6942_v6  ;;  %vm8655_vm7 = vmmov %vm8647_vm0 }
 0x90b   :  { %6419 = vmatmul.mubr.msk.bf16.gmra.mrb[64].mxu0 %vm8640_vm8, %v8087_v21  ;;  %6427 = vmatmul.mubr.msk.bf16.gmra.mrb[72].mxu1 %vm8641_vm9, %v8087_v21  ;;  %vm8656_vm8 = vmmov %vm8647_vm0 }
 0x90c   :  { %4889 = vmatprep.mubr.bf16.mxu0 %v6942_v6  ;;  %5002 = vmatprep.mubr.bf16.mxu1 %v6942_v6  ;;  %vm8657_vm9 = vmmov %vm8647_vm0 }
 0x913   :  { %6420 = vmatmul.mubr.msk.bf16.gmra.mrb[68].mxu0 %vm8642_vm10, %v4780_v23  ;;  %6428 = vmatmul.mubr.msk.bf16.gmra.mrb[76].mxu1 %vm8643_vm11, %v4780_v23  ;;  %vm8658_vm10 = vmmov %vm8647_vm0 }
 0x914   :  { %4899 = vmatprep.mubr.bf16.mxu0 %v6942_v6  ;;  %5012 = vmatprep.mubr.bf16.mxu1 %v6942_v6  ;;  %vm8659_vm11 = vmmov %vm8647_vm0 }
 0x91b   :  { %6421 = vmatmul.mubr.msk.bf16.gmra.mrb[72].mxu0 %vm8644_vm12, %v4781_v32  ;;  %6429 = vmatmul.mubr.msk.bf16.gmra.mrb[80].mxu1 %vm8645_vm13, %v4781_v32  ;;  %vm8660_vm12 = vmmov %vm8647_vm0 }
 0x91c   :  { %4909 = vmatprep.mubr.bf16.mxu0 %v6942_v6  ;;  %5022 = vmatprep.mubr.bf16.mxu1 %v6942_v6  ;;  %vm8661_vm13 = vmmov %vm8647_vm0 }
 0x923   :  { %6422 = vmatmul.mubr.msk.bf16.gmra.mrb[76].mxu0 %vm8646_vm14, %v4782_v33  ;;  %6430 = vmatmul.mubr.msk.bf16.gmra.mrb[84].mxu1 %vm8647_vm0, %v4782_v33  ;;  %vm8662_vm14 = vmmov %vm8647_vm0 }
 0x924   :  { %5065 = vmatprep.mubr.bf16.mxu0 %v6942_v6  ;;  %5178 = vmatprep.mubr.bf16.mxu1 %v6942_v6 }
 0x92b   :  { %6431 = vmatmul.mubr.msk.bf16.vlgmr.msra.gmra.mrb[80].mxu0 %vm8648_vm15, %v8047_v39  ;;  %6439 = vmatmul.mubr.msk.bf16.vlgmr.msra.gmra.mrb[88].mxu1 %vm8649_vm1, %v8047_v39  ;;  %vm8663_vm15 = vmmov %vm8647_vm0 }
 0x92c   :  { %5075 = vmatprep.mubr.bf16.mxu0 %v6942_v6  ;;  %5188 = vmatprep.mubr.bf16.mxu1 %v6942_v6  ;;  %vm8664_vm1 = vmmov %vm8647_vm0 }
 0x92d   :  { %6747 = vmatpush3.bf16.msra.mxu0 %v4727_v18 }
 0x92e   :  { %6748 = vmatprep.subr.bf16.mxu0 %v4736_v34 }
 0x931   :  { %6749 = vmatpush3.bf16.msra.mxu0 %v4736_v34 }
 0x932   :  { %6750 = vmatprep.subr.bf16.mxu0 %v4745_v36 }
 0x933   :  { %6432 = vmatmul.mubr.msk.bf16.gmra.mrb[84].mxu0 %vm8650_vm2, %v8057_v12  ;;  %6440 = vmatmul.mubr.msk.bf16.gmra.mrb[92].mxu1 %vm8651_vm3, %v8057_v12  ;;  %vm8665_vm2 = vmmov %vm8647_vm0 }
 0x934   :  { %5085 = vmatprep.mubr.bf16.mxu0 %v6942_v6  ;;  %5198 = vmatprep.mubr.bf16.mxu1 %v6942_v6  ;;  %vm8666_vm3 = vmmov %vm8647_vm0 }
 0x935   :  { %6751 = vmatpush3.bf16.msra.mxu0 %v4745_v36 }
 0x936   :  { %6752 = vmatprep.subr.bf16.mxu0 %v4754_v31 }
 0x939   :  { %6753 = vmatpush3.bf16.msra.mxu0 %v4754_v31 }
 0x93b   :  { %6433 = vmatmul.mubr.msk.bf16.gmra.mrb[88].mxu0 %vm8652_vm4, %v8067_v17  ;;  %6441 = vmatmul.mubr.msk.bf16.gmra.mrb[96].mxu1 %vm8653_vm5, %v8067_v17  ;;  %vm8667_vm4 = vmmov %vm8647_vm0 }
 0x93c   :  { %5095 = vmatprep.mubr.bf16.mxu0 %v6942_v6  ;;  %5208 = vmatprep.mubr.bf16.mxu1 %v6942_v6  ;;  %vm8668_vm5 = vmmov %vm8647_vm0 }
 0x943   :  { %6434 = vmatmul.mubr.msk.bf16.gmra.mrb[92].mxu0 %vm8654_vm6, %v8077_v19  ;;  %6442 = vmatmul.mubr.msk.bf16.gmra.mrb[100].mxu1 %vm8655_vm7, %v8077_v19  ;;  %vm8669_vm6 = vmmov %vm8647_vm0 }
 0x944   :  { %5105 = vmatprep.mubr.bf16.mxu0 %v6942_v6  ;;  %5218 = vmatprep.mubr.bf16.mxu1 %v6942_v6  ;;  %vm8670_vm7 = vmmov %vm8647_vm0 }
 0x94b   :  { %6435 = vmatmul.mubr.msk.bf16.gmra.mrb[96].mxu0 %vm8656_vm8, %v8087_v21  ;;  %6443 = vmatmul.mubr.msk.bf16.gmra.mrb[104].mxu1 %vm8657_vm9, %v8087_v21  ;;  %vm8677_vm8 = vmmov %vm8647_vm0 }
 0x94c   :  { %5115 = vmatprep.mubr.bf16.mxu0 %v6942_v6  ;;  %5228 = vmatprep.mubr.bf16.mxu1 %v6942_v6  ;;  %vm8697_vm9 = vmmov %vm8647_vm0 }
 0x953   :  { %6436 = vmatmul.mubr.msk.bf16.gmra.mrb[100].mxu0 %vm8658_vm10, %v4780_v23  ;;  %6444 = vmatmul.mubr.msk.bf16.gmra.mrb[108].mxu1 %vm8659_vm11, %v4780_v23  ;;  %vm8699_vm10 = vmmov %vm8647_vm0 }
 0x954   :  { %5125 = vmatprep.mubr.bf16.mxu0 %v6942_v6  ;;  %5238 = vmatprep.mubr.bf16.mxu1 %v6942_v6  ;;  %vm8704_vm11 = vmmov %vm8647_vm0 }
 0x95b   :  { %6437 = vmatmul.mubr.msk.bf16.gmra.mrb[104].mxu0 %vm8660_vm12, %v4781_v32  ;;  %6445 = vmatmul.mubr.msk.bf16.gmra.mrb[112].mxu1 %vm8661_vm13, %v4781_v32  ;;  %vm8716_vm12 = vmmov %vm8647_vm0 }
 0x95c   :  { %5135 = vmatprep.mubr.bf16.mxu0 %v6942_v6  ;;  %5248 = vmatprep.mubr.bf16.mxu1 %v6942_v6  ;;  %v8166_v6 = vld [vmem:[#allocation11 + $0x18] sm:$0xff]  ;;  %vm8721_vm13 = vmmov %vm8647_vm0 }
 0x95d   :  { %8671 = vst [vmem:[#allocation29_spill] sm:$0xff] %v8166_v6 }
 0x963   :  { %6438 = vmatmul.mubr.msk.bf16.gmra.mrb[108].mxu0 %vm8662_vm14, %v4782_v33  ;;  %6446 = vmatmul.mubr.msk.bf16.gmra.mrb[116].mxu1 %vm8647_vm0, %v4782_v33  ;;  %vm8722_vm14 = vmmov %vm8647_vm0 }
 0x964   :  { %6754 = vmatprep.mubr.msk.bf16.mxu0 %vm8663_vm15, %v8047_v39  ;;  %5581 = vmatprep.mubr.bf16.mxu1 %v8169_v25 }
 0x96b   :  { %6755 = vmatmul.mubr.msk.bf16.vlgmr.msra.gmra.mrb[112].mxu0 %vm8664_vm1, %v8057_v12 }
 0x96c   :  { %6758 = vmatprep.mubr.msk.bf16.mxu0 %vm8665_vm2, %v8067_v17 }
 0x973   :  { %6759 = vmatmul.mubr.msk.bf16.gmra.mrb[116].mxu0 %vm8666_vm3, %v8077_v19 }
 0x974   :  { %6762 = vmatprep.mubr.msk.bf16.mxu0 %vm8667_vm4, %v8087_v21 }
 0x97b   :  { %6763 = vmatmul.mubr.msk.bf16.gmra.mrb[120].mxu0 %vm8668_vm5, %v4780_v23 }
 0x97c   :  { %6766 = vmatprep.mubr.msk.bf16.mxu0 %vm8669_vm6, %v4781_v32 }
 0x983   :  { %6767 = vmatmul.mubr.msk.bf16.gmra.mrb[124].mxu0 %vm8670_vm7, %v4782_v33 }
 0x984   :  { %5646 = vmatprep.mubr.bf16.mxu0 %v8166_v6 }
 0x9be   :  { %v4841_v26 = vpop.f32.mrb[48].mxu0  ;;  %v4954_v37 = vpop.f32.mrb[56].mxu1 }
 0x9bf   :  { %v4843_v40 = vpop.f32.mrb[49].mxu0  ;;  %v4956_v42 = vpop.f32.mrb[57].mxu1 }
 0x9c0   :  { %v4845_v44 = vpop.f32.mrb[50].mxu0  ;;  %v4958_v46 = vpop.f32.mrb[58].mxu1 }
 0x9c1   :  { %v5356_v35 = vpack.c.bf16 %v4845_v44, %v4841_v26  ;;  %v5358_v49 = vpack.c.bf16 %v4958_v46, %v4954_v37  ;;  %v4847_v55 = vpop.f32.mrb[51].mxu0  ;;  %v4960_v50 = vpop.f32.mrb[59].mxu1 }
 0x9c2   :  { %v5357_v51 = vpack.c.bf16 %v4847_v55, %v4843_v40  ;;  %v5359_v54 = vpack.c.bf16 %v4960_v50, %v4956_v42  ;;  %v8289_v55 = vld [vmem:[#allocation11 + $0x78] sm:$0xff]  ;;  %v8291_v50 = vld [vmem:[#allocation11 + $0x20] sm:$0xff] }
 0x9c3   :  { %6530 = vmatprep.subr.bf16.mxu1 %v5358_v49  ;;  %8675 = vst [vmem:[#allocation33_spill] sm:$0xff] %v8289_v55  ;;  %8676 = vst [vmem:[#allocation34_spill] sm:$0xff] %v8291_v50 }
 0x9c4   :  { %6531 = vmatpush3.bf16.msra.mxu1 %v5356_v35 }
 0x9c6   :  { %v4851_v56 = vpop.f32.mrb[52].mxu0  ;;  %v4964_v58 = vpop.f32.mrb[60].mxu1 }
 0x9c7   :  { %v4853_v60 = vpop.f32.mrb[53].mxu0  ;;  %v4966_v61 = vpop.f32.mrb[61].mxu1 }
 0x9c8   :  { %v4855_v63 = vpop.f32.mrb[54].mxu0  ;;  %v4968_v57 = vpop.f32.mrb[62].mxu1 }
 0x9c9   :  { %v5365_v62 = vpack.c.bf16 %v4855_v63, %v4851_v56  ;;  %v5367_v3 = vpack.c.bf16 %v4968_v57, %v4964_v58  ;;  %v4857_v0 = vpop.f32.mrb[55].mxu0  ;;  %v4970_v28 = vpop.f32.mrb[63].mxu1 }
 0x9ca   :  { %v5366_v30 = vpack.c.bf16 %v4857_v0, %v4853_v60  ;;  %v5368_v4 = vpack.c.bf16 %v4970_v28, %v4966_v61 }
 0x9cb   :  { %6532 = vmatprep.subr.bf16.mxu1 %v5367_v3 }
 0x9cc   :  { %6533 = vmatpush3.bf16.msra.mxu1 %v5365_v62 }
 0x9ce   :  { %v4861_v5 = vpop.f32.mrb[56].mxu0  ;;  %v4974_v7 = vpop.f32.mrb[64].mxu1 }
 0x9cf   :  { %v4863_v20 = vpop.f32.mrb[57].mxu0  ;;  %v4976_v24 = vpop.f32.mrb[65].mxu1 }
 0x9d0   :  { %v4865_v38 = vpop.f32.mrb[58].mxu0  ;;  %v4978_v47 = vpop.f32.mrb[66].mxu1 }
 0x9d1   :  { %v5374_v59 = vpack.c.bf16 %v4865_v38, %v4861_v5  ;;  %v5376_v1 = vpack.c.bf16 %v4978_v47, %v4974_v7  ;;  %v4867_v8 = vpop.f32.mrb[59].mxu0  ;;  %v4980_v2 = vpop.f32.mrb[67].mxu1  ;;  %v8250_v5 = vld [vmem:[#allocation11 + $0x28] sm:$0xff]  ;;  %v8252_v7 = vld [vmem:[#allocation11 + $0x58] sm:$0xff] }
 0x9d2   :  { %v5375_v13 = vpack.c.bf16 %v4867_v8, %v4863_v20  ;;  %v5377_v27 = vpack.c.bf16 %v4980_v2, %v4976_v24  ;;  %8672 = vst [vmem:[#allocation30_spill] sm:$0xff] %v8252_v7 }
 0x9d3   :  { %6534 = vmatprep.subr.bf16.mxu1 %v5376_v1 }
 0x9d4   :  { %6535 = vmatpush3.bf16.msra.mxu1 %v5374_v59 }
 0x9d6   :  { %v4871_v39 = vpop.f32.mrb[60].mxu0  ;;  %v4984_v9 = vpop.f32.mrb[68].mxu1 }
 0x9d7   :  { %v4873_v48 = vpop.f32.mrb[61].mxu0  ;;  %v4986_v10 = vpop.f32.mrb[69].mxu1 }
 0x9d8   :  { %v4875_v52 = vpop.f32.mrb[62].mxu0  ;;  %v4988_v11 = vpop.f32.mrb[70].mxu1 }
 0x9d9   :  { %v5383_v22 = vpack.c.bf16 %v4875_v52, %v4871_v39  ;;  %v5385_v12 = vpack.c.bf16 %v4988_v11, %v4984_v9  ;;  %v4877_v41 = vpop.f32.mrb[63].mxu0  ;;  %v4990_v43 = vpop.f32.mrb[71].mxu1 }
 0x9da   :  { %v5384_v14 = vpack.c.bf16 %v4877_v41, %v4873_v48  ;;  %v5386_v15 = vpack.c.bf16 %v4990_v43, %v4986_v10  ;;  %v8280_v48 = vld [vmem:[#allocation11 + $0x50] sm:$0xff]  ;;  %v8282_v10 = vld [vmem:[#allocation11 + $0x80] sm:$0xff] }
 0x9db   :  { %6536 = vmatprep.subr.bf16.mxu1 %v5385_v12  ;;  %8673 = vst [vmem:[#allocation31_spill] sm:$0xff] %v8280_v48  ;;  %8674 = vst [vmem:[#allocation32_spill] sm:$0xff] %v8282_v10 }
 0x9dc   :  { %6537 = vmatpush3.bf16.msra.mxu1 %v5383_v22 }
 0x9dd   :  { %6538 = vmatprep.subr.bf16.mxu1 %v5359_v54  ;;  %v8222_v54 = vld [vmem:[#allocation11 + $0x30] sm:$0xff] }
 0x9de   :  { %v8172_v45 = vpop.f32.mrb[64].mxu0  ;;  %v8174_v29 = vpop.f32.mrb[72].mxu1 }
 0x9df   :  { %v8176_v53 = vpop.f32.mrb[65].mxu0  ;;  %v8178_v16 = vpop.f32.mrb[73].mxu1 }
 0x9e0   :  { %v8180_v17 = vpop.f32.mrb[66].mxu0  ;;  %6539 = vmatpush3.bf16.msra.mxu1 %v5357_v51  ;;  %v8182_v18 = vpop.f32.mrb[74].mxu1  ;;  %v8220_v51 = vld [vmem:[#allocation11] sm:$0xff] }
 0x9e1   :  { %v8186_v21 = vpop.f32.mrb[67].mxu0  ;;  %6540 = vmatprep.subr.bf16.mxu1 %v5368_v4  ;;  %v8190_v32 = vpop.f32.mrb[75].mxu1 }
 0x9e4   :  { %6541 = vmatpush3.bf16.msra.mxu1 %v5366_v30 }
 0x9e5   :  { %6542 = vmatprep.subr.bf16.mxu1 %v5377_v27 }
 0x9e6   :  { %v8196_v36 = vpop.f32.mrb[68].mxu0  ;;  %v8198_v31 = vpop.f32.mrb[76].mxu1 }
 0x9e7   :  { %v8200_v26 = vpop.f32.mrb[69].mxu0  ;;  %v8202_v37 = vpop.f32.mrb[77].mxu1 }
 0x9e8   :  { %v8204_v40 = vpop.f32.mrb[70].mxu0  ;;  %6543 = vmatpush3.bf16.msra.mxu1 %v5375_v13  ;;  %v8206_v42 = vpop.f32.mrb[78].mxu1 }
 0x9e9   :  { %v8210_v46 = vpop.f32.mrb[71].mxu0  ;;  %6544 = vmatprep.subr.bf16.mxu1 %v5386_v15  ;;  %v8214_v49 = vpop.f32.mrb[79].mxu1 }
 0x9ec   :  { %6545 = vmatpush3.bf16.msra.mxu1 %v5384_v14 }
 0x9ee   :  { %v8224_v56 = vpop.f32.mrb[72].mxu0  ;;  %v8226_v58 = vpop.f32.mrb[80].mxu1 }
 0x9ef   :  { %v8228_v60 = vpop.f32.mrb[73].mxu0  ;;  %v8230_v61 = vpop.f32.mrb[81].mxu1  ;;  %5582 = vmatmul.mubr.bf16.vlgmr.msra.gmra.mrb[120].mxu1 %v8220_v51 }
 0x9f0   :  { %v8233_v63 = vpop.f32.mrb[74].mxu0  ;;  %v8235_v57 = vpop.f32.mrb[82].mxu1  ;;  %5589 = vmatprep.mubr.bf16.mxu1 %v8222_v54 }
 0x9f1   :  { %v8240_v3 = vpop.f32.mrb[75].mxu0  ;;  %v8244_v28 = vpop.f32.mrb[83].mxu1 }
 0x9f6   :  { %v8254_v20 = vpop.f32.mrb[76].mxu0  ;;  %v8256_v24 = vpop.f32.mrb[84].mxu1 }
 0x9f7   :  { %v8258_v38 = vpop.f32.mrb[77].mxu0  ;;  %v8260_v47 = vpop.f32.mrb[85].mxu1  ;;  %5590 = vmatmul.mubr.bf16.gmra.mrb[124].mxu1 %v8250_v5 }
 0x9f8   :  { %v8263_v59 = vpop.f32.mrb[78].mxu0  ;;  %v8265_v1 = vpop.f32.mrb[86].mxu1  ;;  %5597 = vmatprep.mubr.bf16.mxu1 %v8252_v7 }
 0x9f9   :  { %v8270_v2 = vpop.f32.mrb[79].mxu0  ;;  %v8274_v27 = vpop.f32.mrb[87].mxu1 }
 0x9fe   :  { %v5067_v52 = vpop.f32.mrb[80].mxu0  ;;  %v5180_v11 = vpop.f32.mrb[88].mxu1 }
 0x9ff   :  { %v8284_v22 = vpop.f32.mrb[81].mxu0  ;;  %v5182_v12 = vpop.f32.mrb[89].mxu1  ;;  %5598 = vmatmul.mubr.bf16.gmra.mrb[128].mxu1 %v8280_v48 }
 0xa00   :  { %v5071_v41 = vpop.f32.mrb[82].mxu0  ;;  %v5184_v43 = vpop.f32.mrb[90].mxu1  ;;  %5605 = vmatprep.mubr.bf16.mxu1 %v8282_v10 }
 0xa01   :  { %v5360_v14 = vpack.c.bf16 %v5071_v41, %v5067_v52  ;;  %v5362_v15 = vpack.c.bf16 %v5184_v43, %v5180_v11  ;;  %v5073_v39 = vpop.f32.mrb[83].mxu0  ;;  %v5186_v30 = vpop.f32.mrb[91].mxu1 }
 0xa02   :  { %v5361_v9 = vpack.c.bf16 %v5073_v39, %v8284_v22  ;;  %v5363_v4 = vpack.c.bf16 %v5186_v30, %v5182_v12 }
 0xa03   :  { %6570 = vmatprep.subr.bf16.mxu0 %v5362_v15 }
 0xa04   :  { %6571 = vmatpush3.bf16.msra.mxu0 %v5360_v14 }
 0xa06   :  { %v5077_v33 = vpop.f32.mrb[84].mxu0  ;;  %v5190_v34 = vpop.f32.mrb[92].mxu1 }
 0xa07   :  { %v5079_v8 = vpop.f32.mrb[85].mxu0  ;;  %v5192_v13 = vpop.f32.mrb[93].mxu1  ;;  %5606 = vmatmul.mubr.bf16.gmra.mrb[132].mxu1 %v8289_v55 }
 0xa08   :  { %v5081_v62 = vpop.f32.mrb[86].mxu0  ;;  %v5194_v52 = vpop.f32.mrb[94].mxu1  ;;  %6778 = vmatprep.mubr.msk.bf16.mxu1 %vm8677_vm8, %v8291_v50 }
 0xa09   :  { %v5369_v11 = vpack.c.bf16 %v5081_v62, %v5077_v33  ;;  %v5371_v39 = vpack.c.bf16 %v5194_v52, %v5190_v34  ;;  %v5083_v30 = vpop.f32.mrb[87].mxu0  ;;  %v5196_v22 = vpop.f32.mrb[95].mxu1 }
 0xa0a   :  { %v5370_v12 = vpack.c.bf16 %v5083_v30, %v5079_v8  ;;  %v5372_v41 = vpack.c.bf16 %v5196_v22, %v5192_v13 }
 0xa0b   :  { %6572 = vmatprep.subr.bf16.mxu0 %v5371_v39 }
 0xa0c   :  { %6573 = vmatpush3.bf16.msra.mxu0 %v5369_v11 }
 0xa0e   :  { %v5087_v43 = vpop.f32.mrb[88].mxu0  ;;  %v5200_v14 = vpop.f32.mrb[96].mxu1 }
 0xa0f   :  { %v5089_v15 = vpop.f32.mrb[89].mxu0  ;;  %v5202_v0 = vpop.f32.mrb[97].mxu1 }
 0xa10   :  { %v5091_v44 = vpop.f32.mrb[90].mxu0  ;;  %v5204_v35 = vpop.f32.mrb[98].mxu1 }
 0xa11   :  { %v5378_v19 = vpack.c.bf16 %v5091_v44, %v5087_v43  ;;  %v5380_v23 = vpack.c.bf16 %v5204_v35, %v5200_v14  ;;  %v5093_v55 = vpop.f32.mrb[91].mxu0  ;;  %v5206_v10 = vpop.f32.mrb[99].mxu1 }
 0xa12   :  { %v5379_v48 = vpack.c.bf16 %v5093_v55, %v5089_v15  ;;  %v5381_v50 = vpack.c.bf16 %v5206_v10, %v5202_v0  ;;  %v8349_v15 = vld [vmem:[#allocation11 + $0x40] sm:$0xff] }
 0xa13   :  { %6574 = vmatprep.subr.bf16.mxu0 %v5380_v23  ;;  %8679 = vst [vmem:[#allocation35_spill] sm:$0xff] %v8349_v15 }
 0xa14   :  { %6575 = vmatpush3.bf16.msra.mxu0 %v5378_v19 }
 0xa16   :  { %v5097_v33 = vpop.f32.mrb[92].mxu0  ;;  %v5210_v34 = vpop.f32.mrb[100].mxu1 }
 0xa17   :  { %v5099_v62 = vpop.f32.mrb[93].mxu0  ;;  %v5212_v8 = vpop.f32.mrb[101].mxu1 }
 0xa18   :  { %v5101_v13 = vpop.f32.mrb[94].mxu0  ;;  %v5214_v52 = vpop.f32.mrb[102].mxu1 }
 0xa19   :  { %v5387_v11 = vpack.c.bf16 %v5101_v13, %v5097_v33  ;;  %v5389_v39 = vpack.c.bf16 %v5214_v52, %v5210_v34  ;;  %v5103_v30 = vpop.f32.mrb[95].mxu0  ;;  %v5216_v22 = vpop.f32.mrb[103].mxu1 }
 0xa1a   :  { %v5388_v6 = vpack.c.bf16 %v5103_v30, %v5099_v62  ;;  %v5390_v7 = vpack.c.bf16 %v5216_v22, %v5212_v8  ;;  %v8678_v22 = vpack.c.bf16 %v8182_v18, %v8174_v29  ;;  %v8386_v18 = vld [vmem:[#allocation11 + $0x38] sm:$0xff] }
 0xa1b   :  { %6576 = vmatprep.subr.bf16.mxu0 %v5389_v39  ;;  %8683 = vst [vmem:[#allocation36_spill] sm:$0xff] %v8386_v18 }
 0xa1c   :  { %6577 = vmatpush3.bf16.msra.mxu0 %v5387_v11 }
 0xa1d   :  { %6578 = vmatprep.subr.bf16.mxu0 %v5363_v4 }
 0xa1e   :  { %v8296_v44 = vpop.f32.mrb[96].mxu0  ;;  %v8298_v35 = vpop.f32.mrb[104].mxu1 }
 0xa1f   :  { %v8300_v19 = vpop.f32.mrb[97].mxu0  ;;  %v8302_v23 = vpop.f32.mrb[105].mxu1 }
 0xa20   :  { %v8304_v55 = vpop.f32.mrb[98].mxu0  ;;  %6579 = vmatpush3.bf16.msra.mxu0 %v5361_v9  ;;  %v8306_v0 = vpop.f32.mrb[106].mxu1 }
 0xa21   :  { %v8310_v43 = vpop.f32.mrb[99].mxu0  ;;  %6580 = vmatprep.subr.bf16.mxu0 %v5372_v41  ;;  %v8314_v14 = vpop.f32.mrb[107].mxu1 }
 0xa24   :  { %6581 = vmatpush3.bf16.msra.mxu0 %v5370_v12 }
 0xa25   :  { %6582 = vmatprep.subr.bf16.mxu0 %v5381_v50  ;;  %v8681_v50 = vpack.c.bf16 %v8206_v42, %v8198_v31  ;;  %v8684_v31 = vpack.c.bf16 %v8235_v57, %v8226_v58  ;;  %v8391_v42 = vld [vmem:[#allocation11 + $0x68] sm:$0xff]  ;;  %v8428_v57 = vld [vmem:[#allocation11 + $0x60] sm:$0xff] }
 0xa26   :  { %v8320_v9 = vpop.f32.mrb[100].mxu0  ;;  %v8322_v34 = vpop.f32.mrb[108].mxu1 }
 0xa27   :  { %v8324_v62 = vpop.f32.mrb[101].mxu0  ;;  %v8326_v41 = vpop.f32.mrb[109].mxu1 }
 0xa28   :  { %v8328_v8 = vpop.f32.mrb[102].mxu0  ;;  %6583 = vmatpush3.bf16.msra.mxu0 %v5379_v48  ;;  %v8330_v13 = vpop.f32.mrb[110].mxu1  ;;  %v8344_v48 = vld [vmem:[#allocation11 + $0x10] sm:$0xff] }
 0xa29   :  { %v8334_v11 = vpop.f32.mrb[103].mxu0  ;;  %6584 = vmatprep.subr.bf16.mxu0 %v5390_v7  ;;  %v8338_v12 = vpop.f32.mrb[111].mxu1 }
 0xa2c   :  { %6585 = vmatpush3.bf16.msra.mxu0 %v5388_v6  ;;  %v8680_v6 = vpack.c.bf16 %v8180_v17, %v8172_v45 }
 0xa2d   :  { %6618 = vmatprep.subr.bf16.mxu0 %v8678_v22 }
 0xa2e   :  { %v8351_v7 = vpop.f32.mrb[104].mxu0  ;;  %v8353_v33 = vpop.f32.mrb[112].mxu1 }
 0xa2f   :  { %v8355_v52 = vpop.f32.mrb[105].mxu0  ;;  %5647 = vmatmul.mubr.bf16.vlgmr.msra.gmra.mrb[128].mxu0 %v8344_v48  ;;  %v8358_v39 = vpop.f32.mrb[113].mxu1 }
 0xa30   :  { %v8360_v30 = vpop.f32.mrb[106].mxu0  ;;  %6619 = vmatpush3.bf16.msra.mxu0 %v8680_v6  ;;  %5654 = vmatprep.mubr.bf16.mxu0 %v8349_v15  ;;  %v8366_v29 = vpop.f32.mrb[114].mxu1  ;;  %v8682_v6 = vpack.c.bf16 %v8204_v40, %v8196_v36  ;;  %v8685_v40 = vpack.c.bf16 %v8233_v63, %v8224_v56  ;;  %v8689_v63 = vpack.c.bf16 %v8186_v21, %v8176_v53 }
 0xa31   :  { %v8370_v22 = vpop.f32.mrb[107].mxu0  ;;  %6620 = vmatprep.subr.bf16.mxu0 %v8681_v50  ;;  %v8377_v4 = vpop.f32.mrb[115].mxu1  ;;  %v8692_v53 = vpack.c.bf16 %v8244_v28, %v8230_v61  ;;  %v8695_v28 = vpack.c.bf16 %v8270_v2, %v8258_v38 }
 0xa34   :  { %6621 = vmatpush3.bf16.msra.mxu0 %v8682_v6 }
 0xa35   :  { %6622 = vmatprep.subr.bf16.mxu0 %v8684_v31  ;;  %v8686_v31 = vpack.c.bf16 %v8265_v1, %v8256_v24  ;;  %v8688_v24 = vpack.c.bf16 %v8190_v32, %v8178_v16  ;;  %v8433_v1 = vld [vmem:[#allocation11 + $0x90] sm:$0xff]  ;;  %v8691_v32 = vpack.c.bf16 %v8210_v46, %v8200_v26 }
 0xa36   :  { %v8393_v50 = vpop.f32.mrb[108].mxu0  ;;  %v8395_v10 = vpop.f32.mrb[116].mxu1 }
 0xa37   :  { %v8397_v45 = vpop.f32.mrb[109].mxu0  ;;  %5655 = vmatmul.mubr.bf16.gmra.mrb[132].mxu0 %v8386_v18  ;;  %v8400_v17 = vpop.f32.mrb[117].mxu1 }
 0xa38   :  { %v8402_v36 = vpop.f32.mrb[110].mxu0  ;;  %6623 = vmatpush3.bf16.msra.mxu0 %v8685_v40  ;;  %5662 = vmatprep.mubr.bf16.mxu0 %v8391_v42  ;;  %v8408_v58 = vpop.f32.mrb[118].mxu1  ;;  %v8687_v40 = vpack.c.bf16 %v8263_v59, %v8254_v20 }
 0xa39   :  { %v8412_v6 = vpop.f32.mrb[111].mxu0  ;;  %6624 = vmatprep.subr.bf16.mxu0 %v8686_v31  ;;  %v8419_v15 = vpop.f32.mrb[119].mxu1 }
 0xa3c   :  { %6625 = vmatpush3.bf16.msra.mxu0 %v8687_v40  ;;  %v8690_v40 = vpack.c.bf16 %v8214_v49, %v8202_v37  ;;  %v8693_v49 = vpack.c.bf16 %v8240_v3, %v8228_v60  ;;  %v4764_v3 = vld [vmem:[#allocation11 + $0x48] sm:$0xff] }
 0xa3d   :  { %6626 = vmatprep.subr.bf16.mxu0 %v8688_v24  ;;  %v8446_v24 = vld [vmem:[#allocation11 + $0x88] sm:$0xff] }
 0xa3e   :  { %v6756_v31 = vpop.f32.mrb[112].mxu0 }
 0xa3f   :  { %v5293_v18 = vpop.f32.mrb[113].mxu0  ;;  %5663 = vmatmul.mubr.bf16.gmra.mrb[136].mxu0 %v8428_v57 }
 0xa40   :  { %v6757_v56 = vpop.f32.mrb[114].mxu0  ;;  %6627 = vmatpush3.bf16.msra.mxu0 %v8689_v63  ;;  %5670 = vmatprep.mubr.bf16.mxu0 %v8433_v1 }
 0xa41   :  { %v5373_v20 = vpack.c.bf16 %v6757_v56, %v6756_v31  ;;  %v5296_v59 = vpop.f32.mrb[115].mxu0  ;;  %6628 = vmatprep.subr.bf16.mxu0 %v8690_v40  ;;  %v8702_v40 = vpack.c.bf16 %v8328_v8, %v8320_v9  ;;  %v8707_v9 = vpack.c.bf16 %v8408_v58, %v8395_v10  ;;  %v8708_v8 = vld [vmem:[#allocation31_spill] sm:$0xff]  ;;  %v8713_v10 = vpack.c.bf16 %v8338_v12, %v8326_v41  ;;  %v8714_v58 = vld [vmem:[#allocation33_spill] sm:$0xff] }
 0xa42   :  { %v5364_v16 = vpack.c.bf16 %v5296_v59, %v5293_v18  ;;  %v8694_v18 = vpack.c.bf16 %v8274_v27, %v8260_v47  ;;  %v8696_v27 = vpack.c.bf16 %v8306_v0, %v8298_v35  ;;  %v8701_v0 = vld [vmem:[#allocation30_spill] sm:$0xff] }
 0xa44   :  { %6770 = vmatprep.subr.bf16.mxu1 %v5364_v16  ;;  %6629 = vmatpush3.bf16.msra.mxu0 %v8691_v32  ;;  %v8706_v32 = vld [vmem:[#allocation29_spill] sm:$0xff] }
 0xa45   :  { %6771 = vmatpush3.bf16.msra.mxu1 %v5364_v16  ;;  %6630 = vmatprep.subr.bf16.mxu0 %v8692_v53  ;;  %v8715_v53 = vld [vmem:[#allocation34_spill] sm:$0xff] }
 0xa46   :  { %v6760_v21 = vpop.f32.mrb[116].mxu0  ;;  %6772 = vmatprep.subr.bf16.mxu1 %v5373_v20 }
 0xa47   :  { %v5309_v56 = vpop.f32.mrb[117].mxu0  ;;  %5671 = vmatmul.mubr.bf16.gmra.mrb[140].mxu0 %v8446_v24 }
 0xa48   :  { %v6761_v37 = vpop.f32.mrb[118].mxu0  ;;  %6631 = vmatpush3.bf16.msra.mxu0 %v8693_v49  ;;  %5812 = vmatprep.mubr.bf16.mxu0 %v8169_v25 }
 0xa49   :  { %v5391_v26 = vpack.c.bf16 %v6761_v37, %v6760_v21  ;;  %v5312_v46 = vpop.f32.mrb[119].mxu0  ;;  %6773 = vmatpush3.bf16.msra.mxu1 %v5373_v20  ;;  %6632 = vmatprep.subr.bf16.mxu0 %v8694_v18  ;;  %v4769_v20 = vld [vmem:[#allocation11 + $0x70] sm:$0xff] }
 0xa4a   :  { %v5382_v61 = vpack.c.bf16 %v5312_v46, %v5309_v56 }
 0xa4c   :  { %6774 = vmatprep.subr.bf16.mxu1 %v5382_v61  ;;  %6633 = vmatpush3.bf16.msra.mxu0 %v8695_v28 }
 0xa4d   :  { %6775 = vmatpush3.bf16.msra.mxu1 %v5382_v61 }
 0xa4e   :  { %6776 = vmatprep.subr.bf16.mxu1 %v5391_v26  ;;  %v6764_v63 = vpop.f32.mrb[120].mxu0 }
 0xa4f   :  { %5813 = vmatmul.mubr.bf16.vlgmr.msra.gmra.mrb[144].mxu0 %v8220_v51  ;;  %v5325_v60 = vpop.f32.mrb[121].mxu0  ;;  %v8698_v51 = vpack.c.bf16 %v8304_v55, %v8296_v44  ;;  %v4774_v44 = vld [vmem:[#allocation11 + $0x98] sm:$0xff] }
 0xa50   :  { %5820 = vmatprep.mubr.bf16.mxu0 %v8222_v54  ;;  %v6765_v25 = vpop.f32.mrb[122].mxu0  ;;  %v8700_v54 = vpack.c.bf16 %v8330_v13, %v8322_v34  ;;  %v8703_v34 = vpack.c.bf16 %v8366_v29, %v8353_v33  ;;  %v8709_v33 = vld [vmem:[#allocation32_spill] sm:$0xff]  ;;  %v8710_v29 = vpack.c.bf16 %v8402_v36, %v8393_v50  ;;  %v8717_v50 = vpack.c.bf16 %v8334_v11, %v8324_v62 }
 0xa51   :  { %6777 = vmatpush3.bf16.msra.mxu1 %v5391_v26  ;;  %v5409_v31 = vpack.c.bf16 %v6765_v25, %v6764_v63  ;;  %v5328_v47 = vpop.f32.mrb[123].mxu0  ;;  %v8725_v62 = vld [vmem:[#allocation36_spill] sm:$0xff] }
 0xa52   :  { %6658 = vmatprep.subr.bf16.mxu1 %v8696_v27  ;;  %v5400_v38 = vpack.c.bf16 %v5328_v47, %v5325_v60 }
 0xa54   :  { %6779 = vmatmul.mubr.msk.bf16.vlgmr.msra.gmra.mrb[136].mxu1 %vm8697_vm9, %v4764_v3  ;;  %6786 = vmatprep.subr.bf16.mxu0 %v5400_v38 }
 0xa55   :  { %6659 = vmatpush3.bf16.msra.mxu1 %v8698_v51  ;;  %6782 = vmatprep.mubr.msk.bf16.mxu1 %vm8699_vm10, %v4769_v20 }
 0xa56   :  { %6660 = vmatprep.subr.bf16.mxu1 %v8700_v54  ;;  %6787 = vmatpush3.bf16.msra.mxu0 %v5400_v38  ;;  %v6768_v2 = vpop.f32.mrb[124].mxu0 }
 0xa57   :  { %5821 = vmatmul.mubr.bf16.gmra.mrb[148].mxu0 %v8250_v5  ;;  %v5341_v35 = vpop.f32.mrb[125].mxu0  ;;  %6788 = vmatprep.subr.bf16.mxu0 %v5409_v31  ;;  %v8705_v5 = vpack.c.bf16 %v8360_v30, %v8351_v7  ;;  %v8711_v30 = vpack.c.bf16 %v8314_v14, %v8302_v23  ;;  %v8712_v7 = vpack.c.bf16 %v8310_v43, %v8300_v19 }
 0xa58   :  { %5828 = vmatprep.mubr.bf16.mxu0 %v8701_v0  ;;  %v6769_v59 = vpop.f32.mrb[126].mxu0  ;;  %v8718_v23 = vpack.c.bf16 %v8377_v4, %v8358_v39  ;;  %v8719_v19 = vpack.c.bf16 %v8370_v22, %v8355_v52  ;;  %v8720_v43 = vpack.c.bf16 %v8419_v15, %v8400_v17  ;;  %v8723_v14 = vpack.c.bf16 %v8412_v6, %v8397_v45  ;;  %v8724_v4 = vld [vmem:[#allocation35_spill] sm:$0xff] }
 0xa59   :  { %6661 = vmatpush3.bf16.msra.mxu1 %v8702_v40  ;;  %v5427_v55 = vpack.c.bf16 %v6769_v59, %v6768_v2  ;;  %v5344_v16 = vpop.f32.mrb[127].mxu0 }
 0xa5a   :  { %6662 = vmatprep.subr.bf16.mxu1 %v8703_v34  ;;  %v5418_v13 = vpack.c.bf16 %v5344_v16, %v5341_v35  ;;  %6789 = vmatpush3.bf16.msra.mxu0 %v5409_v31 }
 0xa5c   :  { %6783 = vmatmul.mubr.msk.bf16.gmra.mrb[140].mxu1 %vm8704_vm11, %v4774_v44  ;;  %6790 = vmatprep.subr.bf16.mxu0 %v5418_v13 }
 0xa5d   :  { %6663 = vmatpush3.bf16.msra.mxu1 %v8705_v5  ;;  %5877 = vmatprep.mubr.bf16.mxu1 %v8706_v32 }
 0xa5e   :  { %6664 = vmatprep.subr.bf16.mxu1 %v8707_v9  ;;  %6791 = vmatpush3.bf16.msra.mxu0 %v5418_v13 }
 0xa5f   :  { %5829 = vmatmul.mubr.bf16.gmra.mrb[152].mxu0 %v8708_v8  ;;  %6792 = vmatprep.subr.bf16.mxu0 %v5427_v55 }
 0xa60   :  { %5836 = vmatprep.mubr.bf16.mxu0 %v8709_v33 }
 0xa61   :  { %6665 = vmatpush3.bf16.msra.mxu1 %v8710_v29 }
 0xa62   :  { %6666 = vmatprep.subr.bf16.mxu1 %v8711_v30  ;;  %6793 = vmatpush3.bf16.msra.mxu0 %v5427_v55 }
 0xa65   :  { %6667 = vmatpush3.bf16.msra.mxu1 %v8712_v7 }
 0xa66   :  { %6668 = vmatprep.subr.bf16.mxu1 %v8713_v10 }
 0xa67   :  { %5837 = vmatmul.mubr.bf16.gmra.mrb[156].mxu0 %v8714_v58 }
 0xa68   :  { %6794 = vmatprep.mubr.msk.bf16.mxu0 %vm8716_vm12, %v8715_v53 }
 0xa69   :  { %6669 = vmatpush3.bf16.msra.mxu1 %v8717_v50 }
 0xa6a   :  { %6670 = vmatprep.subr.bf16.mxu1 %v8718_v23 }
 0xa6d   :  { %6671 = vmatpush3.bf16.msra.mxu1 %v8719_v19 }
 0xa6e   :  { %6672 = vmatprep.subr.bf16.mxu1 %v8720_v43 }
 0xa6f   :  { %6795 = vmatmul.mubr.msk.bf16.vlgmr.msra.gmra.mrb[160].mxu0 %vm8721_vm13, %v4764_v3 }
 0xa70   :  { %6798 = vmatprep.mubr.msk.bf16.mxu0 %vm8722_vm14, %v4769_v20 }
 0xa71   :  { %6673 = vmatpush3.bf16.msra.mxu1 %v8723_v14 }
 0xa74   :  { %5878 = vmatmul.mubr.bf16.vlgmr.msra.gmra.mrb[144].mxu1 %v8344_v48 }
 0xa75   :  { %5885 = vmatprep.mubr.bf16.mxu1 %v8724_v4 }
 0xa77   :  { %6799 = vmatmul.mubr.msk.bf16.gmra.mrb[164].mxu0 %vm8647_vm0, %v4774_v44 }
 0xa7c   :  { %5886 = vmatmul.mubr.bf16.gmra.mrb[148].mxu1 %v8725_v62 }
 0xa7d   :  { %5893 = vmatprep.mubr.bf16.mxu1 %v8391_v42 }
 0xa84   :  { %5894 = vmatmul.mubr.bf16.gmra.mrb[152].mxu1 %v8428_v57 }
 0xa85   :  { %5901 = vmatprep.mubr.bf16.mxu1 %v8433_v1 }
 0xa8c   :  { %5902 = vmatmul.mubr.bf16.gmra.mrb[156].mxu1 %v8446_v24 }
 0xac2   :  { %v6546_v15 = vpop.f32.mrb[120].mxu1 }
 0xac3   :  { %v6547_v41 = vpop.f32.mrb[121].mxu1 }
 0xac4   :  { %v6548_v52 = vadd.f32 %v6547_v41, %v6546_v15  ;;  %v6549_v11 = vpop.f32.mrb[122].mxu1 }
 0xac5   :  { %v6550_v12 = vpop.f32.mrb[123].mxu1 }
 0xac6   :  { %v6551_v39 = vadd.f32 %v6550_v12, %v6549_v11 }
 0xaca   :  { %v6552_v48 = vpop.f32.mrb[124].mxu1 }
 0xacb   :  { %v6553_v22 = vpop.f32.mrb[125].mxu1 }
 0xacc   :  { %v6554_v45 = vadd.f32 %v6553_v22, %v6552_v48  ;;  %v6555_v17 = vpop.f32.mrb[126].mxu1 }
 0xacd   :  { %v6556_v36 = vpop.f32.mrb[127].mxu1 }
 0xace   :  { %v6557_v6 = vadd.f32 %v6556_v36, %v6555_v17 }
 0xad2   :  { %v6558_v21 = vpop.f32.mrb[128].mxu1 }
 0xad3   :  { %v6559_v42 = vpop.f32.mrb[129].mxu1 }
 0xad4   :  { %v6560_v56 = vadd.f32 %v6559_v42, %v6558_v21  ;;  %v6561_v57 = vpop.f32.mrb[130].mxu1 }
 0xad5   :  { %v6562_v37 = vpop.f32.mrb[131].mxu1 }
 0xad6   :  { %v6563_v1 = vadd.f32 %v6562_v37, %v6561_v57 }
 0xada   :  { %v6564_v49 = vpop.f32.mrb[132].mxu1 }
 0xadb   :  { %v6565_v24 = vpop.f32.mrb[133].mxu1 }
 0xadc   :  { %v6566_v26 = vadd.f32 %v6565_v24, %v6564_v49  ;;  %v6567_v46 = vpop.f32.mrb[134].mxu1 }
 0xadd   :  { %v6568_v18 = vpop.f32.mrb[135].mxu1 }
 0xade   :  { %v6569_v61 = vadd.f32 %v6568_v18, %v6567_v46 }
 0xb02   :  { %v6586_v28 = vpop.f32.mrb[128].mxu0 }
 0xb03   :  { %v6587_v63 = vpop.f32.mrb[129].mxu0 }
 0xb04   :  { %v6588_v60 = vadd.f32 %v6587_v63, %v6586_v28  ;;  %v6589_v25 = vpop.f32.mrb[130].mxu0 }
 0xb05   :  { %v6590_v3 = vpop.f32.mrb[131].mxu0 }
 0xb06   :  { %v6591_v31 = vadd.f32 %v6590_v3, %v6589_v25  ;;  %v5649_v47 = vadd.f32 %v6588_v60, %v6548_v52 }
 0xb08   :  { %v5652_v27 = vadd.f32 %v6591_v31, %v6551_v39 }
 0xb0a   :  { %v6592_v20 = vpop.f32.mrb[132].mxu0 }
 0xb0b   :  { %v6593_v38 = vpop.f32.mrb[133].mxu0 }
 0xb0c   :  { %v6594_v51 = vadd.f32 %v6593_v38, %v6592_v20  ;;  %v6595_v54 = vpop.f32.mrb[134].mxu0 }
 0xb0d   :  { %v6596_v2 = vpop.f32.mrb[135].mxu0 }
 0xb0e   :  { %v6597_v35 = vadd.f32 %v6596_v2, %v6595_v54  ;;  %v5657_v0 = vadd.f32 %v6594_v51, %v6554_v45 }
 0xb10   :  { %v5660_v59 = vadd.f32 %v6597_v35, %v6557_v6 }
 0xb12   :  { %v6598_v40 = vpop.f32.mrb[136].mxu0 }
 0xb13   :  { %v6599_v44 = vpop.f32.mrb[137].mxu0 }
 0xb14   :  { %v6600_v55 = vadd.f32 %v6599_v44, %v6598_v40  ;;  %v6601_v16 = vpop.f32.mrb[138].mxu0 }
 0xb15   :  { %v6602_v34 = vpop.f32.mrb[139].mxu0 }
 0xb16   :  { %v6603_v13 = vadd.f32 %v6602_v34, %v6601_v16  ;;  %v5665_v5 = vadd.f32 %v6600_v55, %v6560_v56 }
 0xb18   :  { %v5668_v32 = vadd.f32 %v6603_v13, %v6563_v1 }
 0xb1a   :  { %v6604_v9 = vpop.f32.mrb[140].mxu0 }
 0xb1b   :  { %v6605_v8 = vpop.f32.mrb[141].mxu0 }
 0xb1c   :  { %v6606_v33 = vadd.f32 %v6605_v8, %v6604_v9  ;;  %v6607_v29 = vpop.f32.mrb[142].mxu0 }
 0xb1d   :  { %v6608_v30 = vpop.f32.mrb[143].mxu0 }
 0xb1e   :  { %v5673_v7 = vadd.f32 %v6606_v33, %v6566_v26  ;;  %v6609_v10 = vadd.f32 %v6608_v30, %v6607_v29 }
 0xb20   :  { %v5676_v58 = vadd.f32 %v6609_v10, %v6569_v61 }
 0xb22   :  { %v6634_v53 = vpop.f32.mrb[144].mxu0 }
 0xb23   :  { %v6635_v50 = vpop.f32.mrb[145].mxu0 }
 0xb24   :  { %v8533_v23 = vadd.f32 %v6635_v50, %v6634_v53  ;;  %v6637_v19 = vpop.f32.mrb[146].mxu0 }
 0xb25   :  { %v6638_v43 = vpop.f32.mrb[147].mxu0 }
 0xb26   :  { %v8535_v14 = vadd.f32 %v6638_v43, %v6637_v19 }
 0xb27   :  { %v6780_v4 = vpop.f32.mrb[136].mxu1 }
 0xb28   :  { %v5722_v62 = vadd.f32 %v6780_v4, %v5657_v0  ;;  %v5713_v15 = vpop.f32.mrb[137].mxu1 }
 0xb29   :  { %v5714_v41 = vadd.f32 %v5713_v15, %v5649_v47  ;;  %v6781_v52 = vpop.f32.mrb[138].mxu1 }
 0xb2a   :  { %6861 = vtanh.f32 %v5722_v62  ;;  %v5725_v11 = vadd.f32 %v6781_v52, %v5660_v59  ;;  %v5716_v12 = vpop.f32.mrb[139].mxu1  ;;  %v6640_v39 = vpop.f32.mrb[148].mxu0 }
 0xb2b   :  { %6863 = vtanh.f32 %v5714_v41  ;;  %v5717_v48 = vadd.f32 %v5716_v12, %v5652_v27  ;;  %v6641_v22 = vpop.f32.mrb[149].mxu0 }
 0xb2c   :  { %6865 = vtanh.f32 %v5725_v11  ;;  %v8537_v45 = vadd.f32 %v6641_v22, %v6640_v39  ;;  %v6643_v17 = vpop.f32.mrb[150].mxu0 }
 0xb2d   :  { %6867 = vtanh.f32 %v5717_v48  ;;  %v6644_v36 = vpop.f32.mrb[151].mxu0 }
 0xb2e   :  { %v8539_v6 = vadd.f32 %v6644_v36, %v6643_v17 }
 0xb2f   :  { %v6784_v21 = vpop.f32.mrb[140].mxu1 }
 0xb30   :  { %v5738_v42 = vadd.f32 %v6784_v21, %v5673_v7  ;;  %v5729_v56 = vpop.f32.mrb[141].mxu1 }
 0xb31   :  { %v5730_v57 = vadd.f32 %v5729_v56, %v5665_v5  ;;  %v6785_v37 = vpop.f32.mrb[142].mxu1 }
 0xb32   :  { %6869 = vtanh.f32 %v5738_v42  ;;  %v5741_v1 = vadd.f32 %v6785_v37, %v5676_v58  ;;  %v5732_v49 = vpop.f32.mrb[143].mxu1  ;;  %v6646_v24 = vpop.f32.mrb[152].mxu0 }
 0xb33   :  { %6871 = vtanh.f32 %v5730_v57  ;;  %v5733_v26 = vadd.f32 %v5732_v49, %v5668_v32  ;;  %v6647_v46 = vpop.f32.mrb[153].mxu0 }
 0xb34   :  { %v6862_v18 = vpop.eup %6861  ;;  %6873 = vtanh.f32 %v5741_v1  ;;  %v8541_v61 = vadd.f32 %v6647_v46, %v6646_v24  ;;  %v6649_v28 = vpop.f32.mrb[154].mxu0 }
 0xb35   :  { %v6864_v63 = vpop.eup %6863  ;;  %5993 = vst [vmem:[%s8618_s16 + $0x10] sm:$0xff] %v6862_v18  ;;  %6875 = vtanh.f32 %v5733_v26  ;;  %v6650_v60 = vpop.f32.mrb[155].mxu0 }
 0xb36   :  { %v6866_v25 = vpop.eup %6865  ;;  %5991 = vst [vmem:[%s8618_s16] sm:$0xff] %v6864_v63  ;;  %v6651_v3 = vadd.f32 %v6650_v60, %v6649_v28 }
 0xb37   :  { %v6868_v31 = vpop.eup %6867  ;;  %5994 = vst [vmem:[%s8618_s16 + $0x18] sm:$0xff] %v6866_v25 }
 0xb38   :  { %5992 = vst [vmem:[%s8618_s16 + $0x8] sm:$0xff] %v6868_v31 }
 0xb3a   :  { %v6652_v47 = vpop.f32.mrb[156].mxu0 }
 0xb3b   :  { %v6653_v27 = vpop.f32.mrb[157].mxu0 }
 0xb3c   :  { %v6870_v20 = vpop.eup %6869  ;;  %v8555_v38 = vadd.f32 %v6653_v27, %v6652_v47  ;;  %v6655_v51 = vpop.f32.mrb[158].mxu0 }
 0xb3d   :  { %v6872_v54 = vpop.eup %6871  ;;  %5997 = vst [vmem:[%s8618_s16 + $0x30] sm:$0xff] %v6870_v20  ;;  %v6656_v2 = vpop.f32.mrb[159].mxu0 }
 0xb3e   :  { %v6874_v35 = vpop.eup %6873  ;;  %5995 = vst [vmem:[%s8618_s16 + $0x20] sm:$0xff] %v6872_v54  ;;  %v8563_v0 = vadd.f32 %v6656_v2, %v6655_v51 }
 0xb3f   :  { %v6876_v59 = vpop.eup %6875  ;;  %5998 = vst [vmem:[%s8618_s16 + $0x38] sm:$0xff] %v6874_v35 }
 0xb40   :  { %5996 = vst [vmem:[%s8618_s16 + $0x28] sm:$0xff] %v6876_v59 }
 0xb42   :  { %v6796_v40 = vpop.f32.mrb[160].mxu0 }
 0xb43   :  { %v5944_v44 = vpop.f32.mrb[161].mxu0 }
 0xb44   :  { %v6797_v55 = vpop.f32.mrb[162].mxu0 }
 0xb45   :  { %v5947_v16 = vpop.f32.mrb[163].mxu0 }
 0xb47   :  { %v6674_v34 = vpop.f32.mrb[144].mxu1 }
 0xb48   :  { %v6675_v13 = vpop.f32.mrb[145].mxu1 }
 0xb49   :  { %v6676_v5 = vadd.f32 %v6675_v13, %v6674_v34  ;;  %v6677_v32 = vpop.f32.mrb[146].mxu1 }
 0xb4a   :  { %v6678_v9 = vpop.f32.mrb[147].mxu1  ;;  %v6800_v8 = vpop.f32.mrb[164].mxu0 }
 0xb4b   :  { %v6679_v33 = vadd.f32 %v6678_v9, %v6677_v32  ;;  %v5880_v29 = vadd.f32 %v6676_v5, %v8533_v23  ;;  %v5960_v30 = vpop.f32.mrb[165].mxu0 }
 0xb4c   :  { %v6801_v7 = vpop.f32.mrb[166].mxu0 }
 0xb4d   :  { %v5945_v10 = vadd.f32 %v5944_v44, %v5880_v29  ;;  %v5883_v58 = vadd.f32 %v6679_v33, %v8535_v14  ;;  %v5963_v53 = vpop.f32.mrb[167].mxu0 }
 0xb4f   :  { %6877 = vtanh.f32 %v5945_v10  ;;  %v5948_v50 = vadd.f32 %v5947_v16, %v5883_v58  ;;  %v6680_v19 = vpop.f32.mrb[148].mxu1 }
 0xb50   :  { %v6681_v43 = vpop.f32.mrb[149].mxu1 }
 0xb51   :  { %6879 = vtanh.f32 %v5948_v50  ;;  %v6682_v4 = vadd.f32 %v6681_v43, %v6680_v19  ;;  %v6683_v62 = vpop.f32.mrb[150].mxu1 }
 0xb52   :  { %v6684_v15 = vpop.f32.mrb[151].mxu1 }
 0xb53   :  { %v5888_v41 = vadd.f32 %v6682_v4, %v8537_v45  ;;  %v6685_v52 = vadd.f32 %v6684_v15, %v6683_v62 }
 0xb55   :  { %v5953_v11 = vadd.f32 %v6796_v40, %v5888_v41  ;;  %v5891_v23 = vadd.f32 %v6685_v52, %v8539_v6 }
 0xb57   :  { %6881 = vtanh.f32 %v5953_v11  ;;  %v5956_v12 = vadd.f32 %v6797_v55, %v5891_v23  ;;  %v6686_v39 = vpop.f32.mrb[152].mxu1 }
 0xb58   :  { %v6687_v48 = vpop.f32.mrb[153].mxu1 }
 0xb59   :  { %v6878_v14 = vpop.eup %6877  ;;  %6883 = vtanh.f32 %v5956_v12  ;;  %v6688_v22 = vadd.f32 %v6687_v48, %v6686_v39  ;;  %v6689_v17 = vpop.f32.mrb[154].mxu1 }
 0xb5a   :  { %5999 = vst [vmem:[%s8618_s16 + $0x40] sm:$0xff] %v6878_v14  ;;  %v6690_v36 = vpop.f32.mrb[155].mxu1 }
 0xb5b   :  { %v6880_v21 = vpop.eup %6879  ;;  %v6691_v42 = vadd.f32 %v6690_v36, %v6689_v17  ;;  %v5896_v45 = vadd.f32 %v6688_v22, %v8541_v61 }
 0xb5c   :  { %6000 = vst [vmem:[%s8618_s16 + $0x48] sm:$0xff] %v6880_v21 }
 0xb5d   :  { %v5961_v6 = vadd.f32 %v5960_v30, %v5896_v45  ;;  %v5899_v56 = vadd.f32 %v6691_v42, %v6651_v3 }
 0xb5f   :  { %6885 = vtanh.f32 %v5961_v6  ;;  %v5964_v57 = vadd.f32 %v5963_v53, %v5899_v56  ;;  %v6692_v37 = vpop.f32.mrb[156].mxu1 }
 0xb60   :  { %v6693_v1 = vpop.f32.mrb[157].mxu1 }
 0xb61   :  { %v6882_v49 = vpop.eup %6881  ;;  %6887 = vtanh.f32 %v5964_v57  ;;  %v6694_v24 = vadd.f32 %v6693_v1, %v6692_v37  ;;  %v6695_v26 = vpop.f32.mrb[158].mxu1 }
 0xb62   :  { %6001 = vst [vmem:[%s8618_s16 + $0x50] sm:$0xff] %v6882_v49  ;;  %v6696_v46 = vpop.f32.mrb[159].mxu1 }
 0xb63   :  { %v6884_v18 = vpop.eup %6883  ;;  %v5904_v61 = vadd.f32 %v6694_v24, %v8555_v38  ;;  %v6697_v28 = vadd.f32 %v6696_v46, %v6695_v26 }
 0xb64   :  { %6002 = vst [vmem:[%s8618_s16 + $0x58] sm:$0xff] %v6884_v18 }
 0xb65   :  { %v5969_v63 = vadd.f32 %v6800_v8, %v5904_v61  ;;  %v5907_v60 = vadd.f32 %v6697_v28, %v8563_v0 }
 0xb67   :  { %6889 = vtanh.f32 %v5969_v63  ;;  %v5972_v25 = vadd.f32 %v6801_v7, %v5907_v60 }
 0xb69   :  { %v6886_v3 = vpop.eup %6885  ;;  %6891 = vtanh.f32 %v5972_v25 }
 0xb6a   :  { %6003 = vst [vmem:[%s8618_s16 + $0x60] sm:$0xff] %v6886_v3 }
 0xb6b   :  { %v6888_v31 = vpop.eup %6887 }
 0xb6c   :  { %6004 = vst [vmem:[%s8618_s16 + $0x68] sm:$0xff] %v6888_v31 }
 0xb71   :  { %v6890_v47 = vpop.eup %6889 }
 0xb72   :  { %6005 = vst [vmem:[%s8618_s16 + $0x70] sm:$0xff] %v6890_v47 }
 0xb73   :  { %v6892_v27 = vpop.eup %6891 }
 0xb74   :  { %6006 = vst [vmem:[%s8618_s16 + $0x78] sm:$0xff] %v6892_v27 }
 0xb75   :  { %6011 = vsyncpa [#allocation14], 1 }
 0xb76   :  { %6012 = vsyncmov [#allocation12] }
 0xb79   :  { %s6013_s28 = vpop.sfrf %6012 }
 0xb7a   :  { %p6463_p8 = scmp.ne.s32.totalorder %s6013_s28, 0 }
 0xb7c   :  { %6017 = shalt.err (%p6463_p8)  }
 0xb7d   :  { %6019 = vsyncmov [#allocation12 + $0x1] }
 0xb80   :  { %s6020_s15 = vpop.sfrf %6019 }
 0xb81   :  { %p6464_p9 = scmp.ne.s32.totalorder %s6020_s15, 0 }
 0xb83   :  { %6024 = shalt.err (%p6464_p9)  }
 0xb84   :  { %6026 = vsyncmov [#allocation12 + $0x2] }
 0xb87   :  { %s6027_s3 = vpop.sfrf %6026 }
 0xb88   :  { %p6465_p10 = scmp.ne.s32.totalorder %s6027_s3, 0 }
 0xb8a   :  { %6031 = shalt.err (%p6465_p10)  }
 0xb8b   :  { %6033 = vsyncmov [#allocation12 + $0x3] }
 0xb8e   :  { %s6034_s10 = vpop.sfrf %6033 }
 0xb8f   :  { %p6466_p11 = scmp.ne.s32.totalorder %s6034_s10, 0 }
 0xb91   :  { %6038 = shalt.err (%p6466_p11)  }
 0xb92   :  { %6040 = vsyncmov [#allocation12 + $0x4] }
 0xb95   :  { %s6041_s29 = vpop.sfrf %6040 }
 0xb96   :  { %p6467_p12 = scmp.ne.s32.totalorder %s6041_s29, 0 }
 0xb98   :  { %6045 = shalt.err (%p6467_p12)  }
 0xb99   :  { %6047 = vsyncmov [#allocation12 + $0x5] }
 0xb9c   :  { %s6048_s16 = vpop.sfrf %6047 }
 0xb9d   :  { %p6468_p13 = scmp.ne.s32.totalorder %s6048_s16, 0 }
 0xb9f   :  { %6052 = shalt.err (%p6468_p13)  }

</bundles_post_ra>
